<compile_context>
chip_gen: v7x
topology: tpu7x:2x2x1
jax: 0.10.0
libtpu: 0.0.40
codegen_flags: <defaults>
</compile_context>

<pallas_src>
import math
import functools

import jax
import jax.numpy as jnp
from jax import lax
from jax.experimental import pallas as pl
from jax.experimental.pallas import tpu as pltpu

D_MODEL = 250                       # feature_size (module default)
D_PAD = 256                         # padded feature dim (lane aligned)
N_HEAD = 10
HEAD_DIM = D_MODEL // N_HEAD        # 25
HEAD_DIM_PAD = 32                   # padded per-head dim
DIM_FF = 2048                       # nn.TransformerEncoderLayer default
LN_EPS = 1e-5
PACK_W = 1024                       # row width of the packed small-params array
OUT_LANES = 128                     # lane-dense decoder output width (col 0 is real)


# ---------------------------------------------------------------------------
# Pallas kernel: whole encoder layer + decoder, all tokens (B*S) fused.
# ---------------------------------------------------------------------------
def transam_kernel(src_ref, pe_ref, wqkv_ref, wo_ref, w1_hbm, w2_hbm, pack_ref,
                   out_ref, w1_vmem, w2_vmem, dma_sem, *, seq_len):
    BS, Dp = src_ref.shape                       # (16, 256)
    S = seq_len
    B = BS // S
    H, hdp = N_HEAD, HEAD_DIM_PAD
    bf16 = jnp.bfloat16
    scale = 1.0 / math.sqrt(HEAD_DIM)            # real head dim, not padded

    # ---- kick off the FFN weight DMAs so they overlap QKV/attention/LN/FFN1 ----
    w1_cp = pltpu.make_async_copy(w1_hbm, w1_vmem, dma_sem.at[0])
    w2_cp = pltpu.make_async_copy(w2_hbm, w2_vmem, dma_sem.at[1])
    w1_cp.start()
    w2_cp.start()

    # ---- unpack the small parameters (single packed (11,1024) f32 array) ----
    bqkv = pack_ref[0:1, 0:3 * H * hdp]          # (1, 960)
    bo   = pack_ref[1:2, 0:Dp]                   # (1, 256)
    g1   = pack_ref[2:3, 0:Dp]
    be1  = pack_ref[3:4, 0:Dp]
    b1   = jnp.concatenate([pack_ref[4:5, :], pack_ref[5:6, :]], axis=-1)  # (1,2048)
    b2   = pack_ref[6:7, 0:Dp]
    g2   = pack_ref[7:8, 0:Dp]
    be2  = pack_ref[8:9, 0:Dp]
    wd   = pack_ref[9:10, 0:Dp]                  # (1, 256) decoder weight (f32)
    bd   = pack_ref[10:11, 0:1]                  # (1, 1)   decoder bias

    # ---- positional encoding (padded lanes of src/pe are zero) ----
    x = src_ref[...] + pe_ref[...]                                    # (16, 256) f32

    # ---- fused QKV projection over all B*S tokens (bf16 in, f32 acc) ----
    qkv = jnp.dot(x.astype(bf16), wqkv_ref[...],
                  preferred_element_type=jnp.float32) + bqkv          # (16, 960)

    # causal (square-subsequent) mask, replicated per head along sublanes
    row = lax.broadcasted_iota(jnp.int32, (H * S, S), 0)
    col = lax.broadcasted_iota(jnp.int32, (H * S, S), 1)
    allowed = col <= (row % S)                                        # (80, 8)

    # ---- attention: bf16 MXU operands, one K transpose per batch,
    #      softmax batched over all heads (scores/mask/exp stay f32) ----
    ctx_rows = []
    for b in range(B):
        qkv_b = qkv[b * S:(b + 1) * S, :]                             # (8, 960) f32
        q_b  = qkv_b[:, 0:H * hdp].astype(bf16)                       # (8, 320)
        k_bT = qkv_b[:, H * hdp:2 * H * hdp].T.astype(bf16)           # (320, 8)
        v_b  = qkv_b[:, 2 * H * hdp:3 * H * hdp].astype(bf16)         # (8, 320)

        s_tiles = []
        for h in range(H):
            qh  = q_b[:, h * hdp:(h + 1) * hdp]                       # (8, 32)
            khT = k_bT[h * hdp:(h + 1) * hdp, :]                      # (32, 8)
            s_tiles.append(jnp.dot(qh, khT, preferred_element_type=jnp.float32))
        s = jnp.concatenate(s_tiles, axis=0) * scale                  # (80, 8) f32
        s = jnp.where(allowed, s, -1e30)
        m = jnp.max(s, axis=-1, keepdims=True)
        e = jnp.exp(s - m)
        p = (e * pl.reciprocal(jnp.sum(e, axis=-1, keepdims=True), approx=True)
             ).astype(bf16)                                           # (80, 8)

        heads = []
        for h in range(H):
            ph = p[h * S:(h + 1) * S, :]                              # (8, 8)
            vh = v_b[:, h * hdp:(h + 1) * hdp]                        # (8, 32)
            heads.append(jnp.dot(ph, vh, preferred_element_type=jnp.float32))
        ctx_rows.append(jnp.concatenate(heads, axis=-1))              # (8, 320)
    ctx = jnp.concatenate(ctx_rows, axis=0)                           # (16, 320)

    # ---- single fused attention output projection ----
    attn = jnp.dot(ctx.astype(bf16), wo_ref[...],
                   preferred_element_type=jnp.float32) + bo           # (16, 256)

    def layernorm(y, g, be):
        # Padded lanes of y are zero and g/be are zero-padded, so sums over the
        # 256 lanes equal sums over the 250 real features (no masking needed).
        mu = jnp.sum(y, axis=-1, keepdims=True) * (1.0 / D_MODEL)
        var = jnp.sum(y * y, axis=-1, keepdims=True) * (1.0 / D_MODEL) - mu * mu
        return (y - mu) * lax.rsqrt(var + LN_EPS) * g + be

    y = layernorm(x + attn, g1, be1)              # dropout = identity (eval)

    # ---- feed-forward (ReLU, PyTorch default); weights arrive via manual DMA ----
    w1_cp.wait()
    h1 = jnp.dot(y.astype(bf16), w1_vmem[...],
                 preferred_element_type=jnp.float32) + b1             # (16, 2048)
    h1 = jnp.maximum(h1, 0.0)
    w2_cp.wait()
    ff = jnp.dot(h1.astype(bf16), w2_vmem[...],
                 preferred_element_type=jnp.float32) + b2             # (16, 256)
    z = layernorm(y + ff, g2, be2)

    # ---- decoder: VPU multiply + lane reduce, lane-dense (16,128) store ----
    dec = jnp.sum(z * wd, axis=-1, keepdims=True) + bd                # (16, 1)
    out_ref[...] = jnp.broadcast_to(dec, (BS, OUT_LANES))


# ---------------------------------------------------------------------------
# Glue: positional-encoding table, parameter init, packing, pallas_call wrapper
# ---------------------------------------------------------------------------
def make_pe(seq_len, d_model):
    position = jnp.arange(seq_len, dtype=jnp.float32)[:, None]
    div_term = jnp.exp(jnp.arange(0, d_model, 2, dtype=jnp.float32)
                       * (-math.log(10000.0) / d_model))
    pe = jnp.zeros((seq_len, d_model), jnp.float32)
    pe = pe.at[:, 0::2].set(jnp.sin(position * div_term))
    pe = pe.at[:, 1::2].set(jnp.cos(position * div_term))
    return pe                                                         # (S, D)


def init_params(key):
    ks = jax.random.split(key, 9)

    def unif(k, shape, bound):
        return jax.random.uniform(k, shape, jnp.float32, -bound, bound)

    ba = 1.0 / math.sqrt(D_MODEL)
    bf = 1.0 / math.sqrt(DIM_FF)
    p = {}
    # attention weights stored per head: wq/wk/wv (H, D, hd), wo (H, hd, D)
    p["wq"] = unif(ks[0], (N_HEAD, D_MODEL, HEAD_DIM), ba)
    p["wk"] = unif(ks[1], (N_HEAD, D_MODEL, HEAD_DIM), ba)
    p["wv"] = unif(ks[2], (N_HEAD, D_MODEL, HEAD_DIM), ba)
    p["bq"] = jnp.zeros((N_HEAD, HEAD_DIM), jnp.float32)
    p["bk"] = jnp.zeros((N_HEAD, HEAD_DIM), jnp.float32)
    p["bv"] = jnp.zeros((N_HEAD, HEAD_DIM), jnp.float32)
    p["wo"] = unif(ks[3], (N_HEAD, HEAD_DIM, D_MODEL), ba)
    p["bo"] = jnp.zeros((D_MODEL,), jnp.float32)
    # layernorms
    p["g1"] = jnp.ones((D_MODEL,), jnp.float32)
    p["be1"] = jnp.zeros((D_MODEL,), jnp.float32)
    p["g2"] = jnp.ones((D_MODEL,), jnp.float32)
    p["be2"] = jnp.zeros((D_MODEL,), jnp.float32)
    # feed-forward
    p["w1"] = unif(ks[4], (D_MODEL, DIM_FF), ba)
    p["b1"] = unif(ks[5], (DIM_FF,), ba)
    p["w2"] = unif(ks[6], (DIM_FF, D_MODEL), bf)
    p["b2"] = unif(ks[7], (D_MODEL,), bf)
    # decoder: weight ~ U(-0.1, 0.1), bias = 0 (matches init_weights)
    p["wd"] = unif(ks[8], (D_MODEL,), 0.1)
    p["bd"] = jnp.zeros((), jnp.float32)
    return p


def _pack_kernel_inputs(src, params):
    """Fold batch into tokens, pad to lane-aligned shapes, fuse QKV/WO, cast
    streamed weights to bf16, and pack all small params into one (11,1024) array."""
    S, B, D = src.shape
    Dp, hd, hdp, H = D_PAD, HEAD_DIM, HEAD_DIM_PAD, N_HEAD

    # activations: row r = b*S + s, feature dim zero-padded to 256
    x2d = jnp.transpose(src, (1, 0, 2)).reshape(B * S, D)
    x2d = jnp.pad(x2d, ((0, 0), (0, Dp - D)))
    pe2d = jnp.pad(jnp.tile(make_pe(S, D), (B, 1)), ((0, 0), (0, Dp - D)))

    def head_w(w):            # (H, D, hd) -> (Dp, H*hdp), zero padded
        w = jnp.pad(w, ((0, 0), (0, Dp - D), (0, hdp - hd)))
        return jnp.transpose(w, (1, 0, 2)).reshape(Dp, H * hdp)

    def head_b(b):            # (H, hd) -> (H*hdp,)
        return jnp.pad(b, ((0, 0), (0, hdp - hd))).reshape(H * hdp)

    wqkv = jnp.concatenate([head_w(params["wq"]), head_w(params["wk"]),
                            head_w(params["wv"])], axis=1)            # (256, 960)
    bqkv = jnp.concatenate([head_b(params["bq"]), head_b(params["bk"]),
                            head_b(params["bv"])])                    # (960,)
    wo = jnp.pad(params["wo"],
                 ((0, 0), (0, hdp - hd), (0, Dp - D))).reshape(H * hdp, Dp)  # (320,256)
    w1 = jnp.pad(params["w1"], ((0, Dp - D), (0, 0)))                 # (256, 2048)
    w2 = jnp.pad(params["w2"], ((0, 0), (0, Dp - D)))                 # (2048, 256)

    def pad_d(v):
        return jnp.pad(v, (0, Dp - D))

    def row(v):
        return jnp.pad(v, (0, PACK_W - v.shape[0]))

    pack = jnp.stack([
        row(bqkv),
        row(pad_d(params["bo"])),
        row(pad_d(params["g1"])), row(pad_d(params["be1"])),
        params["b1"][:PACK_W], params["b1"][PACK_W:],
        row(pad_d(params["b2"])),
        row(pad_d(params["g2"])), row(pad_d(params["be2"])),
        row(pad_d(params["wd"])),
        jnp.full((PACK_W,), params["bd"], jnp.float32),
    ])                                                                # (11, 1024) f32

    bf16 = jnp.bfloat16
    return (x2d, pe2d, wqkv.astype(bf16), wo.astype(bf16),
            w1.astype(bf16), w2.astype(bf16), pack)


def transam_forward(src, params):
    S, B, _ = src.shape
    args = _pack_kernel_inputs(src, params)
    x2d, pe2d, wqkv, wo, w1, w2, pack = args

    def full_spec(a):
        nd = a.ndim
        return pl.BlockSpec(a.shape, lambda i, nd=nd: (0,) * nd)

    in_specs = [full_spec(x2d), full_spec(pe2d), full_spec(wqkv), full_spec(wo),
                pl.BlockSpec(memory_space=pl.ANY),   # w1 streamed by manual DMA
                pl.BlockSpec(memory_space=pl.ANY),   # w2 streamed by manual DMA
                full_spec(pack)]

    out2d = pl.pallas_call(
        functools.partial(transam_kernel, seq_len=S),
        out_shape=jax.ShapeDtypeStruct((B * S, OUT_LANES), jnp.float32),
        grid=(1,),
        in_specs=in_specs,
        out_specs=pl.BlockSpec((B * S, OUT_LANES), lambda i: (0, 0)),
        scratch_shapes=[pltpu.VMEM((D_PAD, DIM_FF), jnp.bfloat16),    # w1 buffer
                        pltpu.VMEM((DIM_FF, D_PAD), jnp.bfloat16),    # w2 buffer
                        pltpu.SemaphoreType.DMA((2,))],
        compiler_params=pltpu.CompilerParams(
            dimension_semantics=("arbitrary",),
            vmem_limit_bytes=32 * 1024 * 1024),       # fits v5e/v6e/v7x VMEM
    )(*args)
    # column 0 holds the decoder output; undo the batch-major token folding
    return out2d[:, 0].reshape(B, S).T[:, :, None]     # (S, B, 1)


# ---------------------------------------------------------------------------
# Pure-JAX f32 reference (same math, natural per-head layout) for sanity check
# ---------------------------------------------------------------------------
def transam_ref(src, params):
    S, B, D = src.shape
    x = src + make_pe(S, D)[:, None, :]
    row = jnp.arange(S)[:, None]
    col = jnp.arange(S)[None, :]
    allowed = col <= row

    def ln(y, g, b):
        mu = jnp.mean(y, -1, keepdims=True)
        var = jnp.mean((y - mu) ** 2, -1, keepdims=True)
        return (y - mu) / jnp.sqrt(var + LN_EPS) * g + b

    outs = []
    for bi in range(B):
        xb = x[:, bi, :]
        attn = jnp.zeros((S, D), jnp.float32) + params["bo"]
        for h in range(N_HEAD):
            qh = xb @ params["wq"][h] + params["bq"][h]
            kh = xb @ params["wk"][h] + params["bk"][h]
            vh = xb @ params["wv"][h] + params["bv"][h]
            sc = (qh @ kh.T) / math.sqrt(HEAD_DIM)
            sc = jnp.where(allowed, sc, -jnp.inf)
            pr = jax.nn.softmax(sc, axis=-1)
            attn = attn + (pr @ vh) @ params["wo"][h]
        y = ln(xb + attn, params["g1"], params["be1"])
        ff = jnp.maximum(y @ params["w1"] + params["b1"], 0.0) @ params["w2"] + params["b2"]
        z = ln(y + ff, params["g2"], params["be2"])
        outs.append(z @ params["wd"][:, None] + params["bd"])
    return jnp.stack(outs, axis=1)                     # (S, B, 1)


if __name__ == "__main__":
    S, B = 8, 2
    key = jax.random.PRNGKey(0)
    k_src, k_par = jax.random.split(key)
    src = jax.random.normal(k_src, (S, B, D_MODEL), jnp.float32)
    params = init_params(k_par)

    out = jax.jit(transam_forward)(src, params)
    out = jax.block_until_ready(out)

    assert out.shape == (S, B, 1)
    assert bool(jnp.all(jnp.isfinite(out)))

    # Reference uses the same bf16-rounded streamed weights (wqkv/wo/w1/w2);
    # remaining difference is activation rounding + f32-accumulated matmuls.
    params_ref = dict(params)
    for k in ("wq", "wk", "wv", "wo", "w1", "w2"):
        params_ref[k] = params[k].astype(jnp.bfloat16).astype(jnp.float32)
    ref = transam_ref(src, params_ref)
    assert bool(jnp.allclose(out, ref, rtol=5e-2, atol=5e-2)), "mismatch vs reference"

    print("KERNEL_OK")
</pallas_src>

<mosaic_0001>
module attributes {stable_mosaic.version = 11 : i64} {
  func.func @transam_kernel(%arg0: i32, %arg1: memref<16x256xf32, #tpu.memory_space<vmem>>, %arg2: memref<16x256xf32, #tpu.memory_space<vmem>>, %arg3: memref<256x960xbf16, #tpu.memory_space<vmem>>, %arg4: memref<320x256xbf16, #tpu.memory_space<vmem>>, %arg5: memref<256x2048xbf16, #tpu.memory_space<any>>, %arg6: memref<2048x256xbf16, #tpu.memory_space<any>>, %arg7: memref<11x1024xf32, #tpu.memory_space<vmem>>, %arg8: memref<16x128xf32, #tpu.memory_space<vmem>>, %arg9: memref<256x2048xbf16, #tpu.memory_space<vmem>>, %arg10: memref<2048x256xbf16, #tpu.memory_space<vmem>>, %arg11: memref<2x!tpu.dma_semaphore, #tpu.memory_space<semaphore_mem>>) attributes {dimension_semantics = [#tpu.dimension_semantics<arbitrary>], iteration_bounds = array<i64: 1>, scalar_prefetch = 0 : i64, scratch_operands = 3 : i64, tpu.core_type = #tpu.core_type<tc>, window_params = [{pipeline_mode = #tpu.pipeline_mode<synchronous>, transform_indices = @transform_0, window_bounds = array<i64: 16, 256>}, {pipeline_mode = #tpu.pipeline_mode<synchronous>, transform_indices = @transform_1, window_bounds = array<i64: 16, 256>}, {pipeline_mode = #tpu.pipeline_mode<synchronous>, transform_indices = @transform_2, window_bounds = array<i64: 256, 960>}, {pipeline_mode = #tpu.pipeline_mode<synchronous>, transform_indices = @transform_3, window_bounds = array<i64: 320, 256>}, {}, {}, {pipeline_mode = #tpu.pipeline_mode<synchronous>, transform_indices = @transform_6, window_bounds = array<i64: 11, 1024>}, {pipeline_mode = #tpu.pipeline_mode<synchronous>, transform_indices = @transform_7, window_bounds = array<i64: 16, 128>}]} {
    %c0_i32 = arith.constant 0 : i32
    %0 = tpu.memref_slice %arg11[%c0_i32] : memref<2x!tpu.dma_semaphore, #tpu.memory_space<semaphore_mem>> -> memref<1x!tpu.dma_semaphore, #tpu.memory_space<semaphore_mem>>
    %1 = tpu.memref_squeeze %0 : memref<1x!tpu.dma_semaphore, #tpu.memory_space<semaphore_mem>> -> memref<!tpu.dma_semaphore, #tpu.memory_space<semaphore_mem>>
    tpu.enqueue_dma source(%arg5 : memref<256x2048xbf16, #tpu.memory_space<any>>) target(%arg9 : memref<256x2048xbf16, #tpu.memory_space<vmem>>) target_semaphore(%1 : memref<!tpu.dma_semaphore, #tpu.memory_space<semaphore_mem>>)
    %c1_i32 = arith.constant 1 : i32
    %2 = tpu.memref_slice %arg11[%c1_i32] : memref<2x!tpu.dma_semaphore, #tpu.memory_space<semaphore_mem>> -> memref<1x!tpu.dma_semaphore, #tpu.memory_space<semaphore_mem>>
    %3 = tpu.memref_squeeze %2 : memref<1x!tpu.dma_semaphore, #tpu.memory_space<semaphore_mem>> -> memref<!tpu.dma_semaphore, #tpu.memory_space<semaphore_mem>>
    tpu.enqueue_dma source(%arg6 : memref<2048x256xbf16, #tpu.memory_space<any>>) target(%arg10 : memref<2048x256xbf16, #tpu.memory_space<vmem>>) target_semaphore(%3 : memref<!tpu.dma_semaphore, #tpu.memory_space<semaphore_mem>>)
    %c0 = arith.constant 0 : index
    %c0_0 = arith.constant 0 : index
    %4 = vector.load %arg7[%c0, %c0_0] : memref<11x1024xf32, #tpu.memory_space<vmem>>, vector<1x960xf32>
    %c1 = arith.constant 1 : index
    %c0_1 = arith.constant 0 : index
    %5 = vector.load %arg7[%c1, %c0_1] : memref<11x1024xf32, #tpu.memory_space<vmem>>, vector<1x256xf32>
    %c2 = arith.constant 2 : index
    %c0_2 = arith.constant 0 : index
    %6 = vector.load %arg7[%c2, %c0_2] : memref<11x1024xf32, #tpu.memory_space<vmem>>, vector<1x256xf32>
    %c3 = arith.constant 3 : index
    %c0_3 = arith.constant 0 : index
    %7 = vector.load %arg7[%c3, %c0_3] : memref<11x1024xf32, #tpu.memory_space<vmem>>, vector<1x256xf32>
    %c4 = arith.constant 4 : index
    %c0_4 = arith.constant 0 : index
    %8 = vector.load %arg7[%c4, %c0_4] : memref<11x1024xf32, #tpu.memory_space<vmem>>, vector<1x1024xf32>
    %c5 = arith.constant 5 : index
    %c0_5 = arith.constant 0 : index
    %9 = vector.load %arg7[%c5, %c0_5] : memref<11x1024xf32, #tpu.memory_space<vmem>>, vector<1x1024xf32>
    %10 = tpu.concatenate %8, %9 in 1 : vector<1x1024xf32>, vector<1x1024xf32> -> vector<1x2048xf32>
    %c6 = arith.constant 6 : index
    %c0_6 = arith.constant 0 : index
    %11 = vector.load %arg7[%c6, %c0_6] : memref<11x1024xf32, #tpu.memory_space<vmem>>, vector<1x256xf32>
    %c7 = arith.constant 7 : index
    %c0_7 = arith.constant 0 : index
    %12 = vector.load %arg7[%c7, %c0_7] : memref<11x1024xf32, #tpu.memory_space<vmem>>, vector<1x256xf32>
    %c8 = arith.constant 8 : index
    %c0_8 = arith.constant 0 : index
    %13 = vector.load %arg7[%c8, %c0_8] : memref<11x1024xf32, #tpu.memory_space<vmem>>, vector<1x256xf32>
    %c9 = arith.constant 9 : index
    %c0_9 = arith.constant 0 : index
    %14 = vector.load %arg7[%c9, %c0_9] : memref<11x1024xf32, #tpu.memory_space<vmem>>, vector<1x256xf32>
    %c10 = arith.constant 10 : index
    %c0_10 = arith.constant 0 : index
    %15 = vector.load %arg7[%c10, %c0_10] : memref<11x1024xf32, #tpu.memory_space<vmem>>, vector<1x1xf32>
    %c0_11 = arith.constant 0 : index
    %c0_12 = arith.constant 0 : index
    %16 = vector.load %arg1[%c0_11, %c0_12] : memref<16x256xf32, #tpu.memory_space<vmem>>, vector<16x256xf32>
    %c0_13 = arith.constant 0 : index
    %c0_14 = arith.constant 0 : index
    %17 = vector.load %arg2[%c0_13, %c0_14] : memref<16x256xf32, #tpu.memory_space<vmem>>, vector<16x256xf32>
    %18 = arith.addf %16, %17 : vector<16x256xf32>
    %19 = arith.truncf %18 : vector<16x256xf32> to vector<16x256xbf16>
    %c0_15 = arith.constant 0 : index
    %c0_16 = arith.constant 0 : index
    %20 = vector.load %arg3[%c0_15, %c0_16] : memref<256x960xbf16, #tpu.memory_space<vmem>>, vector<256x960xbf16>
    %cst = arith.constant dense<0.000000e+00> : vector<16x960xf32>
    %21 = tpu.matmul %19, %20, %cst {dimension_numbers = #tpu.dot_dimension_numbers<[1], [0], [0], [1], [0, 0, 1, 1], [], []>} : vector<16x256xbf16>, vector<256x960xbf16>, vector<16x960xf32> -> vector<16x960xf32>
    %22 = vector.broadcast %4 : vector<1x960xf32> to vector<16x960xf32>
    %23 = arith.addf %21, %22 : vector<16x960xf32>
    %24 = tpu.iota {dimensions = array<i32: 0>} : vector<80x8xi32>
    %25 = tpu.iota {dimensions = array<i32: 1>} : vector<80x8xi32>
    %c8_i32 = arith.constant 8 : i32
    %c0_i32_17 = arith.constant 0 : i32
    %26 = arith.cmpi eq, %c8_i32, %c0_i32_17 : i32
    %c1_i32_18 = arith.constant 1 : i32
    %27 = arith.select %26, %c1_i32_18, %c8_i32 : i32
    %28 = vector.broadcast %27 : i32 to vector<80x8xi32>
    %29 = arith.remsi %24, %28 : vector<80x8xi32>
    %c0_i32_19 = arith.constant 0 : i32
    %30 = vector.broadcast %c0_i32_19 : i32 to vector<80x8xi32>
    %31 = arith.cmpi ne, %29, %30 : vector<80x8xi32>
    %c0_i32_20 = arith.constant 0 : i32
    %32 = vector.broadcast %c0_i32_20 : i32 to vector<80x8xi32>
    %33 = arith.cmpi slt, %29, %32 : vector<80x8xi32>
    %c0_i32_21 = arith.constant 0 : i32
    %34 = arith.cmpi slt, %27, %c0_i32_21 : i32
    %35 = vector.broadcast %34 : i1 to vector<80x8xi1>
    %36 = vector.broadcast %35 : vector<80x8xi1> to vector<80x8xi1>
    %37 = arith.xori %33, %36 : vector<80x8xi1>
    %38 = arith.andi %37, %31 : vector<80x8xi1>
    %39 = vector.broadcast %27 : i32 to vector<80x8xi32>
    %40 = arith.addi %29, %39 : vector<80x8xi32>
    %41 = arith.select %38, %40, %29 : vector<80x8xi1>, vector<80x8xi32>
    %42 = arith.cmpi sle, %25, %41 : vector<80x8xi32>
    %43 = vector.extract_strided_slice %23 {offsets = [0, 0], sizes = [8, 960], strides = [1, 1]} : vector<16x960xf32> to vector<8x960xf32>
    %44 = vector.extract_strided_slice %43 {offsets = [0, 0], sizes = [8, 320], strides = [1, 1]} : vector<8x960xf32> to vector<8x320xf32>
    %45 = arith.truncf %44 : vector<8x320xf32> to vector<8x320xbf16>
    %46 = vector.extract_strided_slice %43 {offsets = [0, 320], sizes = [8, 320], strides = [1, 1]} : vector<8x960xf32> to vector<8x320xf32>
    %47 = tpu.transpose %46, [1, 0] : vector<8x320xf32> -> vector<320x8xf32>
    %48 = arith.truncf %47 : vector<320x8xf32> to vector<320x8xbf16>
    %49 = vector.extract_strided_slice %43 {offsets = [0, 640], sizes = [8, 320], strides = [1, 1]} : vector<8x960xf32> to vector<8x320xf32>
    %50 = arith.truncf %49 : vector<8x320xf32> to vector<8x320xbf16>
    %51 = vector.extract_strided_slice %45 {offsets = [0, 0], sizes = [8, 32], strides = [1, 1]} : vector<8x320xbf16> to vector<8x32xbf16>
    %52 = vector.extract_strided_slice %48 {offsets = [0, 0], sizes = [32, 8], strides = [1, 1]} : vector<320x8xbf16> to vector<32x8xbf16>
    %cst_22 = arith.constant dense<0.000000e+00> : vector<8x8xf32>
    %53 = tpu.matmul %51, %52, %cst_22 {dimension_numbers = #tpu.dot_dimension_numbers<[1], [0], [0], [1], [0, 0, 1, 1], [], []>} : vector<8x32xbf16>, vector<32x8xbf16>, vector<8x8xf32> -> vector<8x8xf32>
    %54 = vector.extract_strided_slice %45 {offsets = [0, 32], sizes = [8, 32], strides = [1, 1]} : vector<8x320xbf16> to vector<8x32xbf16>
    %55 = vector.extract_strided_slice %48 {offsets = [32, 0], sizes = [32, 8], strides = [1, 1]} : vector<320x8xbf16> to vector<32x8xbf16>
    %cst_23 = arith.constant dense<0.000000e+00> : vector<8x8xf32>
    %56 = tpu.matmul %54, %55, %cst_23 {dimension_numbers = #tpu.dot_dimension_numbers<[1], [0], [0], [1], [0, 0, 1, 1], [], []>} : vector<8x32xbf16>, vector<32x8xbf16>, vector<8x8xf32> -> vector<8x8xf32>
    %57 = vector.extract_strided_slice %45 {offsets = [0, 64], sizes = [8, 32], strides = [1, 1]} : vector<8x320xbf16> to vector<8x32xbf16>
    %58 = vector.extract_strided_slice %48 {offsets = [64, 0], sizes = [32, 8], strides = [1, 1]} : vector<320x8xbf16> to vector<32x8xbf16>
    %cst_24 = arith.constant dense<0.000000e+00> : vector<8x8xf32>
    %59 = tpu.matmul %57, %58, %cst_24 {dimension_numbers = #tpu.dot_dimension_numbers<[1], [0], [0], [1], [0, 0, 1, 1], [], []>} : vector<8x32xbf16>, vector<32x8xbf16>, vector<8x8xf32> -> vector<8x8xf32>
    %60 = vector.extract_strided_slice %45 {offsets = [0, 96], sizes = [8, 32], strides = [1, 1]} : vector<8x320xbf16> to vector<8x32xbf16>
    %61 = vector.extract_strided_slice %48 {offsets = [96, 0], sizes = [32, 8], strides = [1, 1]} : vector<320x8xbf16> to vector<32x8xbf16>
    %cst_25 = arith.constant dense<0.000000e+00> : vector<8x8xf32>
    %62 = tpu.matmul %60, %61, %cst_25 {dimension_numbers = #tpu.dot_dimension_numbers<[1], [0], [0], [1], [0, 0, 1, 1], [], []>} : vector<8x32xbf16>, vector<32x8xbf16>, vector<8x8xf32> -> vector<8x8xf32>
    %63 = vector.extract_strided_slice %45 {offsets = [0, 128], sizes = [8, 32], strides = [1, 1]} : vector<8x320xbf16> to vector<8x32xbf16>
    %64 = vector.extract_strided_slice %48 {offsets = [128, 0], sizes = [32, 8], strides = [1, 1]} : vector<320x8xbf16> to vector<32x8xbf16>
    %cst_26 = arith.constant dense<0.000000e+00> : vector<8x8xf32>
    %65 = tpu.matmul %63, %64, %cst_26 {dimension_numbers = #tpu.dot_dimension_numbers<[1], [0], [0], [1], [0, 0, 1, 1], [], []>} : vector<8x32xbf16>, vector<32x8xbf16>, vector<8x8xf32> -> vector<8x8xf32>
    %66 = vector.extract_strided_slice %45 {offsets = [0, 160], sizes = [8, 32], strides = [1, 1]} : vector<8x320xbf16> to vector<8x32xbf16>
    %67 = vector.extract_strided_slice %48 {offsets = [160, 0], sizes = [32, 8], strides = [1, 1]} : vector<320x8xbf16> to vector<32x8xbf16>
    %cst_27 = arith.constant dense<0.000000e+00> : vector<8x8xf32>
    %68 = tpu.matmul %66, %67, %cst_27 {dimension_numbers = #tpu.dot_dimension_numbers<[1], [0], [0], [1], [0, 0, 1, 1], [], []>} : vector<8x32xbf16>, vector<32x8xbf16>, vector<8x8xf32> -> vector<8x8xf32>
    %69 = vector.extract_strided_slice %45 {offsets = [0, 192], sizes = [8, 32], strides = [1, 1]} : vector<8x320xbf16> to vector<8x32xbf16>
    %70 = vector.extract_strided_slice %48 {offsets = [192, 0], sizes = [32, 8], strides = [1, 1]} : vector<320x8xbf16> to vector<32x8xbf16>
    %cst_28 = arith.constant dense<0.000000e+00> : vector<8x8xf32>
    %71 = tpu.matmul %69, %70, %cst_28 {dimension_numbers = #tpu.dot_dimension_numbers<[1], [0], [0], [1], [0, 0, 1, 1], [], []>} : vector<8x32xbf16>, vector<32x8xbf16>, vector<8x8xf32> -> vector<8x8xf32>
    %72 = vector.extract_strided_slice %45 {offsets = [0, 224], sizes = [8, 32], strides = [1, 1]} : vector<8x320xbf16> to vector<8x32xbf16>
    %73 = vector.extract_strided_slice %48 {offsets = [224, 0], sizes = [32, 8], strides = [1, 1]} : vector<320x8xbf16> to vector<32x8xbf16>
    %cst_29 = arith.constant dense<0.000000e+00> : vector<8x8xf32>
    %74 = tpu.matmul %72, %73, %cst_29 {dimension_numbers = #tpu.dot_dimension_numbers<[1], [0], [0], [1], [0, 0, 1, 1], [], []>} : vector<8x32xbf16>, vector<32x8xbf16>, vector<8x8xf32> -> vector<8x8xf32>
    %75 = vector.extract_strided_slice %45 {offsets = [0, 256], sizes = [8, 32], strides = [1, 1]} : vector<8x320xbf16> to vector<8x32xbf16>
    %76 = vector.extract_strided_slice %48 {offsets = [256, 0], sizes = [32, 8], strides = [1, 1]} : vector<320x8xbf16> to vector<32x8xbf16>
    %cst_30 = arith.constant dense<0.000000e+00> : vector<8x8xf32>
    %77 = tpu.matmul %75, %76, %cst_30 {dimension_numbers = #tpu.dot_dimension_numbers<[1], [0], [0], [1], [0, 0, 1, 1], [], []>} : vector<8x32xbf16>, vector<32x8xbf16>, vector<8x8xf32> -> vector<8x8xf32>
    %78 = vector.extract_strided_slice %45 {offsets = [0, 288], sizes = [8, 32], strides = [1, 1]} : vector<8x320xbf16> to vector<8x32xbf16>
    %79 = vector.extract_strided_slice %48 {offsets = [288, 0], sizes = [32, 8], strides = [1, 1]} : vector<320x8xbf16> to vector<32x8xbf16>
    %cst_31 = arith.constant dense<0.000000e+00> : vector<8x8xf32>
    %80 = tpu.matmul %78, %79, %cst_31 {dimension_numbers = #tpu.dot_dimension_numbers<[1], [0], [0], [1], [0, 0, 1, 1], [], []>} : vector<8x32xbf16>, vector<32x8xbf16>, vector<8x8xf32> -> vector<8x8xf32>
    %81 = tpu.concatenate %53, %56, %59, %62, %65, %68, %71, %74, %77, %80 in 0 : vector<8x8xf32>, vector<8x8xf32>, vector<8x8xf32>, vector<8x8xf32>, vector<8x8xf32>, vector<8x8xf32>, vector<8x8xf32>, vector<8x8xf32>, vector<8x8xf32>, vector<8x8xf32> -> vector<80x8xf32>
    %cst_32 = arith.constant 2.000000e-01 : f32
    %82 = vector.broadcast %cst_32 : f32 to vector<80x8xf32>
    %83 = arith.mulf %81, %82 : vector<80x8xf32>
    %cst_33 = arith.constant -1.000000e+30 : f32
    %84 = vector.broadcast %cst_33 : f32 to vector<80x8xf32>
    %85 = arith.select %42, %83, %84 : vector<80x8xi1>, vector<80x8xf32>
    %cst_34 = arith.constant dense<0xFF800000> : vector<80xf32>
    %86 = vector.multi_reduction <maximumf>, %85, %cst_34 [1] : vector<80x8xf32> to vector<80xf32>
    %87 = vector.shape_cast %86 : vector<80xf32> to vector<80x1xf32>
    %88 = vector.broadcast %87 : vector<80x1xf32> to vector<80x8xf32>
    %89 = arith.subf %85, %88 : vector<80x8xf32>
    %90 = math.exp %89 : vector<80x8xf32>
    %cst_35 = arith.constant dense<0.000000e+00> : vector<80xf32>
    %91 = vector.multi_reduction <add>, %90, %cst_35 [1] : vector<80x8xf32> to vector<80xf32>
    %92 = vector.shape_cast %91 : vector<80xf32> to vector<80x1xf32>
    %93 = tpu.reciprocal %92 {approx = true} : vector<80x1xf32> -> vector<80x1xf32>
    %94 = vector.broadcast %93 : vector<80x1xf32> to vector<80x8xf32>
    %95 = arith.mulf %90, %94 : vector<80x8xf32>
    %96 = arith.truncf %95 : vector<80x8xf32> to vector<80x8xbf16>
    %97 = vector.extract_strided_slice %96 {offsets = [0, 0], sizes = [8, 8], strides = [1, 1]} : vector<80x8xbf16> to vector<8x8xbf16>
    %98 = vector.extract_strided_slice %50 {offsets = [0, 0], sizes = [8, 32], strides = [1, 1]} : vector<8x320xbf16> to vector<8x32xbf16>
    %cst_36 = arith.constant dense<0.000000e+00> : vector<8x32xf32>
    %99 = tpu.matmul %97, %98, %cst_36 {dimension_numbers = #tpu.dot_dimension_numbers<[1], [0], [0], [1], [0, 0, 1, 1], [], []>} : vector<8x8xbf16>, vector<8x32xbf16>, vector<8x32xf32> -> vector<8x32xf32>
    %100 = vector.extract_strided_slice %96 {offsets = [8, 0], sizes = [8, 8], strides = [1, 1]} : vector<80x8xbf16> to vector<8x8xbf16>
    %101 = vector.extract_strided_slice %50 {offsets = [0, 32], sizes = [8, 32], strides = [1, 1]} : vector<8x320xbf16> to vector<8x32xbf16>
    %cst_37 = arith.constant dense<0.000000e+00> : vector<8x32xf32>
    %102 = tpu.matmul %100, %101, %cst_37 {dimension_numbers = #tpu.dot_dimension_numbers<[1], [0], [0], [1], [0, 0, 1, 1], [], []>} : vector<8x8xbf16>, vector<8x32xbf16>, vector<8x32xf32> -> vector<8x32xf32>
    %103 = vector.extract_strided_slice %96 {offsets = [16, 0], sizes = [8, 8], strides = [1, 1]} : vector<80x8xbf16> to vector<8x8xbf16>
    %104 = vector.extract_strided_slice %50 {offsets = [0, 64], sizes = [8, 32], strides = [1, 1]} : vector<8x320xbf16> to vector<8x32xbf16>
    %cst_38 = arith.constant dense<0.000000e+00> : vector<8x32xf32>
    %105 = tpu.matmul %103, %104, %cst_38 {dimension_numbers = #tpu.dot_dimension_numbers<[1], [0], [0], [1], [0, 0, 1, 1], [], []>} : vector<8x8xbf16>, vector<8x32xbf16>, vector<8x32xf32> -> vector<8x32xf32>
    %106 = vector.extract_strided_slice %96 {offsets = [24, 0], sizes = [8, 8], strides = [1, 1]} : vector<80x8xbf16> to vector<8x8xbf16>
    %107 = vector.extract_strided_slice %50 {offsets = [0, 96], sizes = [8, 32], strides = [1, 1]} : vector<8x320xbf16> to vector<8x32xbf16>
    %cst_39 = arith.constant dense<0.000000e+00> : vector<8x32xf32>
    %108 = tpu.matmul %106, %107, %cst_39 {dimension_numbers = #tpu.dot_dimension_numbers<[1], [0], [0], [1], [0, 0, 1, 1], [], []>} : vector<8x8xbf16>, vector<8x32xbf16>, vector<8x32xf32> -> vector<8x32xf32>
    %109 = vector.extract_strided_slice %96 {offsets = [32, 0], sizes = [8, 8], strides = [1, 1]} : vector<80x8xbf16> to vector<8x8xbf16>
    %110 = vector.extract_strided_slice %50 {offsets = [0, 128], sizes = [8, 32], strides = [1, 1]} : vector<8x320xbf16> to vector<8x32xbf16>
    %cst_40 = arith.constant dense<0.000000e+00> : vector<8x32xf32>
    %111 = tpu.matmul %109, %110, %cst_40 {dimension_numbers = #tpu.dot_dimension_numbers<[1], [0], [0], [1], [0, 0, 1, 1], [], []>} : vector<8x8xbf16>, vector<8x32xbf16>, vector<8x32xf32> -> vector<8x32xf32>
    %112 = vector.extract_strided_slice %96 {offsets = [40, 0], sizes = [8, 8], strides = [1, 1]} : vector<80x8xbf16> to vector<8x8xbf16>
    %113 = vector.extract_strided_slice %50 {offsets = [0, 160], sizes = [8, 32], strides = [1, 1]} : vector<8x320xbf16> to vector<8x32xbf16>
    %cst_41 = arith.constant dense<0.000000e+00> : vector<8x32xf32>
    %114 = tpu.matmul %112, %113, %cst_41 {dimension_numbers = #tpu.dot_dimension_numbers<[1], [0], [0], [1], [0, 0, 1, 1], [], []>} : vector<8x8xbf16>, vector<8x32xbf16>, vector<8x32xf32> -> vector<8x32xf32>
    %115 = vector.extract_strided_slice %96 {offsets = [48, 0], sizes = [8, 8], strides = [1, 1]} : vector<80x8xbf16> to vector<8x8xbf16>
    %116 = vector.extract_strided_slice %50 {offsets = [0, 192], sizes = [8, 32], strides = [1, 1]} : vector<8x320xbf16> to vector<8x32xbf16>
    %cst_42 = arith.constant dense<0.000000e+00> : vector<8x32xf32>
    %117 = tpu.matmul %115, %116, %cst_42 {dimension_numbers = #tpu.dot_dimension_numbers<[1], [0], [0], [1], [0, 0, 1, 1], [], []>} : vector<8x8xbf16>, vector<8x32xbf16>, vector<8x32xf32> -> vector<8x32xf32>
    %118 = vector.extract_strided_slice %96 {offsets = [56, 0], sizes = [8, 8], strides = [1, 1]} : vector<80x8xbf16> to vector<8x8xbf16>
    %119 = vector.extract_strided_slice %50 {offsets = [0, 224], sizes = [8, 32], strides = [1, 1]} : vector<8x320xbf16> to vector<8x32xbf16>
    %cst_43 = arith.constant dense<0.000000e+00> : vector<8x32xf32>
    %120 = tpu.matmul %118, %119, %cst_43 {dimension_numbers = #tpu.dot_dimension_numbers<[1], [0], [0], [1], [0, 0, 1, 1], [], []>} : vector<8x8xbf16>, vector<8x32xbf16>, vector<8x32xf32> -> vector<8x32xf32>
    %121 = vector.extract_strided_slice %96 {offsets = [64, 0], sizes = [8, 8], strides = [1, 1]} : vector<80x8xbf16> to vector<8x8xbf16>
    %122 = vector.extract_strided_slice %50 {offsets = [0, 256], sizes = [8, 32], strides = [1, 1]} : vector<8x320xbf16> to vector<8x32xbf16>
    %cst_44 = arith.constant dense<0.000000e+00> : vector<8x32xf32>
    %123 = tpu.matmul %121, %122, %cst_44 {dimension_numbers = #tpu.dot_dimension_numbers<[1], [0], [0], [1], [0, 0, 1, 1], [], []>} : vector<8x8xbf16>, vector<8x32xbf16>, vector<8x32xf32> -> vector<8x32xf32>
    %124 = vector.extract_strided_slice %96 {offsets = [72, 0], sizes = [8, 8], strides = [1, 1]} : vector<80x8xbf16> to vector<8x8xbf16>
    %125 = vector.extract_strided_slice %50 {offsets = [0, 288], sizes = [8, 32], strides = [1, 1]} : vector<8x320xbf16> to vector<8x32xbf16>
    %cst_45 = arith.constant dense<0.000000e+00> : vector<8x32xf32>
    %126 = tpu.matmul %124, %125, %cst_45 {dimension_numbers = #tpu.dot_dimension_numbers<[1], [0], [0], [1], [0, 0, 1, 1], [], []>} : vector<8x8xbf16>, vector<8x32xbf16>, vector<8x32xf32> -> vector<8x32xf32>
    %127 = tpu.concatenate %99, %102, %105, %108, %111, %114, %117, %120, %123, %126 in 1 : vector<8x32xf32>, vector<8x32xf32>, vector<8x32xf32>, vector<8x32xf32>, vector<8x32xf32>, vector<8x32xf32>, vector<8x32xf32>, vector<8x32xf32>, vector<8x32xf32>, vector<8x32xf32> -> vector<8x320xf32>
    %128 = vector.extract_strided_slice %23 {offsets = [8, 0], sizes = [8, 960], strides = [1, 1]} : vector<16x960xf32> to vector<8x960xf32>
    %129 = vector.extract_strided_slice %128 {offsets = [0, 0], sizes = [8, 320], strides = [1, 1]} : vector<8x960xf32> to vector<8x320xf32>
    %130 = arith.truncf %129 : vector<8x320xf32> to vector<8x320xbf16>
    %131 = vector.extract_strided_slice %128 {offsets = [0, 320], sizes = [8, 320], strides = [1, 1]} : vector<8x960xf32> to vector<8x320xf32>
    %132 = tpu.transpose %131, [1, 0] : vector<8x320xf32> -> vector<320x8xf32>
    %133 = arith.truncf %132 : vector<320x8xf32> to vector<320x8xbf16>
    %134 = vector.extract_strided_slice %128 {offsets = [0, 640], sizes = [8, 320], strides = [1, 1]} : vector<8x960xf32> to vector<8x320xf32>
    %135 = arith.truncf %134 : vector<8x320xf32> to vector<8x320xbf16>
    %136 = vector.extract_strided_slice %130 {offsets = [0, 0], sizes = [8, 32], strides = [1, 1]} : vector<8x320xbf16> to vector<8x32xbf16>
    %137 = vector.extract_strided_slice %133 {offsets = [0, 0], sizes = [32, 8], strides = [1, 1]} : vector<320x8xbf16> to vector<32x8xbf16>
    %cst_46 = arith.constant dense<0.000000e+00> : vector<8x8xf32>
    %138 = tpu.matmul %136, %137, %cst_46 {dimension_numbers = #tpu.dot_dimension_numbers<[1], [0], [0], [1], [0, 0, 1, 1], [], []>} : vector<8x32xbf16>, vector<32x8xbf16>, vector<8x8xf32> -> vector<8x8xf32>
    %139 = vector.extract_strided_slice %130 {offsets = [0, 32], sizes = [8, 32], strides = [1, 1]} : vector<8x320xbf16> to vector<8x32xbf16>
    %140 = vector.extract_strided_slice %133 {offsets = [32, 0], sizes = [32, 8], strides = [1, 1]} : vector<320x8xbf16> to vector<32x8xbf16>
    %cst_47 = arith.constant dense<0.000000e+00> : vector<8x8xf32>
    %141 = tpu.matmul %139, %140, %cst_47 {dimension_numbers = #tpu.dot_dimension_numbers<[1], [0], [0], [1], [0, 0, 1, 1], [], []>} : vector<8x32xbf16>, vector<32x8xbf16>, vector<8x8xf32> -> vector<8x8xf32>
    %142 = vector.extract_strided_slice %130 {offsets = [0, 64], sizes = [8, 32], strides = [1, 1]} : vector<8x320xbf16> to vector<8x32xbf16>
    %143 = vector.extract_strided_slice %133 {offsets = [64, 0], sizes = [32, 8], strides = [1, 1]} : vector<320x8xbf16> to vector<32x8xbf16>
    %cst_48 = arith.constant dense<0.000000e+00> : vector<8x8xf32>
    %144 = tpu.matmul %142, %143, %cst_48 {dimension_numbers = #tpu.dot_dimension_numbers<[1], [0], [0], [1], [0, 0, 1, 1], [], []>} : vector<8x32xbf16>, vector<32x8xbf16>, vector<8x8xf32> -> vector<8x8xf32>
    %145 = vector.extract_strided_slice %130 {offsets = [0, 96], sizes = [8, 32], strides = [1, 1]} : vector<8x320xbf16> to vector<8x32xbf16>
    %146 = vector.extract_strided_slice %133 {offsets = [96, 0], sizes = [32, 8], strides = [1, 1]} : vector<320x8xbf16> to vector<32x8xbf16>
    %cst_49 = arith.constant dense<0.000000e+00> : vector<8x8xf32>
    %147 = tpu.matmul %145, %146, %cst_49 {dimension_numbers = #tpu.dot_dimension_numbers<[1], [0], [0], [1], [0, 0, 1, 1], [], []>} : vector<8x32xbf16>, vector<32x8xbf16>, vector<8x8xf32> -> vector<8x8xf32>
    %148 = vector.extract_strided_slice %130 {offsets = [0, 128], sizes = [8, 32], strides = [1, 1]} : vector<8x320xbf16> to vector<8x32xbf16>
    %149 = vector.extract_strided_slice %133 {offsets = [128, 0], sizes = [32, 8], strides = [1, 1]} : vector<320x8xbf16> to vector<32x8xbf16>
    %cst_50 = arith.constant dense<0.000000e+00> : vector<8x8xf32>
    %150 = tpu.matmul %148, %149, %cst_50 {dimension_numbers = #tpu.dot_dimension_numbers<[1], [0], [0], [1], [0, 0, 1, 1], [], []>} : vector<8x32xbf16>, vector<32x8xbf16>, vector<8x8xf32> -> vector<8x8xf32>
    %151 = vector.extract_strided_slice %130 {offsets = [0, 160], sizes = [8, 32], strides = [1, 1]} : vector<8x320xbf16> to vector<8x32xbf16>
    %152 = vector.extract_strided_slice %133 {offsets = [160, 0], sizes = [32, 8], strides = [1, 1]} : vector<320x8xbf16> to vector<32x8xbf16>
    %cst_51 = arith.constant dense<0.000000e+00> : vector<8x8xf32>
    %153 = tpu.matmul %151, %152, %cst_51 {dimension_numbers = #tpu.dot_dimension_numbers<[1], [0], [0], [1], [0, 0, 1, 1], [], []>} : vector<8x32xbf16>, vector<32x8xbf16>, vector<8x8xf32> -> vector<8x8xf32>
    %154 = vector.extract_strided_slice %130 {offsets = [0, 192], sizes = [8, 32], strides = [1, 1]} : vector<8x320xbf16> to vector<8x32xbf16>
    %155 = vector.extract_strided_slice %133 {offsets = [192, 0], sizes = [32, 8], strides = [1, 1]} : vector<320x8xbf16> to vector<32x8xbf16>
    %cst_52 = arith.constant dense<0.000000e+00> : vector<8x8xf32>
    %156 = tpu.matmul %154, %155, %cst_52 {dimension_numbers = #tpu.dot_dimension_numbers<[1], [0], [0], [1], [0, 0, 1, 1], [], []>} : vector<8x32xbf16>, vector<32x8xbf16>, vector<8x8xf32> -> vector<8x8xf32>
    %157 = vector.extract_strided_slice %130 {offsets = [0, 224], sizes = [8, 32], strides = [1, 1]} : vector<8x320xbf16> to vector<8x32xbf16>
    %158 = vector.extract_strided_slice %133 {offsets = [224, 0], sizes = [32, 8], strides = [1, 1]} : vector<320x8xbf16> to vector<32x8xbf16>
    %cst_53 = arith.constant dense<0.000000e+00> : vector<8x8xf32>
    %159 = tpu.matmul %157, %158, %cst_53 {dimension_numbers = #tpu.dot_dimension_numbers<[1], [0], [0], [1], [0, 0, 1, 1], [], []>} : vector<8x32xbf16>, vector<32x8xbf16>, vector<8x8xf32> -> vector<8x8xf32>
    %160 = vector.extract_strided_slice %130 {offsets = [0, 256], sizes = [8, 32], strides = [1, 1]} : vector<8x320xbf16> to vector<8x32xbf16>
    %161 = vector.extract_strided_slice %133 {offsets = [256, 0], sizes = [32, 8], strides = [1, 1]} : vector<320x8xbf16> to vector<32x8xbf16>
    %cst_54 = arith.constant dense<0.000000e+00> : vector<8x8xf32>
    %162 = tpu.matmul %160, %161, %cst_54 {dimension_numbers = #tpu.dot_dimension_numbers<[1], [0], [0], [1], [0, 0, 1, 1], [], []>} : vector<8x32xbf16>, vector<32x8xbf16>, vector<8x8xf32> -> vector<8x8xf32>
    %163 = vector.extract_strided_slice %130 {offsets = [0, 288], sizes = [8, 32], strides = [1, 1]} : vector<8x320xbf16> to vector<8x32xbf16>
    %164 = vector.extract_strided_slice %133 {offsets = [288, 0], sizes = [32, 8], strides = [1, 1]} : vector<320x8xbf16> to vector<32x8xbf16>
    %cst_55 = arith.constant dense<0.000000e+00> : vector<8x8xf32>
    %165 = tpu.matmul %163, %164, %cst_55 {dimension_numbers = #tpu.dot_dimension_numbers<[1], [0], [0], [1], [0, 0, 1, 1], [], []>} : vector<8x32xbf16>, vector<32x8xbf16>, vector<8x8xf32> -> vector<8x8xf32>
    %166 = tpu.concatenate %138, %141, %144, %147, %150, %153, %156, %159, %162, %165 in 0 : vector<8x8xf32>, vector<8x8xf32>, vector<8x8xf32>, vector<8x8xf32>, vector<8x8xf32>, vector<8x8xf32>, vector<8x8xf32>, vector<8x8xf32>, vector<8x8xf32>, vector<8x8xf32> -> vector<80x8xf32>
    %cst_56 = arith.constant 2.000000e-01 : f32
    %167 = vector.broadcast %cst_56 : f32 to vector<80x8xf32>
    %168 = arith.mulf %166, %167 : vector<80x8xf32>
    %cst_57 = arith.constant -1.000000e+30 : f32
    %169 = vector.broadcast %cst_57 : f32 to vector<80x8xf32>
    %170 = arith.select %42, %168, %169 : vector<80x8xi1>, vector<80x8xf32>
    %cst_58 = arith.constant dense<0xFF800000> : vector<80xf32>
    %171 = vector.multi_reduction <maximumf>, %170, %cst_58 [1] : vector<80x8xf32> to vector<80xf32>
    %172 = vector.shape_cast %171 : vector<80xf32> to vector<80x1xf32>
    %173 = vector.broadcast %172 : vector<80x1xf32> to vector<80x8xf32>
    %174 = arith.subf %170, %173 : vector<80x8xf32>
    %175 = math.exp %174 : vector<80x8xf32>
    %cst_59 = arith.constant dense<0.000000e+00> : vector<80xf32>
    %176 = vector.multi_reduction <add>, %175, %cst_59 [1] : vector<80x8xf32> to vector<80xf32>
    %177 = vector.shape_cast %176 : vector<80xf32> to vector<80x1xf32>
    %178 = tpu.reciprocal %177 {approx = true} : vector<80x1xf32> -> vector<80x1xf32>
    %179 = vector.broadcast %178 : vector<80x1xf32> to vector<80x8xf32>
    %180 = arith.mulf %175, %179 : vector<80x8xf32>
    %181 = arith.truncf %180 : vector<80x8xf32> to vector<80x8xbf16>
    %182 = vector.extract_strided_slice %181 {offsets = [0, 0], sizes = [8, 8], strides = [1, 1]} : vector<80x8xbf16> to vector<8x8xbf16>
    %183 = vector.extract_strided_slice %135 {offsets = [0, 0], sizes = [8, 32], strides = [1, 1]} : vector<8x320xbf16> to vector<8x32xbf16>
    %cst_60 = arith.constant dense<0.000000e+00> : vector<8x32xf32>
    %184 = tpu.matmul %182, %183, %cst_60 {dimension_numbers = #tpu.dot_dimension_numbers<[1], [0], [0], [1], [0, 0, 1, 1], [], []>} : vector<8x8xbf16>, vector<8x32xbf16>, vector<8x32xf32> -> vector<8x32xf32>
    %185 = vector.extract_strided_slice %181 {offsets = [8, 0], sizes = [8, 8], strides = [1, 1]} : vector<80x8xbf16> to vector<8x8xbf16>
    %186 = vector.extract_strided_slice %135 {offsets = [0, 32], sizes = [8, 32], strides = [1, 1]} : vector<8x320xbf16> to vector<8x32xbf16>
    %cst_61 = arith.constant dense<0.000000e+00> : vector<8x32xf32>
    %187 = tpu.matmul %185, %186, %cst_61 {dimension_numbers = #tpu.dot_dimension_numbers<[1], [0], [0], [1], [0, 0, 1, 1], [], []>} : vector<8x8xbf16>, vector<8x32xbf16>, vector<8x32xf32> -> vector<8x32xf32>
    %188 = vector.extract_strided_slice %181 {offsets = [16, 0], sizes = [8, 8], strides = [1, 1]} : vector<80x8xbf16> to vector<8x8xbf16>
    %189 = vector.extract_strided_slice %135 {offsets = [0, 64], sizes = [8, 32], strides = [1, 1]} : vector<8x320xbf16> to vector<8x32xbf16>
    %cst_62 = arith.constant dense<0.000000e+00> : vector<8x32xf32>
    %190 = tpu.matmul %188, %189, %cst_62 {dimension_numbers = #tpu.dot_dimension_numbers<[1], [0], [0], [1], [0, 0, 1, 1], [], []>} : vector<8x8xbf16>, vector<8x32xbf16>, vector<8x32xf32> -> vector<8x32xf32>
    %191 = vector.extract_strided_slice %181 {offsets = [24, 0], sizes = [8, 8], strides = [1, 1]} : vector<80x8xbf16> to vector<8x8xbf16>
    %192 = vector.extract_strided_slice %135 {offsets = [0, 96], sizes = [8, 32], strides = [1, 1]} : vector<8x320xbf16> to vector<8x32xbf16>
    %cst_63 = arith.constant dense<0.000000e+00> : vector<8x32xf32>
    %193 = tpu.matmul %191, %192, %cst_63 {dimension_numbers = #tpu.dot_dimension_numbers<[1], [0], [0], [1], [0, 0, 1, 1], [], []>} : vector<8x8xbf16>, vector<8x32xbf16>, vector<8x32xf32> -> vector<8x32xf32>
    %194 = vector.extract_strided_slice %181 {offsets = [32, 0], sizes = [8, 8], strides = [1, 1]} : vector<80x8xbf16> to vector<8x8xbf16>
    %195 = vector.extract_strided_slice %135 {offsets = [0, 128], sizes = [8, 32], strides = [1, 1]} : vector<8x320xbf16> to vector<8x32xbf16>
    %cst_64 = arith.constant dense<0.000000e+00> : vector<8x32xf32>
    %196 = tpu.matmul %194, %195, %cst_64 {dimension_numbers = #tpu.dot_dimension_numbers<[1], [0], [0], [1], [0, 0, 1, 1], [], []>} : vector<8x8xbf16>, vector<8x32xbf16>, vector<8x32xf32> -> vector<8x32xf32>
    %197 = vector.extract_strided_slice %181 {offsets = [40, 0], sizes = [8, 8], strides = [1, 1]} : vector<80x8xbf16> to vector<8x8xbf16>
    %198 = vector.extract_strided_slice %135 {offsets = [0, 160], sizes = [8, 32], strides = [1, 1]} : vector<8x320xbf16> to vector<8x32xbf16>
    %cst_65 = arith.constant dense<0.000000e+00> : vector<8x32xf32>
    %199 = tpu.matmul %197, %198, %cst_65 {dimension_numbers = #tpu.dot_dimension_numbers<[1], [0], [0], [1], [0, 0, 1, 1], [], []>} : vector<8x8xbf16>, vector<8x32xbf16>, vector<8x32xf32> -> vector<8x32xf32>
    %200 = vector.extract_strided_slice %181 {offsets = [48, 0], sizes = [8, 8], strides = [1, 1]} : vector<80x8xbf16> to vector<8x8xbf16>
    %201 = vector.extract_strided_slice %135 {offsets = [0, 192], sizes = [8, 32], strides = [1, 1]} : vector<8x320xbf16> to vector<8x32xbf16>
    %cst_66 = arith.constant dense<0.000000e+00> : vector<8x32xf32>
    %202 = tpu.matmul %200, %201, %cst_66 {dimension_numbers = #tpu.dot_dimension_numbers<[1], [0], [0], [1], [0, 0, 1, 1], [], []>} : vector<8x8xbf16>, vector<8x32xbf16>, vector<8x32xf32> -> vector<8x32xf32>
    %203 = vector.extract_strided_slice %181 {offsets = [56, 0], sizes = [8, 8], strides = [1, 1]} : vector<80x8xbf16> to vector<8x8xbf16>
    %204 = vector.extract_strided_slice %135 {offsets = [0, 224], sizes = [8, 32], strides = [1, 1]} : vector<8x320xbf16> to vector<8x32xbf16>
    %cst_67 = arith.constant dense<0.000000e+00> : vector<8x32xf32>
    %205 = tpu.matmul %203, %204, %cst_67 {dimension_numbers = #tpu.dot_dimension_numbers<[1], [0], [0], [1], [0, 0, 1, 1], [], []>} : vector<8x8xbf16>, vector<8x32xbf16>, vector<8x32xf32> -> vector<8x32xf32>
    %206 = vector.extract_strided_slice %181 {offsets = [64, 0], sizes = [8, 8], strides = [1, 1]} : vector<80x8xbf16> to vector<8x8xbf16>
    %207 = vector.extract_strided_slice %135 {offsets = [0, 256], sizes = [8, 32], strides = [1, 1]} : vector<8x320xbf16> to vector<8x32xbf16>
    %cst_68 = arith.constant dense<0.000000e+00> : vector<8x32xf32>
    %208 = tpu.matmul %206, %207, %cst_68 {dimension_numbers = #tpu.dot_dimension_numbers<[1], [0], [0], [1], [0, 0, 1, 1], [], []>} : vector<8x8xbf16>, vector<8x32xbf16>, vector<8x32xf32> -> vector<8x32xf32>
    %209 = vector.extract_strided_slice %181 {offsets = [72, 0], sizes = [8, 8], strides = [1, 1]} : vector<80x8xbf16> to vector<8x8xbf16>
    %210 = vector.extract_strided_slice %135 {offsets = [0, 288], sizes = [8, 32], strides = [1, 1]} : vector<8x320xbf16> to vector<8x32xbf16>
    %cst_69 = arith.constant dense<0.000000e+00> : vector<8x32xf32>
    %211 = tpu.matmul %209, %210, %cst_69 {dimension_numbers = #tpu.dot_dimension_numbers<[1], [0], [0], [1], [0, 0, 1, 1], [], []>} : vector<8x8xbf16>, vector<8x32xbf16>, vector<8x32xf32> -> vector<8x32xf32>
    %212 = tpu.concatenate %184, %187, %190, %193, %196, %199, %202, %205, %208, %211 in 1 : vector<8x32xf32>, vector<8x32xf32>, vector<8x32xf32>, vector<8x32xf32>, vector<8x32xf32>, vector<8x32xf32>, vector<8x32xf32>, vector<8x32xf32>, vector<8x32xf32>, vector<8x32xf32> -> vector<8x320xf32>
    %213 = tpu.concatenate %127, %212 in 0 : vector<8x320xf32>, vector<8x320xf32> -> vector<16x320xf32>
    %214 = arith.truncf %213 : vector<16x320xf32> to vector<16x320xbf16>
    %c0_70 = arith.constant 0 : index
    %c0_71 = arith.constant 0 : index
    %215 = vector.load %arg4[%c0_70, %c0_71] : memref<320x256xbf16, #tpu.memory_space<vmem>>, vector<320x256xbf16>
    %cst_72 = arith.constant dense<0.000000e+00> : vector<16x256xf32>
    %216 = tpu.matmul %214, %215, %cst_72 {dimension_numbers = #tpu.dot_dimension_numbers<[1], [0], [0], [1], [0, 0, 1, 1], [], []>} : vector<16x320xbf16>, vector<320x256xbf16>, vector<16x256xf32> -> vector<16x256xf32>
    %217 = vector.broadcast %5 : vector<1x256xf32> to vector<16x256xf32>
    %218 = arith.addf %216, %217 : vector<16x256xf32>
    %219 = arith.addf %18, %218 : vector<16x256xf32>
    %cst_73 = arith.constant dense<0.000000e+00> : vector<16xf32>
    %220 = vector.multi_reduction <add>, %219, %cst_73 [1] : vector<16x256xf32> to vector<16xf32>
    %221 = vector.shape_cast %220 : vector<16xf32> to vector<16x1xf32>
    %cst_74 = arith.constant 4.000000e-03 : f32
    %222 = vector.broadcast %cst_74 : f32 to vector<16x1xf32>
    %223 = arith.mulf %221, %222 : vector<16x1xf32>
    %224 = arith.mulf %219, %219 : vector<16x256xf32>
    %cst_75 = arith.constant dense<0.000000e+00> : vector<16xf32>
    %225 = vector.multi_reduction <add>, %224, %cst_75 [1] : vector<16x256xf32> to vector<16xf32>
    %226 = vector.shape_cast %225 : vector<16xf32> to vector<16x1xf32>
    %cst_76 = arith.constant 4.000000e-03 : f32
    %227 = vector.broadcast %cst_76 : f32 to vector<16x1xf32>
    %228 = arith.mulf %226, %227 : vector<16x1xf32>
    %229 = arith.mulf %223, %223 : vector<16x1xf32>
    %230 = arith.subf %228, %229 : vector<16x1xf32>
    %231 = vector.broadcast %223 : vector<16x1xf32> to vector<16x256xf32>
    %232 = arith.subf %219, %231 : vector<16x256xf32>
    %cst_77 = arith.constant 9.99999974E-6 : f32
    %233 = vector.broadcast %cst_77 : f32 to vector<16x1xf32>
    %234 = arith.addf %230, %233 : vector<16x1xf32>
    %235 = math.rsqrt %234 : vector<16x1xf32>
    %236 = vector.broadcast %235 : vector<16x1xf32> to vector<16x256xf32>
    %237 = arith.mulf %232, %236 : vector<16x256xf32>
    %238 = vector.broadcast %6 : vector<1x256xf32> to vector<16x256xf32>
    %239 = arith.mulf %237, %238 : vector<16x256xf32>
    %240 = vector.broadcast %7 : vector<1x256xf32> to vector<16x256xf32>
    %241 = arith.addf %239, %240 : vector<16x256xf32>
    %c0_i32_78 = arith.constant 0 : i32
    %242 = tpu.memref_slice %arg11[%c0_i32_78] : memref<2x!tpu.dma_semaphore, #tpu.memory_space<semaphore_mem>> -> memref<1x!tpu.dma_semaphore, #tpu.memory_space<semaphore_mem>>
    %243 = tpu.memref_squeeze %242 : memref<1x!tpu.dma_semaphore, #tpu.memory_space<semaphore_mem>> -> memref<!tpu.dma_semaphore, #tpu.memory_space<semaphore_mem>>
    tpu.wait_dma2 semaphore(%243 : memref<!tpu.dma_semaphore, #tpu.memory_space<semaphore_mem>>) src(%arg5 : memref<256x2048xbf16, #tpu.memory_space<any>>) dst(%arg9 : memref<256x2048xbf16, #tpu.memory_space<vmem>>)
    %244 = arith.truncf %241 : vector<16x256xf32> to vector<16x256xbf16>
    %c0_79 = arith.constant 0 : index
    %c0_80 = arith.constant 0 : index
    %245 = vector.load %arg9[%c0_79, %c0_80] : memref<256x2048xbf16, #tpu.memory_space<vmem>>, vector<256x2048xbf16>
    %cst_81 = arith.constant dense<0.000000e+00> : vector<16x2048xf32>
    %246 = tpu.matmul %244, %245, %cst_81 {dimension_numbers = #tpu.dot_dimension_numbers<[1], [0], [0], [1], [0, 0, 1, 1], [], []>} : vector<16x256xbf16>, vector<256x2048xbf16>, vector<16x2048xf32> -> vector<16x2048xf32>
    %247 = vector.broadcast %10 : vector<1x2048xf32> to vector<16x2048xf32>
    %248 = arith.addf %246, %247 : vector<16x2048xf32>
    %cst_82 = arith.constant 0.000000e+00 : f32
    %249 = vector.broadcast %cst_82 : f32 to vector<16x2048xf32>
    %250 = arith.maximumf %248, %249 : vector<16x2048xf32>
    %c1_i32_83 = arith.constant 1 : i32
    %251 = tpu.memref_slice %arg11[%c1_i32_83] : memref<2x!tpu.dma_semaphore, #tpu.memory_space<semaphore_mem>> -> memref<1x!tpu.dma_semaphore, #tpu.memory_space<semaphore_mem>>
    %252 = tpu.memref_squeeze %251 : memref<1x!tpu.dma_semaphore, #tpu.memory_space<semaphore_mem>> -> memref<!tpu.dma_semaphore, #tpu.memory_space<semaphore_mem>>
    tpu.wait_dma2 semaphore(%252 : memref<!tpu.dma_semaphore, #tpu.memory_space<semaphore_mem>>) src(%arg6 : memref<2048x256xbf16, #tpu.memory_space<any>>) dst(%arg10 : memref<2048x256xbf16, #tpu.memory_space<vmem>>)
    %253 = arith.truncf %250 : vector<16x2048xf32> to vector<16x2048xbf16>
    %c0_84 = arith.constant 0 : index
    %c0_85 = arith.constant 0 : index
    %254 = vector.load %arg10[%c0_84, %c0_85] : memref<2048x256xbf16, #tpu.memory_space<vmem>>, vector<2048x256xbf16>
    %cst_86 = arith.constant dense<0.000000e+00> : vector<16x256xf32>
    %255 = tpu.matmul %253, %254, %cst_86 {dimension_numbers = #tpu.dot_dimension_numbers<[1], [0], [0], [1], [0, 0, 1, 1], [], []>} : vector<16x2048xbf16>, vector<2048x256xbf16>, vector<16x256xf32> -> vector<16x256xf32>
    %256 = vector.broadcast %11 : vector<1x256xf32> to vector<16x256xf32>
    %257 = arith.addf %255, %256 : vector<16x256xf32>
    %258 = arith.addf %241, %257 : vector<16x256xf32>
    %cst_87 = arith.constant dense<0.000000e+00> : vector<16xf32>
    %259 = vector.multi_reduction <add>, %258, %cst_87 [1] : vector<16x256xf32> to vector<16xf32>
    %260 = vector.shape_cast %259 : vector<16xf32> to vector<16x1xf32>
    %cst_88 = arith.constant 4.000000e-03 : f32
    %261 = vector.broadcast %cst_88 : f32 to vector<16x1xf32>
    %262 = arith.mulf %260, %261 : vector<16x1xf32>
    %263 = arith.mulf %258, %258 : vector<16x256xf32>
    %cst_89 = arith.constant dense<0.000000e+00> : vector<16xf32>
    %264 = vector.multi_reduction <add>, %263, %cst_89 [1] : vector<16x256xf32> to vector<16xf32>
    %265 = vector.shape_cast %264 : vector<16xf32> to vector<16x1xf32>
    %cst_90 = arith.constant 4.000000e-03 : f32
    %266 = vector.broadcast %cst_90 : f32 to vector<16x1xf32>
    %267 = arith.mulf %265, %266 : vector<16x1xf32>
    %268 = arith.mulf %262, %262 : vector<16x1xf32>
    %269 = arith.subf %267, %268 : vector<16x1xf32>
    %270 = vector.broadcast %262 : vector<16x1xf32> to vector<16x256xf32>
    %271 = arith.subf %258, %270 : vector<16x256xf32>
    %cst_91 = arith.constant 9.99999974E-6 : f32
    %272 = vector.broadcast %cst_91 : f32 to vector<16x1xf32>
    %273 = arith.addf %269, %272 : vector<16x1xf32>
    %274 = math.rsqrt %273 : vector<16x1xf32>
    %275 = vector.broadcast %274 : vector<16x1xf32> to vector<16x256xf32>
    %276 = arith.mulf %271, %275 : vector<16x256xf32>
    %277 = vector.broadcast %12 : vector<1x256xf32> to vector<16x256xf32>
    %278 = arith.mulf %276, %277 : vector<16x256xf32>
    %279 = vector.broadcast %13 : vector<1x256xf32> to vector<16x256xf32>
    %280 = arith.addf %278, %279 : vector<16x256xf32>
    %281 = vector.broadcast %14 : vector<1x256xf32> to vector<16x256xf32>
    %282 = arith.mulf %280, %281 : vector<16x256xf32>
    %cst_92 = arith.constant dense<0.000000e+00> : vector<16xf32>
    %283 = vector.multi_reduction <add>, %282, %cst_92 [1] : vector<16x256xf32> to vector<16xf32>
    %284 = vector.shape_cast %283 : vector<16xf32> to vector<16x1xf32>
    %285 = vector.broadcast %15 : vector<1x1xf32> to vector<16x1xf32>
    %286 = arith.addf %284, %285 : vector<16x1xf32>
    %287 = vector.shape_cast %286 : vector<16x1xf32> to vector<16x1xf32>
    %288 = vector.broadcast %287 : vector<16x1xf32> to vector<16x128xf32>
    %c0_93 = arith.constant 0 : index
    %c0_94 = arith.constant 0 : index
    %289 = vector.load %arg8[%c0_93, %c0_94] : memref<16x128xf32, #tpu.memory_space<vmem>>, vector<16x128xf32>
    tpu.vector_store %arg8[%c0_93, %c0_94], %288 {strides = array<i32>} : memref<16x128xf32, #tpu.memory_space<vmem>>, vector<16x128xf32>,
    return
  }
  func.func @transform_0(%arg0: i32) -> (i32, i32) {
    %c0_i32 = arith.constant 0 : i32
    %c0_i32_0 = arith.constant 0 : i32
    %c0_i32_1 = arith.constant 0 : i32
    return %c0_i32, %c0_i32_0 : i32, i32
  }
  func.func @transform_1(%arg0: i32) -> (i32, i32) {
    %c0_i32 = arith.constant 0 : i32
    %c0_i32_0 = arith.constant 0 : i32
    %c0_i32_1 = arith.constant 0 : i32
    return %c0_i32, %c0_i32_0 : i32, i32
  }
  func.func @transform_2(%arg0: i32) -> (i32, i32) {
    %c0_i32 = arith.constant 0 : i32
    %c0_i32_0 = arith.constant 0 : i32
    %c0_i32_1 = arith.constant 0 : i32
    return %c0_i32, %c0_i32_0 : i32, i32
  }
  func.func @transform_3(%arg0: i32) -> (i32, i32) {
    %c0_i32 = arith.constant 0 : i32
    %c0_i32_0 = arith.constant 0 : i32
    %c0_i32_1 = arith.constant 0 : i32
    return %c0_i32, %c0_i32_0 : i32, i32
  }
  func.func @transform_6(%arg0: i32) -> (i32, i32) {
    %c0_i32 = arith.constant 0 : i32
    %c0_i32_0 = arith.constant 0 : i32
    %c0_i32_1 = arith.constant 0 : i32
    return %c0_i32, %c0_i32_0 : i32, i32
  }
  func.func @transform_7(%arg0: i32) -> (i32, i32) {
    %c0_i32 = arith.constant 0 : i32
    %c0_i32_0 = arith.constant 0 : i32
    %c0_i32_1 = arith.constant 0 : i32
    return %c0_i32, %c0_i32_0 : i32, i32
  }
}

</mosaic_0001>

<bundles_post_ra>
// kernel: squeeze.1
= control target key start
LH: loop header
LB: loop body
LE: loop exit
PB: predicated region body
PF: predicated region fallthrough
CT: control target
= control target key end

     0   :  { %s85_s0 = inlined_call_operand.vmem [shape: f32[16], index: 0, kind: input, shape index: {}]   ;;  %s86_s1 = inlined_call_operand.hbm [shape: f32[2,8], index: 1, kind: output, shape index: {}]  }
   0x1   :  { %v5_v0 = vld [vmem:[%s85_s0] sm:$0x1] }
   0x2   :  { %2 = vsyncpa [#allocation1], 0  ;;  %6 = vst [vmem:[#allocation3] sm:$0x1] %v5_v0  ;;  %vm8_vm0 = vcmask 64512   ;;  %s58_s0 = smov 120  }
   0x3   :  { %s59_s8 = smov [#allocation0]  }
   0x4   :  { %s26_s9 = sshll.u32 %s59_s8, 4  ;;  %s27_s9 = int_to_ptr.vmem [resolvable:$true] %s26_s9 }
   0x5   :  { %s34_s10 = scalar_lea.vmem %s27_s9, 32  ;;  %p39_p1 = scmp.lt.s32.totalorder %s27_s9, %s27_s9 }
   0x6   :  { %p35_p0 = scmp.ne.s32.totalorder %s27_s9, %s34_s10  ;;  %p40_p2 = scmp.lt.s32.totalorder %s34_s10, %s34_s10 }
   0x8   :  { %p41_p3 = por %p40_p2, %p39_p1 }
   0x9   :  { %v10_v1 = vld [vmem:[#allocation3] sm:$0x1]  }
   0xa   :  { %v7_v2 = vld [vmem:[#allocation3] sm:$0x1]   ;;  %11 = vrot.lane.b32.xlu0 %v10_v1, %s58_s0  ;;  %p42_p4 = pnand %p41_p3, %p35_p0 }
   0xb   :  { %9 = vst.msk [vmem:[#allocation2] sm:$0x1] %vm8_vm0, %v7_v2  }
  0x7c   :  { %v12_v3 = vpop.permute.xlu0 %11  }
  0x7d   :  { %15 = vst.msk [vmem:[#allocation2 + $0x1] sm:$0x1] %vm8_vm0, %v12_v3  }
  0x84   :  { %v19_v4 = vld [vmem:[#allocation2] sm:$0x3] }
  0x85   :  { %21 = vst [vmem:[#allocation0] sm:$0x3] %v19_v4 }
  0x86   :  { %45 = shalt.err (!%p42_p4)
}
  0x87   :  { %s46_s13 = scalar_lea.hbm %s86_s1, 32 }
  0x88   :  { %p47_p5 = scmp.ne.s32.totalorder %s86_s1, %s46_s13  ;;  %p50_p6 = scmp.lt.u32.totalorder %s46_s13, %s86_s1 }
  0x8a   :  { %p52_p7 = pnand %p50_p6, %p47_p5 }
  0x8c   :  { %55 = shalt.err (!%p52_p7)
}
  0x8d   :  { %29 = dma.vmem_to_hbm [thread:$0]  %s27_s9, 32, %s86_s1, [#allocation1]  }
  0x8e   :  { %56 = dma.done.wait [#allocation1], 32  }
  0x8f   :  { %57 = vsyncadd [#allocation1], 4294967264 }
  0x90   :  { %31 = vsyncpa [#allocation1], 1 }

// kernel: transam_forward.1
= control target key start
LH: loop header
LB: loop body
LE: loop exit
PB: predicated region body
PF: predicated region fallthrough
CT: control target
= control target key end

     0   :  { %s19594_s0 = inlined_call_operand.vmem [shape: f32[16,256], index: 0, kind: input, shape index: {}]   ;;  %s19595_s1 = inlined_call_operand.vmem [shape: f32[16,256], index: 1, kind: input, shape index: {}]   ;;  %s19596_s2 = inlined_call_operand.vmem [shape: bf16[256,960], index: 2, kind: input, shape index: {}]   ;;  %s19597_s3 = inlined_call_operand.vmem [shape: bf16[320,256], index: 3, kind: input, shape index: {}]   ;;  %s19598_s4 = inlined_call_operand.vmem [shape: bf16[256,2048], index: 4, kind: input, shape index: {}]   ;;  %s19599_s5 = inlined_call_operand.vmem [shape: bf16[2048,256], index: 5, kind: input, shape index: {}]   ;;  %s19600_s6 = inlined_call_operand.vmem [shape: f32[11,1024], index: 6, kind: input, shape index: {}]   ;;  %s19601_s7 = inlined_call_operand.vmem [shape: f32[16,128], index: 7, kind: output, shape index: {}]  }
   0x1   :  { %v40_v0 = vld [vmem:[%s19598_s4] sm:$0xf]  ;;  %v44_v2 = vld [vmem:[%s19598_s4 + $0x4] sm:$0xf]  ;;  %v48_v4 = vld [vmem:[%s19598_s4 + $0x8] sm:$0xf] }
   0x2   :  { %v42_v1 = vld [vmem:[%s19598_s4 + $0x40] sm:$0xf]  ;;  %41 = vst [vmem:[#allocation2] sm:$0xf] %v40_v0  ;;  %45 = vst [vmem:[#allocation2 + $0x8] sm:$0xf] %v44_v2 }
   0x3   :  { %43 = vst [vmem:[#allocation2 + $0x4] sm:$0xf] %v42_v1  ;;  %v46_v3 = vld [vmem:[%s19598_s4 + $0x44] sm:$0xf]  ;;  %v50_v5 = vld [vmem:[%s19598_s4 + $0x48] sm:$0xf] }
   0x4   :  { %47 = vst [vmem:[#allocation2 + $0xc] sm:$0xf] %v46_v3  ;;  %49 = vst [vmem:[#allocation2 + $0x10] sm:$0xf] %v48_v4  ;;  %v52_v6 = vld [vmem:[%s19598_s4 + $0xc] sm:$0xf] }
   0x5   :  { %51 = vst [vmem:[#allocation2 + $0x14] sm:$0xf] %v50_v5  ;;  %v54_v7 = vld [vmem:[%s19598_s4 + $0x4c] sm:$0xf]  ;;  %v56_v8 = vld [vmem:[%s19598_s4 + $0x10] sm:$0xf] }
   0x6   :  { %53 = vst [vmem:[#allocation2 + $0x18] sm:$0xf] %v52_v6  ;;  %55 = vst [vmem:[#allocation2 + $0x1c] sm:$0xf] %v54_v7  ;;  %v58_v9 = vld [vmem:[%s19598_s4 + $0x50] sm:$0xf] }
   0x7   :  { %57 = vst [vmem:[#allocation2 + $0x20] sm:$0xf] %v56_v8  ;;  %v60_v10 = vld [vmem:[%s19598_s4 + $0x14] sm:$0xf]  ;;  %59 = vst [vmem:[#allocation2 + $0x24] sm:$0xf] %v58_v9 }
   0x8   :  { %v62_v11 = vld [vmem:[%s19598_s4 + $0x54] sm:$0xf]  ;;  %61 = vst [vmem:[#allocation2 + $0x28] sm:$0xf] %v60_v10  ;;  %v64_v12 = vld [vmem:[%s19598_s4 + $0x18] sm:$0xf] }
   0x9   :  { %63 = vst [vmem:[#allocation2 + $0x2c] sm:$0xf] %v62_v11  ;;  %v66_v13 = vld [vmem:[%s19598_s4 + $0x58] sm:$0xf]  ;;  %v68_v14 = vld [vmem:[%s19598_s4 + $0x1c] sm:$0xf] }
   0xa   :  { %65 = vst [vmem:[#allocation2 + $0x30] sm:$0xf] %v64_v12  ;;  %67 = vst [vmem:[#allocation2 + $0x34] sm:$0xf] %v66_v13  ;;  %v70_v15 = vld [vmem:[%s19598_s4 + $0x5c] sm:$0xf] }
   0xb   :  { %69 = vst [vmem:[#allocation2 + $0x38] sm:$0xf] %v68_v14  ;;  %v72_v16 = vld [vmem:[%s19598_s4 + $0x20] sm:$0xf]  ;;  %71 = vst [vmem:[#allocation2 + $0x3c] sm:$0xf] %v70_v15 }
   0xc   :  { %v74_v17 = vld [vmem:[%s19598_s4 + $0x60] sm:$0xf]  ;;  %73 = vst [vmem:[#allocation2 + $0x40] sm:$0xf] %v72_v16  ;;  %v76_v18 = vld [vmem:[%s19598_s4 + $0x24] sm:$0xf] }
   0xd   :  { %75 = vst [vmem:[#allocation2 + $0x44] sm:$0xf] %v74_v17  ;;  %v78_v19 = vld [vmem:[%s19598_s4 + $0x64] sm:$0xf]  ;;  %v80_v20 = vld [vmem:[%s19598_s4 + $0x28] sm:$0xf] }
   0xe   :  { %77 = vst [vmem:[#allocation2 + $0x48] sm:$0xf] %v76_v18  ;;  %79 = vst [vmem:[#allocation2 + $0x4c] sm:$0xf] %v78_v19  ;;  %v82_v21 = vld [vmem:[%s19598_s4 + $0x68] sm:$0xf] }
   0xf   :  { %81 = vst [vmem:[#allocation2 + $0x50] sm:$0xf] %v80_v20  ;;  %v84_v22 = vld [vmem:[%s19598_s4 + $0x2c] sm:$0xf]  ;;  %83 = vst [vmem:[#allocation2 + $0x54] sm:$0xf] %v82_v21 }
  0x10   :  { %v86_v23 = vld [vmem:[%s19598_s4 + $0x6c] sm:$0xf]  ;;  %85 = vst [vmem:[#allocation2 + $0x58] sm:$0xf] %v84_v22  ;;  %v88_v24 = vld [vmem:[%s19598_s4 + $0x30] sm:$0xf] }
  0x11   :  { %87 = vst [vmem:[#allocation2 + $0x5c] sm:$0xf] %v86_v23  ;;  %v90_v25 = vld [vmem:[%s19598_s4 + $0x70] sm:$0xf]  ;;  %v92_v26 = vld [vmem:[%s19598_s4 + $0x34] sm:$0xf] }
  0x12   :  { %89 = vst [vmem:[#allocation2 + $0x60] sm:$0xf] %v88_v24  ;;  %91 = vst [vmem:[#allocation2 + $0x64] sm:$0xf] %v90_v25  ;;  %v94_v27 = vld [vmem:[%s19598_s4 + $0x74] sm:$0xf] }
  0x13   :  { %93 = vst [vmem:[#allocation2 + $0x68] sm:$0xf] %v92_v26  ;;  %v96_v28 = vld [vmem:[%s19598_s4 + $0x38] sm:$0xf]  ;;  %95 = vst [vmem:[#allocation2 + $0x6c] sm:$0xf] %v94_v27 }
  0x14   :  { %v98_v29 = vld [vmem:[%s19598_s4 + $0x78] sm:$0xf]  ;;  %97 = vst [vmem:[#allocation2 + $0x70] sm:$0xf] %v96_v28  ;;  %v100_v30 = vld [vmem:[%s19598_s4 + $0x3c] sm:$0xf] }
  0x15   :  { %99 = vst [vmem:[#allocation2 + $0x74] sm:$0xf] %v98_v29  ;;  %v102_v31 = vld [vmem:[%s19598_s4 + $0x7c] sm:$0xff]   ;;  %101 = vst [vmem:[#allocation2 + $0x78] sm:$0xf] %v100_v30 }
  0x16   :  { %v106_v32 = vld [vmem:[%s19598_s4 + $0xc0] sm:$0xf]  ;;  %103 = vst [vmem:[#allocation2 + $0x7c] sm:$0xff] %v102_v31   ;;  %v108_v33 = vld [vmem:[%s19598_s4 + $0x84] sm:$0xf] }
  0x17   :  { %107 = vst [vmem:[#allocation2 + $0x84] sm:$0xf] %v106_v32  ;;  %v110_v34 = vld [vmem:[%s19598_s4 + $0xc4] sm:$0xf]  ;;  %v112_v35 = vld [vmem:[%s19598_s4 + $0x88] sm:$0xf] }
  0x18   :  { %109 = vst [vmem:[#allocation2 + $0x88] sm:$0xf] %v108_v33  ;;  %111 = vst [vmem:[#allocation2 + $0x8c] sm:$0xf] %v110_v34  ;;  %v114_v36 = vld [vmem:[%s19598_s4 + $0xc8] sm:$0xf] }
  0x19   :  { %113 = vst [vmem:[#allocation2 + $0x90] sm:$0xf] %v112_v35  ;;  %v116_v37 = vld [vmem:[%s19598_s4 + $0x8c] sm:$0xf]  ;;  %115 = vst [vmem:[#allocation2 + $0x94] sm:$0xf] %v114_v36 }
  0x1a   :  { %v118_v38 = vld [vmem:[%s19598_s4 + $0xcc] sm:$0xf]  ;;  %117 = vst [vmem:[#allocation2 + $0x98] sm:$0xf] %v116_v37  ;;  %v120_v39 = vld [vmem:[%s19598_s4 + $0x90] sm:$0xf] }
  0x1b   :  { %119 = vst [vmem:[#allocation2 + $0x9c] sm:$0xf] %v118_v38  ;;  %v122_v40 = vld [vmem:[%s19598_s4 + $0xd0] sm:$0xf]  ;;  %v124_v41 = vld [vmem:[%s19598_s4 + $0x94] sm:$0xf] }
  0x1c   :  { %121 = vst [vmem:[#allocation2 + $0xa0] sm:$0xf] %v120_v39  ;;  %123 = vst [vmem:[#allocation2 + $0xa4] sm:$0xf] %v122_v40  ;;  %v126_v42 = vld [vmem:[%s19598_s4 + $0xd4] sm:$0xf] }
  0x1d   :  { %125 = vst [vmem:[#allocation2 + $0xa8] sm:$0xf] %v124_v41  ;;  %v128_v43 = vld [vmem:[%s19598_s4 + $0x98] sm:$0xf]  ;;  %127 = vst [vmem:[#allocation2 + $0xac] sm:$0xf] %v126_v42 }
  0x1e   :  { %v130_v44 = vld [vmem:[%s19598_s4 + $0xd8] sm:$0xf]  ;;  %129 = vst [vmem:[#allocation2 + $0xb0] sm:$0xf] %v128_v43  ;;  %v132_v45 = vld [vmem:[%s19598_s4 + $0x9c] sm:$0xf] }
  0x1f   :  { %131 = vst [vmem:[#allocation2 + $0xb4] sm:$0xf] %v130_v44  ;;  %v134_v46 = vld [vmem:[%s19598_s4 + $0xdc] sm:$0xf]  ;;  %v136_v47 = vld [vmem:[%s19598_s4 + $0xa0] sm:$0xf] }
  0x20   :  { %133 = vst [vmem:[#allocation2 + $0xb8] sm:$0xf] %v132_v45  ;;  %135 = vst [vmem:[#allocation2 + $0xbc] sm:$0xf] %v134_v46  ;;  %v138_v48 = vld [vmem:[%s19598_s4 + $0xe0] sm:$0xf] }
  0x21   :  { %137 = vst [vmem:[#allocation2 + $0xc0] sm:$0xf] %v136_v47  ;;  %v140_v49 = vld [vmem:[%s19598_s4 + $0xa4] sm:$0xf]  ;;  %139 = vst [vmem:[#allocation2 + $0xc4] sm:$0xf] %v138_v48 }
  0x22   :  { %v142_v50 = vld [vmem:[%s19598_s4 + $0xe4] sm:$0xf]  ;;  %141 = vst [vmem:[#allocation2 + $0xc8] sm:$0xf] %v140_v49  ;;  %v144_v51 = vld [vmem:[%s19598_s4 + $0xa8] sm:$0xf] }
  0x23   :  { %143 = vst [vmem:[#allocation2 + $0xcc] sm:$0xf] %v142_v50  ;;  %v146_v52 = vld [vmem:[%s19598_s4 + $0xe8] sm:$0xf]  ;;  %v148_v53 = vld [vmem:[%s19598_s4 + $0xac] sm:$0xf] }
  0x24   :  { %145 = vst [vmem:[#allocation2 + $0xd0] sm:$0xf] %v144_v51  ;;  %147 = vst [vmem:[#allocation2 + $0xd4] sm:$0xf] %v146_v52  ;;  %v150_v54 = vld [vmem:[%s19598_s4 + $0xec] sm:$0xf] }
  0x25   :  { %149 = vst [vmem:[#allocation2 + $0xd8] sm:$0xf] %v148_v53  ;;  %v152_v55 = vld [vmem:[%s19598_s4 + $0xb0] sm:$0xf]  ;;  %151 = vst [vmem:[#allocation2 + $0xdc] sm:$0xf] %v150_v54 }
  0x26   :  { %v154_v56 = vld [vmem:[%s19598_s4 + $0xf0] sm:$0xf]  ;;  %153 = vst [vmem:[#allocation2 + $0xe0] sm:$0xf] %v152_v55  ;;  %v156_v57 = vld [vmem:[%s19598_s4 + $0xb4] sm:$0xf] }
  0x27   :  { %155 = vst [vmem:[#allocation2 + $0xe4] sm:$0xf] %v154_v56  ;;  %v158_v58 = vld [vmem:[%s19598_s4 + $0xf4] sm:$0xf]  ;;  %v160_v59 = vld [vmem:[%s19598_s4 + $0xb8] sm:$0xf] }
  0x28   :  { %157 = vst [vmem:[#allocation2 + $0xe8] sm:$0xf] %v156_v57  ;;  %159 = vst [vmem:[#allocation2 + $0xec] sm:$0xf] %v158_v58  ;;  %v162_v60 = vld [vmem:[%s19598_s4 + $0xf8] sm:$0xf] }
  0x29   :  { %161 = vst [vmem:[#allocation2 + $0xf0] sm:$0xf] %v160_v59  ;;  %v164_v61 = vld [vmem:[%s19598_s4 + $0xbc] sm:$0xf]  ;;  %163 = vst [vmem:[#allocation2 + $0xf4] sm:$0xf] %v162_v60 }
  0x2a   :  { %v166_v62 = vld [vmem:[%s19598_s4 + $0xfc] sm:$0xff]   ;;  %165 = vst [vmem:[#allocation2 + $0xf8] sm:$0xf] %v164_v61  ;;  %v172_v0 = vld [vmem:[%s19598_s4 + $0x104] sm:$0xf] }
  0x2b   :  { %167 = vst [vmem:[#allocation2 + $0xfc] sm:$0xff] %v166_v62   ;;  %v170_v63 = vld [vmem:[%s19598_s4 + $0x140] sm:$0xf]  ;;  %v174_v1 = vld [vmem:[%s19598_s4 + $0x144] sm:$0xf] }
  0x2c   :  { %171 = vst [vmem:[#allocation2 + $0x104] sm:$0xf] %v170_v63  ;;  %173 = vst [vmem:[#allocation2 + $0x108] sm:$0xf] %v172_v0  ;;  %v176_v2 = vld [vmem:[%s19598_s4 + $0x108] sm:$0xf] }
  0x2d   :  { %175 = vst [vmem:[#allocation2 + $0x10c] sm:$0xf] %v174_v1  ;;  %v178_v3 = vld [vmem:[%s19598_s4 + $0x148] sm:$0xf]  ;;  %v180_v4 = vld [vmem:[%s19598_s4 + $0x10c] sm:$0xf] }
  0x2e   :  { %177 = vst [vmem:[#allocation2 + $0x110] sm:$0xf] %v176_v2  ;;  %179 = vst [vmem:[#allocation2 + $0x114] sm:$0xf] %v178_v3  ;;  %v182_v5 = vld [vmem:[%s19598_s4 + $0x14c] sm:$0xf] }
  0x2f   :  { %181 = vst [vmem:[#allocation2 + $0x118] sm:$0xf] %v180_v4  ;;  %v184_v6 = vld [vmem:[%s19598_s4 + $0x110] sm:$0xf]  ;;  %183 = vst [vmem:[#allocation2 + $0x11c] sm:$0xf] %v182_v5 }
  0x30   :  { %v186_v7 = vld [vmem:[%s19598_s4 + $0x150] sm:$0xf]  ;;  %185 = vst [vmem:[#allocation2 + $0x120] sm:$0xf] %v184_v6  ;;  %v188_v8 = vld [vmem:[%s19598_s4 + $0x114] sm:$0xf] }
  0x31   :  { %187 = vst [vmem:[#allocation2 + $0x124] sm:$0xf] %v186_v7  ;;  %v190_v9 = vld [vmem:[%s19598_s4 + $0x154] sm:$0xf]  ;;  %v192_v10 = vld [vmem:[%s19598_s4 + $0x118] sm:$0xf] }
  0x32   :  { %189 = vst [vmem:[#allocation2 + $0x128] sm:$0xf] %v188_v8  ;;  %191 = vst [vmem:[#allocation2 + $0x12c] sm:$0xf] %v190_v9  ;;  %v194_v11 = vld [vmem:[%s19598_s4 + $0x158] sm:$0xf] }
  0x33   :  { %193 = vst [vmem:[#allocation2 + $0x130] sm:$0xf] %v192_v10  ;;  %v196_v12 = vld [vmem:[%s19598_s4 + $0x11c] sm:$0xf]  ;;  %195 = vst [vmem:[#allocation2 + $0x134] sm:$0xf] %v194_v11 }
  0x34   :  { %v198_v13 = vld [vmem:[%s19598_s4 + $0x15c] sm:$0xf]  ;;  %197 = vst [vmem:[#allocation2 + $0x138] sm:$0xf] %v196_v12  ;;  %v200_v14 = vld [vmem:[%s19598_s4 + $0x120] sm:$0xf] }
  0x35   :  { %199 = vst [vmem:[#allocation2 + $0x13c] sm:$0xf] %v198_v13  ;;  %v202_v15 = vld [vmem:[%s19598_s4 + $0x160] sm:$0xf]  ;;  %v204_v16 = vld [vmem:[%s19598_s4 + $0x124] sm:$0xf] }
  0x36   :  { %201 = vst [vmem:[#allocation2 + $0x140] sm:$0xf] %v200_v14  ;;  %203 = vst [vmem:[#allocation2 + $0x144] sm:$0xf] %v202_v15  ;;  %v206_v17 = vld [vmem:[%s19598_s4 + $0x164] sm:$0xf] }
  0x37   :  { %205 = vst [vmem:[#allocation2 + $0x148] sm:$0xf] %v204_v16  ;;  %v208_v18 = vld [vmem:[%s19598_s4 + $0x128] sm:$0xf]  ;;  %207 = vst [vmem:[#allocation2 + $0x14c] sm:$0xf] %v206_v17 }
  0x38   :  { %v210_v19 = vld [vmem:[%s19598_s4 + $0x168] sm:$0xf]  ;;  %209 = vst [vmem:[#allocation2 + $0x150] sm:$0xf] %v208_v18  ;;  %v212_v20 = vld [vmem:[%s19598_s4 + $0x12c] sm:$0xf] }
  0x39   :  { %211 = vst [vmem:[#allocation2 + $0x154] sm:$0xf] %v210_v19  ;;  %v214_v21 = vld [vmem:[%s19598_s4 + $0x16c] sm:$0xf]  ;;  %v216_v22 = vld [vmem:[%s19598_s4 + $0x130] sm:$0xf] }
  0x3a   :  { %213 = vst [vmem:[#allocation2 + $0x158] sm:$0xf] %v212_v20  ;;  %215 = vst [vmem:[#allocation2 + $0x15c] sm:$0xf] %v214_v21  ;;  %v218_v23 = vld [vmem:[%s19598_s4 + $0x170] sm:$0xf] }
  0x3b   :  { %217 = vst [vmem:[#allocation2 + $0x160] sm:$0xf] %v216_v22  ;;  %v220_v24 = vld [vmem:[%s19598_s4 + $0x134] sm:$0xf]  ;;  %219 = vst [vmem:[#allocation2 + $0x164] sm:$0xf] %v218_v23 }
  0x3c   :  { %v222_v25 = vld [vmem:[%s19598_s4 + $0x174] sm:$0xf]  ;;  %221 = vst [vmem:[#allocation2 + $0x168] sm:$0xf] %v220_v24  ;;  %v224_v26 = vld [vmem:[%s19598_s4 + $0x138] sm:$0xf] }
  0x3d   :  { %223 = vst [vmem:[#allocation2 + $0x16c] sm:$0xf] %v222_v25  ;;  %v226_v27 = vld [vmem:[%s19598_s4 + $0x178] sm:$0xf]  ;;  %v228_v28 = vld [vmem:[%s19598_s4 + $0x13c] sm:$0xf] }
  0x3e   :  { %225 = vst [vmem:[#allocation2 + $0x170] sm:$0xf] %v224_v26  ;;  %227 = vst [vmem:[#allocation2 + $0x174] sm:$0xf] %v226_v27  ;;  %v230_v29 = vld [vmem:[%s19598_s4 + $0x17c] sm:$0xff]  }
  0x3f   :  { %229 = vst [vmem:[#allocation2 + $0x178] sm:$0xf] %v228_v28  ;;  %v234_v30 = vld [vmem:[%s19598_s4 + $0x1c0] sm:$0xf]  ;;  %v236_v31 = vld [vmem:[%s19598_s4 + $0x184] sm:$0xf] }
  0x40   :  { %231 = vst [vmem:[#allocation2 + $0x17c] sm:$0xff] %v230_v29   ;;  %235 = vst [vmem:[#allocation2 + $0x184] sm:$0xf] %v234_v30  ;;  %v238_v32 = vld [vmem:[%s19598_s4 + $0x1c4] sm:$0xf]  ;;  %v294_v60 = vld [vmem:[%s19598_s4 + $0x1fc] sm:$0xff]  }
  0x41   :  { %237 = vst [vmem:[#allocation2 + $0x188] sm:$0xf] %v236_v31  ;;  %v240_v33 = vld [vmem:[%s19598_s4 + $0x188] sm:$0xf]  ;;  %239 = vst [vmem:[#allocation2 + $0x18c] sm:$0xf] %v238_v32 }
  0x42   :  { %v242_v34 = vld [vmem:[%s19598_s4 + $0x1c8] sm:$0xf]  ;;  %241 = vst [vmem:[#allocation2 + $0x190] sm:$0xf] %v240_v33  ;;  %v244_v35 = vld [vmem:[%s19598_s4 + $0x18c] sm:$0xf] }
  0x43   :  { %243 = vst [vmem:[#allocation2 + $0x194] sm:$0xf] %v242_v34  ;;  %v246_v36 = vld [vmem:[%s19598_s4 + $0x1cc] sm:$0xf]  ;;  %v248_v37 = vld [vmem:[%s19598_s4 + $0x190] sm:$0xf] }
  0x44   :  { %245 = vst [vmem:[#allocation2 + $0x198] sm:$0xf] %v244_v35  ;;  %247 = vst [vmem:[#allocation2 + $0x19c] sm:$0xf] %v246_v36  ;;  %v250_v38 = vld [vmem:[%s19598_s4 + $0x1d0] sm:$0xf] }
  0x45   :  { %249 = vst [vmem:[#allocation2 + $0x1a0] sm:$0xf] %v248_v37  ;;  %v252_v39 = vld [vmem:[%s19598_s4 + $0x194] sm:$0xf]  ;;  %251 = vst [vmem:[#allocation2 + $0x1a4] sm:$0xf] %v250_v38 }
  0x46   :  { %v254_v40 = vld [vmem:[%s19598_s4 + $0x1d4] sm:$0xf]  ;;  %253 = vst [vmem:[#allocation2 + $0x1a8] sm:$0xf] %v252_v39  ;;  %v256_v41 = vld [vmem:[%s19598_s4 + $0x198] sm:$0xf] }
  0x47   :  { %255 = vst [vmem:[#allocation2 + $0x1ac] sm:$0xf] %v254_v40  ;;  %v258_v42 = vld [vmem:[%s19598_s4 + $0x1d8] sm:$0xf]  ;;  %v260_v43 = vld [vmem:[%s19598_s4 + $0x19c] sm:$0xf] }
  0x48   :  { %257 = vst [vmem:[#allocation2 + $0x1b0] sm:$0xf] %v256_v41  ;;  %259 = vst [vmem:[#allocation2 + $0x1b4] sm:$0xf] %v258_v42  ;;  %v262_v44 = vld [vmem:[%s19598_s4 + $0x1dc] sm:$0xf] }
  0x49   :  { %261 = vst [vmem:[#allocation2 + $0x1b8] sm:$0xf] %v260_v43  ;;  %v264_v45 = vld [vmem:[%s19598_s4 + $0x1a0] sm:$0xf]  ;;  %263 = vst [vmem:[#allocation2 + $0x1bc] sm:$0xf] %v262_v44 }
  0x4a   :  { %v266_v46 = vld [vmem:[%s19598_s4 + $0x1e0] sm:$0xf]  ;;  %265 = vst [vmem:[#allocation2 + $0x1c0] sm:$0xf] %v264_v45  ;;  %v268_v47 = vld [vmem:[%s19598_s4 + $0x1a4] sm:$0xf] }
  0x4b   :  { %267 = vst [vmem:[#allocation2 + $0x1c4] sm:$0xf] %v266_v46  ;;  %v270_v48 = vld [vmem:[%s19598_s4 + $0x1e4] sm:$0xf]  ;;  %v272_v49 = vld [vmem:[%s19598_s4 + $0x1a8] sm:$0xf] }
  0x4c   :  { %269 = vst [vmem:[#allocation2 + $0x1c8] sm:$0xf] %v268_v47  ;;  %271 = vst [vmem:[#allocation2 + $0x1cc] sm:$0xf] %v270_v48  ;;  %v274_v50 = vld [vmem:[%s19598_s4 + $0x1e8] sm:$0xf] }
  0x4d   :  { %273 = vst [vmem:[#allocation2 + $0x1d0] sm:$0xf] %v272_v49  ;;  %v276_v51 = vld [vmem:[%s19598_s4 + $0x1ac] sm:$0xf]  ;;  %275 = vst [vmem:[#allocation2 + $0x1d4] sm:$0xf] %v274_v50 }
  0x4e   :  { %v278_v52 = vld [vmem:[%s19598_s4 + $0x1ec] sm:$0xf]  ;;  %277 = vst [vmem:[#allocation2 + $0x1d8] sm:$0xf] %v276_v51  ;;  %v280_v53 = vld [vmem:[%s19598_s4 + $0x1b0] sm:$0xf] }
  0x4f   :  { %279 = vst [vmem:[#allocation2 + $0x1dc] sm:$0xf] %v278_v52  ;;  %v282_v54 = vld [vmem:[%s19598_s4 + $0x1f0] sm:$0xf]  ;;  %v284_v55 = vld [vmem:[%s19598_s4 + $0x1b4] sm:$0xf] }
  0x50   :  { %281 = vst [vmem:[#allocation2 + $0x1e0] sm:$0xf] %v280_v53  ;;  %283 = vst [vmem:[#allocation2 + $0x1e4] sm:$0xf] %v282_v54  ;;  %v286_v56 = vld [vmem:[%s19598_s4 + $0x1f4] sm:$0xf] }
  0x51   :  { %285 = vst [vmem:[#allocation2 + $0x1e8] sm:$0xf] %v284_v55  ;;  %v288_v57 = vld [vmem:[%s19598_s4 + $0x1b8] sm:$0xf]  ;;  %287 = vst [vmem:[#allocation2 + $0x1ec] sm:$0xf] %v286_v56 }
  0x52   :  { %v290_v58 = vld [vmem:[%s19598_s4 + $0x1f8] sm:$0xf]  ;;  %289 = vst [vmem:[#allocation2 + $0x1f0] sm:$0xf] %v288_v57  ;;  %v292_v59 = vld [vmem:[%s19598_s4 + $0x1bc] sm:$0xf] }
  0x53   :  { %291 = vst [vmem:[#allocation2 + $0x1f4] sm:$0xf] %v290_v58  ;;  %v298_v61 = vld [vmem:[%s19598_s4 + $0x240] sm:$0xf]  ;;  %293 = vst [vmem:[#allocation2 + $0x1f8] sm:$0xf] %v292_v59 }
  0x54   :  { %295 = vst [vmem:[#allocation2 + $0x1fc] sm:$0xff] %v294_v60   ;;  %299 = vst [vmem:[#allocation2 + $0x204] sm:$0xf] %v298_v61  ;;  %v300_v62 = vld [vmem:[%s19598_s4 + $0x204] sm:$0xf]  ;;  %v358_v27 = vld [vmem:[%s19598_s4 + $0x27c] sm:$0xff]  }
  0x55   :  { %v302_v63 = vld [vmem:[%s19598_s4 + $0x244] sm:$0xf]  ;;  %v304_v0 = vld [vmem:[%s19598_s4 + $0x208] sm:$0xf]  ;;  %301 = vst [vmem:[#allocation2 + $0x208] sm:$0xf] %v300_v62 }
  0x56   :  { %303 = vst [vmem:[#allocation2 + $0x20c] sm:$0xf] %v302_v63  ;;  %305 = vst [vmem:[#allocation2 + $0x210] sm:$0xf] %v304_v0  ;;  %v306_v1 = vld [vmem:[%s19598_s4 + $0x248] sm:$0xf] }
  0x57   :  { %v308_v2 = vld [vmem:[%s19598_s4 + $0x20c] sm:$0xf]  ;;  %307 = vst [vmem:[#allocation2 + $0x214] sm:$0xf] %v306_v1  ;;  %v312_v4 = vld [vmem:[%s19598_s4 + $0x210] sm:$0xf] }
  0x58   :  { %v310_v3 = vld [vmem:[%s19598_s4 + $0x24c] sm:$0xf]  ;;  %309 = vst [vmem:[#allocation2 + $0x218] sm:$0xf] %v308_v2  ;;  %v314_v5 = vld [vmem:[%s19598_s4 + $0x250] sm:$0xf] }
  0x59   :  { %311 = vst [vmem:[#allocation2 + $0x21c] sm:$0xf] %v310_v3  ;;  %v316_v6 = vld [vmem:[%s19598_s4 + $0x214] sm:$0xf]  ;;  %313 = vst [vmem:[#allocation2 + $0x220] sm:$0xf] %v312_v4 }
  0x5a   :  { %315 = vst [vmem:[#allocation2 + $0x224] sm:$0xf] %v314_v5  ;;  %317 = vst [vmem:[#allocation2 + $0x228] sm:$0xf] %v316_v6  ;;  %v318_v7 = vld [vmem:[%s19598_s4 + $0x254] sm:$0xf] }
  0x5b   :  { %v320_v8 = vld [vmem:[%s19598_s4 + $0x218] sm:$0xf]  ;;  %319 = vst [vmem:[#allocation2 + $0x22c] sm:$0xf] %v318_v7  ;;  %v324_v10 = vld [vmem:[%s19598_s4 + $0x21c] sm:$0xf] }
  0x5c   :  { %v322_v9 = vld [vmem:[%s19598_s4 + $0x258] sm:$0xf]  ;;  %321 = vst [vmem:[#allocation2 + $0x230] sm:$0xf] %v320_v8  ;;  %v326_v11 = vld [vmem:[%s19598_s4 + $0x25c] sm:$0xf] }
  0x5d   :  { %323 = vst [vmem:[#allocation2 + $0x234] sm:$0xf] %v322_v9  ;;  %v328_v12 = vld [vmem:[%s19598_s4 + $0x220] sm:$0xf]  ;;  %325 = vst [vmem:[#allocation2 + $0x238] sm:$0xf] %v324_v10 }
  0x5e   :  { %327 = vst [vmem:[#allocation2 + $0x23c] sm:$0xf] %v326_v11  ;;  %329 = vst [vmem:[#allocation2 + $0x240] sm:$0xf] %v328_v12  ;;  %v330_v13 = vld [vmem:[%s19598_s4 + $0x260] sm:$0xf] }
  0x5f   :  { %v332_v14 = vld [vmem:[%s19598_s4 + $0x224] sm:$0xf]  ;;  %331 = vst [vmem:[#allocation2 + $0x244] sm:$0xf] %v330_v13  ;;  %v336_v16 = vld [vmem:[%s19598_s4 + $0x228] sm:$0xf] }
  0x60   :  { %v334_v15 = vld [vmem:[%s19598_s4 + $0x264] sm:$0xf]  ;;  %333 = vst [vmem:[#allocation2 + $0x248] sm:$0xf] %v332_v14  ;;  %v338_v17 = vld [vmem:[%s19598_s4 + $0x268] sm:$0xf] }
  0x61   :  { %335 = vst [vmem:[#allocation2 + $0x24c] sm:$0xf] %v334_v15  ;;  %v340_v18 = vld [vmem:[%s19598_s4 + $0x22c] sm:$0xf]  ;;  %337 = vst [vmem:[#allocation2 + $0x250] sm:$0xf] %v336_v16 }
  0x62   :  { %339 = vst [vmem:[#allocation2 + $0x254] sm:$0xf] %v338_v17  ;;  %341 = vst [vmem:[#allocation2 + $0x258] sm:$0xf] %v340_v18  ;;  %v342_v19 = vld [vmem:[%s19598_s4 + $0x26c] sm:$0xf] }
  0x63   :  { %v344_v20 = vld [vmem:[%s19598_s4 + $0x230] sm:$0xf]  ;;  %343 = vst [vmem:[#allocation2 + $0x25c] sm:$0xf] %v342_v19  ;;  %v348_v22 = vld [vmem:[%s19598_s4 + $0x234] sm:$0xf] }
  0x64   :  { %v346_v21 = vld [vmem:[%s19598_s4 + $0x270] sm:$0xf]  ;;  %345 = vst [vmem:[#allocation2 + $0x260] sm:$0xf] %v344_v20  ;;  %v350_v23 = vld [vmem:[%s19598_s4 + $0x274] sm:$0xf] }
  0x65   :  { %347 = vst [vmem:[#allocation2 + $0x264] sm:$0xf] %v346_v21  ;;  %v352_v24 = vld [vmem:[%s19598_s4 + $0x238] sm:$0xf]  ;;  %349 = vst [vmem:[#allocation2 + $0x268] sm:$0xf] %v348_v22 }
  0x66   :  { %351 = vst [vmem:[#allocation2 + $0x26c] sm:$0xf] %v350_v23  ;;  %353 = vst [vmem:[#allocation2 + $0x270] sm:$0xf] %v352_v24  ;;  %v354_v25 = vld [vmem:[%s19598_s4 + $0x278] sm:$0xf] }
  0x67   :  { %v356_v26 = vld [vmem:[%s19598_s4 + $0x23c] sm:$0xf]  ;;  %355 = vst [vmem:[#allocation2 + $0x274] sm:$0xf] %v354_v25  ;;  %359 = vst [vmem:[#allocation2 + $0x27c] sm:$0xff] %v358_v27  }
  0x68   :  { %357 = vst [vmem:[#allocation2 + $0x278] sm:$0xf] %v356_v26  ;;  %v362_v28 = vld [vmem:[%s19598_s4 + $0x2c0] sm:$0xf]  ;;  %v364_v29 = vld [vmem:[%s19598_s4 + $0x284] sm:$0xf] }
  0x69   :  { %v366_v30 = vld [vmem:[%s19598_s4 + $0x2c4] sm:$0xf]  ;;  %363 = vst [vmem:[#allocation2 + $0x284] sm:$0xf] %v362_v28  ;;  %365 = vst [vmem:[#allocation2 + $0x288] sm:$0xf] %v364_v29 }
  0x6a   :  { %367 = vst [vmem:[#allocation2 + $0x28c] sm:$0xf] %v366_v30  ;;  %v368_v31 = vld [vmem:[%s19598_s4 + $0x288] sm:$0xf]  ;;  %v372_v33 = vld [vmem:[%s19598_s4 + $0x28c] sm:$0xf] }
  0x6b   :  { %v370_v32 = vld [vmem:[%s19598_s4 + $0x2c8] sm:$0xf]  ;;  %369 = vst [vmem:[#allocation2 + $0x290] sm:$0xf] %v368_v31  ;;  %373 = vst [vmem:[#allocation2 + $0x298] sm:$0xf] %v372_v33 }
  0x6c   :  { %371 = vst [vmem:[#allocation2 + $0x294] sm:$0xf] %v370_v32  ;;  %v374_v34 = vld [vmem:[%s19598_s4 + $0x2cc] sm:$0xf]  ;;  %v376_v35 = vld [vmem:[%s19598_s4 + $0x290] sm:$0xf] }
  0x6d   :  { %v378_v36 = vld [vmem:[%s19598_s4 + $0x2d0] sm:$0xf]  ;;  %375 = vst [vmem:[#allocation2 + $0x29c] sm:$0xf] %v374_v34  ;;  %377 = vst [vmem:[#allocation2 + $0x2a0] sm:$0xf] %v376_v35 }
  0x6e   :  { %379 = vst [vmem:[#allocation2 + $0x2a4] sm:$0xf] %v378_v36  ;;  %v380_v37 = vld [vmem:[%s19598_s4 + $0x294] sm:$0xf]  ;;  %v384_v39 = vld [vmem:[%s19598_s4 + $0x298] sm:$0xf] }
  0x6f   :  { %v382_v38 = vld [vmem:[%s19598_s4 + $0x2d4] sm:$0xf]  ;;  %381 = vst [vmem:[#allocation2 + $0x2a8] sm:$0xf] %v380_v37  ;;  %385 = vst [vmem:[#allocation2 + $0x2b0] sm:$0xf] %v384_v39 }
  0x70   :  { %383 = vst [vmem:[#allocation2 + $0x2ac] sm:$0xf] %v382_v38  ;;  %v386_v40 = vld [vmem:[%s19598_s4 + $0x2d8] sm:$0xf]  ;;  %v388_v41 = vld [vmem:[%s19598_s4 + $0x29c] sm:$0xf] }
  0x71   :  { %v390_v42 = vld [vmem:[%s19598_s4 + $0x2dc] sm:$0xf]  ;;  %387 = vst [vmem:[#allocation2 + $0x2b4] sm:$0xf] %v386_v40  ;;  %389 = vst [vmem:[#allocation2 + $0x2b8] sm:$0xf] %v388_v41 }
  0x72   :  { %391 = vst [vmem:[#allocation2 + $0x2bc] sm:$0xf] %v390_v42  ;;  %v392_v43 = vld [vmem:[%s19598_s4 + $0x2a0] sm:$0xf]  ;;  %v396_v45 = vld [vmem:[%s19598_s4 + $0x2a4] sm:$0xf] }
  0x73   :  { %v394_v44 = vld [vmem:[%s19598_s4 + $0x2e0] sm:$0xf]  ;;  %393 = vst [vmem:[#allocation2 + $0x2c0] sm:$0xf] %v392_v43  ;;  %397 = vst [vmem:[#allocation2 + $0x2c8] sm:$0xf] %v396_v45 }
  0x74   :  { %395 = vst [vmem:[#allocation2 + $0x2c4] sm:$0xf] %v394_v44  ;;  %v398_v46 = vld [vmem:[%s19598_s4 + $0x2e4] sm:$0xf]  ;;  %v400_v47 = vld [vmem:[%s19598_s4 + $0x2a8] sm:$0xf] }
  0x75   :  { %v402_v48 = vld [vmem:[%s19598_s4 + $0x2e8] sm:$0xf]  ;;  %399 = vst [vmem:[#allocation2 + $0x2cc] sm:$0xf] %v398_v46  ;;  %401 = vst [vmem:[#allocation2 + $0x2d0] sm:$0xf] %v400_v47 }
  0x76   :  { %403 = vst [vmem:[#allocation2 + $0x2d4] sm:$0xf] %v402_v48  ;;  %v404_v49 = vld [vmem:[%s19598_s4 + $0x2ac] sm:$0xf]  ;;  %v408_v51 = vld [vmem:[%s19598_s4 + $0x2b0] sm:$0xf] }
  0x77   :  { %v406_v50 = vld [vmem:[%s19598_s4 + $0x2ec] sm:$0xf]  ;;  %405 = vst [vmem:[#allocation2 + $0x2d8] sm:$0xf] %v404_v49  ;;  %409 = vst [vmem:[#allocation2 + $0x2e0] sm:$0xf] %v408_v51 }
  0x78   :  { %407 = vst [vmem:[#allocation2 + $0x2dc] sm:$0xf] %v406_v50  ;;  %v410_v52 = vld [vmem:[%s19598_s4 + $0x2f0] sm:$0xf]  ;;  %v412_v53 = vld [vmem:[%s19598_s4 + $0x2b4] sm:$0xf] }
  0x79   :  { %v414_v54 = vld [vmem:[%s19598_s4 + $0x2f4] sm:$0xf]  ;;  %411 = vst [vmem:[#allocation2 + $0x2e4] sm:$0xf] %v410_v52  ;;  %413 = vst [vmem:[#allocation2 + $0x2e8] sm:$0xf] %v412_v53 }
  0x7a   :  { %415 = vst [vmem:[#allocation2 + $0x2ec] sm:$0xf] %v414_v54  ;;  %v416_v55 = vld [vmem:[%s19598_s4 + $0x2b8] sm:$0xf]  ;;  %v420_v57 = vld [vmem:[%s19598_s4 + $0x2bc] sm:$0xf] }
  0x7b   :  { %v418_v56 = vld [vmem:[%s19598_s4 + $0x2f8] sm:$0xf]  ;;  %417 = vst [vmem:[#allocation2 + $0x2f0] sm:$0xf] %v416_v55  ;;  %421 = vst [vmem:[#allocation2 + $0x2f8] sm:$0xf] %v420_v57 }
  0x7c   :  { %419 = vst [vmem:[#allocation2 + $0x2f4] sm:$0xf] %v418_v56  ;;  %v422_v58 = vld [vmem:[%s19598_s4 + $0x2fc] sm:$0xff]   ;;  %v428_v60 = vld [vmem:[%s19598_s4 + $0x304] sm:$0xf] }
  0x7d   :  { %v426_v59 = vld [vmem:[%s19598_s4 + $0x340] sm:$0xf]  ;;  %423 = vst [vmem:[#allocation2 + $0x2fc] sm:$0xff] %v422_v58   ;;  %429 = vst [vmem:[#allocation2 + $0x308] sm:$0xf] %v428_v60 }
  0x7e   :  { %427 = vst [vmem:[#allocation2 + $0x304] sm:$0xf] %v426_v59  ;;  %v430_v61 = vld [vmem:[%s19598_s4 + $0x344] sm:$0xf]  ;;  %v432_v62 = vld [vmem:[%s19598_s4 + $0x308] sm:$0xf] }
  0x7f   :  { %v434_v63 = vld [vmem:[%s19598_s4 + $0x348] sm:$0xf]  ;;  %431 = vst [vmem:[#allocation2 + $0x30c] sm:$0xf] %v430_v61  ;;  %433 = vst [vmem:[#allocation2 + $0x310] sm:$0xf] %v432_v62 }
  0x80   :  { %435 = vst [vmem:[#allocation2 + $0x314] sm:$0xf] %v434_v63  ;;  %v436_v0 = vld [vmem:[%s19598_s4 + $0x30c] sm:$0xf]  ;;  %v440_v2 = vld [vmem:[%s19598_s4 + $0x310] sm:$0xf] }
  0x81   :  { %v438_v1 = vld [vmem:[%s19598_s4 + $0x34c] sm:$0xf]  ;;  %437 = vst [vmem:[#allocation2 + $0x318] sm:$0xf] %v436_v0  ;;  %441 = vst [vmem:[#allocation2 + $0x320] sm:$0xf] %v440_v2 }
  0x82   :  { %439 = vst [vmem:[#allocation2 + $0x31c] sm:$0xf] %v438_v1  ;;  %v442_v3 = vld [vmem:[%s19598_s4 + $0x350] sm:$0xf]  ;;  %v444_v4 = vld [vmem:[%s19598_s4 + $0x314] sm:$0xf] }
  0x83   :  { %v446_v5 = vld [vmem:[%s19598_s4 + $0x354] sm:$0xf]  ;;  %443 = vst [vmem:[#allocation2 + $0x324] sm:$0xf] %v442_v3  ;;  %445 = vst [vmem:[#allocation2 + $0x328] sm:$0xf] %v444_v4 }
  0x84   :  { %447 = vst [vmem:[#allocation2 + $0x32c] sm:$0xf] %v446_v5  ;;  %v448_v6 = vld [vmem:[%s19598_s4 + $0x318] sm:$0xf]  ;;  %v452_v8 = vld [vmem:[%s19598_s4 + $0x31c] sm:$0xf] }
  0x85   :  { %v450_v7 = vld [vmem:[%s19598_s4 + $0x358] sm:$0xf]  ;;  %449 = vst [vmem:[#allocation2 + $0x330] sm:$0xf] %v448_v6  ;;  %453 = vst [vmem:[#allocation2 + $0x338] sm:$0xf] %v452_v8 }
  0x86   :  { %451 = vst [vmem:[#allocation2 + $0x334] sm:$0xf] %v450_v7  ;;  %v454_v9 = vld [vmem:[%s19598_s4 + $0x35c] sm:$0xf]  ;;  %v456_v10 = vld [vmem:[%s19598_s4 + $0x320] sm:$0xf] }
  0x87   :  { %v458_v11 = vld [vmem:[%s19598_s4 + $0x360] sm:$0xf]  ;;  %455 = vst [vmem:[#allocation2 + $0x33c] sm:$0xf] %v454_v9  ;;  %457 = vst [vmem:[#allocation2 + $0x340] sm:$0xf] %v456_v10 }
  0x88   :  { %459 = vst [vmem:[#allocation2 + $0x344] sm:$0xf] %v458_v11  ;;  %v460_v12 = vld [vmem:[%s19598_s4 + $0x324] sm:$0xf]  ;;  %v464_v14 = vld [vmem:[%s19598_s4 + $0x328] sm:$0xf] }
  0x89   :  { %v462_v13 = vld [vmem:[%s19598_s4 + $0x364] sm:$0xf]  ;;  %461 = vst [vmem:[#allocation2 + $0x348] sm:$0xf] %v460_v12  ;;  %465 = vst [vmem:[#allocation2 + $0x350] sm:$0xf] %v464_v14 }
  0x8a   :  { %463 = vst [vmem:[#allocation2 + $0x34c] sm:$0xf] %v462_v13  ;;  %v466_v15 = vld [vmem:[%s19598_s4 + $0x368] sm:$0xf]  ;;  %v468_v16 = vld [vmem:[%s19598_s4 + $0x32c] sm:$0xf] }
  0x8b   :  { %v470_v17 = vld [vmem:[%s19598_s4 + $0x36c] sm:$0xf]  ;;  %467 = vst [vmem:[#allocation2 + $0x354] sm:$0xf] %v466_v15  ;;  %469 = vst [vmem:[#allocation2 + $0x358] sm:$0xf] %v468_v16 }
  0x8c   :  { %471 = vst [vmem:[#allocation2 + $0x35c] sm:$0xf] %v470_v17  ;;  %v472_v18 = vld [vmem:[%s19598_s4 + $0x330] sm:$0xf]  ;;  %v476_v20 = vld [vmem:[%s19598_s4 + $0x334] sm:$0xf] }
  0x8d   :  { %v474_v19 = vld [vmem:[%s19598_s4 + $0x370] sm:$0xf]  ;;  %473 = vst [vmem:[#allocation2 + $0x360] sm:$0xf] %v472_v18  ;;  %477 = vst [vmem:[#allocation2 + $0x368] sm:$0xf] %v476_v20 }
  0x8e   :  { %475 = vst [vmem:[#allocation2 + $0x364] sm:$0xf] %v474_v19  ;;  %v478_v21 = vld [vmem:[%s19598_s4 + $0x374] sm:$0xf]  ;;  %v480_v22 = vld [vmem:[%s19598_s4 + $0x338] sm:$0xf] }
  0x8f   :  { %v482_v23 = vld [vmem:[%s19598_s4 + $0x378] sm:$0xf]  ;;  %479 = vst [vmem:[#allocation2 + $0x36c] sm:$0xf] %v478_v21  ;;  %481 = vst [vmem:[#allocation2 + $0x370] sm:$0xf] %v480_v22 }
  0x90   :  { %483 = vst [vmem:[#allocation2 + $0x374] sm:$0xf] %v482_v23  ;;  %v484_v24 = vld [vmem:[%s19598_s4 + $0x33c] sm:$0xf]  ;;  %v490_v26 = vld [vmem:[%s19598_s4 + $0x3c0] sm:$0xf] }
  0x91   :  { %v486_v25 = vld [vmem:[%s19598_s4 + $0x37c] sm:$0xff]   ;;  %485 = vst [vmem:[#allocation2 + $0x378] sm:$0xf] %v484_v24  ;;  %491 = vst [vmem:[#allocation2 + $0x384] sm:$0xf] %v490_v26 }
  0x92   :  { %487 = vst [vmem:[#allocation2 + $0x37c] sm:$0xff] %v486_v25   ;;  %v492_v27 = vld [vmem:[%s19598_s4 + $0x384] sm:$0xf]  ;;  %v496_v29 = vld [vmem:[%s19598_s4 + $0x388] sm:$0xf]  ;;  %v550_v56 = vld [vmem:[%s19598_s4 + $0x3fc] sm:$0xff]  }
  0x93   :  { %v494_v28 = vld [vmem:[%s19598_s4 + $0x3c4] sm:$0xf]  ;;  %493 = vst [vmem:[#allocation2 + $0x388] sm:$0xf] %v492_v27  ;;  %497 = vst [vmem:[#allocation2 + $0x390] sm:$0xf] %v496_v29 }
  0x94   :  { %495 = vst [vmem:[#allocation2 + $0x38c] sm:$0xf] %v494_v28  ;;  %v498_v30 = vld [vmem:[%s19598_s4 + $0x3c8] sm:$0xf]  ;;  %v500_v31 = vld [vmem:[%s19598_s4 + $0x38c] sm:$0xf] }
  0x95   :  { %v502_v32 = vld [vmem:[%s19598_s4 + $0x3cc] sm:$0xf]  ;;  %499 = vst [vmem:[#allocation2 + $0x394] sm:$0xf] %v498_v30  ;;  %501 = vst [vmem:[#allocation2 + $0x398] sm:$0xf] %v500_v31 }
  0x96   :  { %503 = vst [vmem:[#allocation2 + $0x39c] sm:$0xf] %v502_v32  ;;  %v504_v33 = vld [vmem:[%s19598_s4 + $0x390] sm:$0xf]  ;;  %v508_v35 = vld [vmem:[%s19598_s4 + $0x394] sm:$0xf] }
  0x97   :  { %v506_v34 = vld [vmem:[%s19598_s4 + $0x3d0] sm:$0xf]  ;;  %505 = vst [vmem:[#allocation2 + $0x3a0] sm:$0xf] %v504_v33  ;;  %509 = vst [vmem:[#allocation2 + $0x3a8] sm:$0xf] %v508_v35 }
  0x98   :  { %507 = vst [vmem:[#allocation2 + $0x3a4] sm:$0xf] %v506_v34  ;;  %v510_v36 = vld [vmem:[%s19598_s4 + $0x3d4] sm:$0xf]  ;;  %v512_v37 = vld [vmem:[%s19598_s4 + $0x398] sm:$0xf] }
  0x99   :  { %v514_v38 = vld [vmem:[%s19598_s4 + $0x3d8] sm:$0xf]  ;;  %511 = vst [vmem:[#allocation2 + $0x3ac] sm:$0xf] %v510_v36  ;;  %513 = vst [vmem:[#allocation2 + $0x3b0] sm:$0xf] %v512_v37 }
  0x9a   :  { %515 = vst [vmem:[#allocation2 + $0x3b4] sm:$0xf] %v514_v38  ;;  %v516_v39 = vld [vmem:[%s19598_s4 + $0x39c] sm:$0xf]  ;;  %v520_v41 = vld [vmem:[%s19598_s4 + $0x3a0] sm:$0xf] }
  0x9b   :  { %v518_v40 = vld [vmem:[%s19598_s4 + $0x3dc] sm:$0xf]  ;;  %517 = vst [vmem:[#allocation2 + $0x3b8] sm:$0xf] %v516_v39  ;;  %521 = vst [vmem:[#allocation2 + $0x3c0] sm:$0xf] %v520_v41 }
  0x9c   :  { %519 = vst [vmem:[#allocation2 + $0x3bc] sm:$0xf] %v518_v40  ;;  %v522_v42 = vld [vmem:[%s19598_s4 + $0x3e0] sm:$0xf]  ;;  %v524_v43 = vld [vmem:[%s19598_s4 + $0x3a4] sm:$0xf] }
  0x9d   :  { %v526_v44 = vld [vmem:[%s19598_s4 + $0x3e4] sm:$0xf]  ;;  %523 = vst [vmem:[#allocation2 + $0x3c4] sm:$0xf] %v522_v42  ;;  %525 = vst [vmem:[#allocation2 + $0x3c8] sm:$0xf] %v524_v43 }
  0x9e   :  { %527 = vst [vmem:[#allocation2 + $0x3cc] sm:$0xf] %v526_v44  ;;  %v528_v45 = vld [vmem:[%s19598_s4 + $0x3a8] sm:$0xf]  ;;  %v532_v47 = vld [vmem:[%s19598_s4 + $0x3ac] sm:$0xf] }
  0x9f   :  { %v530_v46 = vld [vmem:[%s19598_s4 + $0x3e8] sm:$0xf]  ;;  %529 = vst [vmem:[#allocation2 + $0x3d0] sm:$0xf] %v528_v45  ;;  %533 = vst [vmem:[#allocation2 + $0x3d8] sm:$0xf] %v532_v47 }
  0xa0   :  { %531 = vst [vmem:[#allocation2 + $0x3d4] sm:$0xf] %v530_v46  ;;  %v534_v48 = vld [vmem:[%s19598_s4 + $0x3ec] sm:$0xf]  ;;  %v536_v49 = vld [vmem:[%s19598_s4 + $0x3b0] sm:$0xf] }
  0xa1   :  { %v538_v50 = vld [vmem:[%s19598_s4 + $0x3f0] sm:$0xf]  ;;  %535 = vst [vmem:[#allocation2 + $0x3dc] sm:$0xf] %v534_v48  ;;  %537 = vst [vmem:[#allocation2 + $0x3e0] sm:$0xf] %v536_v49 }
  0xa2   :  { %539 = vst [vmem:[#allocation2 + $0x3e4] sm:$0xf] %v538_v50  ;;  %v540_v51 = vld [vmem:[%s19598_s4 + $0x3b4] sm:$0xf]  ;;  %v544_v53 = vld [vmem:[%s19598_s4 + $0x3b8] sm:$0xf] }
  0xa3   :  { %v542_v52 = vld [vmem:[%s19598_s4 + $0x3f4] sm:$0xf]  ;;  %541 = vst [vmem:[#allocation2 + $0x3e8] sm:$0xf] %v540_v51  ;;  %545 = vst [vmem:[#allocation2 + $0x3f0] sm:$0xf] %v544_v53 }
  0xa4   :  { %543 = vst [vmem:[#allocation2 + $0x3ec] sm:$0xf] %v542_v52  ;;  %v546_v54 = vld [vmem:[%s19598_s4 + $0x3f8] sm:$0xf]  ;;  %v548_v55 = vld [vmem:[%s19598_s4 + $0x3bc] sm:$0xf] }
  0xa5   :  { %547 = vst [vmem:[#allocation2 + $0x3f4] sm:$0xf] %v546_v54  ;;  %549 = vst [vmem:[#allocation2 + $0x3f8] sm:$0xf] %v548_v55  ;;  %v554_v57 = vld [vmem:[%s19598_s4 + $0x440] sm:$0xf] }
  0xa6   :  { %551 = vst [vmem:[#allocation2 + $0x3fc] sm:$0xff] %v550_v56   ;;  %v556_v58 = vld [vmem:[%s19598_s4 + $0x404] sm:$0xf]  ;;  %555 = vst [vmem:[#allocation2 + $0x404] sm:$0xf] %v554_v57  ;;  %v614_v23 = vld [vmem:[%s19598_s4 + $0x47c] sm:$0xff]  }
  0xa7   :  { %v558_v59 = vld [vmem:[%s19598_s4 + $0x444] sm:$0xf]  ;;  %557 = vst [vmem:[#allocation2 + $0x408] sm:$0xf] %v556_v58  ;;  %v560_v60 = vld [vmem:[%s19598_s4 + $0x408] sm:$0xf] }
  0xa8   :  { %559 = vst [vmem:[#allocation2 + $0x40c] sm:$0xf] %v558_v59  ;;  %v562_v61 = vld [vmem:[%s19598_s4 + $0x448] sm:$0xf]  ;;  %v564_v62 = vld [vmem:[%s19598_s4 + $0x40c] sm:$0xf] }
  0xa9   :  { %561 = vst [vmem:[#allocation2 + $0x410] sm:$0xf] %v560_v60  ;;  %563 = vst [vmem:[#allocation2 + $0x414] sm:$0xf] %v562_v61  ;;  %v566_v63 = vld [vmem:[%s19598_s4 + $0x44c] sm:$0xf] }
  0xaa   :  { %565 = vst [vmem:[#allocation2 + $0x418] sm:$0xf] %v564_v62  ;;  %v568_v0 = vld [vmem:[%s19598_s4 + $0x410] sm:$0xf]  ;;  %567 = vst [vmem:[#allocation2 + $0x41c] sm:$0xf] %v566_v63 }
  0xab   :  { %v570_v1 = vld [vmem:[%s19598_s4 + $0x450] sm:$0xf]  ;;  %569 = vst [vmem:[#allocation2 + $0x420] sm:$0xf] %v568_v0  ;;  %v572_v2 = vld [vmem:[%s19598_s4 + $0x414] sm:$0xf] }
  0xac   :  { %571 = vst [vmem:[#allocation2 + $0x424] sm:$0xf] %v570_v1  ;;  %v574_v3 = vld [vmem:[%s19598_s4 + $0x454] sm:$0xf]  ;;  %v576_v4 = vld [vmem:[%s19598_s4 + $0x418] sm:$0xf] }
  0xad   :  { %573 = vst [vmem:[#allocation2 + $0x428] sm:$0xf] %v572_v2  ;;  %575 = vst [vmem:[#allocation2 + $0x42c] sm:$0xf] %v574_v3  ;;  %v578_v5 = vld [vmem:[%s19598_s4 + $0x458] sm:$0xf] }
  0xae   :  { %577 = vst [vmem:[#allocation2 + $0x430] sm:$0xf] %v576_v4  ;;  %v580_v6 = vld [vmem:[%s19598_s4 + $0x41c] sm:$0xf]  ;;  %579 = vst [vmem:[#allocation2 + $0x434] sm:$0xf] %v578_v5 }
  0xaf   :  { %v582_v7 = vld [vmem:[%s19598_s4 + $0x45c] sm:$0xf]  ;;  %581 = vst [vmem:[#allocation2 + $0x438] sm:$0xf] %v580_v6  ;;  %v584_v8 = vld [vmem:[%s19598_s4 + $0x420] sm:$0xf] }
  0xb0   :  { %583 = vst [vmem:[#allocation2 + $0x43c] sm:$0xf] %v582_v7  ;;  %v586_v9 = vld [vmem:[%s19598_s4 + $0x460] sm:$0xf]  ;;  %v588_v10 = vld [vmem:[%s19598_s4 + $0x424] sm:$0xf] }
  0xb1   :  { %585 = vst [vmem:[#allocation2 + $0x440] sm:$0xf] %v584_v8  ;;  %587 = vst [vmem:[#allocation2 + $0x444] sm:$0xf] %v586_v9  ;;  %v590_v11 = vld [vmem:[%s19598_s4 + $0x464] sm:$0xf] }
  0xb2   :  { %589 = vst [vmem:[#allocation2 + $0x448] sm:$0xf] %v588_v10  ;;  %v592_v12 = vld [vmem:[%s19598_s4 + $0x428] sm:$0xf]  ;;  %591 = vst [vmem:[#allocation2 + $0x44c] sm:$0xf] %v590_v11 }
  0xb3   :  { %v594_v13 = vld [vmem:[%s19598_s4 + $0x468] sm:$0xf]  ;;  %593 = vst [vmem:[#allocation2 + $0x450] sm:$0xf] %v592_v12  ;;  %v596_v14 = vld [vmem:[%s19598_s4 + $0x42c] sm:$0xf] }
  0xb4   :  { %595 = vst [vmem:[#allocation2 + $0x454] sm:$0xf] %v594_v13  ;;  %v598_v15 = vld [vmem:[%s19598_s4 + $0x46c] sm:$0xf]  ;;  %v600_v16 = vld [vmem:[%s19598_s4 + $0x430] sm:$0xf] }
  0xb5   :  { %597 = vst [vmem:[#allocation2 + $0x458] sm:$0xf] %v596_v14  ;;  %599 = vst [vmem:[#allocation2 + $0x45c] sm:$0xf] %v598_v15  ;;  %v602_v17 = vld [vmem:[%s19598_s4 + $0x470] sm:$0xf] }
  0xb6   :  { %601 = vst [vmem:[#allocation2 + $0x460] sm:$0xf] %v600_v16  ;;  %v604_v18 = vld [vmem:[%s19598_s4 + $0x434] sm:$0xf]  ;;  %603 = vst [vmem:[#allocation2 + $0x464] sm:$0xf] %v602_v17 }
  0xb7   :  { %v606_v19 = vld [vmem:[%s19598_s4 + $0x474] sm:$0xf]  ;;  %605 = vst [vmem:[#allocation2 + $0x468] sm:$0xf] %v604_v18  ;;  %v608_v20 = vld [vmem:[%s19598_s4 + $0x438] sm:$0xf] }
  0xb8   :  { %607 = vst [vmem:[#allocation2 + $0x46c] sm:$0xf] %v606_v19  ;;  %v610_v21 = vld [vmem:[%s19598_s4 + $0x478] sm:$0xf]  ;;  %v612_v22 = vld [vmem:[%s19598_s4 + $0x43c] sm:$0xf] }
  0xb9   :  { %609 = vst [vmem:[#allocation2 + $0x470] sm:$0xf] %v608_v20  ;;  %611 = vst [vmem:[#allocation2 + $0x474] sm:$0xf] %v610_v21  ;;  %v618_v24 = vld [vmem:[%s19598_s4 + $0x4c0] sm:$0xf] }
  0xba   :  { %613 = vst [vmem:[#allocation2 + $0x478] sm:$0xf] %v612_v22  ;;  %v620_v25 = vld [vmem:[%s19598_s4 + $0x484] sm:$0xf]  ;;  %615 = vst [vmem:[#allocation2 + $0x47c] sm:$0xff] %v614_v23   ;;  %v678_v54 = vld [vmem:[%s19598_s4 + $0x4fc] sm:$0xff]  }
  0xbb   :  { %619 = vst [vmem:[#allocation2 + $0x484] sm:$0xf] %v618_v24  ;;  %621 = vst [vmem:[#allocation2 + $0x488] sm:$0xf] %v620_v25  ;;  %v622_v26 = vld [vmem:[%s19598_s4 + $0x4c4] sm:$0xf] }
  0xbc   :  { %v624_v27 = vld [vmem:[%s19598_s4 + $0x488] sm:$0xf]  ;;  %623 = vst [vmem:[#allocation2 + $0x48c] sm:$0xf] %v622_v26  ;;  %v628_v29 = vld [vmem:[%s19598_s4 + $0x48c] sm:$0xf] }
  0xbd   :  { %v626_v28 = vld [vmem:[%s19598_s4 + $0x4c8] sm:$0xf]  ;;  %625 = vst [vmem:[#allocation2 + $0x490] sm:$0xf] %v624_v27  ;;  %v630_v30 = vld [vmem:[%s19598_s4 + $0x4cc] sm:$0xf] }
  0xbe   :  { %627 = vst [vmem:[#allocation2 + $0x494] sm:$0xf] %v626_v28  ;;  %v632_v31 = vld [vmem:[%s19598_s4 + $0x490] sm:$0xf]  ;;  %629 = vst [vmem:[#allocation2 + $0x498] sm:$0xf] %v628_v29 }
  0xbf   :  { %631 = vst [vmem:[#allocation2 + $0x49c] sm:$0xf] %v630_v30  ;;  %633 = vst [vmem:[#allocation2 + $0x4a0] sm:$0xf] %v632_v31  ;;  %v634_v32 = vld [vmem:[%s19598_s4 + $0x4d0] sm:$0xf] }
  0xc0   :  { %v636_v33 = vld [vmem:[%s19598_s4 + $0x494] sm:$0xf]  ;;  %635 = vst [vmem:[#allocation2 + $0x4a4] sm:$0xf] %v634_v32  ;;  %v640_v35 = vld [vmem:[%s19598_s4 + $0x498] sm:$0xf] }
  0xc1   :  { %v638_v34 = vld [vmem:[%s19598_s4 + $0x4d4] sm:$0xf]  ;;  %637 = vst [vmem:[#allocation2 + $0x4a8] sm:$0xf] %v636_v33  ;;  %v642_v36 = vld [vmem:[%s19598_s4 + $0x4d8] sm:$0xf] }
  0xc2   :  { %639 = vst [vmem:[#allocation2 + $0x4ac] sm:$0xf] %v638_v34  ;;  %v644_v37 = vld [vmem:[%s19598_s4 + $0x49c] sm:$0xf]  ;;  %641 = vst [vmem:[#allocation2 + $0x4b0] sm:$0xf] %v640_v35 }
  0xc3   :  { %643 = vst [vmem:[#allocation2 + $0x4b4] sm:$0xf] %v642_v36  ;;  %645 = vst [vmem:[#allocation2 + $0x4b8] sm:$0xf] %v644_v37  ;;  %v646_v38 = vld [vmem:[%s19598_s4 + $0x4dc] sm:$0xf] }
  0xc4   :  { %v648_v39 = vld [vmem:[%s19598_s4 + $0x4a0] sm:$0xf]  ;;  %647 = vst [vmem:[#allocation2 + $0x4bc] sm:$0xf] %v646_v38  ;;  %v652_v41 = vld [vmem:[%s19598_s4 + $0x4a4] sm:$0xf] }
  0xc5   :  { %v650_v40 = vld [vmem:[%s19598_s4 + $0x4e0] sm:$0xf]  ;;  %649 = vst [vmem:[#allocation2 + $0x4c0] sm:$0xf] %v648_v39  ;;  %v654_v42 = vld [vmem:[%s19598_s4 + $0x4e4] sm:$0xf] }
  0xc6   :  { %651 = vst [vmem:[#allocation2 + $0x4c4] sm:$0xf] %v650_v40  ;;  %v656_v43 = vld [vmem:[%s19598_s4 + $0x4a8] sm:$0xf]  ;;  %653 = vst [vmem:[#allocation2 + $0x4c8] sm:$0xf] %v652_v41 }
  0xc7   :  { %655 = vst [vmem:[#allocation2 + $0x4cc] sm:$0xf] %v654_v42  ;;  %657 = vst [vmem:[#allocation2 + $0x4d0] sm:$0xf] %v656_v43  ;;  %v658_v44 = vld [vmem:[%s19598_s4 + $0x4e8] sm:$0xf] }
  0xc8   :  { %v660_v45 = vld [vmem:[%s19598_s4 + $0x4ac] sm:$0xf]  ;;  %659 = vst [vmem:[#allocation2 + $0x4d4] sm:$0xf] %v658_v44  ;;  %v664_v47 = vld [vmem:[%s19598_s4 + $0x4b0] sm:$0xf] }
  0xc9   :  { %v662_v46 = vld [vmem:[%s19598_s4 + $0x4ec] sm:$0xf]  ;;  %661 = vst [vmem:[#allocation2 + $0x4d8] sm:$0xf] %v660_v45  ;;  %v666_v48 = vld [vmem:[%s19598_s4 + $0x4f0] sm:$0xf] }
  0xca   :  { %663 = vst [vmem:[#allocation2 + $0x4dc] sm:$0xf] %v662_v46  ;;  %v668_v49 = vld [vmem:[%s19598_s4 + $0x4b4] sm:$0xf]  ;;  %665 = vst [vmem:[#allocation2 + $0x4e0] sm:$0xf] %v664_v47 }
  0xcb   :  { %667 = vst [vmem:[#allocation2 + $0x4e4] sm:$0xf] %v666_v48  ;;  %669 = vst [vmem:[#allocation2 + $0x4e8] sm:$0xf] %v668_v49  ;;  %v670_v50 = vld [vmem:[%s19598_s4 + $0x4f4] sm:$0xf] }
  0xcc   :  { %v672_v51 = vld [vmem:[%s19598_s4 + $0x4b8] sm:$0xf]  ;;  %671 = vst [vmem:[#allocation2 + $0x4ec] sm:$0xf] %v670_v50  ;;  %v676_v53 = vld [vmem:[%s19598_s4 + $0x4bc] sm:$0xf] }
  0xcd   :  { %v674_v52 = vld [vmem:[%s19598_s4 + $0x4f8] sm:$0xf]  ;;  %673 = vst [vmem:[#allocation2 + $0x4f0] sm:$0xf] %v672_v51  ;;  %v682_v55 = vld [vmem:[%s19598_s4 + $0x540] sm:$0xf] }
  0xce   :  { %675 = vst [vmem:[#allocation2 + $0x4f4] sm:$0xf] %v674_v52  ;;  %677 = vst [vmem:[#allocation2 + $0x4f8] sm:$0xf] %v676_v53  ;;  %v684_v56 = vld [vmem:[%s19598_s4 + $0x504] sm:$0xf] }
  0xcf   :  { %679 = vst [vmem:[#allocation2 + $0x4fc] sm:$0xff] %v678_v54   ;;  %683 = vst [vmem:[#allocation2 + $0x504] sm:$0xf] %v682_v55  ;;  %v686_v57 = vld [vmem:[%s19598_s4 + $0x544] sm:$0xf]  ;;  %v742_v21 = vld [vmem:[%s19598_s4 + $0x57c] sm:$0xff]  }
  0xd0   :  { %v688_v58 = vld [vmem:[%s19598_s4 + $0x508] sm:$0xf]  ;;  %685 = vst [vmem:[#allocation2 + $0x508] sm:$0xf] %v684_v56  ;;  %687 = vst [vmem:[#allocation2 + $0x50c] sm:$0xf] %v686_v57 }
  0xd1   :  { %689 = vst [vmem:[#allocation2 + $0x510] sm:$0xf] %v688_v58  ;;  %v690_v59 = vld [vmem:[%s19598_s4 + $0x548] sm:$0xf]  ;;  %v692_v60 = vld [vmem:[%s19598_s4 + $0x50c] sm:$0xf] }
  0xd2   :  { %v694_v61 = vld [vmem:[%s19598_s4 + $0x54c] sm:$0xf]  ;;  %691 = vst [vmem:[#allocation2 + $0x514] sm:$0xf] %v690_v59  ;;  %693 = vst [vmem:[#allocation2 + $0x518] sm:$0xf] %v692_v60 }
  0xd3   :  { %695 = vst [vmem:[#allocation2 + $0x51c] sm:$0xf] %v694_v61  ;;  %v696_v62 = vld [vmem:[%s19598_s4 + $0x510] sm:$0xf]  ;;  %v700_v0 = vld [vmem:[%s19598_s4 + $0x514] sm:$0xf] }
  0xd4   :  { %v698_v63 = vld [vmem:[%s19598_s4 + $0x550] sm:$0xf]  ;;  %697 = vst [vmem:[#allocation2 + $0x520] sm:$0xf] %v696_v62  ;;  %701 = vst [vmem:[#allocation2 + $0x528] sm:$0xf] %v700_v0 }
  0xd5   :  { %699 = vst [vmem:[#allocation2 + $0x524] sm:$0xf] %v698_v63  ;;  %v702_v1 = vld [vmem:[%s19598_s4 + $0x554] sm:$0xf]  ;;  %v704_v2 = vld [vmem:[%s19598_s4 + $0x518] sm:$0xf] }
  0xd6   :  { %v706_v3 = vld [vmem:[%s19598_s4 + $0x558] sm:$0xf]  ;;  %703 = vst [vmem:[#allocation2 + $0x52c] sm:$0xf] %v702_v1  ;;  %705 = vst [vmem:[#allocation2 + $0x530] sm:$0xf] %v704_v2 }
  0xd7   :  { %707 = vst [vmem:[#allocation2 + $0x534] sm:$0xf] %v706_v3  ;;  %v708_v4 = vld [vmem:[%s19598_s4 + $0x51c] sm:$0xf]  ;;  %v712_v6 = vld [vmem:[%s19598_s4 + $0x520] sm:$0xf] }
  0xd8   :  { %v710_v5 = vld [vmem:[%s19598_s4 + $0x55c] sm:$0xf]  ;;  %709 = vst [vmem:[#allocation2 + $0x538] sm:$0xf] %v708_v4  ;;  %713 = vst [vmem:[#allocation2 + $0x540] sm:$0xf] %v712_v6 }
  0xd9   :  { %711 = vst [vmem:[#allocation2 + $0x53c] sm:$0xf] %v710_v5  ;;  %v714_v7 = vld [vmem:[%s19598_s4 + $0x560] sm:$0xf]  ;;  %v716_v8 = vld [vmem:[%s19598_s4 + $0x524] sm:$0xf] }
  0xda   :  { %v718_v9 = vld [vmem:[%s19598_s4 + $0x564] sm:$0xf]  ;;  %715 = vst [vmem:[#allocation2 + $0x544] sm:$0xf] %v714_v7  ;;  %717 = vst [vmem:[#allocation2 + $0x548] sm:$0xf] %v716_v8 }
  0xdb   :  { %719 = vst [vmem:[#allocation2 + $0x54c] sm:$0xf] %v718_v9  ;;  %v720_v10 = vld [vmem:[%s19598_s4 + $0x528] sm:$0xf]  ;;  %v724_v12 = vld [vmem:[%s19598_s4 + $0x52c] sm:$0xf] }
  0xdc   :  { %v722_v11 = vld [vmem:[%s19598_s4 + $0x568] sm:$0xf]  ;;  %721 = vst [vmem:[#allocation2 + $0x550] sm:$0xf] %v720_v10  ;;  %725 = vst [vmem:[#allocation2 + $0x558] sm:$0xf] %v724_v12 }
  0xdd   :  { %723 = vst [vmem:[#allocation2 + $0x554] sm:$0xf] %v722_v11  ;;  %v726_v13 = vld [vmem:[%s19598_s4 + $0x56c] sm:$0xf]  ;;  %v728_v14 = vld [vmem:[%s19598_s4 + $0x530] sm:$0xf] }
  0xde   :  { %v730_v15 = vld [vmem:[%s19598_s4 + $0x570] sm:$0xf]  ;;  %727 = vst [vmem:[#allocation2 + $0x55c] sm:$0xf] %v726_v13  ;;  %729 = vst [vmem:[#allocation2 + $0x560] sm:$0xf] %v728_v14 }
  0xdf   :  { %731 = vst [vmem:[#allocation2 + $0x564] sm:$0xf] %v730_v15  ;;  %v732_v16 = vld [vmem:[%s19598_s4 + $0x534] sm:$0xf]  ;;  %v736_v18 = vld [vmem:[%s19598_s4 + $0x538] sm:$0xf] }
  0xe0   :  { %v734_v17 = vld [vmem:[%s19598_s4 + $0x574] sm:$0xf]  ;;  %733 = vst [vmem:[#allocation2 + $0x568] sm:$0xf] %v732_v16  ;;  %737 = vst [vmem:[#allocation2 + $0x570] sm:$0xf] %v736_v18 }
  0xe1   :  { %735 = vst [vmem:[#allocation2 + $0x56c] sm:$0xf] %v734_v17  ;;  %v738_v19 = vld [vmem:[%s19598_s4 + $0x578] sm:$0xf]  ;;  %v740_v20 = vld [vmem:[%s19598_s4 + $0x53c] sm:$0xf] }
  0xe2   :  { %739 = vst [vmem:[#allocation2 + $0x574] sm:$0xf] %v738_v19  ;;  %741 = vst [vmem:[#allocation2 + $0x578] sm:$0xf] %v740_v20  ;;  %v746_v22 = vld [vmem:[%s19598_s4 + $0x5c0] sm:$0xf] }
  0xe3   :  { %743 = vst [vmem:[#allocation2 + $0x57c] sm:$0xff] %v742_v21   ;;  %v748_v23 = vld [vmem:[%s19598_s4 + $0x584] sm:$0xf]  ;;  %747 = vst [vmem:[#allocation2 + $0x584] sm:$0xf] %v746_v22  ;;  %v806_v52 = vld [vmem:[%s19598_s4 + $0x5fc] sm:$0xff]  }
  0xe4   :  { %v750_v24 = vld [vmem:[%s19598_s4 + $0x5c4] sm:$0xf]  ;;  %749 = vst [vmem:[#allocation2 + $0x588] sm:$0xf] %v748_v23  ;;  %v752_v25 = vld [vmem:[%s19598_s4 + $0x588] sm:$0xf] }
  0xe5   :  { %751 = vst [vmem:[#allocation2 + $0x58c] sm:$0xf] %v750_v24  ;;  %v754_v26 = vld [vmem:[%s19598_s4 + $0x5c8] sm:$0xf]  ;;  %v756_v27 = vld [vmem:[%s19598_s4 + $0x58c] sm:$0xf] }
  0xe6   :  { %753 = vst [vmem:[#allocation2 + $0x590] sm:$0xf] %v752_v25  ;;  %755 = vst [vmem:[#allocation2 + $0x594] sm:$0xf] %v754_v26  ;;  %v758_v28 = vld [vmem:[%s19598_s4 + $0x5cc] sm:$0xf] }
  0xe7   :  { %757 = vst [vmem:[#allocation2 + $0x598] sm:$0xf] %v756_v27  ;;  %v760_v29 = vld [vmem:[%s19598_s4 + $0x590] sm:$0xf]  ;;  %759 = vst [vmem:[#allocation2 + $0x59c] sm:$0xf] %v758_v28 }
  0xe8   :  { %v762_v30 = vld [vmem:[%s19598_s4 + $0x5d0] sm:$0xf]  ;;  %761 = vst [vmem:[#allocation2 + $0x5a0] sm:$0xf] %v760_v29  ;;  %v764_v31 = vld [vmem:[%s19598_s4 + $0x594] sm:$0xf] }
  0xe9   :  { %763 = vst [vmem:[#allocation2 + $0x5a4] sm:$0xf] %v762_v30  ;;  %v766_v32 = vld [vmem:[%s19598_s4 + $0x5d4] sm:$0xf]  ;;  %v768_v33 = vld [vmem:[%s19598_s4 + $0x598] sm:$0xf] }
  0xea   :  { %765 = vst [vmem:[#allocation2 + $0x5a8] sm:$0xf] %v764_v31  ;;  %767 = vst [vmem:[#allocation2 + $0x5ac] sm:$0xf] %v766_v32  ;;  %v770_v34 = vld [vmem:[%s19598_s4 + $0x5d8] sm:$0xf] }
  0xeb   :  { %769 = vst [vmem:[#allocation2 + $0x5b0] sm:$0xf] %v768_v33  ;;  %v772_v35 = vld [vmem:[%s19598_s4 + $0x59c] sm:$0xf]  ;;  %771 = vst [vmem:[#allocation2 + $0x5b4] sm:$0xf] %v770_v34 }
  0xec   :  { %v774_v36 = vld [vmem:[%s19598_s4 + $0x5dc] sm:$0xf]  ;;  %773 = vst [vmem:[#allocation2 + $0x5b8] sm:$0xf] %v772_v35  ;;  %v776_v37 = vld [vmem:[%s19598_s4 + $0x5a0] sm:$0xf] }
  0xed   :  { %775 = vst [vmem:[#allocation2 + $0x5bc] sm:$0xf] %v774_v36  ;;  %v778_v38 = vld [vmem:[%s19598_s4 + $0x5e0] sm:$0xf]  ;;  %v780_v39 = vld [vmem:[%s19598_s4 + $0x5a4] sm:$0xf] }
  0xee   :  { %777 = vst [vmem:[#allocation2 + $0x5c0] sm:$0xf] %v776_v37  ;;  %779 = vst [vmem:[#allocation2 + $0x5c4] sm:$0xf] %v778_v38  ;;  %v782_v40 = vld [vmem:[%s19598_s4 + $0x5e4] sm:$0xf] }
  0xef   :  { %781 = vst [vmem:[#allocation2 + $0x5c8] sm:$0xf] %v780_v39  ;;  %v784_v41 = vld [vmem:[%s19598_s4 + $0x5a8] sm:$0xf]  ;;  %783 = vst [vmem:[#allocation2 + $0x5cc] sm:$0xf] %v782_v40 }
  0xf0   :  { %v786_v42 = vld [vmem:[%s19598_s4 + $0x5e8] sm:$0xf]  ;;  %785 = vst [vmem:[#allocation2 + $0x5d0] sm:$0xf] %v784_v41  ;;  %v788_v43 = vld [vmem:[%s19598_s4 + $0x5ac] sm:$0xf] }
  0xf1   :  { %787 = vst [vmem:[#allocation2 + $0x5d4] sm:$0xf] %v786_v42  ;;  %v790_v44 = vld [vmem:[%s19598_s4 + $0x5ec] sm:$0xf]  ;;  %v792_v45 = vld [vmem:[%s19598_s4 + $0x5b0] sm:$0xf] }
  0xf2   :  { %789 = vst [vmem:[#allocation2 + $0x5d8] sm:$0xf] %v788_v43  ;;  %791 = vst [vmem:[#allocation2 + $0x5dc] sm:$0xf] %v790_v44  ;;  %v794_v46 = vld [vmem:[%s19598_s4 + $0x5f0] sm:$0xf] }
  0xf3   :  { %793 = vst [vmem:[#allocation2 + $0x5e0] sm:$0xf] %v792_v45  ;;  %v796_v47 = vld [vmem:[%s19598_s4 + $0x5b4] sm:$0xf]  ;;  %795 = vst [vmem:[#allocation2 + $0x5e4] sm:$0xf] %v794_v46 }
  0xf4   :  { %v798_v48 = vld [vmem:[%s19598_s4 + $0x5f4] sm:$0xf]  ;;  %797 = vst [vmem:[#allocation2 + $0x5e8] sm:$0xf] %v796_v47  ;;  %v800_v49 = vld [vmem:[%s19598_s4 + $0x5b8] sm:$0xf] }
  0xf5   :  { %799 = vst [vmem:[#allocation2 + $0x5ec] sm:$0xf] %v798_v48  ;;  %v802_v50 = vld [vmem:[%s19598_s4 + $0x5f8] sm:$0xf]  ;;  %v804_v51 = vld [vmem:[%s19598_s4 + $0x5bc] sm:$0xf] }
  0xf6   :  { %801 = vst [vmem:[#allocation2 + $0x5f0] sm:$0xf] %v800_v49  ;;  %803 = vst [vmem:[#allocation2 + $0x5f4] sm:$0xf] %v802_v50  ;;  %v810_v53 = vld [vmem:[%s19598_s4 + $0x640] sm:$0xf] }
  0xf7   :  { %805 = vst [vmem:[#allocation2 + $0x5f8] sm:$0xf] %v804_v51  ;;  %v812_v54 = vld [vmem:[%s19598_s4 + $0x604] sm:$0xf]  ;;  %807 = vst [vmem:[#allocation2 + $0x5fc] sm:$0xff] %v806_v52   ;;  %v870_v19 = vld [vmem:[%s19598_s4 + $0x67c] sm:$0xff]  }
  0xf8   :  { %811 = vst [vmem:[#allocation2 + $0x604] sm:$0xf] %v810_v53  ;;  %813 = vst [vmem:[#allocation2 + $0x608] sm:$0xf] %v812_v54  ;;  %v814_v55 = vld [vmem:[%s19598_s4 + $0x644] sm:$0xf] }
  0xf9   :  { %v816_v56 = vld [vmem:[%s19598_s4 + $0x608] sm:$0xf]  ;;  %815 = vst [vmem:[#allocation2 + $0x60c] sm:$0xf] %v814_v55  ;;  %v820_v58 = vld [vmem:[%s19598_s4 + $0x60c] sm:$0xf] }
  0xfa   :  { %v818_v57 = vld [vmem:[%s19598_s4 + $0x648] sm:$0xf]  ;;  %817 = vst [vmem:[#allocation2 + $0x610] sm:$0xf] %v816_v56  ;;  %v822_v59 = vld [vmem:[%s19598_s4 + $0x64c] sm:$0xf] }
  0xfb   :  { %819 = vst [vmem:[#allocation2 + $0x614] sm:$0xf] %v818_v57  ;;  %v824_v60 = vld [vmem:[%s19598_s4 + $0x610] sm:$0xf]  ;;  %821 = vst [vmem:[#allocation2 + $0x618] sm:$0xf] %v820_v58 }
  0xfc   :  { %823 = vst [vmem:[#allocation2 + $0x61c] sm:$0xf] %v822_v59  ;;  %825 = vst [vmem:[#allocation2 + $0x620] sm:$0xf] %v824_v60  ;;  %v826_v61 = vld [vmem:[%s19598_s4 + $0x650] sm:$0xf] }
  0xfd   :  { %v828_v62 = vld [vmem:[%s19598_s4 + $0x614] sm:$0xf]  ;;  %827 = vst [vmem:[#allocation2 + $0x624] sm:$0xf] %v826_v61  ;;  %v832_v0 = vld [vmem:[%s19598_s4 + $0x618] sm:$0xf] }
  0xfe   :  { %v830_v63 = vld [vmem:[%s19598_s4 + $0x654] sm:$0xf]  ;;  %829 = vst [vmem:[#allocation2 + $0x628] sm:$0xf] %v828_v62  ;;  %v834_v1 = vld [vmem:[%s19598_s4 + $0x658] sm:$0xf] }
  0xff   :  { %831 = vst [vmem:[#allocation2 + $0x62c] sm:$0xf] %v830_v63  ;;  %v836_v2 = vld [vmem:[%s19598_s4 + $0x61c] sm:$0xf]  ;;  %833 = vst [vmem:[#allocation2 + $0x630] sm:$0xf] %v832_v0 }
 0x100   :  { %835 = vst [vmem:[#allocation2 + $0x634] sm:$0xf] %v834_v1  ;;  %837 = vst [vmem:[#allocation2 + $0x638] sm:$0xf] %v836_v2  ;;  %v838_v3 = vld [vmem:[%s19598_s4 + $0x65c] sm:$0xf] }
 0x101   :  { %v840_v4 = vld [vmem:[%s19598_s4 + $0x620] sm:$0xf]  ;;  %839 = vst [vmem:[#allocation2 + $0x63c] sm:$0xf] %v838_v3  ;;  %v844_v6 = vld [vmem:[%s19598_s4 + $0x624] sm:$0xf] }
 0x102   :  { %v842_v5 = vld [vmem:[%s19598_s4 + $0x660] sm:$0xf]  ;;  %841 = vst [vmem:[#allocation2 + $0x640] sm:$0xf] %v840_v4  ;;  %v846_v7 = vld [vmem:[%s19598_s4 + $0x664] sm:$0xf] }
 0x103   :  { %843 = vst [vmem:[#allocation2 + $0x644] sm:$0xf] %v842_v5  ;;  %v848_v8 = vld [vmem:[%s19598_s4 + $0x628] sm:$0xf]  ;;  %845 = vst [vmem:[#allocation2 + $0x648] sm:$0xf] %v844_v6 }
 0x104   :  { %847 = vst [vmem:[#allocation2 + $0x64c] sm:$0xf] %v846_v7  ;;  %849 = vst [vmem:[#allocation2 + $0x650] sm:$0xf] %v848_v8  ;;  %v850_v9 = vld [vmem:[%s19598_s4 + $0x668] sm:$0xf] }
 0x105   :  { %v852_v10 = vld [vmem:[%s19598_s4 + $0x62c] sm:$0xf]  ;;  %851 = vst [vmem:[#allocation2 + $0x654] sm:$0xf] %v850_v9  ;;  %v856_v12 = vld [vmem:[%s19598_s4 + $0x630] sm:$0xf] }
 0x106   :  { %v854_v11 = vld [vmem:[%s19598_s4 + $0x66c] sm:$0xf]  ;;  %853 = vst [vmem:[#allocation2 + $0x658] sm:$0xf] %v852_v10  ;;  %v858_v13 = vld [vmem:[%s19598_s4 + $0x670] sm:$0xf] }
 0x107   :  { %855 = vst [vmem:[#allocation2 + $0x65c] sm:$0xf] %v854_v11  ;;  %v860_v14 = vld [vmem:[%s19598_s4 + $0x634] sm:$0xf]  ;;  %857 = vst [vmem:[#allocation2 + $0x660] sm:$0xf] %v856_v12 }
 0x108   :  { %859 = vst [vmem:[#allocation2 + $0x664] sm:$0xf] %v858_v13  ;;  %861 = vst [vmem:[#allocation2 + $0x668] sm:$0xf] %v860_v14  ;;  %v862_v15 = vld [vmem:[%s19598_s4 + $0x674] sm:$0xf] }
 0x109   :  { %v864_v16 = vld [vmem:[%s19598_s4 + $0x638] sm:$0xf]  ;;  %863 = vst [vmem:[#allocation2 + $0x66c] sm:$0xf] %v862_v15  ;;  %v868_v18 = vld [vmem:[%s19598_s4 + $0x63c] sm:$0xf] }
 0x10a   :  { %v866_v17 = vld [vmem:[%s19598_s4 + $0x678] sm:$0xf]  ;;  %865 = vst [vmem:[#allocation2 + $0x670] sm:$0xf] %v864_v16  ;;  %v874_v20 = vld [vmem:[%s19598_s4 + $0x6c0] sm:$0xf] }
 0x10b   :  { %867 = vst [vmem:[#allocation2 + $0x674] sm:$0xf] %v866_v17  ;;  %869 = vst [vmem:[#allocation2 + $0x678] sm:$0xf] %v868_v18  ;;  %v876_v21 = vld [vmem:[%s19598_s4 + $0x684] sm:$0xf] }
 0x10c   :  { %871 = vst [vmem:[#allocation2 + $0x67c] sm:$0xff] %v870_v19   ;;  %875 = vst [vmem:[#allocation2 + $0x684] sm:$0xf] %v874_v20  ;;  %v878_v22 = vld [vmem:[%s19598_s4 + $0x6c4] sm:$0xf]  ;;  %v934_v50 = vld [vmem:[%s19598_s4 + $0x6fc] sm:$0xff]  }
 0x10d   :  { %v880_v23 = vld [vmem:[%s19598_s4 + $0x688] sm:$0xf]  ;;  %877 = vst [vmem:[#allocation2 + $0x688] sm:$0xf] %v876_v21  ;;  %879 = vst [vmem:[#allocation2 + $0x68c] sm:$0xf] %v878_v22 }
 0x10e   :  { %881 = vst [vmem:[#allocation2 + $0x690] sm:$0xf] %v880_v23  ;;  %v882_v24 = vld [vmem:[%s19598_s4 + $0x6c8] sm:$0xf]  ;;  %v884_v25 = vld [vmem:[%s19598_s4 + $0x68c] sm:$0xf] }
 0x10f   :  { %v886_v26 = vld [vmem:[%s19598_s4 + $0x6cc] sm:$0xf]  ;;  %883 = vst [vmem:[#allocation2 + $0x694] sm:$0xf] %v882_v24  ;;  %885 = vst [vmem:[#allocation2 + $0x698] sm:$0xf] %v884_v25 }
 0x110   :  { %887 = vst [vmem:[#allocation2 + $0x69c] sm:$0xf] %v886_v26  ;;  %v888_v27 = vld [vmem:[%s19598_s4 + $0x690] sm:$0xf]  ;;  %v892_v29 = vld [vmem:[%s19598_s4 + $0x694] sm:$0xf] }
 0x111   :  { %v890_v28 = vld [vmem:[%s19598_s4 + $0x6d0] sm:$0xf]  ;;  %889 = vst [vmem:[#allocation2 + $0x6a0] sm:$0xf] %v888_v27  ;;  %893 = vst [vmem:[#allocation2 + $0x6a8] sm:$0xf] %v892_v29 }
 0x112   :  { %891 = vst [vmem:[#allocation2 + $0x6a4] sm:$0xf] %v890_v28  ;;  %v894_v30 = vld [vmem:[%s19598_s4 + $0x6d4] sm:$0xf]  ;;  %v896_v31 = vld [vmem:[%s19598_s4 + $0x698] sm:$0xf] }
 0x113   :  { %v898_v32 = vld [vmem:[%s19598_s4 + $0x6d8] sm:$0xf]  ;;  %895 = vst [vmem:[#allocation2 + $0x6ac] sm:$0xf] %v894_v30  ;;  %897 = vst [vmem:[#allocation2 + $0x6b0] sm:$0xf] %v896_v31 }
 0x114   :  { %899 = vst [vmem:[#allocation2 + $0x6b4] sm:$0xf] %v898_v32  ;;  %v900_v33 = vld [vmem:[%s19598_s4 + $0x69c] sm:$0xf]  ;;  %v904_v35 = vld [vmem:[%s19598_s4 + $0x6a0] sm:$0xf] }
 0x115   :  { %v902_v34 = vld [vmem:[%s19598_s4 + $0x6dc] sm:$0xf]  ;;  %901 = vst [vmem:[#allocation2 + $0x6b8] sm:$0xf] %v900_v33  ;;  %905 = vst [vmem:[#allocation2 + $0x6c0] sm:$0xf] %v904_v35 }
 0x116   :  { %903 = vst [vmem:[#allocation2 + $0x6bc] sm:$0xf] %v902_v34  ;;  %v906_v36 = vld [vmem:[%s19598_s4 + $0x6e0] sm:$0xf]  ;;  %v908_v37 = vld [vmem:[%s19598_s4 + $0x6a4] sm:$0xf] }
 0x117   :  { %v910_v38 = vld [vmem:[%s19598_s4 + $0x6e4] sm:$0xf]  ;;  %907 = vst [vmem:[#allocation2 + $0x6c4] sm:$0xf] %v906_v36  ;;  %909 = vst [vmem:[#allocation2 + $0x6c8] sm:$0xf] %v908_v37 }
 0x118   :  { %911 = vst [vmem:[#allocation2 + $0x6cc] sm:$0xf] %v910_v38  ;;  %v912_v39 = vld [vmem:[%s19598_s4 + $0x6a8] sm:$0xf]  ;;  %v916_v41 = vld [vmem:[%s19598_s4 + $0x6ac] sm:$0xf] }
 0x119   :  { %v914_v40 = vld [vmem:[%s19598_s4 + $0x6e8] sm:$0xf]  ;;  %913 = vst [vmem:[#allocation2 + $0x6d0] sm:$0xf] %v912_v39  ;;  %917 = vst [vmem:[#allocation2 + $0x6d8] sm:$0xf] %v916_v41 }
 0x11a   :  { %915 = vst [vmem:[#allocation2 + $0x6d4] sm:$0xf] %v914_v40  ;;  %v918_v42 = vld [vmem:[%s19598_s4 + $0x6ec] sm:$0xf]  ;;  %v920_v43 = vld [vmem:[%s19598_s4 + $0x6b0] sm:$0xf] }
 0x11b   :  { %v922_v44 = vld [vmem:[%s19598_s4 + $0x6f0] sm:$0xf]  ;;  %919 = vst [vmem:[#allocation2 + $0x6dc] sm:$0xf] %v918_v42  ;;  %921 = vst [vmem:[#allocation2 + $0x6e0] sm:$0xf] %v920_v43 }
 0x11c   :  { %923 = vst [vmem:[#allocation2 + $0x6e4] sm:$0xf] %v922_v44  ;;  %v924_v45 = vld [vmem:[%s19598_s4 + $0x6b4] sm:$0xf]  ;;  %v928_v47 = vld [vmem:[%s19598_s4 + $0x6b8] sm:$0xf] }
 0x11d   :  { %v926_v46 = vld [vmem:[%s19598_s4 + $0x6f4] sm:$0xf]  ;;  %925 = vst [vmem:[#allocation2 + $0x6e8] sm:$0xf] %v924_v45  ;;  %929 = vst [vmem:[#allocation2 + $0x6f0] sm:$0xf] %v928_v47 }
 0x11e   :  { %927 = vst [vmem:[#allocation2 + $0x6ec] sm:$0xf] %v926_v46  ;;  %v930_v48 = vld [vmem:[%s19598_s4 + $0x6f8] sm:$0xf]  ;;  %v932_v49 = vld [vmem:[%s19598_s4 + $0x6bc] sm:$0xf] }
 0x11f   :  { %931 = vst [vmem:[#allocation2 + $0x6f4] sm:$0xf] %v930_v48  ;;  %933 = vst [vmem:[#allocation2 + $0x6f8] sm:$0xf] %v932_v49  ;;  %v938_v51 = vld [vmem:[%s19598_s4 + $0x740] sm:$0xf] }
 0x120   :  { %935 = vst [vmem:[#allocation2 + $0x6fc] sm:$0xff] %v934_v50   ;;  %v940_v52 = vld [vmem:[%s19598_s4 + $0x704] sm:$0xf]  ;;  %939 = vst [vmem:[#allocation2 + $0x704] sm:$0xf] %v938_v51  ;;  %v998_v17 = vld [vmem:[%s19598_s4 + $0x77c] sm:$0xff]  }
 0x121   :  { %v942_v53 = vld [vmem:[%s19598_s4 + $0x744] sm:$0xf]  ;;  %941 = vst [vmem:[#allocation2 + $0x708] sm:$0xf] %v940_v52  ;;  %v944_v54 = vld [vmem:[%s19598_s4 + $0x708] sm:$0xf] }
 0x122   :  { %943 = vst [vmem:[#allocation2 + $0x70c] sm:$0xf] %v942_v53  ;;  %v946_v55 = vld [vmem:[%s19598_s4 + $0x748] sm:$0xf]  ;;  %v948_v56 = vld [vmem:[%s19598_s4 + $0x70c] sm:$0xf] }
 0x123   :  { %945 = vst [vmem:[#allocation2 + $0x710] sm:$0xf] %v944_v54  ;;  %947 = vst [vmem:[#allocation2 + $0x714] sm:$0xf] %v946_v55  ;;  %v950_v57 = vld [vmem:[%s19598_s4 + $0x74c] sm:$0xf] }
 0x124   :  { %949 = vst [vmem:[#allocation2 + $0x718] sm:$0xf] %v948_v56  ;;  %v952_v58 = vld [vmem:[%s19598_s4 + $0x710] sm:$0xf]  ;;  %951 = vst [vmem:[#allocation2 + $0x71c] sm:$0xf] %v950_v57 }
 0x125   :  { %v954_v59 = vld [vmem:[%s19598_s4 + $0x750] sm:$0xf]  ;;  %953 = vst [vmem:[#allocation2 + $0x720] sm:$0xf] %v952_v58  ;;  %v956_v60 = vld [vmem:[%s19598_s4 + $0x714] sm:$0xf] }
 0x126   :  { %955 = vst [vmem:[#allocation2 + $0x724] sm:$0xf] %v954_v59  ;;  %v958_v61 = vld [vmem:[%s19598_s4 + $0x754] sm:$0xf]  ;;  %v960_v62 = vld [vmem:[%s19598_s4 + $0x718] sm:$0xf] }
 0x127   :  { %957 = vst [vmem:[#allocation2 + $0x728] sm:$0xf] %v956_v60  ;;  %959 = vst [vmem:[#allocation2 + $0x72c] sm:$0xf] %v958_v61  ;;  %v962_v63 = vld [vmem:[%s19598_s4 + $0x758] sm:$0xf] }
 0x128   :  { %961 = vst [vmem:[#allocation2 + $0x730] sm:$0xf] %v960_v62  ;;  %v964_v0 = vld [vmem:[%s19598_s4 + $0x71c] sm:$0xf]  ;;  %963 = vst [vmem:[#allocation2 + $0x734] sm:$0xf] %v962_v63 }
 0x129   :  { %v966_v1 = vld [vmem:[%s19598_s4 + $0x75c] sm:$0xf]  ;;  %965 = vst [vmem:[#allocation2 + $0x738] sm:$0xf] %v964_v0  ;;  %v968_v2 = vld [vmem:[%s19598_s4 + $0x720] sm:$0xf] }
 0x12a   :  { %967 = vst [vmem:[#allocation2 + $0x73c] sm:$0xf] %v966_v1  ;;  %v970_v3 = vld [vmem:[%s19598_s4 + $0x760] sm:$0xf]  ;;  %v972_v4 = vld [vmem:[%s19598_s4 + $0x724] sm:$0xf] }
 0x12b   :  { %969 = vst [vmem:[#allocation2 + $0x740] sm:$0xf] %v968_v2  ;;  %971 = vst [vmem:[#allocation2 + $0x744] sm:$0xf] %v970_v3  ;;  %v974_v5 = vld [vmem:[%s19598_s4 + $0x764] sm:$0xf] }
 0x12c   :  { %973 = vst [vmem:[#allocation2 + $0x748] sm:$0xf] %v972_v4  ;;  %v976_v6 = vld [vmem:[%s19598_s4 + $0x728] sm:$0xf]  ;;  %975 = vst [vmem:[#allocation2 + $0x74c] sm:$0xf] %v974_v5 }
 0x12d   :  { %v978_v7 = vld [vmem:[%s19598_s4 + $0x768] sm:$0xf]  ;;  %977 = vst [vmem:[#allocation2 + $0x750] sm:$0xf] %v976_v6  ;;  %v980_v8 = vld [vmem:[%s19598_s4 + $0x72c] sm:$0xf] }
 0x12e   :  { %979 = vst [vmem:[#allocation2 + $0x754] sm:$0xf] %v978_v7  ;;  %v982_v9 = vld [vmem:[%s19598_s4 + $0x76c] sm:$0xf]  ;;  %v984_v10 = vld [vmem:[%s19598_s4 + $0x730] sm:$0xf] }
 0x12f   :  { %981 = vst [vmem:[#allocation2 + $0x758] sm:$0xf] %v980_v8  ;;  %983 = vst [vmem:[#allocation2 + $0x75c] sm:$0xf] %v982_v9  ;;  %v986_v11 = vld [vmem:[%s19598_s4 + $0x770] sm:$0xf] }
 0x130   :  { %985 = vst [vmem:[#allocation2 + $0x760] sm:$0xf] %v984_v10  ;;  %v988_v12 = vld [vmem:[%s19598_s4 + $0x734] sm:$0xf]  ;;  %987 = vst [vmem:[#allocation2 + $0x764] sm:$0xf] %v986_v11 }
 0x131   :  { %v990_v13 = vld [vmem:[%s19598_s4 + $0x774] sm:$0xf]  ;;  %989 = vst [vmem:[#allocation2 + $0x768] sm:$0xf] %v988_v12  ;;  %v992_v14 = vld [vmem:[%s19598_s4 + $0x738] sm:$0xf] }
 0x132   :  { %991 = vst [vmem:[#allocation2 + $0x76c] sm:$0xf] %v990_v13  ;;  %v994_v15 = vld [vmem:[%s19598_s4 + $0x778] sm:$0xf]  ;;  %v996_v16 = vld [vmem:[%s19598_s4 + $0x73c] sm:$0xf] }
 0x133   :  { %993 = vst [vmem:[#allocation2 + $0x770] sm:$0xf] %v992_v14  ;;  %995 = vst [vmem:[#allocation2 + $0x774] sm:$0xf] %v994_v15  ;;  %v1002_v18 = vld [vmem:[%s19598_s4 + $0x7c0] sm:$0xf] }
 0x134   :  { %997 = vst [vmem:[#allocation2 + $0x778] sm:$0xf] %v996_v16  ;;  %v1004_v19 = vld [vmem:[%s19598_s4 + $0x784] sm:$0xf]  ;;  %999 = vst [vmem:[#allocation2 + $0x77c] sm:$0xff] %v998_v17  }
 0x135   :  { %1003 = vst [vmem:[#allocation2 + $0x784] sm:$0xf] %v1002_v18  ;;  %1005 = vst [vmem:[#allocation2 + $0x788] sm:$0xf] %v1004_v19  ;;  %v1006_v20 = vld [vmem:[%s19598_s4 + $0x7c4] sm:$0xf] }
 0x136   :  { %v1008_v21 = vld [vmem:[%s19598_s4 + $0x788] sm:$0xf]  ;;  %1007 = vst [vmem:[#allocation2 + $0x78c] sm:$0xf] %v1006_v20  ;;  %v1012_v23 = vld [vmem:[%s19598_s4 + $0x78c] sm:$0xf] }
 0x137   :  { %v1010_v22 = vld [vmem:[%s19598_s4 + $0x7c8] sm:$0xf]  ;;  %1009 = vst [vmem:[#allocation2 + $0x790] sm:$0xf] %v1008_v21  ;;  %v1014_v24 = vld [vmem:[%s19598_s4 + $0x7cc] sm:$0xf] }
 0x138   :  { %1011 = vst [vmem:[#allocation2 + $0x794] sm:$0xf] %v1010_v22  ;;  %v1016_v25 = vld [vmem:[%s19598_s4 + $0x790] sm:$0xf]  ;;  %1013 = vst [vmem:[#allocation2 + $0x798] sm:$0xf] %v1012_v23 }
 0x139   :  { %1015 = vst [vmem:[#allocation2 + $0x79c] sm:$0xf] %v1014_v24  ;;  %1017 = vst [vmem:[#allocation2 + $0x7a0] sm:$0xf] %v1016_v25  ;;  %v1018_v26 = vld [vmem:[%s19598_s4 + $0x7d0] sm:$0xf] }
 0x13a   :  { %v1020_v27 = vld [vmem:[%s19598_s4 + $0x794] sm:$0xf]  ;;  %1019 = vst [vmem:[#allocation2 + $0x7a4] sm:$0xf] %v1018_v26  ;;  %v1024_v29 = vld [vmem:[%s19598_s4 + $0x798] sm:$0xf] }
 0x13b   :  { %v1022_v28 = vld [vmem:[%s19598_s4 + $0x7d4] sm:$0xf]  ;;  %1021 = vst [vmem:[#allocation2 + $0x7a8] sm:$0xf] %v1020_v27  ;;  %v1026_v30 = vld [vmem:[%s19598_s4 + $0x7d8] sm:$0xf] }
 0x13c   :  { %1023 = vst [vmem:[#allocation2 + $0x7ac] sm:$0xf] %v1022_v28  ;;  %v1028_v31 = vld [vmem:[%s19598_s4 + $0x79c] sm:$0xf]  ;;  %1025 = vst [vmem:[#allocation2 + $0x7b0] sm:$0xf] %v1024_v29 }
 0x13d   :  { %1027 = vst [vmem:[#allocation2 + $0x7b4] sm:$0xf] %v1026_v30  ;;  %1029 = vst [vmem:[#allocation2 + $0x7b8] sm:$0xf] %v1028_v31  ;;  %v1030_v32 = vld [vmem:[%s19598_s4 + $0x7dc] sm:$0xf] }
 0x13e   :  { %v1032_v33 = vld [vmem:[%s19598_s4 + $0x7a0] sm:$0xf]  ;;  %1031 = vst [vmem:[#allocation2 + $0x7bc] sm:$0xf] %v1030_v32  ;;  %v1036_v35 = vld [vmem:[%s19598_s4 + $0x7a4] sm:$0xf] }
 0x13f   :  { %v1034_v34 = vld [vmem:[%s19598_s4 + $0x7e0] sm:$0xf]  ;;  %1033 = vst [vmem:[#allocation2 + $0x7c0] sm:$0xf] %v1032_v33  ;;  %v1038_v36 = vld [vmem:[%s19598_s4 + $0x7e4] sm:$0xf] }
 0x140   :  { %1035 = vst [vmem:[#allocation2 + $0x7c4] sm:$0xf] %v1034_v34  ;;  %v1040_v37 = vld [vmem:[%s19598_s4 + $0x7a8] sm:$0xf]  ;;  %1037 = vst [vmem:[#allocation2 + $0x7c8] sm:$0xf] %v1036_v35 }
 0x141   :  { %1039 = vst [vmem:[#allocation2 + $0x7cc] sm:$0xf] %v1038_v36  ;;  %1041 = vst [vmem:[#allocation2 + $0x7d0] sm:$0xf] %v1040_v37  ;;  %v1042_v38 = vld [vmem:[%s19598_s4 + $0x7e8] sm:$0xf] }
 0x142   :  { %v1044_v39 = vld [vmem:[%s19598_s4 + $0x7ac] sm:$0xf]  ;;  %1043 = vst [vmem:[#allocation2 + $0x7d4] sm:$0xf] %v1042_v38  ;;  %v1048_v41 = vld [vmem:[%s19598_s4 + $0x7b0] sm:$0xf] }
 0x143   :  { %v1046_v40 = vld [vmem:[%s19598_s4 + $0x7ec] sm:$0xf]  ;;  %1045 = vst [vmem:[#allocation2 + $0x7d8] sm:$0xf] %v1044_v39  ;;  %v1050_v42 = vld [vmem:[%s19598_s4 + $0x7f0] sm:$0xf] }
 0x144   :  { %1047 = vst [vmem:[#allocation2 + $0x7dc] sm:$0xf] %v1046_v40  ;;  %v1052_v43 = vld [vmem:[%s19598_s4 + $0x7b4] sm:$0xf]  ;;  %1049 = vst [vmem:[#allocation2 + $0x7e0] sm:$0xf] %v1048_v41 }
 0x145   :  { %1051 = vst [vmem:[#allocation2 + $0x7e4] sm:$0xf] %v1050_v42  ;;  %1053 = vst [vmem:[#allocation2 + $0x7e8] sm:$0xf] %v1052_v43  ;;  %v1054_v44 = vld [vmem:[%s19598_s4 + $0x7f4] sm:$0xf] }
 0x146   :  { %v1056_v45 = vld [vmem:[%s19598_s4 + $0x7b8] sm:$0xf]  ;;  %1055 = vst [vmem:[#allocation2 + $0x7ec] sm:$0xf] %v1054_v44  ;;  %v1060_v47 = vld [vmem:[%s19598_s4 + $0x7bc] sm:$0xf] }
 0x147   :  { %v1058_v46 = vld [vmem:[%s19598_s4 + $0x7f8] sm:$0xf]  ;;  %1057 = vst [vmem:[#allocation2 + $0x7f0] sm:$0xf] %v1056_v45  ;;  %v1062_v48 = vld [vmem:[%s19598_s4 + $0x7fc] sm:$0xf] }
 0x148   :  { %1059 = vst [vmem:[#allocation2 + $0x7f4] sm:$0xf] %v1058_v46  ;;  %1061 = vst [vmem:[#allocation2 + $0x7f8] sm:$0xf] %v1060_v47 }
 0x149   :  { %1063 = vst [vmem:[#allocation2 + $0x7fc] sm:$0xf] %v1062_v48 }
 0x14a   :  { %4199 = vsyncadd [#allocation4], 32768  ;;  %v4218_v49 = vld [vmem:[%s19599_s5] sm:$0xf]  ;;  %v4220_v50 = vld [vmem:[%s19599_s5 + $0x8] sm:$0xf] }
 0x14b   :  { %4219 = vst [vmem:[#allocation3] sm:$0xf] %v4218_v49  ;;  %4221 = vst [vmem:[#allocation3 + $0x4] sm:$0xf] %v4220_v50  ;;  %v4222_v51 = vld [vmem:[%s19599_s5 + $0x4] sm:$0xf] }
 0x14c   :  { %v4224_v52 = vld [vmem:[%s19599_s5 + $0xc] sm:$0xff]   ;;  %v4228_v53 = vld [vmem:[%s19599_s5 + $0x18] sm:$0xf]  ;;  %4223 = vst [vmem:[#allocation3 + $0x8] sm:$0xf] %v4222_v51  ;;  %v4232_v55 = vld [vmem:[%s19599_s5 + $0x1c] sm:$0xff]  }
 0x14d   :  { %4225 = vst [vmem:[#allocation3 + $0xc] sm:$0xff] %v4224_v52   ;;  %4229 = vst [vmem:[#allocation3 + $0x14] sm:$0xf] %v4228_v53  ;;  %v4230_v54 = vld [vmem:[%s19599_s5 + $0x14] sm:$0xf]  ;;  %v4240_v58 = vld [vmem:[%s19599_s5 + $0x2c] sm:$0xff]  }
 0x14e   :  { %v4236_v56 = vld [vmem:[%s19599_s5 + $0x28] sm:$0xf]  ;;  %4231 = vst [vmem:[#allocation3 + $0x18] sm:$0xf] %v4230_v54  ;;  %4233 = vst [vmem:[#allocation3 + $0x1c] sm:$0xff] %v4232_v55   ;;  %v4248_v61 = vld [vmem:[%s19599_s5 + $0x3c] sm:$0xff]  }
 0x14f   :  { %4237 = vst [vmem:[#allocation3 + $0x24] sm:$0xf] %v4236_v56  ;;  %v4238_v57 = vld [vmem:[%s19599_s5 + $0x24] sm:$0xf]  ;;  %v4244_v59 = vld [vmem:[%s19599_s5 + $0x38] sm:$0xf] }
 0x150   :  { %4239 = vst [vmem:[#allocation3 + $0x28] sm:$0xf] %v4238_v57  ;;  %4241 = vst [vmem:[#allocation3 + $0x2c] sm:$0xff] %v4240_v58   ;;  %v4246_v60 = vld [vmem:[%s19599_s5 + $0x34] sm:$0xf]  ;;  %v4256_v0 = vld [vmem:[%s19599_s5 + $0x4c] sm:$0xff]  }
 0x151   :  { %4245 = vst [vmem:[#allocation3 + $0x34] sm:$0xf] %v4244_v59  ;;  %v4252_v62 = vld [vmem:[%s19599_s5 + $0x48] sm:$0xf]  ;;  %4247 = vst [vmem:[#allocation3 + $0x38] sm:$0xf] %v4246_v60 }
 0x152   :  { %4249 = vst [vmem:[#allocation3 + $0x3c] sm:$0xff] %v4248_v61   ;;  %4253 = vst [vmem:[#allocation3 + $0x44] sm:$0xf] %v4252_v62  ;;  %v4254_v63 = vld [vmem:[%s19599_s5 + $0x44] sm:$0xf]  ;;  %v4264_v3 = vld [vmem:[%s19599_s5 + $0x5c] sm:$0xff]  }
 0x153   :  { %v4260_v1 = vld [vmem:[%s19599_s5 + $0x58] sm:$0xf]  ;;  %4255 = vst [vmem:[#allocation3 + $0x48] sm:$0xf] %v4254_v63  ;;  %4257 = vst [vmem:[#allocation3 + $0x4c] sm:$0xff] %v4256_v0   ;;  %v4272_v6 = vld [vmem:[%s19599_s5 + $0x6c] sm:$0xff]  }
 0x154   :  { %4261 = vst [vmem:[#allocation3 + $0x54] sm:$0xf] %v4260_v1  ;;  %v4262_v2 = vld [vmem:[%s19599_s5 + $0x54] sm:$0xf]  ;;  %v4268_v4 = vld [vmem:[%s19599_s5 + $0x68] sm:$0xf] }
 0x155   :  { %4263 = vst [vmem:[#allocation3 + $0x58] sm:$0xf] %v4262_v2  ;;  %4265 = vst [vmem:[#allocation3 + $0x5c] sm:$0xff] %v4264_v3   ;;  %v4270_v5 = vld [vmem:[%s19599_s5 + $0x64] sm:$0xf]  ;;  %v4280_v9 = vld [vmem:[%s19599_s5 + $0x7c] sm:$0xff]  }
 0x156   :  { %4269 = vst [vmem:[#allocation3 + $0x64] sm:$0xf] %v4268_v4  ;;  %v4276_v7 = vld [vmem:[%s19599_s5 + $0x78] sm:$0xf]  ;;  %4271 = vst [vmem:[#allocation3 + $0x68] sm:$0xf] %v4270_v5 }
 0x157   :  { %4273 = vst [vmem:[#allocation3 + $0x6c] sm:$0xff] %v4272_v6   ;;  %4277 = vst [vmem:[#allocation3 + $0x74] sm:$0xf] %v4276_v7  ;;  %v4278_v8 = vld [vmem:[%s19599_s5 + $0x74] sm:$0xf]  ;;  %v4288_v12 = vld [vmem:[%s19599_s5 + $0x8c] sm:$0xff]  }
 0x158   :  { %v4284_v10 = vld [vmem:[%s19599_s5 + $0x88] sm:$0xf]  ;;  %4279 = vst [vmem:[#allocation3 + $0x78] sm:$0xf] %v4278_v8  ;;  %4281 = vst [vmem:[#allocation3 + $0x7c] sm:$0xff] %v4280_v9   ;;  %v4296_v15 = vld [vmem:[%s19599_s5 + $0x9c] sm:$0xff]  }
 0x159   :  { %4285 = vst [vmem:[#allocation3 + $0x84] sm:$0xf] %v4284_v10  ;;  %v4286_v11 = vld [vmem:[%s19599_s5 + $0x84] sm:$0xf]  ;;  %v4292_v13 = vld [vmem:[%s19599_s5 + $0x98] sm:$0xf] }
 0x15a   :  { %4287 = vst [vmem:[#allocation3 + $0x88] sm:$0xf] %v4286_v11  ;;  %4289 = vst [vmem:[#allocation3 + $0x8c] sm:$0xff] %v4288_v12   ;;  %v4294_v14 = vld [vmem:[%s19599_s5 + $0x94] sm:$0xf]  ;;  %v4304_v18 = vld [vmem:[%s19599_s5 + $0xac] sm:$0xff]  }
 0x15b   :  { %4293 = vst [vmem:[#allocation3 + $0x94] sm:$0xf] %v4292_v13  ;;  %v4300_v16 = vld [vmem:[%s19599_s5 + $0xa8] sm:$0xf]  ;;  %4295 = vst [vmem:[#allocation3 + $0x98] sm:$0xf] %v4294_v14 }
 0x15c   :  { %4297 = vst [vmem:[#allocation3 + $0x9c] sm:$0xff] %v4296_v15   ;;  %4301 = vst [vmem:[#allocation3 + $0xa4] sm:$0xf] %v4300_v16  ;;  %v4302_v17 = vld [vmem:[%s19599_s5 + $0xa4] sm:$0xf]  ;;  %v4312_v21 = vld [vmem:[%s19599_s5 + $0xbc] sm:$0xff]  }
 0x15d   :  { %v4308_v19 = vld [vmem:[%s19599_s5 + $0xb8] sm:$0xf]  ;;  %4303 = vst [vmem:[#allocation3 + $0xa8] sm:$0xf] %v4302_v17  ;;  %4305 = vst [vmem:[#allocation3 + $0xac] sm:$0xff] %v4304_v18   ;;  %v4320_v24 = vld [vmem:[%s19599_s5 + $0xcc] sm:$0xff]  }
 0x15e   :  { %4309 = vst [vmem:[#allocation3 + $0xb4] sm:$0xf] %v4308_v19  ;;  %v4310_v20 = vld [vmem:[%s19599_s5 + $0xb4] sm:$0xf]  ;;  %v4316_v22 = vld [vmem:[%s19599_s5 + $0xc8] sm:$0xf] }
 0x15f   :  { %4311 = vst [vmem:[#allocation3 + $0xb8] sm:$0xf] %v4310_v20  ;;  %4313 = vst [vmem:[#allocation3 + $0xbc] sm:$0xff] %v4312_v21   ;;  %v4318_v23 = vld [vmem:[%s19599_s5 + $0xc4] sm:$0xf]  ;;  %v4328_v27 = vld [vmem:[%s19599_s5 + $0xdc] sm:$0xff]  }
 0x160   :  { %4317 = vst [vmem:[#allocation3 + $0xc4] sm:$0xf] %v4316_v22  ;;  %v4324_v25 = vld [vmem:[%s19599_s5 + $0xd8] sm:$0xf]  ;;  %4319 = vst [vmem:[#allocation3 + $0xc8] sm:$0xf] %v4318_v23 }
 0x161   :  { %4321 = vst [vmem:[#allocation3 + $0xcc] sm:$0xff] %v4320_v24   ;;  %4325 = vst [vmem:[#allocation3 + $0xd4] sm:$0xf] %v4324_v25  ;;  %v4326_v26 = vld [vmem:[%s19599_s5 + $0xd4] sm:$0xf]  ;;  %v4336_v30 = vld [vmem:[%s19599_s5 + $0xec] sm:$0xff]  }
 0x162   :  { %v4332_v28 = vld [vmem:[%s19599_s5 + $0xe8] sm:$0xf]  ;;  %4327 = vst [vmem:[#allocation3 + $0xd8] sm:$0xf] %v4326_v26  ;;  %4329 = vst [vmem:[#allocation3 + $0xdc] sm:$0xff] %v4328_v27   ;;  %v4344_v33 = vld [vmem:[%s19599_s5 + $0xfc] sm:$0xff]  }
 0x163   :  { %4333 = vst [vmem:[#allocation3 + $0xe4] sm:$0xf] %v4332_v28  ;;  %v4334_v29 = vld [vmem:[%s19599_s5 + $0xe4] sm:$0xf]  ;;  %v4340_v31 = vld [vmem:[%s19599_s5 + $0xf8] sm:$0xf] }
 0x164   :  { %4335 = vst [vmem:[#allocation3 + $0xe8] sm:$0xf] %v4334_v29  ;;  %4337 = vst [vmem:[#allocation3 + $0xec] sm:$0xff] %v4336_v30   ;;  %v4342_v32 = vld [vmem:[%s19599_s5 + $0xf4] sm:$0xf]  ;;  %v4352_v36 = vld [vmem:[%s19599_s5 + $0x10c] sm:$0xff]  }
 0x165   :  { %4341 = vst [vmem:[#allocation3 + $0xf4] sm:$0xf] %v4340_v31  ;;  %v4348_v34 = vld [vmem:[%s19599_s5 + $0x108] sm:$0xf]  ;;  %4343 = vst [vmem:[#allocation3 + $0xf8] sm:$0xf] %v4342_v32 }
 0x166   :  { %4345 = vst [vmem:[#allocation3 + $0xfc] sm:$0xff] %v4344_v33   ;;  %4349 = vst [vmem:[#allocation3 + $0x104] sm:$0xf] %v4348_v34  ;;  %v4350_v35 = vld [vmem:[%s19599_s5 + $0x104] sm:$0xf]  ;;  %v4360_v39 = vld [vmem:[%s19599_s5 + $0x11c] sm:$0xff]  }
 0x167   :  { %v4356_v37 = vld [vmem:[%s19599_s5 + $0x118] sm:$0xf]  ;;  %4351 = vst [vmem:[#allocation3 + $0x108] sm:$0xf] %v4350_v35  ;;  %4353 = vst [vmem:[#allocation3 + $0x10c] sm:$0xff] %v4352_v36   ;;  %v4368_v42 = vld [vmem:[%s19599_s5 + $0x12c] sm:$0xff]  }
 0x168   :  { %4357 = vst [vmem:[#allocation3 + $0x114] sm:$0xf] %v4356_v37  ;;  %v4358_v38 = vld [vmem:[%s19599_s5 + $0x114] sm:$0xf]  ;;  %v4364_v40 = vld [vmem:[%s19599_s5 + $0x128] sm:$0xf] }
 0x169   :  { %4359 = vst [vmem:[#allocation3 + $0x118] sm:$0xf] %v4358_v38  ;;  %4361 = vst [vmem:[#allocation3 + $0x11c] sm:$0xff] %v4360_v39   ;;  %v4366_v41 = vld [vmem:[%s19599_s5 + $0x124] sm:$0xf]  ;;  %v4376_v45 = vld [vmem:[%s19599_s5 + $0x13c] sm:$0xff]  }
 0x16a   :  { %4365 = vst [vmem:[#allocation3 + $0x124] sm:$0xf] %v4364_v40  ;;  %v4372_v43 = vld [vmem:[%s19599_s5 + $0x138] sm:$0xf]  ;;  %4367 = vst [vmem:[#allocation3 + $0x128] sm:$0xf] %v4366_v41 }
 0x16b   :  { %4369 = vst [vmem:[#allocation3 + $0x12c] sm:$0xff] %v4368_v42   ;;  %4373 = vst [vmem:[#allocation3 + $0x134] sm:$0xf] %v4372_v43  ;;  %v4374_v44 = vld [vmem:[%s19599_s5 + $0x134] sm:$0xf]  ;;  %v4384_v48 = vld [vmem:[%s19599_s5 + $0x14c] sm:$0xff]  }
 0x16c   :  { %v4380_v46 = vld [vmem:[%s19599_s5 + $0x148] sm:$0xf]  ;;  %4375 = vst [vmem:[#allocation3 + $0x138] sm:$0xf] %v4374_v44  ;;  %4377 = vst [vmem:[#allocation3 + $0x13c] sm:$0xff] %v4376_v45   ;;  %v4392_v51 = vld [vmem:[%s19599_s5 + $0x15c] sm:$0xff]  }
 0x16d   :  { %4381 = vst [vmem:[#allocation3 + $0x144] sm:$0xf] %v4380_v46  ;;  %v4382_v47 = vld [vmem:[%s19599_s5 + $0x144] sm:$0xf]  ;;  %v4388_v49 = vld [vmem:[%s19599_s5 + $0x158] sm:$0xf] }
 0x16e   :  { %4383 = vst [vmem:[#allocation3 + $0x148] sm:$0xf] %v4382_v47  ;;  %4385 = vst [vmem:[#allocation3 + $0x14c] sm:$0xff] %v4384_v48   ;;  %v4390_v50 = vld [vmem:[%s19599_s5 + $0x154] sm:$0xf]  ;;  %v4400_v54 = vld [vmem:[%s19599_s5 + $0x16c] sm:$0xff]  }
 0x16f   :  { %4389 = vst [vmem:[#allocation3 + $0x154] sm:$0xf] %v4388_v49  ;;  %v4396_v52 = vld [vmem:[%s19599_s5 + $0x168] sm:$0xf]  ;;  %4391 = vst [vmem:[#allocation3 + $0x158] sm:$0xf] %v4390_v50 }
 0x170   :  { %4393 = vst [vmem:[#allocation3 + $0x15c] sm:$0xff] %v4392_v51   ;;  %4397 = vst [vmem:[#allocation3 + $0x164] sm:$0xf] %v4396_v52  ;;  %v4398_v53 = vld [vmem:[%s19599_s5 + $0x164] sm:$0xf]  ;;  %v4408_v57 = vld [vmem:[%s19599_s5 + $0x17c] sm:$0xff]  }
 0x171   :  { %v4404_v55 = vld [vmem:[%s19599_s5 + $0x178] sm:$0xf]  ;;  %4399 = vst [vmem:[#allocation3 + $0x168] sm:$0xf] %v4398_v53  ;;  %4401 = vst [vmem:[#allocation3 + $0x16c] sm:$0xff] %v4400_v54   ;;  %v4416_v60 = vld [vmem:[%s19599_s5 + $0x18c] sm:$0xff]  }
 0x172   :  { %4405 = vst [vmem:[#allocation3 + $0x174] sm:$0xf] %v4404_v55  ;;  %v4406_v56 = vld [vmem:[%s19599_s5 + $0x174] sm:$0xf]  ;;  %v4412_v58 = vld [vmem:[%s19599_s5 + $0x188] sm:$0xf] }
 0x173   :  { %4407 = vst [vmem:[#allocation3 + $0x178] sm:$0xf] %v4406_v56  ;;  %4409 = vst [vmem:[#allocation3 + $0x17c] sm:$0xff] %v4408_v57   ;;  %v4414_v59 = vld [vmem:[%s19599_s5 + $0x184] sm:$0xf]  ;;  %v4424_v63 = vld [vmem:[%s19599_s5 + $0x19c] sm:$0xff]  }
 0x174   :  { %4413 = vst [vmem:[#allocation3 + $0x184] sm:$0xf] %v4412_v58  ;;  %v4420_v61 = vld [vmem:[%s19599_s5 + $0x198] sm:$0xf]  ;;  %4415 = vst [vmem:[#allocation3 + $0x188] sm:$0xf] %v4414_v59 }
 0x175   :  { %4417 = vst [vmem:[#allocation3 + $0x18c] sm:$0xff] %v4416_v60   ;;  %4421 = vst [vmem:[#allocation3 + $0x194] sm:$0xf] %v4420_v61  ;;  %v4422_v62 = vld [vmem:[%s19599_s5 + $0x194] sm:$0xf]  ;;  %v4432_v2 = vld [vmem:[%s19599_s5 + $0x1ac] sm:$0xff]  }
 0x176   :  { %v4428_v0 = vld [vmem:[%s19599_s5 + $0x1a8] sm:$0xf]  ;;  %4423 = vst [vmem:[#allocation3 + $0x198] sm:$0xf] %v4422_v62  ;;  %4425 = vst [vmem:[#allocation3 + $0x19c] sm:$0xff] %v4424_v63   ;;  %v4440_v5 = vld [vmem:[%s19599_s5 + $0x1bc] sm:$0xff]  }
 0x177   :  { %4429 = vst [vmem:[#allocation3 + $0x1a4] sm:$0xf] %v4428_v0  ;;  %v4430_v1 = vld [vmem:[%s19599_s5 + $0x1a4] sm:$0xf]  ;;  %v4436_v3 = vld [vmem:[%s19599_s5 + $0x1b8] sm:$0xf] }
 0x178   :  { %4431 = vst [vmem:[#allocation3 + $0x1a8] sm:$0xf] %v4430_v1  ;;  %4433 = vst [vmem:[#allocation3 + $0x1ac] sm:$0xff] %v4432_v2   ;;  %v4438_v4 = vld [vmem:[%s19599_s5 + $0x1b4] sm:$0xf]  ;;  %v4448_v8 = vld [vmem:[%s19599_s5 + $0x1cc] sm:$0xff]  }
 0x179   :  { %4437 = vst [vmem:[#allocation3 + $0x1b4] sm:$0xf] %v4436_v3  ;;  %v4444_v6 = vld [vmem:[%s19599_s5 + $0x1c8] sm:$0xf]  ;;  %4439 = vst [vmem:[#allocation3 + $0x1b8] sm:$0xf] %v4438_v4 }
 0x17a   :  { %4441 = vst [vmem:[#allocation3 + $0x1bc] sm:$0xff] %v4440_v5   ;;  %4445 = vst [vmem:[#allocation3 + $0x1c4] sm:$0xf] %v4444_v6  ;;  %v4446_v7 = vld [vmem:[%s19599_s5 + $0x1c4] sm:$0xf]  ;;  %v4456_v11 = vld [vmem:[%s19599_s5 + $0x1dc] sm:$0xff]  }
 0x17b   :  { %v4452_v9 = vld [vmem:[%s19599_s5 + $0x1d8] sm:$0xf]  ;;  %4447 = vst [vmem:[#allocation3 + $0x1c8] sm:$0xf] %v4446_v7  ;;  %4449 = vst [vmem:[#allocation3 + $0x1cc] sm:$0xff] %v4448_v8   ;;  %v4464_v14 = vld [vmem:[%s19599_s5 + $0x1ec] sm:$0xff]  }
 0x17c   :  { %4453 = vst [vmem:[#allocation3 + $0x1d4] sm:$0xf] %v4452_v9  ;;  %v4454_v10 = vld [vmem:[%s19599_s5 + $0x1d4] sm:$0xf]  ;;  %v4460_v12 = vld [vmem:[%s19599_s5 + $0x1e8] sm:$0xf] }
 0x17d   :  { %4455 = vst [vmem:[#allocation3 + $0x1d8] sm:$0xf] %v4454_v10  ;;  %4457 = vst [vmem:[#allocation3 + $0x1dc] sm:$0xff] %v4456_v11   ;;  %v4462_v13 = vld [vmem:[%s19599_s5 + $0x1e4] sm:$0xf]  ;;  %v4472_v17 = vld [vmem:[%s19599_s5 + $0x1fc] sm:$0xff]  }
 0x17e   :  { %4461 = vst [vmem:[#allocation3 + $0x1e4] sm:$0xf] %v4460_v12  ;;  %v4468_v15 = vld [vmem:[%s19599_s5 + $0x1f8] sm:$0xf]  ;;  %4463 = vst [vmem:[#allocation3 + $0x1e8] sm:$0xf] %v4462_v13 }
 0x17f   :  { %4465 = vst [vmem:[#allocation3 + $0x1ec] sm:$0xff] %v4464_v14   ;;  %4469 = vst [vmem:[#allocation3 + $0x1f4] sm:$0xf] %v4468_v15  ;;  %v4470_v16 = vld [vmem:[%s19599_s5 + $0x1f4] sm:$0xf]  ;;  %v4480_v20 = vld [vmem:[%s19599_s5 + $0x20c] sm:$0xff]  }
 0x180   :  { %v4476_v18 = vld [vmem:[%s19599_s5 + $0x208] sm:$0xf]  ;;  %4471 = vst [vmem:[#allocation3 + $0x1f8] sm:$0xf] %v4470_v16  ;;  %4473 = vst [vmem:[#allocation3 + $0x1fc] sm:$0xff] %v4472_v17   ;;  %v4488_v23 = vld [vmem:[%s19599_s5 + $0x21c] sm:$0xff]  }
 0x181   :  { %4477 = vst [vmem:[#allocation3 + $0x204] sm:$0xf] %v4476_v18  ;;  %v4478_v19 = vld [vmem:[%s19599_s5 + $0x204] sm:$0xf]  ;;  %v4484_v21 = vld [vmem:[%s19599_s5 + $0x218] sm:$0xf] }
 0x182   :  { %4479 = vst [vmem:[#allocation3 + $0x208] sm:$0xf] %v4478_v19  ;;  %4481 = vst [vmem:[#allocation3 + $0x20c] sm:$0xff] %v4480_v20   ;;  %v4486_v22 = vld [vmem:[%s19599_s5 + $0x214] sm:$0xf]  ;;  %v4496_v26 = vld [vmem:[%s19599_s5 + $0x22c] sm:$0xff]  }
 0x183   :  { %4485 = vst [vmem:[#allocation3 + $0x214] sm:$0xf] %v4484_v21  ;;  %v4492_v24 = vld [vmem:[%s19599_s5 + $0x228] sm:$0xf]  ;;  %4487 = vst [vmem:[#allocation3 + $0x218] sm:$0xf] %v4486_v22 }
 0x184   :  { %4489 = vst [vmem:[#allocation3 + $0x21c] sm:$0xff] %v4488_v23   ;;  %4493 = vst [vmem:[#allocation3 + $0x224] sm:$0xf] %v4492_v24  ;;  %v4494_v25 = vld [vmem:[%s19599_s5 + $0x224] sm:$0xf]  ;;  %v4504_v29 = vld [vmem:[%s19599_s5 + $0x23c] sm:$0xff]  }
 0x185   :  { %v4500_v27 = vld [vmem:[%s19599_s5 + $0x238] sm:$0xf]  ;;  %4495 = vst [vmem:[#allocation3 + $0x228] sm:$0xf] %v4494_v25  ;;  %4497 = vst [vmem:[#allocation3 + $0x22c] sm:$0xff] %v4496_v26   ;;  %v4512_v32 = vld [vmem:[%s19599_s5 + $0x24c] sm:$0xff]  }
 0x186   :  { %4501 = vst [vmem:[#allocation3 + $0x234] sm:$0xf] %v4500_v27  ;;  %v4502_v28 = vld [vmem:[%s19599_s5 + $0x234] sm:$0xf]  ;;  %v4508_v30 = vld [vmem:[%s19599_s5 + $0x248] sm:$0xf] }
 0x187   :  { %4503 = vst [vmem:[#allocation3 + $0x238] sm:$0xf] %v4502_v28  ;;  %4505 = vst [vmem:[#allocation3 + $0x23c] sm:$0xff] %v4504_v29   ;;  %v4510_v31 = vld [vmem:[%s19599_s5 + $0x244] sm:$0xf]  ;;  %v4520_v35 = vld [vmem:[%s19599_s5 + $0x25c] sm:$0xff]  }
 0x188   :  { %4509 = vst [vmem:[#allocation3 + $0x244] sm:$0xf] %v4508_v30  ;;  %v4516_v33 = vld [vmem:[%s19599_s5 + $0x258] sm:$0xf]  ;;  %4511 = vst [vmem:[#allocation3 + $0x248] sm:$0xf] %v4510_v31 }
 0x189   :  { %4513 = vst [vmem:[#allocation3 + $0x24c] sm:$0xff] %v4512_v32   ;;  %4517 = vst [vmem:[#allocation3 + $0x254] sm:$0xf] %v4516_v33  ;;  %v4518_v34 = vld [vmem:[%s19599_s5 + $0x254] sm:$0xf]  ;;  %v4528_v38 = vld [vmem:[%s19599_s5 + $0x26c] sm:$0xff]  }
 0x18a   :  { %v4524_v36 = vld [vmem:[%s19599_s5 + $0x268] sm:$0xf]  ;;  %4519 = vst [vmem:[#allocation3 + $0x258] sm:$0xf] %v4518_v34  ;;  %4521 = vst [vmem:[#allocation3 + $0x25c] sm:$0xff] %v4520_v35   ;;  %v4536_v41 = vld [vmem:[%s19599_s5 + $0x27c] sm:$0xff]  }
 0x18b   :  { %4525 = vst [vmem:[#allocation3 + $0x264] sm:$0xf] %v4524_v36  ;;  %v4526_v37 = vld [vmem:[%s19599_s5 + $0x264] sm:$0xf]  ;;  %v4532_v39 = vld [vmem:[%s19599_s5 + $0x278] sm:$0xf] }
 0x18c   :  { %4527 = vst [vmem:[#allocation3 + $0x268] sm:$0xf] %v4526_v37  ;;  %4529 = vst [vmem:[#allocation3 + $0x26c] sm:$0xff] %v4528_v38   ;;  %v4534_v40 = vld [vmem:[%s19599_s5 + $0x274] sm:$0xf]  ;;  %v4544_v44 = vld [vmem:[%s19599_s5 + $0x28c] sm:$0xff]  }
 0x18d   :  { %4533 = vst [vmem:[#allocation3 + $0x274] sm:$0xf] %v4532_v39  ;;  %v4540_v42 = vld [vmem:[%s19599_s5 + $0x288] sm:$0xf]  ;;  %4535 = vst [vmem:[#allocation3 + $0x278] sm:$0xf] %v4534_v40 }
 0x18e   :  { %4537 = vst [vmem:[#allocation3 + $0x27c] sm:$0xff] %v4536_v41   ;;  %4541 = vst [vmem:[#allocation3 + $0x284] sm:$0xf] %v4540_v42  ;;  %v4542_v43 = vld [vmem:[%s19599_s5 + $0x284] sm:$0xf]  ;;  %v4552_v47 = vld [vmem:[%s19599_s5 + $0x29c] sm:$0xff]  }
 0x18f   :  { %v4548_v45 = vld [vmem:[%s19599_s5 + $0x298] sm:$0xf]  ;;  %4543 = vst [vmem:[#allocation3 + $0x288] sm:$0xf] %v4542_v43  ;;  %4545 = vst [vmem:[#allocation3 + $0x28c] sm:$0xff] %v4544_v44   ;;  %v4560_v50 = vld [vmem:[%s19599_s5 + $0x2ac] sm:$0xff]  }
 0x190   :  { %4549 = vst [vmem:[#allocation3 + $0x294] sm:$0xf] %v4548_v45  ;;  %v4550_v46 = vld [vmem:[%s19599_s5 + $0x294] sm:$0xf]  ;;  %v4556_v48 = vld [vmem:[%s19599_s5 + $0x2a8] sm:$0xf] }
 0x191   :  { %4551 = vst [vmem:[#allocation3 + $0x298] sm:$0xf] %v4550_v46  ;;  %4553 = vst [vmem:[#allocation3 + $0x29c] sm:$0xff] %v4552_v47   ;;  %v4558_v49 = vld [vmem:[%s19599_s5 + $0x2a4] sm:$0xf]  ;;  %v4568_v53 = vld [vmem:[%s19599_s5 + $0x2bc] sm:$0xff]  }
 0x192   :  { %4557 = vst [vmem:[#allocation3 + $0x2a4] sm:$0xf] %v4556_v48  ;;  %v4564_v51 = vld [vmem:[%s19599_s5 + $0x2b8] sm:$0xf]  ;;  %4559 = vst [vmem:[#allocation3 + $0x2a8] sm:$0xf] %v4558_v49 }
 0x193   :  { %4561 = vst [vmem:[#allocation3 + $0x2ac] sm:$0xff] %v4560_v50   ;;  %4565 = vst [vmem:[#allocation3 + $0x2b4] sm:$0xf] %v4564_v51  ;;  %v4566_v52 = vld [vmem:[%s19599_s5 + $0x2b4] sm:$0xf]  ;;  %v4576_v56 = vld [vmem:[%s19599_s5 + $0x2cc] sm:$0xff]  }
 0x194   :  { %v4572_v54 = vld [vmem:[%s19599_s5 + $0x2c8] sm:$0xf]  ;;  %4567 = vst [vmem:[#allocation3 + $0x2b8] sm:$0xf] %v4566_v52  ;;  %4569 = vst [vmem:[#allocation3 + $0x2bc] sm:$0xff] %v4568_v53   ;;  %v4584_v59 = vld [vmem:[%s19599_s5 + $0x2dc] sm:$0xff]  }
 0x195   :  { %4573 = vst [vmem:[#allocation3 + $0x2c4] sm:$0xf] %v4572_v54  ;;  %v4574_v55 = vld [vmem:[%s19599_s5 + $0x2c4] sm:$0xf]  ;;  %v4580_v57 = vld [vmem:[%s19599_s5 + $0x2d8] sm:$0xf] }
 0x196   :  { %4575 = vst [vmem:[#allocation3 + $0x2c8] sm:$0xf] %v4574_v55  ;;  %4577 = vst [vmem:[#allocation3 + $0x2cc] sm:$0xff] %v4576_v56   ;;  %v4582_v58 = vld [vmem:[%s19599_s5 + $0x2d4] sm:$0xf]  ;;  %v4592_v62 = vld [vmem:[%s19599_s5 + $0x2ec] sm:$0xff]  }
 0x197   :  { %4581 = vst [vmem:[#allocation3 + $0x2d4] sm:$0xf] %v4580_v57  ;;  %v4588_v60 = vld [vmem:[%s19599_s5 + $0x2e8] sm:$0xf]  ;;  %4583 = vst [vmem:[#allocation3 + $0x2d8] sm:$0xf] %v4582_v58 }
 0x198   :  { %4585 = vst [vmem:[#allocation3 + $0x2dc] sm:$0xff] %v4584_v59   ;;  %4589 = vst [vmem:[#allocation3 + $0x2e4] sm:$0xf] %v4588_v60  ;;  %v4590_v61 = vld [vmem:[%s19599_s5 + $0x2e4] sm:$0xf]  ;;  %v4600_v1 = vld [vmem:[%s19599_s5 + $0x2fc] sm:$0xff]  }
 0x199   :  { %v4596_v63 = vld [vmem:[%s19599_s5 + $0x2f8] sm:$0xf]  ;;  %4591 = vst [vmem:[#allocation3 + $0x2e8] sm:$0xf] %v4590_v61  ;;  %4593 = vst [vmem:[#allocation3 + $0x2ec] sm:$0xff] %v4592_v62   ;;  %v4608_v4 = vld [vmem:[%s19599_s5 + $0x30c] sm:$0xff]  }
 0x19a   :  { %4597 = vst [vmem:[#allocation3 + $0x2f4] sm:$0xf] %v4596_v63  ;;  %v4598_v0 = vld [vmem:[%s19599_s5 + $0x2f4] sm:$0xf]  ;;  %v4604_v2 = vld [vmem:[%s19599_s5 + $0x308] sm:$0xf] }
 0x19b   :  { %4599 = vst [vmem:[#allocation3 + $0x2f8] sm:$0xf] %v4598_v0  ;;  %4601 = vst [vmem:[#allocation3 + $0x2fc] sm:$0xff] %v4600_v1   ;;  %v4606_v3 = vld [vmem:[%s19599_s5 + $0x304] sm:$0xf]  ;;  %v4616_v7 = vld [vmem:[%s19599_s5 + $0x31c] sm:$0xff]  }
 0x19c   :  { %4605 = vst [vmem:[#allocation3 + $0x304] sm:$0xf] %v4604_v2  ;;  %v4612_v5 = vld [vmem:[%s19599_s5 + $0x318] sm:$0xf]  ;;  %4607 = vst [vmem:[#allocation3 + $0x308] sm:$0xf] %v4606_v3 }
 0x19d   :  { %4609 = vst [vmem:[#allocation3 + $0x30c] sm:$0xff] %v4608_v4   ;;  %4613 = vst [vmem:[#allocation3 + $0x314] sm:$0xf] %v4612_v5  ;;  %v4614_v6 = vld [vmem:[%s19599_s5 + $0x314] sm:$0xf]  ;;  %v4624_v10 = vld [vmem:[%s19599_s5 + $0x32c] sm:$0xff]  }
 0x19e   :  { %v4620_v8 = vld [vmem:[%s19599_s5 + $0x328] sm:$0xf]  ;;  %4615 = vst [vmem:[#allocation3 + $0x318] sm:$0xf] %v4614_v6  ;;  %4617 = vst [vmem:[#allocation3 + $0x31c] sm:$0xff] %v4616_v7   ;;  %v4632_v13 = vld [vmem:[%s19599_s5 + $0x33c] sm:$0xff]  }
 0x19f   :  { %4621 = vst [vmem:[#allocation3 + $0x324] sm:$0xf] %v4620_v8  ;;  %v4622_v9 = vld [vmem:[%s19599_s5 + $0x324] sm:$0xf]  ;;  %v4628_v11 = vld [vmem:[%s19599_s5 + $0x338] sm:$0xf] }
 0x1a0   :  { %4623 = vst [vmem:[#allocation3 + $0x328] sm:$0xf] %v4622_v9  ;;  %4625 = vst [vmem:[#allocation3 + $0x32c] sm:$0xff] %v4624_v10   ;;  %v4630_v12 = vld [vmem:[%s19599_s5 + $0x334] sm:$0xf]  ;;  %v4640_v16 = vld [vmem:[%s19599_s5 + $0x34c] sm:$0xff]  }
 0x1a1   :  { %4629 = vst [vmem:[#allocation3 + $0x334] sm:$0xf] %v4628_v11  ;;  %v4636_v14 = vld [vmem:[%s19599_s5 + $0x348] sm:$0xf]  ;;  %4631 = vst [vmem:[#allocation3 + $0x338] sm:$0xf] %v4630_v12 }
 0x1a2   :  { %4633 = vst [vmem:[#allocation3 + $0x33c] sm:$0xff] %v4632_v13   ;;  %4637 = vst [vmem:[#allocation3 + $0x344] sm:$0xf] %v4636_v14  ;;  %v4638_v15 = vld [vmem:[%s19599_s5 + $0x344] sm:$0xf]  ;;  %v4648_v19 = vld [vmem:[%s19599_s5 + $0x35c] sm:$0xff]  }
 0x1a3   :  { %v4644_v17 = vld [vmem:[%s19599_s5 + $0x358] sm:$0xf]  ;;  %4639 = vst [vmem:[#allocation3 + $0x348] sm:$0xf] %v4638_v15  ;;  %4641 = vst [vmem:[#allocation3 + $0x34c] sm:$0xff] %v4640_v16   ;;  %v4656_v22 = vld [vmem:[%s19599_s5 + $0x36c] sm:$0xff]  }
 0x1a4   :  { %4645 = vst [vmem:[#allocation3 + $0x354] sm:$0xf] %v4644_v17  ;;  %v4646_v18 = vld [vmem:[%s19599_s5 + $0x354] sm:$0xf]  ;;  %v4652_v20 = vld [vmem:[%s19599_s5 + $0x368] sm:$0xf] }
 0x1a5   :  { %4647 = vst [vmem:[#allocation3 + $0x358] sm:$0xf] %v4646_v18  ;;  %4649 = vst [vmem:[#allocation3 + $0x35c] sm:$0xff] %v4648_v19   ;;  %v4654_v21 = vld [vmem:[%s19599_s5 + $0x364] sm:$0xf]  ;;  %v4664_v25 = vld [vmem:[%s19599_s5 + $0x37c] sm:$0xff]  }
 0x1a6   :  { %4653 = vst [vmem:[#allocation3 + $0x364] sm:$0xf] %v4652_v20  ;;  %v4660_v23 = vld [vmem:[%s19599_s5 + $0x378] sm:$0xf]  ;;  %4655 = vst [vmem:[#allocation3 + $0x368] sm:$0xf] %v4654_v21 }
 0x1a7   :  { %4657 = vst [vmem:[#allocation3 + $0x36c] sm:$0xff] %v4656_v22   ;;  %4661 = vst [vmem:[#allocation3 + $0x374] sm:$0xf] %v4660_v23  ;;  %v4662_v24 = vld [vmem:[%s19599_s5 + $0x374] sm:$0xf]  ;;  %v4672_v28 = vld [vmem:[%s19599_s5 + $0x38c] sm:$0xff]  }
 0x1a8   :  { %v4668_v26 = vld [vmem:[%s19599_s5 + $0x388] sm:$0xf]  ;;  %4663 = vst [vmem:[#allocation3 + $0x378] sm:$0xf] %v4662_v24  ;;  %4665 = vst [vmem:[#allocation3 + $0x37c] sm:$0xff] %v4664_v25   ;;  %v4680_v31 = vld [vmem:[%s19599_s5 + $0x39c] sm:$0xff]  }
 0x1a9   :  { %4669 = vst [vmem:[#allocation3 + $0x384] sm:$0xf] %v4668_v26  ;;  %v4670_v27 = vld [vmem:[%s19599_s5 + $0x384] sm:$0xf]  ;;  %v4676_v29 = vld [vmem:[%s19599_s5 + $0x398] sm:$0xf] }
 0x1aa   :  { %4671 = vst [vmem:[#allocation3 + $0x388] sm:$0xf] %v4670_v27  ;;  %4673 = vst [vmem:[#allocation3 + $0x38c] sm:$0xff] %v4672_v28   ;;  %v4678_v30 = vld [vmem:[%s19599_s5 + $0x394] sm:$0xf]  ;;  %v4688_v34 = vld [vmem:[%s19599_s5 + $0x3ac] sm:$0xff]  }
 0x1ab   :  { %4677 = vst [vmem:[#allocation3 + $0x394] sm:$0xf] %v4676_v29  ;;  %v4684_v32 = vld [vmem:[%s19599_s5 + $0x3a8] sm:$0xf]  ;;  %4679 = vst [vmem:[#allocation3 + $0x398] sm:$0xf] %v4678_v30 }
 0x1ac   :  { %4681 = vst [vmem:[#allocation3 + $0x39c] sm:$0xff] %v4680_v31   ;;  %4685 = vst [vmem:[#allocation3 + $0x3a4] sm:$0xf] %v4684_v32  ;;  %v4686_v33 = vld [vmem:[%s19599_s5 + $0x3a4] sm:$0xf]  ;;  %v4696_v37 = vld [vmem:[%s19599_s5 + $0x3bc] sm:$0xff]  }
 0x1ad   :  { %v4692_v35 = vld [vmem:[%s19599_s5 + $0x3b8] sm:$0xf]  ;;  %4687 = vst [vmem:[#allocation3 + $0x3a8] sm:$0xf] %v4686_v33  ;;  %4689 = vst [vmem:[#allocation3 + $0x3ac] sm:$0xff] %v4688_v34   ;;  %v4704_v40 = vld [vmem:[%s19599_s5 + $0x3cc] sm:$0xff]  }
 0x1ae   :  { %4693 = vst [vmem:[#allocation3 + $0x3b4] sm:$0xf] %v4692_v35  ;;  %v4694_v36 = vld [vmem:[%s19599_s5 + $0x3b4] sm:$0xf]  ;;  %v4700_v38 = vld [vmem:[%s19599_s5 + $0x3c8] sm:$0xf] }
 0x1af   :  { %4695 = vst [vmem:[#allocation3 + $0x3b8] sm:$0xf] %v4694_v36  ;;  %4697 = vst [vmem:[#allocation3 + $0x3bc] sm:$0xff] %v4696_v37   ;;  %v4702_v39 = vld [vmem:[%s19599_s5 + $0x3c4] sm:$0xf]  ;;  %v4712_v43 = vld [vmem:[%s19599_s5 + $0x3dc] sm:$0xff]  }
 0x1b0   :  { %4701 = vst [vmem:[#allocation3 + $0x3c4] sm:$0xf] %v4700_v38  ;;  %v4708_v41 = vld [vmem:[%s19599_s5 + $0x3d8] sm:$0xf]  ;;  %4703 = vst [vmem:[#allocation3 + $0x3c8] sm:$0xf] %v4702_v39 }
 0x1b1   :  { %4705 = vst [vmem:[#allocation3 + $0x3cc] sm:$0xff] %v4704_v40   ;;  %4709 = vst [vmem:[#allocation3 + $0x3d4] sm:$0xf] %v4708_v41  ;;  %v4710_v42 = vld [vmem:[%s19599_s5 + $0x3d4] sm:$0xf]  ;;  %v4720_v46 = vld [vmem:[%s19599_s5 + $0x3ec] sm:$0xff]  }
 0x1b2   :  { %v4716_v44 = vld [vmem:[%s19599_s5 + $0x3e8] sm:$0xf]  ;;  %4711 = vst [vmem:[#allocation3 + $0x3d8] sm:$0xf] %v4710_v42  ;;  %4713 = vst [vmem:[#allocation3 + $0x3dc] sm:$0xff] %v4712_v43   ;;  %v4728_v49 = vld [vmem:[%s19599_s5 + $0x3fc] sm:$0xff]  }
 0x1b3   :  { %4717 = vst [vmem:[#allocation3 + $0x3e4] sm:$0xf] %v4716_v44  ;;  %v4718_v45 = vld [vmem:[%s19599_s5 + $0x3e4] sm:$0xf]  ;;  %v4724_v47 = vld [vmem:[%s19599_s5 + $0x3f8] sm:$0xf] }
 0x1b4   :  { %4719 = vst [vmem:[#allocation3 + $0x3e8] sm:$0xf] %v4718_v45  ;;  %4721 = vst [vmem:[#allocation3 + $0x3ec] sm:$0xff] %v4720_v46   ;;  %v4726_v48 = vld [vmem:[%s19599_s5 + $0x3f4] sm:$0xf]  ;;  %v4736_v52 = vld [vmem:[%s19599_s5 + $0x40c] sm:$0xff]  }
 0x1b5   :  { %4725 = vst [vmem:[#allocation3 + $0x3f4] sm:$0xf] %v4724_v47  ;;  %v4732_v50 = vld [vmem:[%s19599_s5 + $0x408] sm:$0xf]  ;;  %4727 = vst [vmem:[#allocation3 + $0x3f8] sm:$0xf] %v4726_v48 }
 0x1b6   :  { %4729 = vst [vmem:[#allocation3 + $0x3fc] sm:$0xff] %v4728_v49   ;;  %4733 = vst [vmem:[#allocation3 + $0x404] sm:$0xf] %v4732_v50  ;;  %v4734_v51 = vld [vmem:[%s19599_s5 + $0x404] sm:$0xf]  ;;  %v4744_v55 = vld [vmem:[%s19599_s5 + $0x41c] sm:$0xff]  }
 0x1b7   :  { %v4740_v53 = vld [vmem:[%s19599_s5 + $0x418] sm:$0xf]  ;;  %4735 = vst [vmem:[#allocation3 + $0x408] sm:$0xf] %v4734_v51  ;;  %4737 = vst [vmem:[#allocation3 + $0x40c] sm:$0xff] %v4736_v52   ;;  %v4752_v58 = vld [vmem:[%s19599_s5 + $0x42c] sm:$0xff]  }
 0x1b8   :  { %4741 = vst [vmem:[#allocation3 + $0x414] sm:$0xf] %v4740_v53  ;;  %v4742_v54 = vld [vmem:[%s19599_s5 + $0x414] sm:$0xf]  ;;  %v4748_v56 = vld [vmem:[%s19599_s5 + $0x428] sm:$0xf] }
 0x1b9   :  { %4743 = vst [vmem:[#allocation3 + $0x418] sm:$0xf] %v4742_v54  ;;  %4745 = vst [vmem:[#allocation3 + $0x41c] sm:$0xff] %v4744_v55   ;;  %v4750_v57 = vld [vmem:[%s19599_s5 + $0x424] sm:$0xf]  ;;  %v4760_v61 = vld [vmem:[%s19599_s5 + $0x43c] sm:$0xff]  }
 0x1ba   :  { %4749 = vst [vmem:[#allocation3 + $0x424] sm:$0xf] %v4748_v56  ;;  %v4756_v59 = vld [vmem:[%s19599_s5 + $0x438] sm:$0xf]  ;;  %4751 = vst [vmem:[#allocation3 + $0x428] sm:$0xf] %v4750_v57 }
 0x1bb   :  { %4753 = vst [vmem:[#allocation3 + $0x42c] sm:$0xff] %v4752_v58   ;;  %4757 = vst [vmem:[#allocation3 + $0x434] sm:$0xf] %v4756_v59  ;;  %v4758_v60 = vld [vmem:[%s19599_s5 + $0x434] sm:$0xf]  ;;  %v4768_v0 = vld [vmem:[%s19599_s5 + $0x44c] sm:$0xff]  }
 0x1bc   :  { %v4764_v62 = vld [vmem:[%s19599_s5 + $0x448] sm:$0xf]  ;;  %4759 = vst [vmem:[#allocation3 + $0x438] sm:$0xf] %v4758_v60  ;;  %4761 = vst [vmem:[#allocation3 + $0x43c] sm:$0xff] %v4760_v61   ;;  %v4776_v3 = vld [vmem:[%s19599_s5 + $0x45c] sm:$0xff]  }
 0x1bd   :  { %4765 = vst [vmem:[#allocation3 + $0x444] sm:$0xf] %v4764_v62  ;;  %v4766_v63 = vld [vmem:[%s19599_s5 + $0x444] sm:$0xf]  ;;  %v4772_v1 = vld [vmem:[%s19599_s5 + $0x458] sm:$0xf] }
 0x1be   :  { %4767 = vst [vmem:[#allocation3 + $0x448] sm:$0xf] %v4766_v63  ;;  %4769 = vst [vmem:[#allocation3 + $0x44c] sm:$0xff] %v4768_v0   ;;  %v4774_v2 = vld [vmem:[%s19599_s5 + $0x454] sm:$0xf]  ;;  %v4784_v6 = vld [vmem:[%s19599_s5 + $0x46c] sm:$0xff]  }
 0x1bf   :  { %4773 = vst [vmem:[#allocation3 + $0x454] sm:$0xf] %v4772_v1  ;;  %v4780_v4 = vld [vmem:[%s19599_s5 + $0x468] sm:$0xf]  ;;  %4775 = vst [vmem:[#allocation3 + $0x458] sm:$0xf] %v4774_v2 }
 0x1c0   :  { %4777 = vst [vmem:[#allocation3 + $0x45c] sm:$0xff] %v4776_v3   ;;  %4781 = vst [vmem:[#allocation3 + $0x464] sm:$0xf] %v4780_v4  ;;  %v4782_v5 = vld [vmem:[%s19599_s5 + $0x464] sm:$0xf]  ;;  %v4792_v9 = vld [vmem:[%s19599_s5 + $0x47c] sm:$0xff]  }
 0x1c1   :  { %v4788_v7 = vld [vmem:[%s19599_s5 + $0x478] sm:$0xf]  ;;  %4783 = vst [vmem:[#allocation3 + $0x468] sm:$0xf] %v4782_v5  ;;  %4785 = vst [vmem:[#allocation3 + $0x46c] sm:$0xff] %v4784_v6   ;;  %v4800_v12 = vld [vmem:[%s19599_s5 + $0x48c] sm:$0xff]  }
 0x1c2   :  { %4789 = vst [vmem:[#allocation3 + $0x474] sm:$0xf] %v4788_v7  ;;  %v4790_v8 = vld [vmem:[%s19599_s5 + $0x474] sm:$0xf]  ;;  %v4796_v10 = vld [vmem:[%s19599_s5 + $0x488] sm:$0xf] }
 0x1c3   :  { %4791 = vst [vmem:[#allocation3 + $0x478] sm:$0xf] %v4790_v8  ;;  %4793 = vst [vmem:[#allocation3 + $0x47c] sm:$0xff] %v4792_v9   ;;  %v4798_v11 = vld [vmem:[%s19599_s5 + $0x484] sm:$0xf]  ;;  %v4808_v15 = vld [vmem:[%s19599_s5 + $0x49c] sm:$0xff]  }
 0x1c4   :  { %4797 = vst [vmem:[#allocation3 + $0x484] sm:$0xf] %v4796_v10  ;;  %v4804_v13 = vld [vmem:[%s19599_s5 + $0x498] sm:$0xf]  ;;  %4799 = vst [vmem:[#allocation3 + $0x488] sm:$0xf] %v4798_v11 }
 0x1c5   :  { %4801 = vst [vmem:[#allocation3 + $0x48c] sm:$0xff] %v4800_v12   ;;  %4805 = vst [vmem:[#allocation3 + $0x494] sm:$0xf] %v4804_v13  ;;  %v4806_v14 = vld [vmem:[%s19599_s5 + $0x494] sm:$0xf]  ;;  %v4816_v18 = vld [vmem:[%s19599_s5 + $0x4ac] sm:$0xff]  }
 0x1c6   :  { %v4812_v16 = vld [vmem:[%s19599_s5 + $0x4a8] sm:$0xf]  ;;  %4807 = vst [vmem:[#allocation3 + $0x498] sm:$0xf] %v4806_v14  ;;  %4809 = vst [vmem:[#allocation3 + $0x49c] sm:$0xff] %v4808_v15   ;;  %v4824_v21 = vld [vmem:[%s19599_s5 + $0x4bc] sm:$0xff]  }
 0x1c7   :  { %4813 = vst [vmem:[#allocation3 + $0x4a4] sm:$0xf] %v4812_v16  ;;  %v4814_v17 = vld [vmem:[%s19599_s5 + $0x4a4] sm:$0xf]  ;;  %v4820_v19 = vld [vmem:[%s19599_s5 + $0x4b8] sm:$0xf] }
 0x1c8   :  { %4815 = vst [vmem:[#allocation3 + $0x4a8] sm:$0xf] %v4814_v17  ;;  %4817 = vst [vmem:[#allocation3 + $0x4ac] sm:$0xff] %v4816_v18   ;;  %v4822_v20 = vld [vmem:[%s19599_s5 + $0x4b4] sm:$0xf]  ;;  %v4832_v24 = vld [vmem:[%s19599_s5 + $0x4cc] sm:$0xff]  }
 0x1c9   :  { %4821 = vst [vmem:[#allocation3 + $0x4b4] sm:$0xf] %v4820_v19  ;;  %v4828_v22 = vld [vmem:[%s19599_s5 + $0x4c8] sm:$0xf]  ;;  %4823 = vst [vmem:[#allocation3 + $0x4b8] sm:$0xf] %v4822_v20 }
 0x1ca   :  { %4825 = vst [vmem:[#allocation3 + $0x4bc] sm:$0xff] %v4824_v21   ;;  %4829 = vst [vmem:[#allocation3 + $0x4c4] sm:$0xf] %v4828_v22  ;;  %v4830_v23 = vld [vmem:[%s19599_s5 + $0x4c4] sm:$0xf]  ;;  %v4840_v27 = vld [vmem:[%s19599_s5 + $0x4dc] sm:$0xff]  }
 0x1cb   :  { %v4836_v25 = vld [vmem:[%s19599_s5 + $0x4d8] sm:$0xf]  ;;  %4831 = vst [vmem:[#allocation3 + $0x4c8] sm:$0xf] %v4830_v23  ;;  %4833 = vst [vmem:[#allocation3 + $0x4cc] sm:$0xff] %v4832_v24   ;;  %v4848_v30 = vld [vmem:[%s19599_s5 + $0x4ec] sm:$0xff]  }
 0x1cc   :  { %4837 = vst [vmem:[#allocation3 + $0x4d4] sm:$0xf] %v4836_v25  ;;  %v4838_v26 = vld [vmem:[%s19599_s5 + $0x4d4] sm:$0xf]  ;;  %v4844_v28 = vld [vmem:[%s19599_s5 + $0x4e8] sm:$0xf] }
 0x1cd   :  { %4839 = vst [vmem:[#allocation3 + $0x4d8] sm:$0xf] %v4838_v26  ;;  %4841 = vst [vmem:[#allocation3 + $0x4dc] sm:$0xff] %v4840_v27   ;;  %v4846_v29 = vld [vmem:[%s19599_s5 + $0x4e4] sm:$0xf]  ;;  %v4856_v33 = vld [vmem:[%s19599_s5 + $0x4fc] sm:$0xff]  }
 0x1ce   :  { %4845 = vst [vmem:[#allocation3 + $0x4e4] sm:$0xf] %v4844_v28  ;;  %v4852_v31 = vld [vmem:[%s19599_s5 + $0x4f8] sm:$0xf]  ;;  %4847 = vst [vmem:[#allocation3 + $0x4e8] sm:$0xf] %v4846_v29 }
 0x1cf   :  { %4849 = vst [vmem:[#allocation3 + $0x4ec] sm:$0xff] %v4848_v30   ;;  %4853 = vst [vmem:[#allocation3 + $0x4f4] sm:$0xf] %v4852_v31  ;;  %v4854_v32 = vld [vmem:[%s19599_s5 + $0x4f4] sm:$0xf]  ;;  %v4864_v36 = vld [vmem:[%s19599_s5 + $0x50c] sm:$0xff]  }
 0x1d0   :  { %v4860_v34 = vld [vmem:[%s19599_s5 + $0x508] sm:$0xf]  ;;  %4855 = vst [vmem:[#allocation3 + $0x4f8] sm:$0xf] %v4854_v32  ;;  %4857 = vst [vmem:[#allocation3 + $0x4fc] sm:$0xff] %v4856_v33   ;;  %v4872_v39 = vld [vmem:[%s19599_s5 + $0x51c] sm:$0xff]  }
 0x1d1   :  { %4861 = vst [vmem:[#allocation3 + $0x504] sm:$0xf] %v4860_v34  ;;  %v4862_v35 = vld [vmem:[%s19599_s5 + $0x504] sm:$0xf]  ;;  %v4868_v37 = vld [vmem:[%s19599_s5 + $0x518] sm:$0xf] }
 0x1d2   :  { %4863 = vst [vmem:[#allocation3 + $0x508] sm:$0xf] %v4862_v35  ;;  %4865 = vst [vmem:[#allocation3 + $0x50c] sm:$0xff] %v4864_v36   ;;  %v4870_v38 = vld [vmem:[%s19599_s5 + $0x514] sm:$0xf]  ;;  %v4880_v42 = vld [vmem:[%s19599_s5 + $0x52c] sm:$0xff]  }
 0x1d3   :  { %4869 = vst [vmem:[#allocation3 + $0x514] sm:$0xf] %v4868_v37  ;;  %v4876_v40 = vld [vmem:[%s19599_s5 + $0x528] sm:$0xf]  ;;  %4871 = vst [vmem:[#allocation3 + $0x518] sm:$0xf] %v4870_v38 }
 0x1d4   :  { %4873 = vst [vmem:[#allocation3 + $0x51c] sm:$0xff] %v4872_v39   ;;  %4877 = vst [vmem:[#allocation3 + $0x524] sm:$0xf] %v4876_v40  ;;  %v4878_v41 = vld [vmem:[%s19599_s5 + $0x524] sm:$0xf]  ;;  %v4888_v45 = vld [vmem:[%s19599_s5 + $0x53c] sm:$0xff]  }
 0x1d5   :  { %v4884_v43 = vld [vmem:[%s19599_s5 + $0x538] sm:$0xf]  ;;  %4879 = vst [vmem:[#allocation3 + $0x528] sm:$0xf] %v4878_v41  ;;  %4881 = vst [vmem:[#allocation3 + $0x52c] sm:$0xff] %v4880_v42   ;;  %v4896_v48 = vld [vmem:[%s19599_s5 + $0x54c] sm:$0xff]  }
 0x1d6   :  { %4885 = vst [vmem:[#allocation3 + $0x534] sm:$0xf] %v4884_v43  ;;  %v4886_v44 = vld [vmem:[%s19599_s5 + $0x534] sm:$0xf]  ;;  %v4892_v46 = vld [vmem:[%s19599_s5 + $0x548] sm:$0xf] }
 0x1d7   :  { %4887 = vst [vmem:[#allocation3 + $0x538] sm:$0xf] %v4886_v44  ;;  %4889 = vst [vmem:[#allocation3 + $0x53c] sm:$0xff] %v4888_v45   ;;  %v4894_v47 = vld [vmem:[%s19599_s5 + $0x544] sm:$0xf]  ;;  %v4904_v51 = vld [vmem:[%s19599_s5 + $0x55c] sm:$0xff]  }
 0x1d8   :  { %4893 = vst [vmem:[#allocation3 + $0x544] sm:$0xf] %v4892_v46  ;;  %v4900_v49 = vld [vmem:[%s19599_s5 + $0x558] sm:$0xf]  ;;  %4895 = vst [vmem:[#allocation3 + $0x548] sm:$0xf] %v4894_v47 }
 0x1d9   :  { %4897 = vst [vmem:[#allocation3 + $0x54c] sm:$0xff] %v4896_v48   ;;  %4901 = vst [vmem:[#allocation3 + $0x554] sm:$0xf] %v4900_v49  ;;  %v4902_v50 = vld [vmem:[%s19599_s5 + $0x554] sm:$0xf]  ;;  %v4912_v54 = vld [vmem:[%s19599_s5 + $0x56c] sm:$0xff]  }
 0x1da   :  { %v4908_v52 = vld [vmem:[%s19599_s5 + $0x568] sm:$0xf]  ;;  %4903 = vst [vmem:[#allocation3 + $0x558] sm:$0xf] %v4902_v50  ;;  %4905 = vst [vmem:[#allocation3 + $0x55c] sm:$0xff] %v4904_v51   ;;  %v4920_v57 = vld [vmem:[%s19599_s5 + $0x57c] sm:$0xff]  }
 0x1db   :  { %4909 = vst [vmem:[#allocation3 + $0x564] sm:$0xf] %v4908_v52  ;;  %v4910_v53 = vld [vmem:[%s19599_s5 + $0x564] sm:$0xf]  ;;  %v4916_v55 = vld [vmem:[%s19599_s5 + $0x578] sm:$0xf] }
 0x1dc   :  { %4911 = vst [vmem:[#allocation3 + $0x568] sm:$0xf] %v4910_v53  ;;  %4913 = vst [vmem:[#allocation3 + $0x56c] sm:$0xff] %v4912_v54   ;;  %v4918_v56 = vld [vmem:[%s19599_s5 + $0x574] sm:$0xf]  ;;  %v4928_v60 = vld [vmem:[%s19599_s5 + $0x58c] sm:$0xff]  }
 0x1dd   :  { %4917 = vst [vmem:[#allocation3 + $0x574] sm:$0xf] %v4916_v55  ;;  %v4924_v58 = vld [vmem:[%s19599_s5 + $0x588] sm:$0xf]  ;;  %4919 = vst [vmem:[#allocation3 + $0x578] sm:$0xf] %v4918_v56 }
 0x1de   :  { %4921 = vst [vmem:[#allocation3 + $0x57c] sm:$0xff] %v4920_v57   ;;  %4925 = vst [vmem:[#allocation3 + $0x584] sm:$0xf] %v4924_v58  ;;  %v4926_v59 = vld [vmem:[%s19599_s5 + $0x584] sm:$0xf]  ;;  %v4936_v63 = vld [vmem:[%s19599_s5 + $0x59c] sm:$0xff]  }
 0x1df   :  { %v4932_v61 = vld [vmem:[%s19599_s5 + $0x598] sm:$0xf]  ;;  %4927 = vst [vmem:[#allocation3 + $0x588] sm:$0xf] %v4926_v59  ;;  %4929 = vst [vmem:[#allocation3 + $0x58c] sm:$0xff] %v4928_v60   ;;  %v4944_v2 = vld [vmem:[%s19599_s5 + $0x5ac] sm:$0xff]  }
 0x1e0   :  { %4933 = vst [vmem:[#allocation3 + $0x594] sm:$0xf] %v4932_v61  ;;  %v4934_v62 = vld [vmem:[%s19599_s5 + $0x594] sm:$0xf]  ;;  %v4940_v0 = vld [vmem:[%s19599_s5 + $0x5a8] sm:$0xf] }
 0x1e1   :  { %4935 = vst [vmem:[#allocation3 + $0x598] sm:$0xf] %v4934_v62  ;;  %4937 = vst [vmem:[#allocation3 + $0x59c] sm:$0xff] %v4936_v63   ;;  %v4942_v1 = vld [vmem:[%s19599_s5 + $0x5a4] sm:$0xf]  ;;  %v4952_v5 = vld [vmem:[%s19599_s5 + $0x5bc] sm:$0xff]  }
 0x1e2   :  { %4941 = vst [vmem:[#allocation3 + $0x5a4] sm:$0xf] %v4940_v0  ;;  %v4948_v3 = vld [vmem:[%s19599_s5 + $0x5b8] sm:$0xf]  ;;  %4943 = vst [vmem:[#allocation3 + $0x5a8] sm:$0xf] %v4942_v1 }
 0x1e3   :  { %4945 = vst [vmem:[#allocation3 + $0x5ac] sm:$0xff] %v4944_v2   ;;  %4949 = vst [vmem:[#allocation3 + $0x5b4] sm:$0xf] %v4948_v3  ;;  %v4950_v4 = vld [vmem:[%s19599_s5 + $0x5b4] sm:$0xf]  ;;  %v4960_v8 = vld [vmem:[%s19599_s5 + $0x5cc] sm:$0xff]  }
 0x1e4   :  { %v4956_v6 = vld [vmem:[%s19599_s5 + $0x5c8] sm:$0xf]  ;;  %4951 = vst [vmem:[#allocation3 + $0x5b8] sm:$0xf] %v4950_v4  ;;  %4953 = vst [vmem:[#allocation3 + $0x5bc] sm:$0xff] %v4952_v5   ;;  %v4968_v11 = vld [vmem:[%s19599_s5 + $0x5dc] sm:$0xff]  }
 0x1e5   :  { %4957 = vst [vmem:[#allocation3 + $0x5c4] sm:$0xf] %v4956_v6  ;;  %v4958_v7 = vld [vmem:[%s19599_s5 + $0x5c4] sm:$0xf]  ;;  %v4964_v9 = vld [vmem:[%s19599_s5 + $0x5d8] sm:$0xf] }
 0x1e6   :  { %4959 = vst [vmem:[#allocation3 + $0x5c8] sm:$0xf] %v4958_v7  ;;  %4961 = vst [vmem:[#allocation3 + $0x5cc] sm:$0xff] %v4960_v8   ;;  %v4966_v10 = vld [vmem:[%s19599_s5 + $0x5d4] sm:$0xf]  ;;  %v4976_v14 = vld [vmem:[%s19599_s5 + $0x5ec] sm:$0xff]  }
 0x1e7   :  { %4965 = vst [vmem:[#allocation3 + $0x5d4] sm:$0xf] %v4964_v9  ;;  %v4972_v12 = vld [vmem:[%s19599_s5 + $0x5e8] sm:$0xf]  ;;  %4967 = vst [vmem:[#allocation3 + $0x5d8] sm:$0xf] %v4966_v10 }
 0x1e8   :  { %4969 = vst [vmem:[#allocation3 + $0x5dc] sm:$0xff] %v4968_v11   ;;  %4973 = vst [vmem:[#allocation3 + $0x5e4] sm:$0xf] %v4972_v12  ;;  %v4974_v13 = vld [vmem:[%s19599_s5 + $0x5e4] sm:$0xf]  ;;  %v4984_v17 = vld [vmem:[%s19599_s5 + $0x5fc] sm:$0xff]  }
 0x1e9   :  { %v4980_v15 = vld [vmem:[%s19599_s5 + $0x5f8] sm:$0xf]  ;;  %4975 = vst [vmem:[#allocation3 + $0x5e8] sm:$0xf] %v4974_v13  ;;  %4977 = vst [vmem:[#allocation3 + $0x5ec] sm:$0xff] %v4976_v14   ;;  %v4992_v20 = vld [vmem:[%s19599_s5 + $0x60c] sm:$0xff]  }
 0x1ea   :  { %4981 = vst [vmem:[#allocation3 + $0x5f4] sm:$0xf] %v4980_v15  ;;  %v4982_v16 = vld [vmem:[%s19599_s5 + $0x5f4] sm:$0xf]  ;;  %v4988_v18 = vld [vmem:[%s19599_s5 + $0x608] sm:$0xf] }
 0x1eb   :  { %4983 = vst [vmem:[#allocation3 + $0x5f8] sm:$0xf] %v4982_v16  ;;  %4985 = vst [vmem:[#allocation3 + $0x5fc] sm:$0xff] %v4984_v17   ;;  %v4990_v19 = vld [vmem:[%s19599_s5 + $0x604] sm:$0xf]  ;;  %v5000_v23 = vld [vmem:[%s19599_s5 + $0x61c] sm:$0xff]  }
 0x1ec   :  { %4989 = vst [vmem:[#allocation3 + $0x604] sm:$0xf] %v4988_v18  ;;  %v4996_v21 = vld [vmem:[%s19599_s5 + $0x618] sm:$0xf]  ;;  %4991 = vst [vmem:[#allocation3 + $0x608] sm:$0xf] %v4990_v19 }
 0x1ed   :  { %4993 = vst [vmem:[#allocation3 + $0x60c] sm:$0xff] %v4992_v20   ;;  %4997 = vst [vmem:[#allocation3 + $0x614] sm:$0xf] %v4996_v21  ;;  %v4998_v22 = vld [vmem:[%s19599_s5 + $0x614] sm:$0xf]  ;;  %v5008_v26 = vld [vmem:[%s19599_s5 + $0x62c] sm:$0xff]  }
 0x1ee   :  { %v5004_v24 = vld [vmem:[%s19599_s5 + $0x628] sm:$0xf]  ;;  %4999 = vst [vmem:[#allocation3 + $0x618] sm:$0xf] %v4998_v22  ;;  %5001 = vst [vmem:[#allocation3 + $0x61c] sm:$0xff] %v5000_v23   ;;  %v5016_v29 = vld [vmem:[%s19599_s5 + $0x63c] sm:$0xff]  }
 0x1ef   :  { %5005 = vst [vmem:[#allocation3 + $0x624] sm:$0xf] %v5004_v24  ;;  %v5006_v25 = vld [vmem:[%s19599_s5 + $0x624] sm:$0xf]  ;;  %v5012_v27 = vld [vmem:[%s19599_s5 + $0x638] sm:$0xf] }
 0x1f0   :  { %5007 = vst [vmem:[#allocation3 + $0x628] sm:$0xf] %v5006_v25  ;;  %5009 = vst [vmem:[#allocation3 + $0x62c] sm:$0xff] %v5008_v26   ;;  %v5014_v28 = vld [vmem:[%s19599_s5 + $0x634] sm:$0xf]  ;;  %v5024_v32 = vld [vmem:[%s19599_s5 + $0x64c] sm:$0xff]  }
 0x1f1   :  { %5013 = vst [vmem:[#allocation3 + $0x634] sm:$0xf] %v5012_v27  ;;  %v5020_v30 = vld [vmem:[%s19599_s5 + $0x648] sm:$0xf]  ;;  %5015 = vst [vmem:[#allocation3 + $0x638] sm:$0xf] %v5014_v28 }
 0x1f2   :  { %5017 = vst [vmem:[#allocation3 + $0x63c] sm:$0xff] %v5016_v29   ;;  %5021 = vst [vmem:[#allocation3 + $0x644] sm:$0xf] %v5020_v30  ;;  %v5022_v31 = vld [vmem:[%s19599_s5 + $0x644] sm:$0xf]  ;;  %v5032_v35 = vld [vmem:[%s19599_s5 + $0x65c] sm:$0xff]  }
 0x1f3   :  { %v5028_v33 = vld [vmem:[%s19599_s5 + $0x658] sm:$0xf]  ;;  %5023 = vst [vmem:[#allocation3 + $0x648] sm:$0xf] %v5022_v31  ;;  %5025 = vst [vmem:[#allocation3 + $0x64c] sm:$0xff] %v5024_v32   ;;  %v5040_v38 = vld [vmem:[%s19599_s5 + $0x66c] sm:$0xff]  }
 0x1f4   :  { %5029 = vst [vmem:[#allocation3 + $0x654] sm:$0xf] %v5028_v33  ;;  %v5030_v34 = vld [vmem:[%s19599_s5 + $0x654] sm:$0xf]  ;;  %v5036_v36 = vld [vmem:[%s19599_s5 + $0x668] sm:$0xf] }
 0x1f5   :  { %5031 = vst [vmem:[#allocation3 + $0x658] sm:$0xf] %v5030_v34  ;;  %5033 = vst [vmem:[#allocation3 + $0x65c] sm:$0xff] %v5032_v35   ;;  %v5038_v37 = vld [vmem:[%s19599_s5 + $0x664] sm:$0xf]  ;;  %v5048_v41 = vld [vmem:[%s19599_s5 + $0x67c] sm:$0xff]  }
 0x1f6   :  { %5037 = vst [vmem:[#allocation3 + $0x664] sm:$0xf] %v5036_v36  ;;  %v5044_v39 = vld [vmem:[%s19599_s5 + $0x678] sm:$0xf]  ;;  %5039 = vst [vmem:[#allocation3 + $0x668] sm:$0xf] %v5038_v37 }
 0x1f7   :  { %5041 = vst [vmem:[#allocation3 + $0x66c] sm:$0xff] %v5040_v38   ;;  %5045 = vst [vmem:[#allocation3 + $0x674] sm:$0xf] %v5044_v39  ;;  %v5046_v40 = vld [vmem:[%s19599_s5 + $0x674] sm:$0xf]  ;;  %v5056_v44 = vld [vmem:[%s19599_s5 + $0x68c] sm:$0xff]  }
 0x1f8   :  { %v5052_v42 = vld [vmem:[%s19599_s5 + $0x688] sm:$0xf]  ;;  %5047 = vst [vmem:[#allocation3 + $0x678] sm:$0xf] %v5046_v40  ;;  %5049 = vst [vmem:[#allocation3 + $0x67c] sm:$0xff] %v5048_v41   ;;  %v5064_v47 = vld [vmem:[%s19599_s5 + $0x69c] sm:$0xff]  }
 0x1f9   :  { %5053 = vst [vmem:[#allocation3 + $0x684] sm:$0xf] %v5052_v42  ;;  %v5054_v43 = vld [vmem:[%s19599_s5 + $0x684] sm:$0xf]  ;;  %v5060_v45 = vld [vmem:[%s19599_s5 + $0x698] sm:$0xf] }
 0x1fa   :  { %5055 = vst [vmem:[#allocation3 + $0x688] sm:$0xf] %v5054_v43  ;;  %5057 = vst [vmem:[#allocation3 + $0x68c] sm:$0xff] %v5056_v44   ;;  %v5062_v46 = vld [vmem:[%s19599_s5 + $0x694] sm:$0xf]  ;;  %v5072_v50 = vld [vmem:[%s19599_s5 + $0x6ac] sm:$0xff]  }
 0x1fb   :  { %5061 = vst [vmem:[#allocation3 + $0x694] sm:$0xf] %v5060_v45  ;;  %v5068_v48 = vld [vmem:[%s19599_s5 + $0x6a8] sm:$0xf]  ;;  %5063 = vst [vmem:[#allocation3 + $0x698] sm:$0xf] %v5062_v46 }
 0x1fc   :  { %5065 = vst [vmem:[#allocation3 + $0x69c] sm:$0xff] %v5064_v47   ;;  %5069 = vst [vmem:[#allocation3 + $0x6a4] sm:$0xf] %v5068_v48  ;;  %v5070_v49 = vld [vmem:[%s19599_s5 + $0x6a4] sm:$0xf]  ;;  %v5080_v53 = vld [vmem:[%s19599_s5 + $0x6bc] sm:$0xff]  }
 0x1fd   :  { %v5076_v51 = vld [vmem:[%s19599_s5 + $0x6b8] sm:$0xf]  ;;  %5071 = vst [vmem:[#allocation3 + $0x6a8] sm:$0xf] %v5070_v49  ;;  %5073 = vst [vmem:[#allocation3 + $0x6ac] sm:$0xff] %v5072_v50   ;;  %v5088_v56 = vld [vmem:[%s19599_s5 + $0x6cc] sm:$0xff]  }
 0x1fe   :  { %5077 = vst [vmem:[#allocation3 + $0x6b4] sm:$0xf] %v5076_v51  ;;  %v5078_v52 = vld [vmem:[%s19599_s5 + $0x6b4] sm:$0xf]  ;;  %v5084_v54 = vld [vmem:[%s19599_s5 + $0x6c8] sm:$0xf] }
 0x1ff   :  { %5079 = vst [vmem:[#allocation3 + $0x6b8] sm:$0xf] %v5078_v52  ;;  %5081 = vst [vmem:[#allocation3 + $0x6bc] sm:$0xff] %v5080_v53   ;;  %v5086_v55 = vld [vmem:[%s19599_s5 + $0x6c4] sm:$0xf]  ;;  %v5096_v59 = vld [vmem:[%s19599_s5 + $0x6dc] sm:$0xff]  }
 0x200   :  { %5085 = vst [vmem:[#allocation3 + $0x6c4] sm:$0xf] %v5084_v54  ;;  %v5092_v57 = vld [vmem:[%s19599_s5 + $0x6d8] sm:$0xf]  ;;  %5087 = vst [vmem:[#allocation3 + $0x6c8] sm:$0xf] %v5086_v55 }
 0x201   :  { %5089 = vst [vmem:[#allocation3 + $0x6cc] sm:$0xff] %v5088_v56   ;;  %5093 = vst [vmem:[#allocation3 + $0x6d4] sm:$0xf] %v5092_v57  ;;  %v5094_v58 = vld [vmem:[%s19599_s5 + $0x6d4] sm:$0xf]  ;;  %v5104_v62 = vld [vmem:[%s19599_s5 + $0x6ec] sm:$0xff]  }
 0x202   :  { %v5100_v60 = vld [vmem:[%s19599_s5 + $0x6e8] sm:$0xf]  ;;  %5095 = vst [vmem:[#allocation3 + $0x6d8] sm:$0xf] %v5094_v58  ;;  %5097 = vst [vmem:[#allocation3 + $0x6dc] sm:$0xff] %v5096_v59   ;;  %v5112_v1 = vld [vmem:[%s19599_s5 + $0x6fc] sm:$0xff]  }
 0x203   :  { %5101 = vst [vmem:[#allocation3 + $0x6e4] sm:$0xf] %v5100_v60  ;;  %v5102_v61 = vld [vmem:[%s19599_s5 + $0x6e4] sm:$0xf]  ;;  %v5108_v63 = vld [vmem:[%s19599_s5 + $0x6f8] sm:$0xf] }
 0x204   :  { %5103 = vst [vmem:[#allocation3 + $0x6e8] sm:$0xf] %v5102_v61  ;;  %5105 = vst [vmem:[#allocation3 + $0x6ec] sm:$0xff] %v5104_v62   ;;  %v5110_v0 = vld [vmem:[%s19599_s5 + $0x6f4] sm:$0xf]  ;;  %v5120_v4 = vld [vmem:[%s19599_s5 + $0x70c] sm:$0xff]  }
 0x205   :  { %5109 = vst [vmem:[#allocation3 + $0x6f4] sm:$0xf] %v5108_v63  ;;  %v5116_v2 = vld [vmem:[%s19599_s5 + $0x708] sm:$0xf]  ;;  %5111 = vst [vmem:[#allocation3 + $0x6f8] sm:$0xf] %v5110_v0 }
 0x206   :  { %5113 = vst [vmem:[#allocation3 + $0x6fc] sm:$0xff] %v5112_v1   ;;  %5117 = vst [vmem:[#allocation3 + $0x704] sm:$0xf] %v5116_v2  ;;  %v5118_v3 = vld [vmem:[%s19599_s5 + $0x704] sm:$0xf]  ;;  %v5128_v7 = vld [vmem:[%s19599_s5 + $0x71c] sm:$0xff]  }
 0x207   :  { %v5124_v5 = vld [vmem:[%s19599_s5 + $0x718] sm:$0xf]  ;;  %5119 = vst [vmem:[#allocation3 + $0x708] sm:$0xf] %v5118_v3  ;;  %5121 = vst [vmem:[#allocation3 + $0x70c] sm:$0xff] %v5120_v4   ;;  %v5136_v10 = vld [vmem:[%s19599_s5 + $0x72c] sm:$0xff]  }
 0x208   :  { %5125 = vst [vmem:[#allocation3 + $0x714] sm:$0xf] %v5124_v5  ;;  %v5126_v6 = vld [vmem:[%s19599_s5 + $0x714] sm:$0xf]  ;;  %v5132_v8 = vld [vmem:[%s19599_s5 + $0x728] sm:$0xf] }
 0x209   :  { %5127 = vst [vmem:[#allocation3 + $0x718] sm:$0xf] %v5126_v6  ;;  %5129 = vst [vmem:[#allocation3 + $0x71c] sm:$0xff] %v5128_v7   ;;  %v5134_v9 = vld [vmem:[%s19599_s5 + $0x724] sm:$0xf]  ;;  %v5144_v13 = vld [vmem:[%s19599_s5 + $0x73c] sm:$0xff]  }
 0x20a   :  { %5133 = vst [vmem:[#allocation3 + $0x724] sm:$0xf] %v5132_v8  ;;  %v5140_v11 = vld [vmem:[%s19599_s5 + $0x738] sm:$0xf]  ;;  %5135 = vst [vmem:[#allocation3 + $0x728] sm:$0xf] %v5134_v9 }
 0x20b   :  { %5137 = vst [vmem:[#allocation3 + $0x72c] sm:$0xff] %v5136_v10   ;;  %5141 = vst [vmem:[#allocation3 + $0x734] sm:$0xf] %v5140_v11  ;;  %v5142_v12 = vld [vmem:[%s19599_s5 + $0x734] sm:$0xf]  ;;  %v5152_v16 = vld [vmem:[%s19599_s5 + $0x74c] sm:$0xff]  }
 0x20c   :  { %v5148_v14 = vld [vmem:[%s19599_s5 + $0x748] sm:$0xf]  ;;  %5143 = vst [vmem:[#allocation3 + $0x738] sm:$0xf] %v5142_v12  ;;  %5145 = vst [vmem:[#allocation3 + $0x73c] sm:$0xff] %v5144_v13   ;;  %v5160_v19 = vld [vmem:[%s19599_s5 + $0x75c] sm:$0xff]  }
 0x20d   :  { %5149 = vst [vmem:[#allocation3 + $0x744] sm:$0xf] %v5148_v14  ;;  %v5150_v15 = vld [vmem:[%s19599_s5 + $0x744] sm:$0xf]  ;;  %v5156_v17 = vld [vmem:[%s19599_s5 + $0x758] sm:$0xf] }
 0x20e   :  { %5151 = vst [vmem:[#allocation3 + $0x748] sm:$0xf] %v5150_v15  ;;  %5153 = vst [vmem:[#allocation3 + $0x74c] sm:$0xff] %v5152_v16   ;;  %v5158_v18 = vld [vmem:[%s19599_s5 + $0x754] sm:$0xf]  ;;  %v5168_v22 = vld [vmem:[%s19599_s5 + $0x76c] sm:$0xff]  }
 0x20f   :  { %5157 = vst [vmem:[#allocation3 + $0x754] sm:$0xf] %v5156_v17  ;;  %v5164_v20 = vld [vmem:[%s19599_s5 + $0x768] sm:$0xf]  ;;  %5159 = vst [vmem:[#allocation3 + $0x758] sm:$0xf] %v5158_v18 }
 0x210   :  { %5161 = vst [vmem:[#allocation3 + $0x75c] sm:$0xff] %v5160_v19   ;;  %5165 = vst [vmem:[#allocation3 + $0x764] sm:$0xf] %v5164_v20  ;;  %v5166_v21 = vld [vmem:[%s19599_s5 + $0x764] sm:$0xf]  ;;  %v5176_v25 = vld [vmem:[%s19599_s5 + $0x77c] sm:$0xff]  }
 0x211   :  { %v5172_v23 = vld [vmem:[%s19599_s5 + $0x778] sm:$0xf]  ;;  %5167 = vst [vmem:[#allocation3 + $0x768] sm:$0xf] %v5166_v21  ;;  %5169 = vst [vmem:[#allocation3 + $0x76c] sm:$0xff] %v5168_v22   ;;  %v5184_v28 = vld [vmem:[%s19599_s5 + $0x78c] sm:$0xff]  }
 0x212   :  { %5173 = vst [vmem:[#allocation3 + $0x774] sm:$0xf] %v5172_v23  ;;  %v5174_v24 = vld [vmem:[%s19599_s5 + $0x774] sm:$0xf]  ;;  %v5180_v26 = vld [vmem:[%s19599_s5 + $0x788] sm:$0xf] }
 0x213   :  { %5175 = vst [vmem:[#allocation3 + $0x778] sm:$0xf] %v5174_v24  ;;  %5177 = vst [vmem:[#allocation3 + $0x77c] sm:$0xff] %v5176_v25   ;;  %v5182_v27 = vld [vmem:[%s19599_s5 + $0x784] sm:$0xf]  ;;  %v5192_v31 = vld [vmem:[%s19599_s5 + $0x79c] sm:$0xff]  }
 0x214   :  { %5181 = vst [vmem:[#allocation3 + $0x784] sm:$0xf] %v5180_v26  ;;  %v5188_v29 = vld [vmem:[%s19599_s5 + $0x798] sm:$0xf]  ;;  %5183 = vst [vmem:[#allocation3 + $0x788] sm:$0xf] %v5182_v27 }
 0x215   :  { %5185 = vst [vmem:[#allocation3 + $0x78c] sm:$0xff] %v5184_v28   ;;  %5189 = vst [vmem:[#allocation3 + $0x794] sm:$0xf] %v5188_v29  ;;  %v5190_v30 = vld [vmem:[%s19599_s5 + $0x794] sm:$0xf]  ;;  %v5200_v34 = vld [vmem:[%s19599_s5 + $0x7ac] sm:$0xff]  }
 0x216   :  { %v5196_v32 = vld [vmem:[%s19599_s5 + $0x7a8] sm:$0xf]  ;;  %5191 = vst [vmem:[#allocation3 + $0x798] sm:$0xf] %v5190_v30  ;;  %5193 = vst [vmem:[#allocation3 + $0x79c] sm:$0xff] %v5192_v31   ;;  %v5208_v37 = vld [vmem:[%s19599_s5 + $0x7bc] sm:$0xff]  }
 0x217   :  { %5197 = vst [vmem:[#allocation3 + $0x7a4] sm:$0xf] %v5196_v32  ;;  %v5198_v33 = vld [vmem:[%s19599_s5 + $0x7a4] sm:$0xf]  ;;  %v5204_v35 = vld [vmem:[%s19599_s5 + $0x7b8] sm:$0xf] }
 0x218   :  { %5199 = vst [vmem:[#allocation3 + $0x7a8] sm:$0xf] %v5198_v33  ;;  %5201 = vst [vmem:[#allocation3 + $0x7ac] sm:$0xff] %v5200_v34   ;;  %v5206_v36 = vld [vmem:[%s19599_s5 + $0x7b4] sm:$0xf]  ;;  %v5216_v40 = vld [vmem:[%s19599_s5 + $0x7cc] sm:$0xff]  }
 0x219   :  { %5205 = vst [vmem:[#allocation3 + $0x7b4] sm:$0xf] %v5204_v35  ;;  %v5212_v38 = vld [vmem:[%s19599_s5 + $0x7c8] sm:$0xf]  ;;  %5207 = vst [vmem:[#allocation3 + $0x7b8] sm:$0xf] %v5206_v36 }
 0x21a   :  { %5209 = vst [vmem:[#allocation3 + $0x7bc] sm:$0xff] %v5208_v37   ;;  %5213 = vst [vmem:[#allocation3 + $0x7c4] sm:$0xf] %v5212_v38  ;;  %v5214_v39 = vld [vmem:[%s19599_s5 + $0x7c4] sm:$0xf]  ;;  %v5224_v43 = vld [vmem:[%s19599_s5 + $0x7dc] sm:$0xff]  }
 0x21b   :  { %v5220_v41 = vld [vmem:[%s19599_s5 + $0x7d8] sm:$0xf]  ;;  %5215 = vst [vmem:[#allocation3 + $0x7c8] sm:$0xf] %v5214_v39  ;;  %5217 = vst [vmem:[#allocation3 + $0x7cc] sm:$0xff] %v5216_v40   ;;  %v5232_v46 = vld [vmem:[%s19599_s5 + $0x7ec] sm:$0xff]  }
 0x21c   :  { %5221 = vst [vmem:[#allocation3 + $0x7d4] sm:$0xf] %v5220_v41  ;;  %v5222_v42 = vld [vmem:[%s19599_s5 + $0x7d4] sm:$0xf]  ;;  %v5228_v44 = vld [vmem:[%s19599_s5 + $0x7e8] sm:$0xf] }
 0x21d   :  { %5223 = vst [vmem:[#allocation3 + $0x7d8] sm:$0xf] %v5222_v42  ;;  %5225 = vst [vmem:[#allocation3 + $0x7dc] sm:$0xff] %v5224_v43   ;;  %v5230_v45 = vld [vmem:[%s19599_s5 + $0x7e4] sm:$0xf] }
 0x21e   :  { %5229 = vst [vmem:[#allocation3 + $0x7e4] sm:$0xf] %v5228_v44  ;;  %v5236_v47 = vld [vmem:[%s19599_s5 + $0x7f8] sm:$0xf]  ;;  %5231 = vst [vmem:[#allocation3 + $0x7e8] sm:$0xf] %v5230_v45 }
 0x21f   :  { %5233 = vst [vmem:[#allocation3 + $0x7ec] sm:$0xff] %v5232_v46   ;;  %5237 = vst [vmem:[#allocation3 + $0x7f4] sm:$0xf] %v5236_v47  ;;  %v5238_v48 = vld [vmem:[%s19599_s5 + $0x7f4] sm:$0xf] }
 0x220   :  { %v5240_v49 = vld [vmem:[%s19599_s5 + $0x7fc] sm:$0xf]  ;;  %5239 = vst [vmem:[#allocation3 + $0x7f8] sm:$0xf] %v5238_v48 }
 0x221   :  { %5241 = vst [vmem:[#allocation3 + $0x7fc] sm:$0xf] %v5240_v49 }
 0x222   :  { %8377 = vsyncadd [#allocation4 + $0x1], 32768  ;;  %v17783_v50 = vld [vmem:[%s19600_s6 + $0x6] ss:$8 sm:$0x3]  ;;  %v8489_v9 = vld [vmem:[%s19594_s0 + $0x18] sm:$0xff] }
 0x223   :  { %19613 = vst [vmem:[#allocation9_spill] sm:$0xff] %v17783_v50  ;;  %v8500_v51 = vld [vmem:[%s19596_s2] sm:$0xff]  ;;  %v8487_v8 = vld [vmem:[%s19594_s0 + $0x8] sm:$0xff]  ;;  %v8493_v12 = vld [vmem:[%s19595_s1 + $0x18] sm:$0xff]  ;;  %s15089_s25 = smov 64   ;;  %s15090_s26 = smov 32  }
 0x224   :  { %v17791_v52 = vld [vmem:[%s19600_s6 + $0x7] ss:$8 sm:$0x3]  ;;  %v17796_v53 = vld [vmem:[%s19600_s6 + $0x40] ss:$8 sm:$0x3]  ;;  %v17849_v15 = vadd.f32 %v8493_v12, %v8489_v9 }
 0x225   :  { %19614 = vst [vmem:[#allocation10_spill] sm:$0xff] %v17791_v52  ;;  %19615 = vst [vmem:[#allocation11_spill] sm:$0xff] %v17796_v53  ;;  %v17801_v54 = vld [vmem:[%s19600_s6 + $0x41] ss:$8 sm:$0x3]  ;;  %vm9636_vm0 = vcmask 523264  }
 0x226   :  { %19616 = vst [vmem:[#allocation12_spill] sm:$0xff] %v17801_v54  ;;  %v17806_v55 = vld [vmem:[%s19600_s6 + $0x42] ss:$0 sm:$0xff]  ;;  %v8491_v10 = vld [vmem:[%s19595_s1 + $0x8] sm:$0xff]  ;;  %vm15092_vm1 = vmmov 0   ;;  %vm9761_vm2 = vcmask 261120  }
 0x227   :  { %19617 = vst [vmem:[#allocation13_spill] sm:$0xff] %v17806_v55  ;;  %v8504_v56 = vld [vmem:[%s19596_s2 + $0x20] sm:$0xff]  ;;  %v17847_v13 = vadd.f32 %v8491_v10, %v8487_v8  ;;  %v8509_v12 = vld [vmem:[%s19596_s2 + $0x48] sm:$0xff]  ;;  %vm10348_vm3 = vcmask 1043456   ;;  %vm10229_vm5 = vcmask 64512   ;;  %vm10863_vm15 = vcmask 785408  }
 0x228   :  { %v14089_v57 = vcombine.high %v8500_v51, %v8504_v56  ;;  %v14088_v58 = vcombine.low %v8500_v51, %v8504_v56  ;;  %v8508_v59 = vld [vmem:[%s19596_s2 + $0x40] sm:$0xff] }
 0x229   :  { %v8512_v60 = vld [vmem:[%s19596_s2 + $0x60] sm:$0xff]  ;;  %v17859_v18 = vpack.c.bf16 %v17849_v15, %v17847_v13 }
 0x22a   :  { %v14097_v61 = vcombine.high %v8508_v59, %v8512_v60  ;;  %v8516_v62 = vld [vmem:[%s19596_s2 + $0x80] sm:$0xff]  ;;  %9309 = vmatprep.subr.bf16.mxu1 %v14089_v57  ;;  %v14096_v0 = vcombine.low %v8508_v59, %v8512_v60 }
 0x22b   :  { %v8520_v63 = vld [vmem:[%s19596_s2 + $0xa0] sm:$0xff]  ;;  %9310 = vmatpush1.bf16.msra.mxu1 %v14088_v58  ;;  %9341 = vmatprep.mubr.bf16.mxu1 %v17859_v18 }
 0x22c   :  { %9311 = vmatprep.subr.bf16.mxu1 %v14097_v61  ;;  %v14105_v1 = vcombine.high %v8516_v62, %v8520_v63  ;;  %v8524_v2 = vld [vmem:[%s19596_s2 + $0xc0] sm:$0xff]  ;;  %v14104_v4 = vcombine.low %v8516_v62, %v8520_v63 }
 0x22d   :  { %v8528_v3 = vld [vmem:[%s19596_s2 + $0xe0] sm:$0xff] }
 0x22e   :  { %v14113_v5 = vcombine.high %v8524_v2, %v8528_v3  ;;  %v8532_v6 = vld [vmem:[%s19596_s2 + $0x100] sm:$0xff]  ;;  %v14112_v11 = vcombine.low %v8524_v2, %v8528_v3  ;;  %v8488_v2 = vld [vmem:[%s19594_s0 + $0x10] sm:$0xff] }
 0x22f   :  { %9312 = vmatpush1.bf16.msra.mxu1 %v14096_v0  ;;  %v8536_v7 = vld [vmem:[%s19596_s2 + $0x120] sm:$0xff] }
 0x230   :  { %9313 = vmatprep.subr.bf16.mxu1 %v14105_v1  ;;  %v14121_v14 = vcombine.high %v8532_v6, %v8536_v7  ;;  %v8540_v16 = vld [vmem:[%s19596_s2 + $0x140] sm:$0xff]  ;;  %v14120_v19 = vcombine.low %v8532_v6, %v8536_v7  ;;  %v8501_v6 = vld [vmem:[%s19596_s2 + $0x8] sm:$0xff] }
 0x231   :  { %v8544_v17 = vld [vmem:[%s19596_s2 + $0x160] sm:$0xff]  ;;  %v8505_v7 = vld [vmem:[%s19596_s2 + $0x28] sm:$0xff] }
 0x232   :  { %v14129_v20 = vcombine.high %v8540_v16, %v8544_v17  ;;  %v8548_v21 = vld [vmem:[%s19596_s2 + $0x180] sm:$0xff]  ;;  %v14128_v23 = vcombine.low %v8540_v16, %v8544_v17  ;;  %v14090_v17 = vcombine.low %v8501_v6, %v8505_v7 }
 0x233   :  { %9314 = vmatpush1.bf16.msra.mxu1 %v14104_v4  ;;  %v8552_v22 = vld [vmem:[%s19596_s2 + $0x1a0] sm:$0xff]  ;;  %v8492_v4 = vld [vmem:[%s19595_s1 + $0x10] sm:$0xff] }
 0x234   :  { %9315 = vmatprep.subr.bf16.mxu1 %v14113_v5  ;;  %v14137_v24 = vcombine.high %v8548_v21, %v8552_v22  ;;  %v8556_v25 = vld [vmem:[%s19596_s2 + $0x1c0] sm:$0xff]  ;;  %v14136_v27 = vcombine.low %v8548_v21, %v8552_v22  ;;  %v17942_v9 = vadd.f32 %v8492_v4, %v8488_v2  ;;  %v8521_v21 = vld [vmem:[%s19596_s2 + $0xa8] sm:$0xff]  ;;  %v8396_v22 = vlaneseq }
 0x235   :  { %v8560_v26 = vld [vmem:[%s19596_s2 + $0x1e0] sm:$0xff]  ;;  %v8581_v4 = vld [vmem:[%s19596_s2 + $0x288] sm:$0xff] }
 0x236   :  { %v14145_v28 = vcombine.high %v8556_v25, %v8560_v26  ;;  %v8564_v29 = vld [vmem:[%s19596_s2 + $0x200] sm:$0xff]  ;;  %v14144_v31 = vcombine.low %v8556_v25, %v8560_v26 }
 0x237   :  { %9316 = vmatpush1.bf16.msra.mxu1 %v14112_v11  ;;  %v8568_v30 = vld [vmem:[%s19596_s2 + $0x220] sm:$0xff]  ;;  %v14091_v11 = vcombine.high %v8501_v6, %v8505_v7 }
 0x238   :  { %9317 = vmatprep.subr.bf16.mxu1 %v14121_v14  ;;  %v14153_v32 = vcombine.high %v8564_v29, %v8568_v30  ;;  %v8572_v33 = vld [vmem:[%s19596_s2 + $0x240] sm:$0xff]  ;;  %v14152_v35 = vcombine.low %v8564_v29, %v8568_v30  ;;  %v8513_v14 = vld [vmem:[%s19596_s2 + $0x68] sm:$0xff] }
 0x239   :  { %v8576_v34 = vld [vmem:[%s19596_s2 + $0x260] sm:$0xff]  ;;  %v8525_v29 = vld [vmem:[%s19596_s2 + $0xc8] sm:$0xff] }
 0x23a   :  { %v8580_v36 = vld [vmem:[%s19596_s2 + $0x280] sm:$0xff]  ;;  %v14161_v38 = vcombine.high %v8572_v33, %v8576_v34  ;;  %v14160_v39 = vcombine.low %v8572_v33, %v8576_v34  ;;  %v8529_v30 = vld [vmem:[%s19596_s2 + $0xe8] sm:$0xff]  ;;  %v17985_v33 = vshrl.u32 %v8396_v22, 7 }
 0x23b   :  { %9318 = vmatpush1.bf16.msra.mxu1 %v14120_v19  ;;  %v8584_v37 = vld [vmem:[%s19596_s2 + $0x2a0] sm:$0xff]  ;;  %v14099_v19 = vcombine.high %v8509_v12, %v8513_v14 }
 0x23c   :  { %9319 = vmatprep.subr.bf16.mxu1 %v14129_v20  ;;  %v8588_v40 = vld [vmem:[%s19596_s2 + $0x2c0] sm:$0xff]  ;;  %v14169_v42 = vcombine.high %v8580_v36, %v8584_v37  ;;  %v14168_v43 = vcombine.low %v8580_v36, %v8584_v37  ;;  %v8517_v20 = vld [vmem:[%s19596_s2 + $0x88] sm:$0xff]  ;;  %v14115_v36 = vcombine.high %v8525_v29, %v8529_v30 }
 0x23d   :  { %v8592_v41 = vld [vmem:[%s19596_s2 + $0x2e0] sm:$0xff]  ;;  %v14107_v26 = vcombine.high %v8517_v20, %v8521_v21  ;;  %v14106_v34 = vcombine.low %v8517_v20, %v8521_v21  ;;  %v8533_v37 = vld [vmem:[%s19596_s2 + $0x108] sm:$0xff] }
 0x23e   :  { %v8596_v44 = vld [vmem:[%s19596_s2 + $0x300] sm:$0xff]  ;;  %v14177_v46 = vcombine.high %v8588_v40, %v8592_v41  ;;  %v14176_v47 = vcombine.low %v8588_v40, %v8592_v41  ;;  %v14114_v41 = vcombine.low %v8525_v29, %v8529_v30 }
 0x23f   :  { %9320 = vmatpush1.bf16.msra.mxu1 %v14128_v23  ;;  %v8600_v45 = vld [vmem:[%s19596_s2 + $0x320] sm:$0xff]  ;;  %v14098_v23 = vcombine.low %v8509_v12, %v8513_v14 }
 0x240   :  { %9321 = vmatprep.subr.bf16.mxu1 %v14137_v24  ;;  %v14185_v48 = vcombine.high %v8596_v44, %v8600_v45  ;;  %v8604_v49 = vld [vmem:[%s19596_s2 + $0x340] sm:$0xff]  ;;  %v14184_v56 = vcombine.low %v8596_v44, %v8600_v45  ;;  %v8545_v44 = vld [vmem:[%s19596_s2 + $0x168] sm:$0xff] }
 0x241   :  { %v8608_v51 = vld [vmem:[%s19596_s2 + $0x360] sm:$0xff] }
 0x242   :  { %v14193_v57 = vcombine.high %v8604_v49, %v8608_v51  ;;  %v8612_v58 = vld [vmem:[%s19596_s2 + $0x380] sm:$0xff]  ;;  %v14192_v60 = vcombine.low %v8604_v49, %v8608_v51 }
 0x243   :  { %9322 = vmatpush1.bf16.msra.mxu1 %v14136_v27  ;;  %v8616_v59 = vld [vmem:[%s19596_s2 + $0x3a0] sm:$0xff] }
 0x244   :  { %9323 = vmatprep.subr.bf16.mxu1 %v14145_v28  ;;  %v14201_v61 = vcombine.high %v8612_v58, %v8616_v59  ;;  %v8620_v62 = vld [vmem:[%s19596_s2 + $0x3c0] sm:$0xff]  ;;  %v14200_v1 = vcombine.low %v8612_v58, %v8616_v59 }
 0x245   :  { %v8624_v63 = vld [vmem:[%s19596_s2 + $0x3e0] sm:$0xff] }
 0x246   :  { %v8486_v0 = vld [vmem:[%s19594_s0] sm:$0xff]  ;;  %v14209_v5 = vcombine.high %v8620_v62, %v8624_v63  ;;  %v14208_v10 = vcombine.low %v8620_v62, %v8624_v63 }
 0x247   :  { %9324 = vmatpush1.bf16.msra.mxu1 %v14144_v31  ;;  %v8490_v3 = vld [vmem:[%s19595_s1] sm:$0xff]  ;;  %s15088_s1 = smov 96  }
 0x248   :  { %9325 = vmatprep.subr.bf16.mxu1 %v14153_v32  ;;  %v17940_v8 = vadd.f32 %v8490_v3, %v8486_v0  ;;  %v14080_v24 = vld [vmem:[%s19600_s6 + $0x4] ss:$8 sm:$0xf]  ;;  %v14082_v27 = vld [vmem:[%s19600_s6 + $0x5] ss:$8 sm:$0xf] }
 0x249   :  { %v14081_v25 = vld [vmem:[%s19600_s6 + $0x4] ss:$8 sm:$0xf0]  ;;  %v14083_v28 = vld [vmem:[%s19600_s6 + $0x5] ss:$8 sm:$0xf0] }
 0x24a   :  { %v17952_v16 = vpack.c.bf16 %v17942_v9, %v17940_v8  ;;  %v17980_v31 = vor.u32 %v14081_v25, %v14080_v24  ;;  %v17982_v32 = vor.u32 %v14083_v28, %v14082_v27  ;;  %v8573_v0 = vld [vmem:[%s19596_s2 + $0x248] sm:$0xff] }
 0x24b   :  { %9326 = vmatpush1.bf16.msra.mxu1 %v14152_v35  ;;  %v17988_v35 = vsub.s32 0, %v17985_v33  ;;  %v8609_v24 = vld [vmem:[%s19596_s2 + $0x368] sm:$0xff] }
 0x24c   :  { %9327 = vmatprep.subr.bf16.mxu1 %v14161_v38  ;;  %v8537_v38 = vld [vmem:[%s19596_s2 + $0x128] sm:$0xff] }
 0x24d   :  { %v14122_v45 = vcombine.low %v8533_v37, %v8537_v38  ;;  %v8613_v27 = vld [vmem:[%s19596_s2 + $0x388] sm:$0xff] }
 0x24e   :  { %v8617_v28 = vld [vmem:[%s19596_s2 + $0x3a8] sm:$0xff] }
 0x24f   :  { %9328 = vmatpush1.bf16.msra.mxu1 %v14160_v39  ;;  %v14203_v30 = vcombine.high %v8613_v27, %v8617_v28 }
 0x250   :  { %9329 = vmatprep.subr.bf16.mxu1 %v14169_v42  ;;  %v14123_v42 = vcombine.high %v8533_v37, %v8537_v38  ;;  %v14202_v37 = vcombine.low %v8613_v27, %v8617_v28  ;;  %v18130_v27 = vsub.s32 2, %v17985_v33 }
 0x253   :  { %9330 = vmatpush1.bf16.msra.mxu1 %v14168_v43  ;;  %v8541_v43 = vld [vmem:[%s19596_s2 + $0x148] sm:$0xff] }
 0x254   :  { %9331 = vmatprep.subr.bf16.mxu1 %v14177_v46  ;;  %v14131_v46 = vcombine.high %v8541_v43, %v8545_v44  ;;  %v14130_v49 = vcombine.low %v8541_v43, %v8545_v44 }
 0x257   :  { %9332 = vmatpush1.bf16.msra.mxu1 %v14176_v47  ;;  %v8549_v47 = vld [vmem:[%s19596_s2 + $0x188] sm:$0xff] }
 0x258   :  { %9333 = vmatprep.subr.bf16.mxu1 %v14185_v48  ;;  %v8553_v48 = vld [vmem:[%s19596_s2 + $0x1a8] sm:$0xff] }
 0x259   :  { %v14139_v51 = vcombine.high %v8549_v47, %v8553_v48  ;;  %v14138_v58 = vcombine.low %v8549_v47, %v8553_v48 }
 0x25b   :  { %9334 = vmatpush1.bf16.msra.mxu1 %v14184_v56  ;;  %v8557_v56 = vld [vmem:[%s19596_s2 + $0x1c8] sm:$0xff] }
 0x25c   :  { %9335 = vmatprep.subr.bf16.mxu1 %v14193_v57  ;;  %v8561_v57 = vld [vmem:[%s19596_s2 + $0x1e8] sm:$0xff] }
 0x25d   :  { %v14147_v59 = vcombine.high %v8557_v56, %v8561_v57  ;;  %v14146_v62 = vcombine.low %v8557_v56, %v8561_v57 }
 0x25f   :  { %9336 = vmatpush1.bf16.msra.mxu1 %v14192_v60  ;;  %v8565_v60 = vld [vmem:[%s19596_s2 + $0x208] sm:$0xff] }
 0x260   :  { %9337 = vmatprep.subr.bf16.mxu1 %v14201_v61  ;;  %v8569_v61 = vld [vmem:[%s19596_s2 + $0x228] sm:$0xff] }
 0x261   :  { %v14155_v63 = vcombine.high %v8565_v60, %v8569_v61  ;;  %v14154_v2 = vcombine.low %v8565_v60, %v8569_v61 }
 0x263   :  { %9338 = vmatpush1.bf16.msra.mxu1 %v14200_v1  ;;  %v8577_v1 = vld [vmem:[%s19596_s2 + $0x268] sm:$0xff] }
 0x264   :  { %9339 = vmatprep.subr.bf16.mxu1 %v14209_v5  ;;  %v14163_v3 = vcombine.high %v8573_v0, %v8577_v1  ;;  %v8585_v5 = vld [vmem:[%s19596_s2 + $0x2a8] sm:$0xff]  ;;  %v14162_v6 = vcombine.low %v8573_v0, %v8577_v1 }
 0x265   :  { %v14171_v7 = vcombine.high %v8581_v4, %v8585_v5  ;;  %v14170_v12 = vcombine.low %v8581_v4, %v8585_v5 }
 0x267   :  { %9340 = vmatpush1.bf16.msra.mxu1 %v14208_v10  ;;  %v8589_v10 = vld [vmem:[%s19596_s2 + $0x2c8] sm:$0xff] }
 0x268   :  { %9352 = vmatprep.subr.bf16.mxu1 %v14091_v11  ;;  %v8593_v11 = vld [vmem:[%s19596_s2 + $0x2e8] sm:$0xff] }
 0x269   :  { %v14179_v14 = vcombine.high %v8589_v10, %v8593_v11  ;;  %v14178_v20 = vcombine.low %v8589_v10, %v8593_v11 }
 0x26a   :  { %9342 = vmatmul.mubr.bf16.vlgmr.msra.gmra.mrb[0].mxu1 %v17952_v16 }
 0x26b   :  { %9353 = vmatpush1.bf16.msra.mxu1 %v14090_v17  ;;  %9384 = vmatprep.mubr.bf16.mxu1 %v17859_v18  ;;  %v8597_v17 = vld [vmem:[%s19596_s2 + $0x308] sm:$0xff] }
 0x26c   :  { %9354 = vmatprep.subr.bf16.mxu1 %v14099_v19  ;;  %v8601_v19 = vld [vmem:[%s19596_s2 + $0x328] sm:$0xff] }
 0x26d   :  { %v14187_v21 = vcombine.high %v8597_v17, %v8601_v19  ;;  %v14186_v25 = vcombine.low %v8597_v17, %v8601_v19  ;;  %v18117_v17 = vsub.s32 1, %v17985_v33 }
 0x26f   :  { %9355 = vmatpush1.bf16.msra.mxu1 %v14098_v23  ;;  %v8605_v23 = vld [vmem:[%s19596_s2 + $0x348] sm:$0xff] }
 0x270   :  { %9356 = vmatprep.subr.bf16.mxu1 %v14107_v26  ;;  %v14195_v26 = vcombine.high %v8605_v23, %v8609_v24  ;;  %v14194_v29 = vcombine.low %v8605_v23, %v8609_v24  ;;  %v8566_v24 = vld [vmem:[%s19596_s2 + $0x210] sm:$0xff] }
 0x273   :  { %9357 = vmatpush1.bf16.msra.mxu1 %v14106_v34  ;;  %v8621_v34 = vld [vmem:[%s19596_s2 + $0x3c8] sm:$0xff] }
 0x274   :  { %9358 = vmatprep.subr.bf16.mxu1 %v14115_v36  ;;  %v8625_v36 = vld [vmem:[%s19596_s2 + $0x3e8] sm:$0xff] }
 0x275   :  { %v14211_v38 = vcombine.high %v8621_v34, %v8625_v36  ;;  %v14210_v43 = vcombine.low %v8621_v34, %v8625_v36 }
 0x277   :  { %9359 = vmatpush1.bf16.msra.mxu1 %v14114_v41  ;;  %v8502_v41 = vld [vmem:[%s19596_s2 + $0x10] sm:$0xff] }
 0x278   :  { %9360 = vmatprep.subr.bf16.mxu1 %v14123_v42  ;;  %v8506_v42 = vld [vmem:[%s19596_s2 + $0x30] sm:$0xff] }
 0x279   :  { %v14093_v44 = vcombine.high %v8502_v41, %v8506_v42  ;;  %v14092_v47 = vcombine.low %v8502_v41, %v8506_v42  ;;  %v8582_v41 = vld [vmem:[%s19596_s2 + $0x290] sm:$0xff] }
 0x27a   :  { %v8586_v42 = vld [vmem:[%s19596_s2 + $0x2b0] sm:$0xff] }
 0x27b   :  { %9361 = vmatpush1.bf16.msra.mxu1 %v14122_v45  ;;  %v8510_v45 = vld [vmem:[%s19596_s2 + $0x50] sm:$0xff] }
 0x27c   :  { %9362 = vmatprep.subr.bf16.mxu1 %v14131_v46  ;;  %v8514_v46 = vld [vmem:[%s19596_s2 + $0x70] sm:$0xff] }
 0x27d   :  { %v14101_v48 = vcombine.high %v8510_v45, %v8514_v46  ;;  %v14100_v56 = vcombine.low %v8510_v45, %v8514_v46  ;;  %v8590_v45 = vld [vmem:[%s19596_s2 + $0x2d0] sm:$0xff] }
 0x27e   :  { %v8594_v46 = vld [vmem:[%s19596_s2 + $0x2f0] sm:$0xff] }
 0x27f   :  { %9363 = vmatpush1.bf16.msra.mxu1 %v14130_v49  ;;  %v8518_v49 = vld [vmem:[%s19596_s2 + $0x90] sm:$0xff] }
 0x280   :  { %9364 = vmatprep.subr.bf16.mxu1 %v14139_v51  ;;  %v8522_v51 = vld [vmem:[%s19596_s2 + $0xb0] sm:$0xff] }
 0x281   :  { %v14109_v57 = vcombine.high %v8518_v49, %v8522_v51  ;;  %v14108_v60 = vcombine.low %v8518_v49, %v8522_v51  ;;  %v8598_v49 = vld [vmem:[%s19596_s2 + $0x310] sm:$0xff] }
 0x282   :  { %v8602_v51 = vld [vmem:[%s19596_s2 + $0x330] sm:$0xff] }
 0x283   :  { %9365 = vmatpush1.bf16.msra.mxu1 %v14138_v58  ;;  %v8526_v58 = vld [vmem:[%s19596_s2 + $0xd0] sm:$0xff] }
 0x284   :  { %9366 = vmatprep.subr.bf16.mxu1 %v14147_v59  ;;  %v8530_v59 = vld [vmem:[%s19596_s2 + $0xf0] sm:$0xff] }
 0x285   :  { %v14117_v61 = vcombine.high %v8526_v58, %v8530_v59  ;;  %v14116_v0 = vcombine.low %v8526_v58, %v8530_v59  ;;  %v8606_v58 = vld [vmem:[%s19596_s2 + $0x350] sm:$0xff] }
 0x286   :  { %v8610_v59 = vld [vmem:[%s19596_s2 + $0x370] sm:$0xff] }
 0x287   :  { %9367 = vmatpush1.bf16.msra.mxu1 %v14146_v62  ;;  %v8534_v62 = vld [vmem:[%s19596_s2 + $0x110] sm:$0xff] }
 0x288   :  { %9368 = vmatprep.subr.bf16.mxu1 %v14155_v63  ;;  %v8538_v63 = vld [vmem:[%s19596_s2 + $0x130] sm:$0xff] }
 0x289   :  { %v14125_v1 = vcombine.high %v8534_v62, %v8538_v63  ;;  %v14124_v4 = vcombine.low %v8534_v62, %v8538_v63  ;;  %v8614_v62 = vld [vmem:[%s19596_s2 + $0x390] sm:$0xff] }
 0x28a   :  { %v8618_v63 = vld [vmem:[%s19596_s2 + $0x3b0] sm:$0xff] }
 0x28b   :  { %9369 = vmatpush1.bf16.msra.mxu1 %v14154_v2  ;;  %v8542_v2 = vld [vmem:[%s19596_s2 + $0x150] sm:$0xff] }
 0x28c   :  { %9370 = vmatprep.subr.bf16.mxu1 %v14163_v3  ;;  %v8546_v3 = vld [vmem:[%s19596_s2 + $0x170] sm:$0xff] }
 0x28d   :  { %v14133_v5 = vcombine.high %v8542_v2, %v8546_v3  ;;  %v14132_v10 = vcombine.low %v8542_v2, %v8546_v3  ;;  %v8622_v2 = vld [vmem:[%s19596_s2 + $0x3d0] sm:$0xff] }
 0x28e   :  { %v8626_v3 = vld [vmem:[%s19596_s2 + $0x3f0] sm:$0xff] }
 0x28f   :  { %9371 = vmatpush1.bf16.msra.mxu1 %v14162_v6  ;;  %v8550_v6 = vld [vmem:[%s19596_s2 + $0x190] sm:$0xff] }
 0x290   :  { %9372 = vmatprep.subr.bf16.mxu1 %v14171_v7  ;;  %v8554_v7 = vld [vmem:[%s19596_s2 + $0x1b0] sm:$0xff] }
 0x291   :  { %v14141_v11 = vcombine.high %v8550_v6, %v8554_v7  ;;  %v14140_v19 = vcombine.low %v8550_v6, %v8554_v7  ;;  %v14212_v6 = vcombine.low %v8622_v2, %v8626_v3  ;;  %v18181_v7 = vsub.s32 3, %v17985_v33 }
 0x293   :  { %9373 = vmatpush1.bf16.msra.mxu1 %v14170_v12  ;;  %v8558_v12 = vld [vmem:[%s19596_s2 + $0x1d0] sm:$0xff] }
 0x294   :  { %9374 = vmatprep.subr.bf16.mxu1 %v14179_v14  ;;  %v8562_v14 = vld [vmem:[%s19596_s2 + $0x1f0] sm:$0xff] }
 0x297   :  { %9375 = vmatpush1.bf16.msra.mxu1 %v14178_v20  ;;  %v14149_v20 = vcombine.high %v8558_v12, %v8562_v14 }
 0x298   :  { %9376 = vmatprep.subr.bf16.mxu1 %v14187_v21 }
 0x29b   :  { %9377 = vmatpush1.bf16.msra.mxu1 %v14186_v25  ;;  %v8570_v25 = vld [vmem:[%s19596_s2 + $0x230] sm:$0xff] }
 0x29c   :  { %9378 = vmatprep.subr.bf16.mxu1 %v14195_v26  ;;  %v14148_v26 = vcombine.low %v8558_v12, %v8562_v14  ;;  %v14157_v28 = vcombine.high %v8566_v24, %v8570_v25  ;;  %v8378_v12 = vld [vmem:[%s19600_s6] ss:$8 sm:$0xf] }
 0x29d   :  { %v8379_v14 = vld [vmem:[%s19600_s6] ss:$8 sm:$0xf0] }
 0x29f   :  { %9379 = vmatpush1.bf16.msra.mxu1 %v14194_v29  ;;  %v8574_v29 = vld [vmem:[%s19596_s2 + $0x250] sm:$0xff] }
 0x2a0   :  { %9380 = vmatprep.subr.bf16.mxu1 %v14203_v30  ;;  %v8578_v30 = vld [vmem:[%s19596_s2 + $0x270] sm:$0xff] }
 0x2a3   :  { %9381 = vmatpush1.bf16.msra.mxu1 %v14202_v37  ;;  %v14156_v37 = vcombine.low %v8566_v24, %v8570_v25 }
 0x2a4   :  { %9382 = vmatprep.subr.bf16.mxu1 %v14211_v38  ;;  %v14165_v38 = vcombine.high %v8574_v29, %v8578_v30 }
 0x2a7   :  { %9383 = vmatpush1.bf16.msra.mxu1 %v14210_v43  ;;  %v14164_v43 = vcombine.low %v8574_v29, %v8578_v30 }
 0x2a8   :  { %9395 = vmatprep.subr.bf16.mxu1 %v14093_v44  ;;  %v14173_v44 = vcombine.high %v8582_v41, %v8586_v42 }
 0x2aa   :  { %9385 = vmatmul.mubr.bf16.vlgmr.msra.gmra.mrb[4].mxu1 %v17952_v16 }
 0x2ab   :  { %9396 = vmatpush1.bf16.msra.mxu1 %v14092_v47  ;;  %9427 = vmatprep.mubr.bf16.mxu1 %v17859_v18  ;;  %v14172_v47 = vcombine.low %v8582_v41, %v8586_v42 }
 0x2ac   :  { %9397 = vmatprep.subr.bf16.mxu1 %v14101_v48  ;;  %v14181_v48 = vcombine.high %v8590_v45, %v8594_v46 }
 0x2af   :  { %9398 = vmatpush1.bf16.msra.mxu1 %v14100_v56  ;;  %v14180_v56 = vcombine.low %v8590_v45, %v8594_v46 }
 0x2b0   :  { %9399 = vmatprep.subr.bf16.mxu1 %v14109_v57  ;;  %v14189_v57 = vcombine.high %v8598_v49, %v8602_v51 }
 0x2b3   :  { %9400 = vmatpush1.bf16.msra.mxu1 %v14108_v60  ;;  %v14188_v60 = vcombine.low %v8598_v49, %v8602_v51 }
 0x2b4   :  { %9401 = vmatprep.subr.bf16.mxu1 %v14117_v61  ;;  %v14197_v61 = vcombine.high %v8606_v58, %v8610_v59 }
 0x2b7   :  { %9402 = vmatpush1.bf16.msra.mxu1 %v14116_v0  ;;  %v14196_v0 = vcombine.low %v8606_v58, %v8610_v59 }
 0x2b8   :  { %9403 = vmatprep.subr.bf16.mxu1 %v14125_v1  ;;  %v14205_v1 = vcombine.high %v8614_v62, %v8618_v63 }
 0x2bb   :  { %9404 = vmatpush1.bf16.msra.mxu1 %v14124_v4  ;;  %v14204_v4 = vcombine.low %v8614_v62, %v8618_v63 }
 0x2bc   :  { %9405 = vmatprep.subr.bf16.mxu1 %v14133_v5  ;;  %v14213_v5 = vcombine.high %v8622_v2, %v8626_v3 }
 0x2bf   :  { %9406 = vmatpush1.bf16.msra.mxu1 %v14132_v10 }
 0x2c0   :  { %9407 = vmatprep.subr.bf16.mxu1 %v14141_v11 }
 0x2c3   :  { %9408 = vmatpush1.bf16.msra.mxu1 %v14140_v19  ;;  %v18194_v19 = vsub.s32 4, %v17985_v33 }
 0x2c4   :  { %9409 = vmatprep.subr.bf16.mxu1 %v14149_v20 }
 0x2c7   :  { %9410 = vmatpush1.bf16.msra.mxu1 %v14148_v26  ;;  %v18205_v26 = vsub.s32 5, %v17985_v33 }
 0x2c8   :  { %9411 = vmatprep.subr.bf16.mxu1 %v14157_v28 }
 0x2cb   :  { %9412 = vmatpush1.bf16.msra.mxu1 %v14156_v37 }
 0x2cc   :  { %9413 = vmatprep.subr.bf16.mxu1 %v14165_v38 }
 0x2cf   :  { %9414 = vmatpush1.bf16.msra.mxu1 %v14164_v43 }
 0x2d0   :  { %9415 = vmatprep.subr.bf16.mxu1 %v14173_v44 }
 0x2d3   :  { %9416 = vmatpush1.bf16.msra.mxu1 %v14172_v47 }
 0x2d4   :  { %9417 = vmatprep.subr.bf16.mxu1 %v14181_v48 }
 0x2d7   :  { %9418 = vmatpush1.bf16.msra.mxu1 %v14180_v56 }
 0x2d8   :  { %9419 = vmatprep.subr.bf16.mxu1 %v14189_v57 }
 0x2db   :  { %9420 = vmatpush1.bf16.msra.mxu1 %v14188_v60 }
 0x2dc   :  { %9421 = vmatprep.subr.bf16.mxu1 %v14197_v61 }
 0x2df   :  { %9422 = vmatpush1.bf16.msra.mxu1 %v14196_v0 }
 0x2e0   :  { %9423 = vmatprep.subr.bf16.mxu1 %v14205_v1 }
 0x2e3   :  { %9424 = vmatpush1.bf16.msra.mxu1 %v14204_v4 }
 0x2e4   :  { %9425 = vmatprep.subr.bf16.mxu1 %v14213_v5 }
 0x2e7   :  { %9426 = vmatpush1.bf16.msra.mxu1 %v14212_v6 }
 0x2ea   :  { %9428 = vmatmul.mubr.bf16.vlgmr.msra.gmra.mrb[8].mxu1 %v17952_v16 }
 0x2eb   :  { %9470 = vmatprep.mubr.bf16.mxu1 %v17859_v18  ;;  %v18196_v18 = vor.u32 %v8379_v14, %v8378_v12 }
 0x2ed   :  { %v8632_v25 = vrot.slane %v18196_v18, %v17988_v35  ;;  %v8636_v41 = vrot.slane %v18196_v18, %v18117_v17  ;;  %v8640_v47 = vrot.slane %v18196_v18, %v18130_v27  ;;  %v8644_v48 = vrot.slane %v18196_v18, %v18181_v7 }
 0x2ee   :  { %v8648_v0 = vrot.slane %v18196_v18, %v18194_v19  ;;  %v18238_v4 = vrot.slane %v18196_v18, %v18205_v26 }
 0x33d   :  { %v9343_v28 = vpop.f32.mrb[0].mxu1 }
 0x33e   :  { %v9344_v29 = vadd.f32 %v9343_v28, %v8632_v25  ;;  %v9345_v30 = vpop.f32.mrb[1].mxu1 }
 0x33f   :  { %v9347_v42 = vpop.f32.mrb[2].mxu1 }
 0x340   :  { %v18213_v43 = vpack.c.bf16 %v9344_v29, %v9344_v29  ;;  %v18215_v44 = vadd.f32 %v9347_v42, %v8632_v25  ;;  %v9349_v45 = vpop.f32.mrb[3].mxu1  ;;  %v9346_v25 = vadd.f32 %v9345_v30, %v8636_v41  ;;  %v8503_v30 = vld [vmem:[%s19596_s2 + $0x18] sm:$0xff] }
 0x341   :  { %v18217_v46 = vadd.f32 %v9349_v45, %v8636_v41  ;;  %v8507_v41 = vld [vmem:[%s19596_s2 + $0x38] sm:$0xff] }
 0x342   :  { %9806 = vrot.lane.b32.xlu1 %v18213_v43, %s15088_s1  ;;  %v18250_v28 = vpack.c.bf16 %v9346_v25, %v9346_v25  ;;  %v14095_v42 = vcombine.high %v8503_v30, %v8507_v41  ;;  %v14094_v45 = vcombine.low %v8503_v30, %v8507_v41  ;;  %v8543_v30 = vld [vmem:[%s19596_s2 + $0x158] sm:$0xff] }
 0x343   :  { %v8547_v41 = vld [vmem:[%s19596_s2 + $0x178] sm:$0xff] }
 0x344   :  { %9438 = vmatprep.subr.bf16.mxu1 %v14095_v42 }
 0x345   :  { %9439 = vmatpush1.bf16.msra.mxu1 %v14094_v45  ;;  %v14135_v45 = vcombine.high %v8543_v30, %v8547_v41 }
 0x37d   :  { %v9386_v49 = vpop.f32.mrb[4].mxu1 }
 0x37e   :  { %v9387_v51 = vadd.f32 %v9386_v49, %v8640_v47  ;;  %v9388_v56 = vpop.f32.mrb[5].mxu1 }
 0x37f   :  { %v9389_v57 = vadd.f32 %v9388_v56, %v8644_v48  ;;  %v9390_v58 = vpop.f32.mrb[6].mxu1  ;;  %v8519_v56 = vld [vmem:[%s19596_s2 + $0x98] sm:$0xff] }
 0x380   :  { %v18225_v59 = vadd.f32 %v9390_v58, %v8640_v47  ;;  %v9392_v60 = vpop.f32.mrb[7].mxu1  ;;  %v18258_v29 = vpack.c.bf16 %v9387_v51, %v9387_v51  ;;  %v8511_v47 = vld [vmem:[%s19596_s2 + $0x58] sm:$0xff] }
 0x381   :  { %v18227_v61 = vadd.f32 %v9392_v60, %v8644_v48  ;;  %v14725_v62 = vpack.i.bf16 %v9389_v57, %v9387_v51  ;;  %v8515_v48 = vld [vmem:[%s19596_s2 + $0x78] sm:$0xff] }
 0x382   :  { %v14103_v49 = vcombine.high %v8511_v47, %v8515_v48  ;;  %v14102_v51 = vcombine.low %v8511_v47, %v8515_v48  ;;  %v8523_v57 = vld [vmem:[%s19596_s2 + $0xb8] sm:$0xff]  ;;  %v14134_v47 = vcombine.low %v8543_v30, %v8547_v41 }
 0x383   :  { %v14812_v63 = vpack.i.bf16 %v18227_v61, %v18225_v59  ;;  %14726 = vrot.lane.b32.xlu0 %v14725_v62, %s15089_s25  ;;  %v14111_v58 = vcombine.high %v8519_v56, %v8523_v57  ;;  %v14110_v60 = vcombine.low %v8519_v56, %v8523_v57  ;;  %v8527_v62 = vld [vmem:[%s19596_s2 + $0xd8] sm:$0xff]  ;;  %v18387_v61 = vsub.s32 7, %v17985_v33 }
 0x384   :  { %9440 = vmatprep.subr.bf16.mxu1 %v14103_v49  ;;  %v8551_v48 = vld [vmem:[%s19596_s2 + $0x198] sm:$0xff] }
 0x385   :  { %9441 = vmatpush1.bf16.msra.mxu1 %v14102_v51  ;;  %v8555_v49 = vld [vmem:[%s19596_s2 + $0x1b8] sm:$0xff]  ;;  %19619 = vst [vmem:[#allocation15_spill] sm:$0xff] %v18387_v61 }
 0x386   :  { %9442 = vmatprep.subr.bf16.mxu1 %v14111_v58  ;;  %v14143_v51 = vcombine.high %v8551_v48, %v8555_v49  ;;  %v14142_v56 = vcombine.low %v8551_v48, %v8555_v49  ;;  %v8559_v57 = vld [vmem:[%s19596_s2 + $0x1d8] sm:$0xff] }
 0x387   :  { %v8563_v58 = vld [vmem:[%s19596_s2 + $0x1f8] sm:$0xff] }
 0x388   :  { %v8583_v41 = vld [vmem:[%s19596_s2 + $0x298] sm:$0xff] }
 0x389   :  { %9443 = vmatpush1.bf16.msra.mxu1 %v14110_v60  ;;  %v14151_v60 = vcombine.high %v8559_v57, %v8563_v58  ;;  %v8591_v48 = vld [vmem:[%s19596_s2 + $0x2d8] sm:$0xff] }
 0x38a   :  { %v8595_v49 = vld [vmem:[%s19596_s2 + $0x2f8] sm:$0xff] }
 0x3bd   :  { %v9429_v1 = vpop.f32.mrb[8].mxu1 }
 0x3be   :  { %v9430_v2 = vadd.f32 %v9429_v1, %v8648_v0  ;;  %v18234_v3 = vpop.f32.mrb[9].mxu1  ;;  %v8535_v1 = vld [vmem:[%s19596_s2 + $0x118] sm:$0xff] }
 0x3bf   :  { %v9433_v5 = vpop.f32.mrb[10].mxu1 }
 0x3c0   :  { %v18240_v6 = vadd.f32 %v9433_v5, %v8648_v0  ;;  %v9435_v12 = vpop.f32.mrb[11].mxu1  ;;  %9634 = vrot.lane.b32.xlu0 %v9430_v2, %s15089_s25  ;;  %v8531_v0 = vld [vmem:[%s19596_s2 + $0xf8] sm:$0xff] }
 0x3c1   :  { %v18244_v14 = vadd.f32 %v9435_v12, %v18238_v4  ;;  %v14118_v2 = vcombine.low %v8527_v62, %v8531_v0  ;;  %v14119_v5 = vcombine.high %v8527_v62, %v8531_v0  ;;  %v8539_v12 = vld [vmem:[%s19596_s2 + $0x138] sm:$0xff]  ;;  %v14150_v62 = vcombine.low %v8559_v57, %v8563_v58 }
 0x3c2   :  { %v14127_v25 = vcombine.high %v8535_v1, %v8539_v12  ;;  %v14126_v42 = vcombine.low %v8535_v1, %v8539_v12  ;;  %v8567_v0 = vld [vmem:[%s19596_s2 + $0x218] sm:$0xff] }
 0x3c3   :  { %9444 = vmatprep.subr.bf16.mxu1 %v14119_v5  ;;  %v8571_v1 = vld [vmem:[%s19596_s2 + $0x238] sm:$0xff] }
 0x3c4   :  { %9851 = vrot.lane.b32.xlu0 %v18213_v43, %s15089_s25  ;;  %9445 = vmatpush1.bf16.msra.mxu1 %v14118_v2  ;;  %v8575_v2 = vld [vmem:[%s19596_s2 + $0x258] sm:$0xff]  ;;  %v14158_v5 = vcombine.low %v8567_v0, %v8571_v1  ;;  %v14159_v12 = vcombine.high %v8567_v0, %v8571_v1 }
 0x3c5   :  { %9446 = vmatprep.subr.bf16.mxu1 %v14127_v25  ;;  %v8579_v25 = vld [vmem:[%s19596_s2 + $0x278] sm:$0xff] }
 0x3c6   :  { %v14167_v30 = vcombine.high %v8575_v2, %v8579_v25  ;;  %v8599_v57 = vld [vmem:[%s19596_s2 + $0x318] sm:$0xff] }
 0x3c7   :  { %v8603_v58 = vld [vmem:[%s19596_s2 + $0x338] sm:$0xff] }
 0x3c8   :  { %9896 = vrot.lane.b32.xlu0 %v18213_v43, %s15090_s26  ;;  %9447 = vmatpush1.bf16.msra.mxu1 %v14126_v42  ;;  %v8587_v42 = vld [vmem:[%s19596_s2 + $0x2b8] sm:$0xff] }
 0x3c9   :  { %9448 = vmatprep.subr.bf16.mxu1 %v14135_v45  ;;  %v14166_v45 = vcombine.low %v8575_v2, %v8579_v25  ;;  %v8607_v0 = vld [vmem:[%s19596_s2 + $0x358] sm:$0xff]  ;;  %v14190_v2 = vcombine.low %v8599_v57, %v8603_v58 }
 0x3ca   :  { %v8611_v1 = vld [vmem:[%s19596_s2 + $0x378] sm:$0xff] }
 0x3cb   :  { %v8619_v25 = vld [vmem:[%s19596_s2 + $0x3b8] sm:$0xff] }
 0x3cc   :  { %9985 = vrot.lane.b32.xlu0 %v18250_v28, %s15088_s1  ;;  %9449 = vmatpush1.bf16.msra.mxu1 %v14134_v47  ;;  %v14175_v47 = vcombine.high %v8583_v41, %v8587_v42 }
 0x3cd   :  { %9450 = vmatprep.subr.bf16.mxu1 %v14143_v51  ;;  %v14174_v51 = vcombine.low %v8583_v41, %v8587_v42  ;;  %v8623_v42 = vld [vmem:[%s19596_s2 + $0x3d8] sm:$0xff] }
 0x3d0   :  { %10030 = vrot.lane.b32.xlu0 %v18250_v28, %s15089_s25  ;;  %9451 = vmatpush1.bf16.msra.mxu1 %v14142_v56  ;;  %v14183_v56 = vcombine.high %v8591_v48, %v8595_v49 }
 0x3d1   :  { %9452 = vmatprep.subr.bf16.mxu1 %v14151_v60  ;;  %v14182_v60 = vcombine.low %v8591_v48, %v8595_v49 }
 0x3d4   :  { %10075 = vrot.lane.b32.xlu0 %v18250_v28, %s15090_s26  ;;  %9453 = vmatpush1.bf16.msra.mxu1 %v14150_v62  ;;  %v14191_v62 = vcombine.high %v8599_v57, %v8603_v58 }
 0x3d5   :  { %9454 = vmatprep.subr.bf16.mxu1 %v14159_v12  ;;  %v8615_v12 = vld [vmem:[%s19596_s2 + $0x398] sm:$0xff] }
 0x3d6   :  { %v14207_v41 = vcombine.high %v8615_v12, %v8619_v25  ;;  %v14206_v48 = vcombine.low %v8615_v12, %v8619_v25  ;;  %v9807_v12 = vpop.permute.xlu1 %9806 }
 0x3d8   :  { %10164 = vrot.lane.b32.xlu0 %v18258_v29, %s15088_s1  ;;  %9455 = vmatpush1.bf16.msra.mxu1 %v14158_v5  ;;  %v14199_v5 = vcombine.high %v8607_v0, %v8611_v1 }
 0x3d9   :  { %9456 = vmatprep.subr.bf16.mxu1 %v14167_v30  ;;  %v14198_v30 = vcombine.low %v8607_v0, %v8611_v1  ;;  %v19602_v1 = vmov 0.0  }
 0x3da   :  { %14447 = vmatprep.subr.bf16.mxu0 %v19602_v1  ;;  %14451 = vmatprep.mubr.msk.bf16.mxu0 %vm15092_vm1, %v19602_v1 }
 0x3dc   :  { %9457 = vmatpush1.bf16.msra.mxu1 %v14166_v45  ;;  %v8627_v45 = vld [vmem:[%s19596_s2 + $0x3f8] sm:$0xff] }
 0x3dd   :  { %9458 = vmatprep.subr.bf16.mxu1 %v14175_v47  ;;  %v14215_v49 = vcombine.high %v8623_v42, %v8627_v45  ;;  %v14214_v57 = vcombine.low %v8623_v42, %v8627_v45 }
 0x3e0   :  { %9459 = vmatpush1.bf16.msra.mxu1 %v14174_v51 }
 0x3e1   :  { %9460 = vmatprep.subr.bf16.mxu1 %v14183_v56 }
 0x3e4   :  { %9461 = vmatpush1.bf16.msra.mxu1 %v14182_v60 }
 0x3e5   :  { %9462 = vmatprep.subr.bf16.mxu1 %v14191_v62 }
 0x3e8   :  { %9463 = vmatpush1.bf16.msra.mxu1 %v14190_v2  ;;  %v9432_v2 = vadd.f32 %v18234_v3, %v18238_v4  ;;  %v18384_v3 = vsub.s32 6, %v17985_v33 }
 0x3e9   :  { %9464 = vmatprep.subr.bf16.mxu1 %v14199_v5 }
 0x3ea   :  { %19618 = vst [vmem:[#allocation14_spill] sm:$0xff] %v18384_v3 }
 0x3ec   :  { %9465 = vmatpush1.bf16.msra.mxu1 %v14198_v30 }
 0x3ed   :  { %9466 = vmatprep.subr.bf16.mxu1 %v14207_v41 }
 0x3f0   :  { %9467 = vmatpush1.bf16.msra.mxu1 %v14206_v48 }
 0x3f1   :  { %9468 = vmatprep.subr.bf16.mxu1 %v14215_v49 }
 0x3f4   :  { %9469 = vmatpush1.bf16.msra.mxu1 %v14214_v57 }
 0x3f5   :  { %v14727_v47 = vpop.permute.xlu0 %14726  ;;  %14399 = vmatprep.subr.bf16.mxu1 %v19602_v1 }
 0x3f6   :  { %v14729_v51 = vunpack.i.h.bf16 %v14727_v47  ;;  %v14728_v56 = vunpack.i.l.bf16 %v14727_v47 }
 0x3f7   :  { %9471 = vmatmul.mubr.bf16.vlgmr.msra.gmra.mrb[12].mxu1 %v17952_v16  ;;  %v18373_v16 = vpack.c.bf16 %v9432_v2, %v9432_v2 }
 0x3f8   :  { %v9637_v60 = vsel %vm9636_vm0, %v14728_v56, %v14729_v51  ;;  %14403 = vmatprep.mubr.msk.bf16.mxu1 %vm15092_vm1, %v19602_v1 }
 0x432   :  { %v9635_v58 = vpop.permute.xlu0 %9634 }
 0x433   :  { %9706 = vxpose.xlu0.b32.start.end [1/1] (short) (narrow) %v9635_v58, 64  ;;  %v9638_v62 = vsel %vm9636_vm0, %v14729_v51, %v9635_v58 }
 0x434   :  { %v14730_v0 = vpack.i.bf16 %v9638_v62, %v9637_v60 }
 0x436   :  { %14731 = vxpose.xlu1.b32.start.end [1/1] (short) %v14730_v0, 128  ;;  %v18397_v25 = vpop.permute.xlu0 %9851 }
 0x43a   :  { %v18405_v47 = vpop.permute.xlu0 %9896 }
 0x43e   :  { %v18410_v51 = vpop.permute.xlu0 %9985 }
 0x442   :  { %v10031_v0 = vpop.permute.xlu0 %10030 }
 0x478   :  { %14813 = vrot.lane.b32.xlu0 %v14812_v63, %s15089_s25 }
 0x47c   :  { %10395 = vrot.lane.b32.xlu0 %v18373_v16, %s15088_s1 }
 0x480   :  { %10443 = vrot.lane.b32.xlu0 %v18373_v16, %s15089_s25 }
 0x490   :  { %10879 = vrot.lane.b32.xlu1 %v18240_v6, %s15089_s25 }
 0x494   :  { %10493 = vrot.lane.b32.xlu1 %v18373_v16, %s15090_s26 }
 0x4b6   :  { %v18399_v30 = vpop.trf.xlu1 }
 0x4b7   :  { %v14733_v42 = vunpack.i.l.bf16 %v18399_v30 }
 0x4ba   :  { %v18401_v41 = vpop.trf.xlu1 }
 0x4bb   :  { %v14738_v45 = vunpack.i.l.bf16 %v18401_v41 }
 0x4bd   :  { %v9738_v48 = vpack.c.bf16 %v14738_v45, %v14733_v42 }
 0x4be   :  { %v18407_v49 = vpop.trf.xlu1 }
 0x4bf   :  { %14400 = vmatpush3.bf16.msra.mxu1 %v9738_v48  ;;  %v14743_v57 = vunpack.i.l.bf16 %v18407_v49 }
 0x4c0   :  { %14401 = vmatprep.subr.bf16.mxu1 %v19602_v1 }
 0x4c2   :  { %v18412_v56 = vpop.trf.xlu1 }
 0x4c3   :  { %v14748_v58 = vunpack.i.l.bf16 %v18412_v56 }
 0x4c5   :  { %v9739_v60 = vpack.c.bf16 %v14748_v58, %v14743_v57  ;;  %v18427_v57 = vpop.permute.xlu0 %10075 }
 0x4c6   :  { %v18416_v62 = vpop.trf.xlu1 }
 0x4c7   :  { %14402 = vmatpush3.bf16.msra.mxu1 %v9739_v60  ;;  %v14753_v42 = vunpack.i.l.bf16 %v18416_v62 }
 0x4c8   :  { %14407 = vmatprep.subr.bf16.mxu1 %v19602_v1 }
 0x4c9   :  { %v18436_v4 = vpop.permute.xlu0 %10164 }
 0x4ca   :  { %v18419_v2 = vpop.trf.xlu1  ;;  %14404 = vmatmul.mubr.msk.bf16.vlgmr.msra.gmra.mrb[16].mxu1 %vm9761_vm2, %v18213_v43 }
 0x4cb   :  { %v14758_v45 = vunpack.i.l.bf16 %v18419_v2  ;;  %14411 = vmatprep.mubr.msk.bf16.mxu1 %vm15092_vm1, %v19602_v1 }
 0x4cd   :  { %v9740_v48 = vpack.c.bf16 %v14758_v45, %v14753_v42  ;;  %v9722_v38 = vpop.trf.xlu0 }
 0x4ce   :  { %v18429_v58 = vpop.trf.xlu1 }
 0x4cf   :  { %14408 = vmatpush3.bf16.msra.mxu1 %v9740_v48  ;;  %v14763_v6 = vunpack.i.l.bf16 %v18429_v58 }
 0x4d0   :  { %14409 = vmatprep.subr.bf16.mxu1 %v19602_v1 }
 0x4d1   :  { %v9723_v40 = vpop.trf.xlu0 }
 0x4d2   :  { %v18432_v60 = vpop.trf.xlu1 }
 0x4d3   :  { %v14768_v43 = vunpack.i.l.bf16 %v18432_v60 }
 0x4d5   :  { %v9741_v11 = vpack.c.bf16 %v14768_v43, %v14763_v6  ;;  %v9724_v34 = vpop.trf.xlu0 }
 0x4d6   :  { %v14772_v36 = vpop.trf.xlu1 }
 0x4d7   :  { %14410 = vmatpush3.bf16.msra.mxu1 %v9741_v11  ;;  %v14773_v42 = vunpack.i.l.bf16 %v14772_v36  ;;  %v14776_v45 = vunpack.i.h.bf16 %v14772_v36 }
 0x4d8   :  { %14415 = vmatprep.subr.bf16.mxu1 %v19602_v1 }
 0x4da   :  { %v14777_v24 = vpop.trf.xlu1  ;;  %14412 = vmatmul.mubr.msk.bf16.vlgmr.msra.gmra.mrb[20].mxu1 %vm9761_vm2, %v9807_v12 }
 0x4db   :  { %v14778_v48 = vunpack.i.l.bf16 %v14777_v24  ;;  %v14781_v5 = vunpack.i.h.bf16 %v14777_v24  ;;  %14419 = vmatprep.mubr.msk.bf16.mxu1 %vm15092_vm1, %v19602_v1 }
 0x4dd   :  { %v9742_v63 = vpack.c.bf16 %v14778_v48, %v14773_v42  ;;  %v9750_v23 = vpack.c.bf16 %v14781_v5, %v14776_v45  ;;  %v9754_v42 = vpack.c.bf16 %v9723_v40, %v9722_v38  ;;  %v14741_v48 = vunpack.i.h.bf16 %v18401_v41 }
 0x4de   :  { %v14782_v10 = vpop.trf.xlu1 }
 0x4df   :  { %14416 = vmatpush3.bf16.msra.mxu1 %v9742_v63  ;;  %14448 = vmatpush3.bf16.msra.mxu0 %v9750_v23  ;;  %v14783_v11 = vunpack.i.l.bf16 %v14782_v10  ;;  %v14786_v36 = vunpack.i.h.bf16 %v14782_v10  ;;  %v9725_v23 = vpop.trf.xlu0 }
 0x4e0   :  { %14417 = vmatprep.subr.bf16.mxu1 %v19602_v1  ;;  %14449 = vmatprep.subr.bf16.mxu0 %v19602_v1  ;;  %v9755_v10 = vpack.c.bf16 %v9725_v23, %v9724_v34 }
 0x4e2   :  { %v14787_v6 = vpop.trf.xlu1 }
 0x4e3   :  { %v14788_v43 = vunpack.i.l.bf16 %v14787_v6  ;;  %v14791_v12 = vunpack.i.h.bf16 %v14787_v6  ;;  %v9726_v6 = vpop.trf.xlu0 }
 0x4e5   :  { %v9743_v24 = vpack.c.bf16 %v14788_v43, %v14783_v11  ;;  %v9751_v37 = vpack.c.bf16 %v14791_v12, %v14786_v36  ;;  %v14736_v36 = vunpack.i.h.bf16 %v18399_v30  ;;  %v14761_v30 = vunpack.i.h.bf16 %v18419_v2 }
 0x4e6   :  { %v18444_v20 = vpop.trf.xlu1  ;;  %v14756_v12 = vunpack.i.h.bf16 %v18416_v62 }
 0x4e7   :  { %14418 = vmatpush3.bf16.msra.mxu1 %v9743_v24  ;;  %14450 = vmatpush3.bf16.msra.mxu0 %v9751_v37  ;;  %v14793_v63 = vunpack.i.l.bf16 %v18444_v20  ;;  %v9746_v43 = vpack.c.bf16 %v14741_v48, %v14736_v36  ;;  %v9727_v24 = vpop.trf.xlu0  ;;  %v14796_v62 = vunpack.i.h.bf16 %v18444_v20 }
 0x4e8   :  { %14463 = vmatprep.subr.bf16.mxu0 %v19602_v1  ;;  %14423 = vmatprep.subr.bf16.mxu1 %v19602_v1 }
 0x4ea   :  { %v14797_v5 = vpop.trf.xlu1  ;;  %14420 = vmatmul.mubr.msk.bf16.vlgmr.msra.gmra.mrb[24].mxu1 %vm9761_vm2, %v18397_v25  ;;  %14452 = vmatmul.mubr.msk.bf16.vlgmr.msra.gmra.mrb[0].mxu0 %vm9761_vm2, %v10031_v0  ;;  %v10350_v0 = vsel %vm10348_vm3, %v18373_v16, 0  ;;  %v14746_v16 = vunpack.i.h.bf16 %v18407_v49  ;;  %v14766_v49 = vunpack.i.h.bf16 %v18429_v58 }
 0x4eb   :  { %14464 = vmatpush3.bf16.msra.mxu0 %v9754_v42  ;;  %14467 = vmatprep.mubr.msk.bf16.mxu0 %vm15092_vm1, %v19602_v1  ;;  %v14798_v40 = vunpack.i.l.bf16 %v14797_v5  ;;  %v9728_v2 = vpop.trf.xlu0  ;;  %v14801_v42 = vunpack.i.h.bf16 %v14797_v5 }
 0x4ec   :  { %14465 = vmatprep.subr.bf16.mxu0 %v19602_v1  ;;  %14427 = vmatprep.mubr.msk.bf16.mxu1 %vm15092_vm1, %v19602_v1 }
 0x4ed   :  { %v9744_v38 = vpack.c.bf16 %v14798_v40, %v14793_v63  ;;  %v9752_v58 = vpack.c.bf16 %v14801_v42, %v14796_v62  ;;  %v18494_v40 = vrot.slane %v18196_v18, %v18387_v61 }
 0x4ee   :  { %v14802_v37 = vpop.trf.xlu1 }
 0x4ef   :  { %14466 = vmatpush3.bf16.msra.mxu0 %v9755_v10  ;;  %14424 = vmatpush3.bf16.msra.mxu1 %v9744_v38  ;;  %v14803_v34 = vunpack.i.l.bf16 %v14802_v37  ;;  %v9472_v10 = vpop.f32.mrb[12].mxu1  ;;  %v9729_v20 = vpop.trf.xlu0 }
 0x4f0   :  { %14479 = vmatprep.subr.bf16.mxu0 %v19602_v1  ;;  %14425 = vmatprep.subr.bf16.mxu1 %v19602_v1  ;;  %v18498_v38 = vpop.f32.mrb[13].mxu1 }
 0x4f1   :  { %v9475_v39 = vadd.f32 %v18498_v38, %v18494_v40 }
 0x4f2   :  { %v14807_v25 = vpop.trf.xlu1  ;;  %14468 = vmatmul.mubr.msk.bf16.vlgmr.msra.gmra.mrb[4].mxu0 %vm9761_vm2, %v18258_v29  ;;  %v14751_v29 = vunpack.i.h.bf16 %v18412_v56  ;;  %v14771_v56 = vunpack.i.h.bf16 %v18432_v60  ;;  %v8656_v60 = vrot.slane %v18196_v18, %v18384_v3 }
 0x4f3   :  { %14480 = vmatpush3.bf16.msra.mxu0 %v10350_v0  ;;  %14481 = vmatprep.mubr.msk.bf16.mxu0 %vm15092_vm1, %v19602_v1  ;;  %v14808_v45 = vunpack.i.l.bf16 %v14807_v25  ;;  %v14811_v63 = vunpack.i.h.bf16 %v14807_v25  ;;  %v18511_v48 = vpop.permute.xlu0 %14813 }
 0x4f4   :  { %14491 = vmatprep.subr.bf16.mxu0 %v19602_v1  ;;  %v9747_v41 = vpack.c.bf16 %v14751_v29, %v14746_v16  ;;  %v9749_v23 = vpack.c.bf16 %v14771_v56, %v14766_v49  ;;  %v9473_v5 = vadd.f32 %v9472_v10, %v8656_v60  ;;  %v9483_v56 = vadd.s32 8, %v17985_v33 }
 0x4f5   :  { %v9745_v11 = vpack.c.bf16 %v14808_v45, %v14803_v34  ;;  %v9756_v45 = vpack.c.bf16 %v9727_v24, %v9726_v6  ;;  %v9498_v6 = vand.u32 7, %v17985_v33 }
 0x4f6   :  { %v18501_v25 = vpack.c.bf16 %v9473_v5, %v9473_v5 }
 0x4f7   :  { %14426 = vmatpush3.bf16.msra.mxu1 %v9745_v11  ;;  %v9757_v11 = vpack.c.bf16 %v9729_v20, %v9728_v2  ;;  %v10396_v36 = vpop.permute.xlu0 %10395 }
 0x4f8   :  { %14431 = vmatprep.subr.bf16.mxu1 %v19602_v1  ;;  %10590 = vrot.lane.b32.xlu0 %v18501_v25, %s15088_s1  ;;  %v10401_v29 = vsel %vm10348_vm3, %v10396_v36, 0 }
 0x4fa   :  { %14428 = vmatmul.mubr.msk.bf16.vlgmr.msra.gmra.mrb[28].mxu1 %vm9761_vm2, %v18405_v47  ;;  %v9748_v47 = vpack.c.bf16 %v14761_v30, %v14756_v12 }
 0x4fb   :  { %14432 = vmatpush3.bf16.msra.mxu1 %v9746_v43  ;;  %14435 = vmatprep.mubr.msk.bf16.mxu1 %vm15092_vm1, %v19602_v1 }
 0x4fc   :  { %14433 = vmatprep.subr.bf16.mxu1 %v19602_v1 }
 0x4ff   :  { %14434 = vmatpush3.bf16.msra.mxu1 %v9747_v41 }
 0x500   :  { %14439 = vmatprep.subr.bf16.mxu1 %v19602_v1 }
 0x502   :  { %14436 = vmatmul.mubr.msk.bf16.vlgmr.msra.gmra.mrb[32].mxu1 %vm9761_vm2, %v18250_v28  ;;  %v14806_v28 = vunpack.i.h.bf16 %v14802_v37  ;;  %v9476_v37 = vpop.f32.mrb[14].mxu1 }
 0x503   :  { %14440 = vmatpush3.bf16.msra.mxu1 %v9748_v47  ;;  %14443 = vmatprep.mubr.msk.bf16.mxu1 %vm15092_vm1, %v19602_v1  ;;  %v9478_v0 = vpop.f32.mrb[15].mxu1  ;;  %v9505_v47 = vand.u32 7, %v9483_v56 }
 0x504   :  { %14441 = vmatprep.subr.bf16.mxu1 %v19602_v1  ;;  %v9753_v34 = vpack.c.bf16 %v14811_v63, %v14806_v28  ;;  %v18506_v18 = vadd.f32 %v9478_v0, %v18494_v40 }
 0x507   :  { %14442 = vmatpush3.bf16.msra.mxu1 %v9749_v23 }
 0x508   :  { %14455 = vmatprep.subr.bf16.mxu1 %v19602_v1 }
 0x50a   :  { %14444 = vmatmul.mubr.msk.bf16.vlgmr.msra.gmra.mrb[36].mxu1 %vm9761_vm2, %v18410_v51  ;;  %v18503_v51 = vadd.f32 %v9476_v37, %v8656_v60 }
 0x50b   :  { %14456 = vmatpush3.bf16.msra.mxu1 %v9752_v58  ;;  %14459 = vmatprep.mubr.msk.bf16.mxu1 %vm15092_vm1, %v19602_v1  ;;  %v9484_v58 = vadd.s32 16, %v17985_v33 }
 0x50c   :  { %14457 = vmatprep.subr.bf16.mxu1 %v19602_v1 }
 0x50d   :  { %v9512_v10 = vand.u32 7, %v9484_v58  ;;  %v9488_v58 = vadd.s32 48, %v17985_v33 }
 0x50f   :  { %14458 = vmatpush3.bf16.msra.mxu1 %v9753_v34 }
 0x510   :  { %14471 = vmatprep.subr.bf16.mxu1 %v19602_v1 }
 0x512   :  { %14460 = vmatmul.mubr.msk.bf16.vlgmr.msra.gmra.mrb[40].mxu1 %vm9761_vm2, %v18427_v57  ;;  %v18526_v57 = vand.u32 127, %v8396_v22 }
 0x513   :  { %14472 = vmatpush3.bf16.msra.mxu1 %v9756_v45  ;;  %14475 = vmatprep.mubr.msk.bf16.mxu1 %vm15092_vm1, %v19602_v1 }
 0x514   :  { %14473 = vmatprep.subr.bf16.mxu1 %v19602_v1  ;;  %vm18530_vm4 = vcmp.le.s32.totalorder %v18526_v57, %v9498_v6  ;;  %vm18542_vm6 = vcmp.le.s32.totalorder %v18526_v57, %v9505_v47  ;;  %vm18554_vm7 = vcmp.le.s32.totalorder %v18526_v57, %v9512_v10 }
 0x517   :  { %14474 = vmatpush3.bf16.msra.mxu1 %v9757_v11 }
 0x518   :  { %14485 = vmatprep.subr.bf16.mxu1 %v19602_v1 }
 0x51a   :  { %14476 = vmatmul.mubr.msk.bf16.vlgmr.msra.gmra.mrb[44].mxu1 %vm9761_vm2, %v18436_v4 }
 0x51b   :  { %14486 = vmatpush3.bf16.msra.mxu1 %v10401_v29  ;;  %14487 = vmatprep.mubr.msk.bf16.mxu1 %vm15092_vm1, %v19602_v1 }
 0x51c   :  { %14497 = vmatprep.subr.bf16.mxu1 %v19602_v1 }
 0x59d   :  { %v9799_v43 = vpop.f32.mrb[16].mxu1 }
 0x59e   :  { %v10209_v30 = vmul.f32 0.2, %v9799_v43  ;;  %v14405_v41 = vpop.f32.mrb[17].mxu1 }
 0x59f   :  { %v9802_v4 = vpop.f32.mrb[18].mxu1 }
 0x5a0   :  { %v14406_v12 = vpop.f32.mrb[19].mxu1  ;;  %v18536_v24 = vsel %vm18530_vm4, %v10209_v30, -1e+30 }
 0x5a1   :  { %v10230_v22 = vsel %vm10229_vm5, %v18536_v24, -inf  ;;  %v9485_v12 = vadd.s32 24, %v17985_v33 }
 0x5a2   :  { %10231 = vmax.xlane.f32.xlu1 %v10230_v22 }
 0x5a3   :  { %v9519_v47 = vand.u32 7, %v9485_v12 }
 0x5a5   :  { %vm18566_vm8 = vcmp.le.s32.totalorder %v18526_v57, %v9519_v47 }
 0x5ad   :  { %v9845_v49 = vpop.f32.mrb[20].mxu1 }
 0x5ae   :  { %v10210_v62 = vmul.f32 0.2, %v9845_v49  ;;  %v14413_v42 = vpop.f32.mrb[21].mxu1 }
 0x5af   :  { %v9848_v23 = vpop.f32.mrb[22].mxu1  ;;  %v9486_v42 = vadd.s32 32, %v17985_v33 }
 0x5b0   :  { %v14414_v60 = vpop.f32.mrb[23].mxu1  ;;  %v18548_v28 = vsel %vm18542_vm6, %v10210_v62, -1e+30 }
 0x5b1   :  { %v10233_v63 = vsel %vm10229_vm5, %v18548_v28, -inf }
 0x5b2   :  { %10234 = vmax.xlane.f32.xlu0 %v10233_v63 }
 0x5bd   :  { %v9890_v20 = vpop.f32.mrb[24].mxu1  ;;  %v10069_v5 = vpop.f32.mrb[0].mxu0 }
 0x5be   :  { %v10211_v34 = vmul.f32 0.2, %v9890_v20  ;;  %v14421_v0 = vpop.f32.mrb[25].mxu1  ;;  %v14453_v45 = vpop.f32.mrb[1].mxu0 }
 0x5bf   :  { %v9893_v11 = vpop.f32.mrb[26].mxu1  ;;  %v10072_v36 = vpop.f32.mrb[2].mxu0  ;;  %v9526_v0 = vand.u32 7, %v9486_v42  ;;  %v9540_v45 = vand.u32 7, %v9488_v58 }
 0x5c0   :  { %v14422_v29 = vpop.f32.mrb[27].mxu1  ;;  %v14454_v6 = vpop.f32.mrb[3].mxu0  ;;  %v18560_v43 = vsel %vm18554_vm7, %v10211_v34, -1e+30  ;;  %v9490_v11 = vadd.s32 64, %v17985_v33 }
 0x5c1   :  { %v10236_v30 = vsel %vm10229_vm5, %v18560_v43, -inf  ;;  %vm18580_vm9 = vcmp.le.s32.totalorder %v18526_v57, %v9526_v0  ;;  %v9487_v6 = vadd.s32 40, %v17985_v33  ;;  %vm18586_vm10 = vcmp.le.s32.totalorder %v18526_v57, %v9540_v45 }
 0x5c2   :  { %10237 = vmax.xlane.f32.xlu0 %v10236_v30  ;;  %v10215_v30 = vmul.f32 0.2, %v10069_v5  ;;  %v9554_v47 = vand.u32 7, %v9490_v11 }
 0x5c4   :  { %v18598_v5 = vsel %vm18586_vm10, %v10215_v30, -1e+30  ;;  %vm18601_vm11 = vcmp.le.s32.totalorder %v18526_v57, %v9554_v47 }
 0x5c5   :  { %v10157_v41 = vpop.f32.mrb[4].mxu0 }
 0x5c6   :  { %v14469_v4 = vpop.f32.mrb[5].mxu0 }
 0x5c7   :  { %v10160_v22 = vpop.f32.mrb[6].mxu0 }
 0x5c8   :  { %v14470_v56 = vpop.f32.mrb[7].mxu0 }
 0x5cd   :  { %v9935_v49 = vpop.f32.mrb[28].mxu1 }
 0x5ce   :  { %v10212_v23 = vmul.f32 0.2, %v9935_v49  ;;  %v14429_v60 = vpop.f32.mrb[29].mxu1 }
 0x5cf   :  { %v9938_v63 = vpop.f32.mrb[30].mxu1  ;;  %v9533_v60 = vand.u32 7, %v9487_v6 }
 0x5d0   :  { %v14430_v10 = vpop.f32.mrb[31].mxu1  ;;  %v18574_v20 = vsel %vm18566_vm8, %v10212_v23, -1e+30  ;;  %v10217_v63 = vmul.f32 0.2, %v10157_v41  ;;  %v9489_v41 = vadd.s32 56, %v17985_v33 }
 0x5d1   :  { %v10239_v34 = vsel %vm10229_vm5, %v18574_v20, -inf  ;;  %vm18608_vm12 = vcmp.le.s32.totalorder %v18526_v57, %v9533_v60  ;;  %v9491_v60 = vadd.s32 72, %v17985_v33 }
 0x5d2   :  { %10240 = vmax.xlane.f32.xlu0 %v10239_v34  ;;  %v10248_v34 = vsel %vm10229_vm5, %v18598_v5, -inf  ;;  %v9547_v47 = vand.u32 7, %v9489_v41 }
 0x5d4   :  { %vm18626_vm13 = vcmp.le.s32.totalorder %v18526_v57, %v9547_v47 }
 0x5d5   :  { %v9978_v36 = vpop.f32.mrb[32].mxu1 }
 0x5d6   :  { %v10213_v4 = vmul.f32 0.2, %v9978_v36  ;;  %v14437_v12 = vpop.f32.mrb[33].mxu1  ;;  %v18615_v36 = vsel %vm18601_vm11, %v10217_v63, -1e+30 }
 0x5d7   :  { %v9981_v22 = vpop.f32.mrb[34].mxu1  ;;  %v10254_v12 = vsel %vm10229_vm5, %v18615_v36, -inf }
 0x5d8   :  { %v14438_v49 = vpop.f32.mrb[35].mxu1  ;;  %v18592_v42 = vsel %vm18580_vm9, %v10213_v4, -1e+30 }
 0x5d9   :  { %v10242_v23 = vsel %vm10229_vm5, %v18592_v42, -inf }
 0x5da   :  { %10243 = vmax.xlane.f32.xlu0 %v10242_v23 }
 0x5dd   :  { %v10024_v10 = vpop.f32.mrb[36].mxu1 }
 0x5de   :  { %v10214_v45 = vmul.f32 0.2, %v10024_v10  ;;  %10249 = vmax.xlane.f32.xlu0 %v10248_v34  ;;  %v14445_v11 = vpop.f32.mrb[37].mxu1 }
 0x5df   :  { %v10027_v6 = vpop.f32.mrb[38].mxu1 }
 0x5e0   :  { %v14446_v30 = vpop.f32.mrb[39].mxu1  ;;  %v18619_v4 = vsel %vm18608_vm12, %v10214_v45, -1e+30  ;;  %v9561_v6 = vand.u32 7, %v9491_v60  ;;  %v18650_v60 = vpop.permute.xlu1 %10879 }
 0x5e1   :  { %v10245_v22 = vsel %vm10229_vm5, %v18619_v4, -inf }
 0x5e2   :  { %10255 = vmax.xlane.f32.xlu0 %v10254_v12  ;;  %10246 = vmax.xlane.f32.xlu1 %v10245_v22  ;;  %vm18638_vm14 = vcmp.le.s32.totalorder %v18526_v57, %v9561_v6  ;;  %v18655_v6 = vpop.permute.xlu0 %10443 }
 0x5e4   :  { %v18652_v57 = vpop.permute.xlu1 %10493 }
 0x5e5   :  { %v10114_v49 = vpop.f32.mrb[40].mxu1 }
 0x5e6   :  { %v10216_v63 = vmul.f32 0.2, %v10114_v49  ;;  %v14461_v10 = vpop.f32.mrb[41].mxu1 }
 0x5e7   :  { %v10117_v34 = vpop.f32.mrb[42].mxu1 }
 0x5e8   :  { %v14462_v45 = vpop.f32.mrb[43].mxu1  ;;  %v18633_v11 = vsel %vm18626_vm13, %v10216_v63, -1e+30 }
 0x5e9   :  { %v10251_v41 = vsel %vm10229_vm5, %v18633_v11, -inf }
 0x5ea   :  { %10252 = vmax.xlane.f32.xlu1 %v10251_v41 }
 0x5ed   :  { %v10203_v30 = vpop.f32.mrb[44].mxu1 }
 0x5ee   :  { %v10218_v33 = vmul.f32 0.2, %v10203_v30  ;;  %v14477_v22 = vpop.f32.mrb[45].mxu1  ;;  %v18657_v30 = vpop.permute.xlu0 %10590 }
 0x5ef   :  { %v10206_v47 = vpop.f32.mrb[46].mxu1 }
 0x5f0   :  { %v14478_v49 = vpop.f32.mrb[47].mxu1  ;;  %v18644_v10 = vsel %vm18638_vm14, %v10218_v33, -1e+30 }
 0x5f1   :  { %v10257_v63 = vsel %vm10229_vm5, %v18644_v10, -inf }
 0x5f2   :  { %10258 = vmax.xlane.f32.xlu1 %v10257_v63 }
 0x5f8   :  { %10638 = vrot.lane.b32.xlu0 %v18501_v25, %s15089_s25 }
 0x62f   :  { %v10232_v34 = vpop.xlane.xlu1 %10231 }
 0x630   :  { %v10260_v45 = vsub.f32 %v18536_v24, %v10232_v34 }
 0x632   :  { %v10270_v41 = vmul.f32 1.442695, %v10260_v45 }
 0x634   :  { %14994 = vpow2.f32 %v10270_v41 }
 0x63e   :  { %v18659_v33 = vpop.eup %14994 }
 0x63f   :  { %v10235_v22 = vpop.xlane.xlu0 %10234  ;;  %v10290_v47 = vsel %vm10229_vm5, %v18659_v33, 0.0 }
 0x640   :  { %v10261_v49 = vsub.f32 %v18548_v28, %v10235_v22  ;;  %10291 = vadd.xlane.f32.xlu0 %v10290_v47  ;;  %v18673_v28 = vpack.c.bf16 %v9475_v39, %v9475_v39 }
 0x642   :  { %v10272_v63 = vmul.f32 1.442695, %v10261_v49 }
 0x644   :  { %14996 = vpow2.f32 %v10272_v63 }
 0x64e   :  { %v18664_v21 = vpop.eup %14996 }
 0x64f   :  { %v10238_v24 = vpop.xlane.xlu0 %10237  ;;  %v10293_v34 = vsel %vm10229_vm5, %v18664_v21, 0.0 }
 0x650   :  { %v10262_v45 = vsub.f32 %v18560_v43, %v10238_v24  ;;  %10294 = vadd.xlane.f32.xlu1 %v10293_v34 }
 0x652   :  { %v10274_v41 = vmul.f32 1.442695, %v10262_v45 }
 0x654   :  { %14998 = vpow2.f32 %v10274_v41 }
 0x65e   :  { %v18671_v1 = vpop.eup %14998 }
 0x65f   :  { %v10296_v22 = vsel %vm10229_vm5, %v18671_v1, 0.0  ;;  %v10241_v47 = vpop.xlane.xlu0 %10240 }
 0x660   :  { %10297 = vadd.xlane.f32.xlu0 %v10296_v22  ;;  %v10263_v43 = vsub.f32 %v18574_v20, %v10241_v47 }
 0x661   :  { %10785 = vrot.lane.b32.xlu1 %v18673_v28, %s15088_s1 }
 0x662   :  { %v10276_v63 = vmul.f32 1.442695, %v10263_v43 }
 0x664   :  { %15000 = vpow2.f32 %v10276_v63 }
 0x667   :  { %v10244_v49 = vpop.xlane.xlu0 %10243 }
 0x668   :  { %v10264_v24 = vsub.f32 %v18592_v42, %v10244_v49 }
 0x66a   :  { %v10278_v39 = vmul.f32 1.442695, %v10264_v24 }
 0x66b   :  { %v10250_v40 = vpop.xlane.xlu0 %10249 }
 0x66c   :  { %15002 = vpow2.f32 %v10278_v39  ;;  %v10266_v45 = vsub.f32 %v18598_v5, %v10250_v40  ;;  %v18708_v40 = vpack.c.bf16 %v18215_v44, %v18215_v44 }
 0x66e   :  { %v10282_v55 = vmul.f32 1.442695, %v10266_v45  ;;  %v18686_v47 = vpop.eup %15000  ;;  %v14816_v45 = vunpack.i.h.bf16 %v18511_v48 }
 0x66f   :  { %v10247_v34 = vpop.xlane.xlu1 %10246  ;;  %v10256_v22 = vpop.xlane.xlu0 %10255  ;;  %v10299_v43 = vsel %vm10229_vm5, %v18686_v47, 0.0 }
 0x670   :  { %v10265_v38 = vsub.f32 %v18619_v4, %v10247_v34  ;;  %v10268_v20 = vsub.f32 %v18615_v36, %v10256_v22  ;;  %v10882_v44 = vsel %vm9636_vm0, %v14816_v45, %v18650_v60 }
 0x672   :  { %v10280_v41 = vmul.f32 1.442695, %v10265_v38  ;;  %v10286_v42 = vmul.f32 1.442695, %v10268_v20 }
 0x674   :  { %15004 = vpow2.f32 %v10280_v41  ;;  %v14815_v41 = vunpack.i.l.bf16 %v18511_v48  ;;  %v18730_v48 = vpack.c.bf16 %v18217_v46, %v18217_v46 }
 0x675   :  { %15006 = vpow2.f32 %v10282_v55 }
 0x676   :  { %10688 = vrot.lane.b32.xlu0 %v18501_v25, %s15090_s26  ;;  %v18690_v49 = vpop.eup %15002  ;;  %15008 = vpow2.f32 %v10286_v42  ;;  %v10881_v20 = vsel %vm9636_vm0, %v14815_v41, %v14816_v45 }
 0x677   :  { %v10302_v5 = vsel %vm10229_vm5, %v18690_v49, 0.0  ;;  %v10253_v39 = vpop.xlane.xlu1 %10252  ;;  %v14817_v42 = vpack.i.bf16 %v10882_v44, %v10881_v20  ;;  %v10449_v44 = vsel %vm10348_vm3, %v18655_v6, 0 }
 0x678   :  { %v10267_v38 = vsub.f32 %v18633_v11, %v10253_v39  ;;  %v18726_v11 = vpop.permute.xlu0 %10638 }
 0x67a   :  { %v10284_v22 = vmul.f32 1.442695, %v10267_v38 }
 0x67c   :  { %15010 = vpow2.f32 %v10284_v22 }
 0x67e   :  { %v18694_v4 = vpop.eup %15004 }
 0x67f   :  { %v10305_v36 = vsel %vm10229_vm5, %v18694_v4, 0.0  ;;  %v18698_v63 = vpop.eup %15006 }
 0x680   :  { %v10308_v55 = vsel %vm10229_vm5, %v18698_v63, 0.0  ;;  %v18702_v24 = vpop.eup %15008 }
 0x681   :  { %v10314_v34 = vsel %vm10229_vm5, %v18702_v24, 0.0 }
 0x685   :  { %10300 = vadd.xlane.f32.xlu1 %v10299_v43 }
 0x686   :  { %v18722_v43 = vpop.eup %15010 }
 0x689   :  { %10303 = vadd.xlane.f32.xlu1 %v10302_v5  ;;  %v10311_v5 = vsel %vm10229_vm5, %v18722_v43, 0.0 }
 0x68d   :  { %10306 = vadd.xlane.f32.xlu1 %v10305_v36  ;;  %v10259_v36 = vpop.xlane.xlu1 %10258 }
 0x68e   :  { %v10269_v20 = vsub.f32 %v18644_v10, %v10259_v36 }
 0x691   :  { %10309 = vadd.xlane.f32.xlu1 %v10308_v55 }
 0x695   :  { %10315 = vadd.xlane.f32.xlu0 %v10314_v34 }
 0x6a2   :  { %11049 = vrot.lane.b32.xlu1 %v18708_v40, %s15088_s1 }
 0x6a6   :  { %11094 = vrot.lane.b32.xlu1 %v18708_v40, %s15089_s25 }
 0x6aa   :  { %11139 = vrot.lane.b32.xlu1 %v18708_v40, %s15090_s26 }
 0x6c2   :  { %14818 = vxpose.xlu0.b32.start.end [1/1] (short) %v14817_v42, 128  ;;  %v19640_v42 = vmov 0.0  }
 0x6cd   :  { %v10292_v55 = vpop.xlane.xlu0 %10291 }
 0x6ce   :  { %10312 = vadd.xlane.f32.xlu1 %v10311_v5  ;;  %15012 = vrcp.f32 %v10292_v55  ;;  %v10499_v5 = vsel %vm10348_vm3, %v18652_v57, 0 }
 0x6d8   :  { %v15013_v39 = vpop.eup %15012 }
 0x6d9   :  { %v10330_v45 = vmul.f32 %v15013_v39, %v18659_v33 }
 0x6dd   :  { %v10295_v34 = vpop.xlane.xlu1 %10294 }
 0x6de   :  { %15014 = vrcp.f32 %v10295_v34  ;;  %v18761_v34 = vpack.c.bf16 %v18225_v59, %v18225_v59 }
 0x6df   :  { %11228 = vrot.lane.b32.xlu1 %v18730_v48, %s15088_s1 }
 0x6e1   :  { %v18753_v33 = vpop.permute.xlu1 %10785 }
 0x6e8   :  { %v15015_v38 = vpop.eup %15014 }
 0x6e9   :  { %v10331_v41 = vmul.f32 %v15015_v38, %v18664_v21  ;;  %v10288_v21 = vmul.f32 1.442695, %v10269_v20  ;;  %v10545_v20 = vsel %vm10348_vm3, %v18501_v25, 0 }
 0x6eb   :  { %v10340_v22 = vpack.c.bf16 %v10331_v41, %v10330_v45  ;;  %15016 = vpow2.f32 %v10288_v21 }
 0x6ed   :  { %14482 = vmatmul.mubr.msk.bf16.vlgmr.msra.gmra.mrb[8].mxu0 %vm10229_vm5, %v10340_v22  ;;  %v10393_v46 = vrot.slane %v10340_v22, 4  ;;  %v10298_v57 = vpop.xlane.xlu0 %10297 }
 0x6ee   :  { %14492 = vmatpush3.bf16.msra.mxu0 %v10449_v44  ;;  %14493 = vmatprep.mubr.msk.bf16.mxu0 %vm15092_vm1, %v19640_v42  ;;  %15018 = vrcp.f32 %v10298_v57 }
 0x6ef   :  { %14488 = vmatmul.mubr.msk.bf16.vlgmr.msra.gmra.mrb[48].mxu1 %vm10229_vm5, %v10393_v46  ;;  %14503 = vmatprep.subr.bf16.mxu0 %v19640_v42 }
 0x6f0   :  { %14498 = vmatpush3.bf16.msra.mxu1 %v10499_v5  ;;  %14499 = vmatprep.mubr.msk.bf16.mxu1 %vm15092_vm1, %v19640_v42  ;;  %v10596_v5 = vsel %vm10348_vm3, %v18657_v30, 0  ;;  %v10644_v30 = vsel %vm10348_vm3, %v18726_v11, 0 }
 0x6f1   :  { %14509 = vmatprep.subr.bf16.mxu1 %v19640_v42 }
 0x6f5   :  { %v18749_v10 = vpop.eup %15016 }
 0x6f6   :  { %v10317_v6 = vsel %vm10229_vm5, %v18749_v10, 0.0 }
 0x6f8   :  { %v15019_v38 = vpop.eup %15018 }
 0x6f9   :  { %v10332_v41 = vmul.f32 %v15019_v38, %v18671_v1 }
 0x703   :  { %10318 = vadd.xlane.f32.xlu1 %v10317_v6  ;;  %v10689_v6 = vpop.permute.xlu0 %10688 }
 0x712   :  { %v10301_v36 = vpop.xlane.xlu1 %10300 }
 0x713   :  { %15020 = vrcp.f32 %v10301_v36  ;;  %v10694_v36 = vsel %vm10348_vm3, %v10689_v6, 0 }
 0x714   :  { %11273 = vrot.lane.b32.xlu1 %v18730_v48, %s15089_s25 }
 0x716   :  { %v10304_v55 = vpop.xlane.xlu1 %10303 }
 0x717   :  { %15022 = vrcp.f32 %v10304_v55 }
 0x718   :  { %11318 = vrot.lane.b32.xlu1 %v18730_v48, %s15090_s26 }
 0x71a   :  { %v10307_v39 = vpop.xlane.xlu1 %10306 }
 0x71b   :  { %15024 = vrcp.f32 %v10307_v39 }
 0x71c   :  { %11407 = vrot.lane.b32.xlu1 %v18761_v34, %s15088_s1 }
 0x71d   :  { %v15021_v45 = vpop.eup %15020 }
 0x71e   :  { %v10333_v22 = vmul.f32 %v15021_v45, %v18686_v47  ;;  %v10310_v11 = vpop.xlane.xlu1 %10309 }
 0x71f   :  { %15026 = vrcp.f32 %v10310_v11 }
 0x720   :  { %v10341_v44 = vpack.c.bf16 %v10333_v22, %v10332_v41 }
 0x721   :  { %v15023_v59 = vpop.eup %15022 }
 0x722   :  { %14494 = vmatmul.mubr.msk.bf16.vlgmr.msra.gmra.mrb[12].mxu0 %vm10229_vm5, %v10341_v44  ;;  %v10492_v46 = vrot.slane %v10341_v44, 4  ;;  %v10334_v25 = vmul.f32 %v15023_v59, %v18690_v49  ;;  %v18792_v49 = vpop.xlane.xlu0 %10315 }
 0x723   :  { %14504 = vmatpush3.bf16.msra.mxu0 %v10545_v20  ;;  %14505 = vmatprep.mubr.msk.bf16.mxu0 %vm15092_vm1, %v19640_v42 }
 0x724   :  { %14500 = vmatmul.mubr.msk.bf16.vlgmr.msra.gmra.mrb[52].mxu1 %vm10229_vm5, %v10492_v46  ;;  %14515 = vmatprep.subr.bf16.mxu0 %v19640_v42  ;;  %v18799_v46 = vpop.permute.xlu1 %11049 }
 0x725   :  { %v15025_v1 = vpop.eup %15024  ;;  %14510 = vmatpush3.bf16.msra.mxu1 %v10596_v5  ;;  %14511 = vmatprep.mubr.msk.bf16.mxu1 %vm15092_vm1, %v19640_v42 }
 0x726   :  { %v10335_v47 = vmul.f32 %v15025_v1, %v18694_v4  ;;  %14521 = vmatprep.subr.bf16.mxu1 %v19640_v42 }
 0x728   :  { %v10342_v21 = vpack.c.bf16 %v10335_v47, %v10334_v25 }
 0x729   :  { %v15027_v50 = vpop.eup %15026 }
 0x72a   :  { %14506 = vmatmul.mubr.msk.bf16.vlgmr.msra.gmra.mrb[16].mxu0 %vm10229_vm5, %v10342_v21  ;;  %v10588_v57 = vrot.slane %v10342_v21, 4  ;;  %v18801_v21 = vpop.permute.xlu1 %11094  ;;  %v10336_v11 = vmul.f32 %v15027_v50, %v18698_v63  ;;  %v10791_v50 = vsel %vm10348_vm3, %v18753_v33, 0 }
 0x72b   :  { %14516 = vmatpush3.bf16.msra.mxu0 %v10644_v30  ;;  %14517 = vmatprep.mubr.msk.bf16.mxu0 %vm15092_vm1, %v19640_v42 }
 0x72c   :  { %14512 = vmatmul.mubr.msk.bf16.vlgmr.msra.gmra.mrb[56].mxu1 %vm10229_vm5, %v10588_v57  ;;  %14527 = vmatprep.subr.bf16.mxu0 %v19640_v42 }
 0x72d   :  { %14522 = vmatpush3.bf16.msra.mxu1 %v10694_v36  ;;  %14523 = vmatprep.mubr.msk.bf16.mxu1 %vm15092_vm1, %v19640_v42 }
 0x72e   :  { %14533 = vmatprep.subr.bf16.mxu1 %v19640_v42 }
 0x742   :  { %v14819_v4 = vpop.trf.xlu0 }
 0x743   :  { %v14823_v55 = vunpack.i.h.bf16 %v14819_v4  ;;  %v14820_v39 = vunpack.i.l.bf16 %v14819_v4 }
 0x745   :  { %10950 = vxpose.xlu1.b32.start.end [1/1] (short) (narrow) %v18650_v60, 64 }
 0x746   :  { %v14824_v38 = vpop.trf.xlu0 }
 0x747   :  { %v14828_v45 = vunpack.i.h.bf16 %v14824_v38  ;;  %v14825_v41 = vunpack.i.l.bf16 %v14824_v38 }
 0x749   :  { %v18795_v22 = vpack.c.bf16 %v14825_v41, %v14820_v39  ;;  %v18797_v44 = vpack.c.bf16 %v14828_v45, %v14823_v55  ;;  %v18807_v55 = vpop.permute.xlu1 %11139 }
 0x74a   :  { %v14829_v20 = vpop.trf.xlu0 }
 0x74b   :  { %v14833_v59 = vunpack.i.h.bf16 %v14829_v20  ;;  %v14830_v5 = vunpack.i.l.bf16 %v14829_v20 }
 0x74e   :  { %v14834_v1 = vpop.trf.xlu0 }
 0x74f   :  { %v14838_v25 = vunpack.i.h.bf16 %v14834_v1  ;;  %v14835_v47 = vunpack.i.l.bf16 %v14834_v1 }
 0x751   :  { %v18803_v60 = vpack.c.bf16 %v14835_v47, %v14830_v5  ;;  %v18805_v6 = vpack.c.bf16 %v14838_v25, %v14833_v59 }
 0x752   :  { %v14839_v30 = vpop.trf.xlu0 }
 0x753   :  { %v14843_v57 = vunpack.i.h.bf16 %v14839_v30  ;;  %v14840_v36 = vunpack.i.l.bf16 %v14839_v30 }
 0x756   :  { %v14844_v4 = vpop.trf.xlu0 }
 0x757   :  { %v14848_v39 = vunpack.i.h.bf16 %v14844_v4  ;;  %v14845_v38 = vunpack.i.l.bf16 %v14844_v4 }
 0x759   :  { %v10984_v45 = vpack.c.bf16 %v14845_v38, %v14840_v36  ;;  %v18809_v41 = vpack.c.bf16 %v14848_v39, %v14843_v57 }
 0x75a   :  { %v14849_v20 = vpop.trf.xlu0 }
 0x75b   :  { %v10313_v1 = vpop.xlane.xlu1 %10312  ;;  %v14853_v54 = vunpack.i.h.bf16 %v14849_v20  ;;  %v14850_v5 = vunpack.i.l.bf16 %v14849_v20 }
 0x75c   :  { %15028 = vrcp.f32 %v10313_v1  ;;  %v10740_v1 = vsel %vm10348_vm3, %v18673_v28, 0 }
 0x75d   :  { %15030 = vrcp.f32 %v18792_v49 }
 0x75e   :  { %v14854_v47 = vpop.trf.xlu0 }
 0x75f   :  { %v14858_v59 = vunpack.i.h.bf16 %v14854_v47  ;;  %v14855_v25 = vunpack.i.l.bf16 %v14854_v47 }
 0x761   :  { %v10985_v53 = vpack.c.bf16 %v14855_v25, %v14850_v5  ;;  %v18811_v52 = vpack.c.bf16 %v14858_v59, %v14853_v54 }
 0x762   :  { %v14859_v30 = vpop.trf.xlu0 }
 0x763   :  { %v14863_v61 = vunpack.i.h.bf16 %v14859_v30  ;;  %v14860_v49 = vunpack.i.l.bf16 %v14859_v30 }
 0x766   :  { %v15029_v3 = vpop.eup %15028  ;;  %v14864_v36 = vpop.trf.xlu0 }
 0x767   :  { %v10337_v57 = vmul.f32 %v15029_v3, %v18722_v43  ;;  %v14868_v4 = vunpack.i.h.bf16 %v14864_v36 }
 0x769   :  { %v10343_v39 = vpack.c.bf16 %v10337_v57, %v10336_v11  ;;  %v18815_v38 = vpack.c.bf16 %v14868_v4, %v14863_v61  ;;  %v18837_v57 = vpop.permute.xlu1 %11228 }
 0x76a   :  { %v14869_v20 = vpop.trf.xlu0 }
 0x76b   :  { %14518 = vmatmul.mubr.msk.bf16.vlgmr.msra.gmra.mrb[20].mxu0 %vm10229_vm5, %v10343_v39  ;;  %v10687_v54 = vrot.slane %v10343_v39, 4  ;;  %v14873_v3 = vunpack.i.h.bf16 %v14869_v20  ;;  %v15031_v39 = vpop.eup %15030 }
 0x76c   :  { %14528 = vmatpush3.bf16.msra.mxu0 %v10740_v1  ;;  %14529 = vmatprep.mubr.msk.bf16.mxu0 %vm15092_vm1, %v19640_v42 }
 0x76d   :  { %14524 = vmatmul.mubr.msk.bf16.vlgmr.msra.gmra.mrb[60].mxu1 %vm10229_vm5, %v10687_v54  ;;  %14539 = vmatprep.subr.bf16.mxu0 %v19640_v42  ;;  %v10338_v54 = vmul.f32 %v15031_v39, %v18702_v24 }
 0x76e   :  { %14534 = vmatpush3.bf16.msra.mxu1 %v10791_v50  ;;  %v14874_v61 = vpop.trf.xlu0  ;;  %14535 = vmatprep.mubr.msk.bf16.mxu1 %vm15092_vm1, %v19640_v42 }
 0x76f   :  { %v14878_v28 = vunpack.i.h.bf16 %v14874_v61  ;;  %14547 = vmatprep.subr.bf16.mxu1 %v19640_v42 }
 0x771   :  { %v18829_v63 = vpack.c.bf16 %v14878_v28, %v14873_v3 }
 0x772   :  { %v14879_v43 = vpop.trf.xlu0 }
 0x773   :  { %v14883_v5 = vunpack.i.h.bf16 %v14879_v43  ;;  %v14880_v24 = vunpack.i.l.bf16 %v14879_v43 }
 0x776   :  { %v14884_v47 = vpop.trf.xlu0 }
 0x777   :  { %v14888_v59 = vunpack.i.h.bf16 %v14884_v47 }
 0x779   :  { %v18831_v33 = vpack.c.bf16 %v14888_v59, %v14883_v5  ;;  %v14865_v5 = vunpack.i.l.bf16 %v14864_v36  ;;  %v14875_v59 = vunpack.i.l.bf16 %v14874_v61 }
 0x77a   :  { %v18833_v25 = vpop.trf.xlu0 }
 0x77e   :  { %v18835_v11 = vpop.trf.xlu0 }
 0x77f   :  { %v14895_v30 = vunpack.i.l.bf16 %v18835_v11 }
 0x790   :  { %v10319_v4 = vpop.xlane.xlu1 %10318 }
 0x791   :  { %15032 = vrcp.f32 %v10319_v4  ;;  %v10986_v4 = vpack.c.bf16 %v14865_v5, %v14860_v49 }
 0x79b   :  { %v15033_v1 = vpop.eup %15032 }
 0x79c   :  { %v10339_v50 = vmul.f32 %v15033_v1, %v18749_v10  ;;  %v14885_v10 = vunpack.i.l.bf16 %v14884_v47  ;;  %v18914_v1 = vpack.c.bf16 %v18244_v14, %v18244_v14 }
 0x79e   :  { %v10344_v3 = vpack.c.bf16 %v10339_v50, %v10338_v54  ;;  %v10988_v36 = vpack.c.bf16 %v14885_v10, %v14880_v24  ;;  %v11591_v50 = vsel %vm10348_vm3, %v18914_v1, 0 }
 0x7a0   :  { %14530 = vmatmul.mubr.msk.bf16.vlgmr.msra.gmra.mrb[24].mxu0 %vm10229_vm5, %v10344_v3  ;;  %v10783_v28 = vrot.slane %v10344_v3, 4 }
 0x7a1   :  { %14540 = vmatpush3.bf16.msra.mxu0 %v18795_v22  ;;  %14543 = vmatprep.mubr.msk.bf16.mxu0 %vm15092_vm1, %v19640_v42  ;;  %v14870_v22 = vunpack.i.l.bf16 %v14869_v20 }
 0x7a2   :  { %14536 = vmatmul.mubr.msk.bf16.vlgmr.msra.gmra.mrb[64].mxu1 %vm10229_vm5, %v10783_v28  ;;  %14541 = vmatprep.subr.bf16.mxu0 %v19640_v42 }
 0x7a3   :  { %14548 = vmatpush3.bf16.msra.mxu1 %v10984_v45  ;;  %14551 = vmatprep.mubr.msk.bf16.mxu1 %vm15092_vm1, %v19640_v42  ;;  %v14890_v45 = vunpack.i.l.bf16 %v18833_v25 }
 0x7a4   :  { %14549 = vmatprep.subr.bf16.mxu1 %v19640_v42 }
 0x7a5   :  { %14542 = vmatpush3.bf16.msra.mxu0 %v18803_v60 }
 0x7a6   :  { %14555 = vmatprep.subr.bf16.mxu0 %v19640_v42 }
 0x7a7   :  { %14550 = vmatpush3.bf16.msra.mxu1 %v10985_v53  ;;  %v10987_v53 = vpack.c.bf16 %v14875_v59, %v14870_v22 }
 0x7a8   :  { %14544 = vmatmul.mubr.msk.bf16.vlgmr.msra.gmra.mrb[28].mxu0 %vm9761_vm2, %v18708_v40  ;;  %14563 = vmatprep.subr.bf16.mxu1 %v19640_v42  ;;  %v10989_v40 = vpack.c.bf16 %v14895_v30, %v14890_v45 }
 0x7a9   :  { %14556 = vmatpush3.bf16.msra.mxu0 %v10986_v4  ;;  %14559 = vmatprep.mubr.msk.bf16.mxu0 %vm15092_vm1, %v19640_v42 }
 0x7aa   :  { %14552 = vmatmul.mubr.msk.bf16.vlgmr.msra.gmra.mrb[68].mxu1 %vm9761_vm2, %v18799_v46  ;;  %14557 = vmatprep.subr.bf16.mxu0 %v19640_v42  ;;  %v11274_v46 = vpop.permute.xlu1 %11273 }
 0x7ab   :  { %14564 = vmatpush3.bf16.msra.mxu1 %v10988_v36  ;;  %14567 = vmatprep.mubr.msk.bf16.mxu1 %vm15092_vm1, %v19640_v42 }
 0x7ac   :  { %14565 = vmatprep.subr.bf16.mxu1 %v19640_v42 }
 0x7ad   :  { %14558 = vmatpush3.bf16.msra.mxu0 %v10987_v53 }
 0x7ae   :  { %14571 = vmatprep.subr.bf16.mxu0 %v19640_v42 }
 0x7af   :  { %14566 = vmatpush3.bf16.msra.mxu1 %v10989_v40 }
 0x7b0   :  { %14560 = vmatmul.mubr.msk.bf16.vlgmr.msra.gmra.mrb[32].mxu0 %vm9761_vm2, %v18801_v21  ;;  %14579 = vmatprep.subr.bf16.mxu1 %v19640_v42  ;;  %v14898_v21 = vunpack.i.h.bf16 %v18835_v11 }
 0x7b1   :  { %14572 = vmatpush3.bf16.msra.mxu0 %v18797_v44  ;;  %14575 = vmatprep.mubr.msk.bf16.mxu0 %vm15092_vm1, %v19640_v42  ;;  %v14893_v44 = vunpack.i.h.bf16 %v18833_v25 }
 0x7b2   :  { %14568 = vmatmul.mubr.msk.bf16.vlgmr.msra.gmra.mrb[72].mxu1 %vm9761_vm2, %v18807_v55  ;;  %14573 = vmatprep.subr.bf16.mxu0 %v19640_v42 }
 0x7b3   :  { %14580 = vmatpush3.bf16.msra.mxu1 %v18809_v41  ;;  %14583 = vmatprep.mubr.msk.bf16.mxu1 %vm15092_vm1, %v19640_v42 }
 0x7b4   :  { %14581 = vmatprep.subr.bf16.mxu1 %v19640_v42 }
 0x7b5   :  { %14574 = vmatpush3.bf16.msra.mxu0 %v18805_v6 }
 0x7b6   :  { %14587 = vmatprep.subr.bf16.mxu0 %v19640_v42 }
 0x7b7   :  { %14582 = vmatpush3.bf16.msra.mxu1 %v18811_v52  ;;  %v11319_v52 = vpop.permute.xlu1 %11318 }
 0x7b8   :  { %14576 = vmatmul.mubr.msk.bf16.vlgmr.msra.gmra.mrb[36].mxu0 %vm9761_vm2, %v18730_v48  ;;  %14595 = vmatprep.subr.bf16.mxu1 %v19640_v42  ;;  %v10997_v48 = vpack.c.bf16 %v14898_v21, %v14893_v44 }
 0x7b9   :  { %14588 = vmatpush3.bf16.msra.mxu0 %v18815_v38  ;;  %14591 = vmatprep.mubr.msk.bf16.mxu0 %vm15092_vm1, %v19640_v42 }
 0x7ba   :  { %14584 = vmatmul.mubr.msk.bf16.vlgmr.msra.gmra.mrb[76].mxu1 %vm9761_vm2, %v18837_v57  ;;  %14589 = vmatprep.subr.bf16.mxu0 %v19640_v42 }
 0x7bb   :  { %14596 = vmatpush3.bf16.msra.mxu1 %v18831_v33  ;;  %14599 = vmatprep.mubr.msk.bf16.mxu1 %vm15092_vm1, %v19640_v42  ;;  %v11408_v6 = vpop.permute.xlu1 %11407 }
 0x7bc   :  { %14597 = vmatprep.subr.bf16.mxu1 %v19640_v42 }
 0x7bd   :  { %14590 = vmatpush3.bf16.msra.mxu0 %v18829_v63 }
 0x7be   :  { %14603 = vmatprep.subr.bf16.mxu0 %v19640_v42 }
 0x7bf   :  { %14598 = vmatpush3.bf16.msra.mxu1 %v10997_v48 }
 0x7c0   :  { %v18900_v60 = vpop.f32.mrb[8].mxu0  ;;  %14592 = vmatmul.mubr.msk.bf16.vlgmr.msra.gmra.mrb[40].mxu0 %vm9761_vm2, %v11274_v46  ;;  %14611 = vmatprep.subr.bf16.mxu1 %v19640_v42 }
 0x7c1   :  { %v14483_v55 = vpop.f32.mrb[9].mxu0  ;;  %14607 = vmatprep.mubr.msk.bf16.mxu0 %vm15092_vm1, %v19640_v42 }
 0x7c2   :  { %v10389_v41 = vpop.f32.mrb[10].mxu0  ;;  %v18906_v38 = vpop.f32.mrb[48].mxu1  ;;  %14600 = vmatmul.mubr.msk.bf16.vlgmr.msra.gmra.mrb[80].mxu1 %vm9761_vm2, %v11319_v52 }
 0x7c3   :  { %v14484_v20 = vpop.f32.mrb[11].mxu0  ;;  %v14489_v61 = vpop.f32.mrb[49].mxu1  ;;  %14615 = vmatprep.mubr.msk.bf16.mxu1 %vm15092_vm1, %v19640_v42 }
 0x7c4   :  { %v10440_v63 = vpop.f32.mrb[50].mxu1 }
 0x7c5   :  { %v10966_v43 = vpop.trf.xlu1  ;;  %v14490_v47 = vpop.f32.mrb[51].mxu1 }
 0x7c9   :  { %v10967_v33 = vpop.trf.xlu1 }
 0x7ca   :  { %v10998_v25 = vpack.c.bf16 %v10967_v33, %v10966_v43 }
 0x7cc   :  { %14604 = vmatpush3.bf16.msra.mxu0 %v10998_v25 }
 0x7cd   :  { %v10968_v11 = vpop.trf.xlu1  ;;  %14605 = vmatprep.subr.bf16.mxu0 %v19640_v42 }
 0x7d1   :  { %v10969_v57 = vpop.trf.xlu1 }
 0x7d2   :  { %v10999_v39 = vpack.c.bf16 %v10969_v57, %v10968_v11 }
 0x7d4   :  { %14606 = vmatpush3.bf16.msra.mxu0 %v10999_v39 }
 0x7d5   :  { %v10970_v54 = vpop.trf.xlu1  ;;  %14619 = vmatprep.subr.bf16.mxu0 %v19640_v42 }
 0x7d7   :  { %14608 = vmatmul.mubr.msk.bf16.vlgmr.msra.gmra.mrb[44].mxu0 %vm9761_vm2, %v18761_v34 }
 0x7d8   :  { %14620 = vmatpush3.bf16.msra.mxu0 %v11591_v50  ;;  %14621 = vmatprep.mubr.msk.bf16.mxu0 %vm15092_vm1, %v19640_v42 }
 0x7d9   :  { %v10971_v3 = vpop.trf.xlu1  ;;  %14631 = vmatprep.subr.bf16.mxu0 %v19640_v42 }
 0x7da   :  { %v11000_v28 = vpack.c.bf16 %v10971_v3, %v10970_v54 }
 0x7dc   :  { %14612 = vmatpush3.bf16.msra.mxu1 %v11000_v28 }
 0x7dd   :  { %v10972_v14 = vpop.trf.xlu1  ;;  %14613 = vmatprep.subr.bf16.mxu1 %v19640_v42 }
 0x7e1   :  { %v10973_v49 = vpop.trf.xlu1 }
 0x7e2   :  { %v11001_v5 = vpack.c.bf16 %v10973_v49, %v10972_v14 }
 0x7e4   :  { %14614 = vmatpush3.bf16.msra.mxu1 %v11001_v5 }
 0x7e5   :  { %14625 = vmatprep.subr.bf16.mxu1 %v19640_v42 }
 0x7e7   :  { %14616 = vmatmul.mubr.msk.bf16.vlgmr.msra.gmra.mrb[84].mxu1 %vm9761_vm2, %v11408_v6 }
 0x7e8   :  { %14627 = vmatprep.mubr.msk.bf16.mxu1 %vm15092_vm1, %v19640_v42 }
 0x7f5   :  { %v18929_v34 = vpop.f32.mrb[12].mxu0 }
 0x7f6   :  { %v14495_v24 = vpop.f32.mrb[13].mxu0 }
 0x7f7   :  { %v10488_v10 = vpop.f32.mrb[14].mxu0  ;;  %v18931_v22 = vpop.f32.mrb[52].mxu1 }
 0x7f8   :  { %v14496_v59 = vpop.f32.mrb[15].mxu0  ;;  %v14501_v4 = vpop.f32.mrb[53].mxu1 }
 0x7f9   :  { %v10538_v45 = vpop.f32.mrb[54].mxu1 }
 0x7fa   :  { %v14502_v30 = vpop.f32.mrb[55].mxu1 }
 0x7fd   :  { %v18933_v36 = vpop.f32.mrb[16].mxu0 }
 0x7fe   :  { %v14507_v53 = vpop.f32.mrb[17].mxu0 }
 0x7ff   :  { %v10584_v40 = vpop.f32.mrb[18].mxu0  ;;  %v18935_v46 = vpop.f32.mrb[56].mxu1 }
 0x800   :  { %v14508_v44 = vpop.f32.mrb[19].mxu0  ;;  %v14513_v21 = vpop.f32.mrb[57].mxu1 }
 0x801   :  { %v10635_v52 = vpop.f32.mrb[58].mxu1 }
 0x802   :  { %v14514_v48 = vpop.f32.mrb[59].mxu1 }
 0x83e   :  { %v18937_v6 = vpop.f32.mrb[20].mxu0 }
 0x83f   :  { %v14519_v55 = vpop.f32.mrb[21].mxu0 }
 0x840   :  { %v10683_v41 = vpop.f32.mrb[22].mxu0  ;;  %v18939_v20 = vpop.f32.mrb[60].mxu1 }
 0x841   :  { %v14520_v61 = vpop.f32.mrb[23].mxu0  ;;  %v14525_v63 = vpop.f32.mrb[61].mxu1 }
 0x842   :  { %v10733_v43 = vpop.f32.mrb[62].mxu1 }
 0x843   :  { %v14526_v47 = vpop.f32.mrb[63].mxu1 }
 0x873   :  { %v18941_v33 = vpop.f32.mrb[24].mxu0 }
 0x874   :  { %v14531_v25 = vpop.f32.mrb[25].mxu0 }
 0x875   :  { %v10779_v11 = vpop.f32.mrb[26].mxu0  ;;  %v18943_v57 = vpop.f32.mrb[64].mxu1 }
 0x876   :  { %v14532_v39 = vpop.f32.mrb[27].mxu0  ;;  %v14537_v54 = vpop.f32.mrb[65].mxu1 }
 0x877   :  { %v10830_v50 = vpop.f32.mrb[66].mxu1 }
 0x878   :  { %v14538_v3 = vpop.f32.mrb[67].mxu1 }
 0x87b   :  { %v11042_v28 = vpop.f32.mrb[28].mxu0 }
 0x87c   :  { %v11452_v14 = vmul.f32 0.2, %v11042_v28  ;;  %v14545_v49 = vpop.f32.mrb[29].mxu0 }
 0x87d   :  { %v11045_v5 = vpop.f32.mrb[30].mxu0  ;;  %v11088_v24 = vpop.f32.mrb[68].mxu1 }
 0x87e   :  { %v11453_v10 = vmul.f32 0.2, %v11088_v24  ;;  %v14546_v59 = vpop.f32.mrb[31].mxu0  ;;  %v14553_v4 = vpop.f32.mrb[69].mxu1  ;;  %v18947_v45 = vsel %vm18530_vm4, %v11452_v14, -1e+30 }
 0x87f   :  { %v11091_v30 = vpop.f32.mrb[70].mxu1  ;;  %v11472_v53 = vsel %vm10229_vm5, %v18947_v45, -inf }
 0x880   :  { %11473 = vmax.xlane.f32.xlu0 %v11472_v53  ;;  %v14554_v40 = vpop.f32.mrb[71].mxu1  ;;  %v18953_v44 = vsel %vm18542_vm6, %v11453_v10, -1e+30 }
 0x881   :  { %v11475_v21 = vsel %vm10229_vm5, %v18953_v44, -inf }
 0x882   :  { %11476 = vmax.xlane.f32.xlu1 %v11475_v21 }
 0x883   :  { %v11133_v52 = vpop.f32.mrb[32].mxu0 }
 0x884   :  { %v11454_v48 = vmul.f32 0.2, %v11133_v52  ;;  %v14561_v55 = vpop.f32.mrb[33].mxu0 }
 0x885   :  { %v11136_v16 = vpop.f32.mrb[34].mxu0  ;;  %v11178_v41 = vpop.f32.mrb[72].mxu1 }
 0x886   :  { %v11455_v61 = vmul.f32 0.2, %v11178_v41  ;;  %v14562_v63 = vpop.f32.mrb[35].mxu0  ;;  %v14569_v43 = vpop.f32.mrb[73].mxu1  ;;  %v18959_v47 = vsel %vm18554_vm7, %v11454_v48, -1e+30 }
 0x887   :  { %v11181_v25 = vpop.f32.mrb[74].mxu1  ;;  %v11478_v2 = vsel %vm10229_vm5, %v18959_v47, -inf }
 0x888   :  { %11479 = vmax.xlane.f32.xlu0 %v11478_v2  ;;  %v14570_v11 = vpop.f32.mrb[75].mxu1  ;;  %v18965_v39 = vsel %vm18566_vm8, %v11455_v61, -1e+30 }
 0x889   :  { %v11481_v54 = vsel %vm10229_vm5, %v18965_v39, -inf }
 0x88a   :  { %11482 = vmax.xlane.f32.xlu1 %v11481_v54 }
 0x88b   :  { %v11221_v50 = vpop.f32.mrb[36].mxu0 }
 0x88c   :  { %v11456_v3 = vmul.f32 0.2, %v11221_v50  ;;  %v14577_v28 = vpop.f32.mrb[37].mxu0 }
 0x88d   :  { %v11224_v37 = vpop.f32.mrb[38].mxu0  ;;  %v11267_v14 = vpop.f32.mrb[76].mxu1 }
 0x88e   :  { %v18971_v49 = vsel %vm18580_vm9, %v11456_v3, -1e+30  ;;  %v11457_v5 = vmul.f32 0.2, %v11267_v14  ;;  %v14578_v24 = vpop.f32.mrb[39].mxu0  ;;  %v14585_v10 = vpop.f32.mrb[77].mxu1 }
 0x88f   :  { %v11270_v59 = vpop.f32.mrb[78].mxu1  ;;  %v11484_v62 = vsel %vm10229_vm5, %v18971_v49, -inf }
 0x890   :  { %11485 = vmax.xlane.f32.xlu0 %v11484_v62  ;;  %v14586_v4 = vpop.f32.mrb[79].mxu1  ;;  %v11467_v30 = vsel %vm18608_vm12, %v11457_v5, -1e+30 }
 0x891   :  { %v11487_v53 = vsel %vm10229_vm5, %v11467_v30, -inf }
 0x892   :  { %11488 = vmax.xlane.f32.xlu1 %v11487_v53 }
 0x893   :  { %v11312_v40 = vpop.f32.mrb[40].mxu0 }
 0x894   :  { %v11458_v21 = vmul.f32 0.2, %v11312_v40  ;;  %v14593_v29 = vpop.f32.mrb[41].mxu0 }
 0x895   :  { %v11315_v52 = vpop.f32.mrb[42].mxu0  ;;  %v11357_v48 = vpop.f32.mrb[80].mxu1 }
 0x896   :  { %v18980_v55 = vsel %vm18586_vm10, %v11458_v21, -1e+30  ;;  %v14594_v16 = vpop.f32.mrb[43].mxu0  ;;  %v14601_v41 = vpop.f32.mrb[81].mxu1  ;;  %v11459_v28 = vmul.f32 0.2, %v11357_v48 }
 0x897   :  { %v11360_v61 = vpop.f32.mrb[82].mxu1  ;;  %v11490_v63 = vsel %vm10229_vm5, %v18980_v55, -inf }
 0x898   :  { %11491 = vmax.xlane.f32.xlu0 %v11490_v63  ;;  %v14602_v0 = vpop.f32.mrb[83].mxu1  ;;  %v18990_v37 = vsel %vm18626_vm13, %v11459_v28, -1e+30 }
 0x899   :  { %v11493_v24 = vsel %vm10229_vm5, %v18990_v37, -inf }
 0x8a3   :  { %11684 = vrot.lane.b32.xlu1 %v18914_v1, %s15089_s25 }
 0x8aa   :  { %v11400_v43 = vpop.f32.mrb[44].mxu0 }
 0x8ab   :  { %v14609_v25 = vpop.f32.mrb[45].mxu0  ;;  %v11460_v5 = vmul.f32 0.2, %v11400_v43 }
 0x8ac   :  { %v11403_v2 = vpop.f32.mrb[46].mxu0 }
 0x8ad   :  { %v14610_v11 = vpop.f32.mrb[47].mxu0  ;;  %v19000_v59 = vsel %vm18601_vm11, %v11460_v5, -1e+30 }
 0x8ae   :  { %11636 = vrot.lane.b32.xlu0 %v18914_v1, %s15088_s1  ;;  %v11496_v23 = vsel %vm10229_vm5, %v19000_v59, -inf }
 0x8ba   :  { %v11446_v56 = vpop.f32.mrb[84].mxu1 }
 0x8bb   :  { %v14617_v54 = vpop.f32.mrb[85].mxu1  ;;  %v11461_v14 = vmul.f32 0.2, %v11446_v56 }
 0x8bc   :  { %v11449_v50 = vpop.f32.mrb[86].mxu1 }
 0x8bd   :  { %v14618_v3 = vpop.f32.mrb[87].mxu1  ;;  %v18996_v10 = vsel %vm18638_vm14, %v11461_v14, -1e+30  ;;  %v19031_v50 = vpack.c.bf16 %v18503_v51, %v18503_v51 }
 0x8be   :  { %v11499_v62 = vsel %vm10229_vm5, %v18996_v10, -inf }
 0x8c7   :  { %11494 = vmax.xlane.f32.xlu1 %v11493_v24 }
 0x8cb   :  { %11500 = vmax.xlane.f32.xlu1 %v11499_v62 }
 0x8cd   :  { %11497 = vmax.xlane.f32.xlu0 %v11496_v23 }
 0x8dc   :  { %11734 = vrot.lane.b32.xlu1 %v18914_v1, %s15090_s26 }
 0x90d   :  { %v11474_v4 = vpop.xlane.xlu0 %11473 }
 0x90e   :  { %v11502_v12 = vsub.f32 %v18947_v45, %v11474_v4 }
 0x90f   :  { %v11477_v53 = vpop.xlane.xlu1 %11476 }
 0x910   :  { %v11512_v40 = vmul.f32 1.442695, %v11502_v12  ;;  %v11503_v58 = vsub.f32 %v18953_v44, %v11477_v53 }
 0x912   :  { %15034 = vpow2.f32 %v11512_v40  ;;  %v11514_v21 = vmul.f32 1.442695, %v11503_v58 }
 0x914   :  { %15036 = vpow2.f32 %v11514_v21 }
 0x915   :  { %v11480_v41 = vpop.xlane.xlu0 %11479 }
 0x916   :  { %v11504_v3 = vsub.f32 %v18959_v47, %v11480_v41 }
 0x917   :  { %v11483_v29 = vpop.xlane.xlu1 %11482 }
 0x918   :  { %v11505_v52 = vsub.f32 %v18965_v39, %v11483_v29  ;;  %v11516_v28 = vmul.f32 1.442695, %v11504_v3 }
 0x91a   :  { %v11518_v48 = vmul.f32 1.442695, %v11505_v52 }
 0x91c   :  { %v19011_v16 = vpop.eup %15034  ;;  %15038 = vpow2.f32 %v11518_v48 }
 0x91d   :  { %v11532_v1 = vsel %vm10229_vm5, %v19011_v16, 0.0  ;;  %v11486_v0 = vpop.xlane.xlu0 %11485 }
 0x91e   :  { %v19015_v61 = vpop.eup %15036  ;;  %11533 = vadd.xlane.f32.xlu0 %v11532_v1  ;;  %v11506_v14 = vsub.f32 %v18971_v49, %v11486_v0 }
 0x91f   :  { %v11489_v45 = vpop.xlane.xlu1 %11488  ;;  %v11535_v44 = vsel %vm10229_vm5, %v19015_v61, 0.0 }
 0x920   :  { %v11507_v63 = vsub.f32 %v11467_v30, %v11489_v45  ;;  %11536 = vadd.xlane.f32.xlu1 %v11535_v44  ;;  %v11520_v5 = vmul.f32 1.442695, %v11506_v14 }
 0x922   :  { %v11522_v43 = vmul.f32 1.442695, %v11507_v63 }
 0x923   :  { %v11685_v4 = vpop.permute.xlu1 %11684 }
 0x924   :  { %15040 = vpow2.f32 %v11522_v43  ;;  %v19071_v43 = vpack.c.bf16 %v18506_v18, %v18506_v18  ;;  %v11690_v14 = vsel %vm10348_vm3, %v11685_v4, 0 }
 0x925   :  { %v11492_v39 = vpop.xlane.xlu0 %11491  ;;  %15042 = vpow2.f32 %v11516_v28 }
 0x926   :  { %v19019_v25 = vpop.eup %15038  ;;  %v11508_v24 = vsub.f32 %v18980_v55, %v11492_v39  ;;  %15044 = vpow2.f32 %v11520_v5 }
 0x927   :  { %v11541_v2 = vsel %vm10229_vm5, %v19019_v25, 0.0 }
 0x928   :  { %11542 = vadd.xlane.f32.xlu1 %v11541_v2  ;;  %v11524_v62 = vmul.f32 1.442695, %v11508_v24 }
 0x929   :  { %v11637_v11 = vpop.permute.xlu0 %11636 }
 0x92a   :  { %v11642_v56 = vsel %vm10348_vm3, %v11637_v11, 0  ;;  %15046 = vpow2.f32 %v11524_v62 }
 0x92b   :  { %14626 = vmatpush3.bf16.msra.mxu1 %v11642_v56 }
 0x92c   :  { %14637 = vmatprep.subr.bf16.mxu1 %v19640_v42 }
 0x92e   :  { %v19025_v54 = vpop.eup %15040 }
 0x92f   :  { %v11547_v30 = vsel %vm10229_vm5, %v19025_v54, 0.0  ;;  %v19038_v23 = vpop.eup %15042 }
 0x930   :  { %11548 = vadd.xlane.f32.xlu1 %v11547_v30  ;;  %v11538_v51 = vsel %vm10229_vm5, %v19038_v23, 0.0  ;;  %v19042_v12 = vpop.eup %15044 }
 0x931   :  { %v11544_v49 = vsel %vm10229_vm5, %v19042_v12, 0.0 }
 0x934   :  { %11831 = vrot.lane.b32.xlu0 %v19031_v50, %s15088_s1  ;;  %v19047_v40 = vpop.eup %15046 }
 0x935   :  { %v11550_v21 = vsel %vm10229_vm5, %v19047_v40, 0.0 }
 0x953   :  { %11539 = vadd.xlane.f32.xlu0 %v11538_v51 }
 0x954   :  { %v11495_v47 = vpop.xlane.xlu1 %11494 }
 0x955   :  { %v11509_v53 = vsub.f32 %v18990_v37, %v11495_v47 }
 0x957   :  { %v11526_v55 = vmul.f32 1.442695, %v11509_v53  ;;  %11545 = vadd.xlane.f32.xlu0 %v11544_v49 }
 0x958   :  { %v11501_v45 = vpop.xlane.xlu1 %11500 }
 0x959   :  { %15048 = vpow2.f32 %v11526_v55 }
 0x95a   :  { %v11498_v58 = vpop.xlane.xlu0 %11497 }
 0x95b   :  { %v11510_v29 = vsub.f32 %v19000_v59, %v11498_v58  ;;  %11551 = vadd.xlane.f32.xlu0 %v11550_v21  ;;  %v11511_v59 = vsub.f32 %v18996_v10, %v11501_v45 }
 0x95c   :  { %v11735_v39 = vpop.permute.xlu1 %11734 }
 0x95d   :  { %v11528_v52 = vmul.f32 1.442695, %v11510_v29  ;;  %v11530_v44 = vmul.f32 1.442695, %v11511_v59  ;;  %v11740_v5 = vsel %vm10348_vm3, %v11735_v39, 0 }
 0x95f   :  { %15050 = vpow2.f32 %v11528_v52 }
 0x960   :  { %15052 = vpow2.f32 %v11530_v44 }
 0x963   :  { %v19052_v48 = vpop.eup %15048 }
 0x964   :  { %v11553_v37 = vsel %vm10229_vm5, %v19052_v48, 0.0 }
 0x965   :  { %11554 = vadd.xlane.f32.xlu1 %v11553_v37  ;;  %v11786_v37 = vsel %vm10348_vm3, %v19031_v50, 0 }
 0x969   :  { %v19056_v41 = vpop.eup %15050 }
 0x96a   :  { %v11556_v1 = vsel %vm10229_vm5, %v19056_v41, 0.0  ;;  %v19065_v63 = vpop.eup %15052 }
 0x96b   :  { %11557 = vadd.xlane.f32.xlu0 %v11556_v1  ;;  %v11559_v0 = vsel %vm10229_vm5, %v19065_v63, 0.0 }
 0x976   :  { %11879 = vrot.lane.b32.xlu1 %v19031_v50, %s15089_s25 }
 0x981   :  { %11929 = vrot.lane.b32.xlu0 %v19031_v50, %s15090_s26 }
 0x99a   :  { %11560 = vadd.xlane.f32.xlu1 %v11559_v0 }
 0x9ab   :  { %v11534_v2 = vpop.xlane.xlu0 %11533  ;;  %12026 = vrot.lane.b32.xlu1 %v19071_v43, %s15088_s1 }
 0x9ac   :  { %15054 = vrcp.f32 %v11534_v2 }
 0x9ad   :  { %v11537_v11 = vpop.xlane.xlu1 %11536 }
 0x9ae   :  { %15056 = vrcp.f32 %v11537_v11 }
 0x9b6   :  { %v15055_v10 = vpop.eup %15054 }
 0x9b7   :  { %v11572_v30 = vmul.f32 %v15055_v10, %v19011_v16  ;;  %v11832_v16 = vpop.permute.xlu0 %11831 }
 0x9b8   :  { %v15057_v56 = vpop.eup %15056 }
 0x9b9   :  { %v11573_v3 = vmul.f32 %v15057_v56, %v19015_v61  ;;  %v11543_v61 = vpop.xlane.xlu1 %11542 }
 0x9ba   :  { %15058 = vrcp.f32 %v11543_v61 }
 0x9bb   :  { %v11582_v28 = vpack.c.bf16 %v11573_v3, %v11572_v30  ;;  %v11981_v3 = vsel %vm10348_vm3, %v19071_v43, 0 }
 0x9bd   :  { %14622 = vmatmul.mubr.msk.bf16.vlgmr.msra.gmra.mrb[48].mxu0 %vm10229_vm5, %v11582_v28  ;;  %v11634_v18 = vrot.slane %v11582_v28, 4  ;;  %v11549_v62 = vpop.xlane.xlu1 %11548 }
 0x9be   :  { %14632 = vmatpush3.bf16.msra.mxu0 %v11690_v14  ;;  %14633 = vmatprep.mubr.msk.bf16.mxu0 %vm15092_vm1, %v19640_v42 }
 0x9bf   :  { %14628 = vmatmul.mubr.msk.bf16.vlgmr.msra.gmra.mrb[88].mxu1 %vm10229_vm5, %v11634_v18  ;;  %14643 = vmatprep.subr.bf16.mxu0 %v19640_v42 }
 0x9c0   :  { %14638 = vmatpush3.bf16.msra.mxu1 %v11740_v5  ;;  %14639 = vmatprep.mubr.msk.bf16.mxu1 %vm15092_vm1, %v19640_v42 }
 0x9c1   :  { %14649 = vmatprep.subr.bf16.mxu1 %v19640_v42 }
 0x9c4   :  { %v15059_v51 = vpop.eup %15058 }
 0x9c5   :  { %v11575_v53 = vmul.f32 %v15059_v51, %v19019_v25  ;;  %v11837_v25 = vsel %vm10348_vm3, %v11832_v16, 0 }
 0x9e0   :  { %v11540_v24 = vpop.xlane.xlu0 %11539 }
 0x9e1   :  { %15060 = vrcp.f32 %v11540_v24 }
 0x9e2   :  { %15062 = vrcp.f32 %v11549_v62  ;;  %v14936_v62 = vld [vmem:[%s19597_s3 + $0x4] ss:$8 sps:$4 sm:$0xff]  }
 0x9e4   :  { %v11546_v4 = vpop.xlane.xlu0 %11545 }
 0x9e5   :  { %15064 = vrcp.f32 %v11546_v4 }
 0x9e8   :  { %v11552_v58 = vpop.xlane.xlu0 %11551 }
 0x9e9   :  { %15066 = vrcp.f32 %v11552_v58 }
 0x9eb   :  { %v15061_v47 = vpop.eup %15060 }
 0x9ec   :  { %v11574_v49 = vmul.f32 %v15061_v47, %v19038_v23  ;;  %v15063_v55 = vpop.eup %15062 }
 0x9ed   :  { %v11577_v23 = vmul.f32 %v15063_v55, %v19025_v54 }
 0x9ee   :  { %v11583_v21 = vpack.c.bf16 %v11575_v53, %v11574_v49  ;;  %v14937_v53 = vld [vmem:[%s19597_s3 + $0x10] ss:$8 sps:$4 sm:$0xff]  }
 0x9ef   :  { %v15065_v29 = vpop.eup %15064 }
 0x9f0   :  { %v11576_v52 = vmul.f32 %v15065_v29, %v19042_v12  ;;  %14634 = vmatmul.mubr.msk.bf16.vlgmr.msra.gmra.mrb[52].mxu0 %vm10229_vm5, %v11583_v21  ;;  %v11733_v1 = vrot.slane %v11583_v21, 4  ;;  %v14942_v21 = vld [vmem:[%s19597_s3 + $0x24] ss:$8 sps:$4 sm:$0xff]  }
 0x9f1   :  { %14644 = vmatpush3.bf16.msra.mxu0 %v11786_v37  ;;  %14645 = vmatprep.mubr.msk.bf16.mxu0 %vm15092_vm1, %v19640_v42  ;;  %v14940_v37 = vld [vmem:[%s19597_s3 + $0x20] ss:$8 sps:$4 sm:$0xff]  }
 0x9f2   :  { %14640 = vmatmul.mubr.msk.bf16.vlgmr.msra.gmra.mrb[92].mxu1 %vm10229_vm5, %v11733_v1  ;;  %v11555_v45 = vpop.xlane.xlu1 %11554  ;;  %14655 = vmatprep.subr.bf16.mxu0 %v19640_v42  ;;  %v11584_v50 = vpack.c.bf16 %v11577_v23, %v11576_v52  ;;  %v14943_v1 = vld [vmem:[%s19597_s3 + $0x30] ss:$8 sps:$4 sm:$0xff]   ;;  %v14946_v23 = vld [vmem:[%s19597_s3 + $0x40] ss:$8 sps:$4 sm:$0xff]  }
 0x9f3   :  { %14650 = vmatpush3.bf16.msra.mxu1 %v11837_v25  ;;  %15068 = vrcp.f32 %v11555_v45  ;;  %14651 = vmatprep.mubr.msk.bf16.mxu1 %vm15092_vm1, %v19640_v42  ;;  %v15067_v0 = vpop.eup %15066  ;;  %v14948_v25 = vld [vmem:[%s19597_s3 + $0x44] ss:$8 sps:$4 sm:$0xff]   ;;  %v14951_v45 = vld [vmem:[%s19597_s3 + $0x54] ss:$8 sps:$4 sm:$0xff]  }
 0x9f4   :  { %14661 = vmatprep.subr.bf16.mxu1 %v19640_v42  ;;  %v11829_v54 = vrot.slane %v11584_v50, 4  ;;  %v11578_v10 = vmul.f32 %v15067_v0, %v19047_v40  ;;  %v14960_v0 = vld [vmem:[%s19597_s3 + $0x84] ss:$8 sps:$4 sm:$0xff]  }
 0x9f6   :  { %v11880_v12 = vpop.permute.xlu1 %11879 }
 0x9f7   :  { %v11885_v59 = vsel %vm10348_vm3, %v11880_v12, 0  ;;  %v14954_v12 = vld [vmem:[%s19597_s3 + $0x64] ss:$8 sps:$4 sm:$0xff]  }
 0x9f8   :  { %v11558_v44 = vpop.xlane.xlu0 %11557  ;;  %14646 = vmatmul.mubr.msk.bf16.vlgmr.msra.gmra.mrb[56].mxu0 %vm10229_vm5, %v11584_v50  ;;  %v14949_v50 = vld [vmem:[%s19597_s3 + $0x50] ss:$8 sps:$4 sm:$0xff]  }
 0x9f9   :  { %14656 = vmatpush3.bf16.msra.mxu0 %v11885_v59  ;;  %14657 = vmatprep.mubr.msk.bf16.mxu0 %vm15092_vm1, %v19640_v42  ;;  %15070 = vrcp.f32 %v11558_v44  ;;  %v14952_v59 = vld [vmem:[%s19597_s3 + $0x60] ss:$8 sps:$4 sm:$0xff]   ;;  %v14957_v44 = vld [vmem:[%s19597_s3 + $0x74] ss:$8 sps:$4 sm:$0xff]  }
 0x9fa   :  { %14652 = vmatmul.mubr.msk.bf16.vlgmr.msra.gmra.mrb[96].mxu1 %vm10229_vm5, %v11829_v54  ;;  %14667 = vmatprep.subr.bf16.mxu0 %v19640_v42  ;;  %v14955_v54 = vld [vmem:[%s19597_s3 + $0x70] ss:$8 sps:$4 sm:$0xff]  }
 0x9fb   :  { %14663 = vmatprep.mubr.msk.bf16.mxu1 %vm15092_vm1, %v19640_v42 }
 0x9fc   :  { %v11930_v39 = vpop.permute.xlu0 %11929 }
 0x9fd   :  { %v15069_v2 = vpop.eup %15068  ;;  %v11935_v11 = vsel %vm10348_vm3, %v11930_v39, 0  ;;  %v14958_v39 = vld [vmem:[%s19597_s3 + $0x80] ss:$8 sps:$4 sm:$0xff]  }
 0x9fe   :  { %v11579_v56 = vmul.f32 %v15069_v2, %v19052_v48  ;;  %14662 = vmatpush3.bf16.msra.mxu1 %v11935_v11  ;;  %v14963_v2 = vld [vmem:[%s19597_s3 + $0x94] ss:$8 sps:$4 sm:$0xff]   ;;  %v14961_v11 = vld [vmem:[%s19597_s3 + $0x90] ss:$8 sps:$4 sm:$0xff]  }
 0x9ff   :  { %14673 = vmatprep.subr.bf16.mxu1 %v19640_v42 }
 0xa00   :  { %v11585_v30 = vpack.c.bf16 %v11579_v56, %v11578_v10  ;;  %v14966_v10 = vld [vmem:[%s19597_s3 + $0xa4] ss:$8 sps:$4 sm:$0xff]   ;;  %v14964_v56 = vld [vmem:[%s19597_s3 + $0xa0] ss:$8 sps:$4 sm:$0xff]  }
 0xa02   :  { %14658 = vmatmul.mubr.msk.bf16.vlgmr.msra.gmra.mrb[60].mxu0 %vm10229_vm5, %v11585_v30  ;;  %v11928_v28 = vrot.slane %v11585_v30, 4  ;;  %v14967_v30 = vld [vmem:[%s19597_s3 + $0xb0] ss:$8 sps:$4 sm:$0xff]  }
 0xa03   :  { %14668 = vmatpush3.bf16.msra.mxu0 %v11981_v3  ;;  %14669 = vmatprep.mubr.msk.bf16.mxu0 %vm15092_vm1, %v19640_v42  ;;  %v15071_v43 = vpop.eup %15070  ;;  %v14969_v3 = vld [vmem:[%s19597_s3 + $0xb4] ss:$8 sps:$4 sm:$0xff]  }
 0xa04   :  { %14664 = vmatmul.mubr.msk.bf16.vlgmr.msra.gmra.mrb[100].mxu1 %vm10229_vm5, %v11928_v28  ;;  %v11580_v5 = vmul.f32 %v15071_v43, %v19056_v41  ;;  %v14939_v41 = vld [vmem:[%s19597_s3 + $0x14] ss:$8 sps:$4 sm:$0xff]  }
 0xa05   :  { %14675 = vmatprep.mubr.msk.bf16.mxu1 %vm15092_vm1, %v19640_v42  ;;  %v14934_v42 = vld [vmem:[%s19597_s3] ss:$8 sps:$4 sm:$0xff]  }
 0xa27   :  { %v11561_v40 = vpop.xlane.xlu1 %11560 }
 0xa28   :  { %15072 = vrcp.f32 %v11561_v40 }
 0xa2b   :  { %v12027_v48 = vpop.permute.xlu1 %12026 }
 0xa2c   :  { %v12032_v14 = vsel %vm10348_vm3, %v12027_v48, 0 }
 0xa2d   :  { %14674 = vmatpush3.bf16.msra.mxu1 %v12032_v14 }
 0xa2e   :  { %12366 = vmatprep.subr.bf16.mxu1 %v14936_v62 }
 0xa32   :  { %v15073_v18 = vpop.eup %15072 }
 0xa33   :  { %v11581_v16 = vmul.f32 %v15073_v18, %v19065_v63  ;;  %v14970_v18 = vld [vmem:[%s19597_s3 + $0xc0] ss:$8 sps:$4 sm:$0xff]  }
 0xa35   :  { %v11586_v61 = vpack.c.bf16 %v11581_v16, %v11580_v5  ;;  %v14972_v5 = vld [vmem:[%s19597_s3 + $0xc4] ss:$8 sps:$4 sm:$0xff]  }
 0xa37   :  { %14670 = vmatmul.mubr.msk.bf16.vlgmr.msra.gmra.mrb[64].mxu0 %vm10229_vm5, %v11586_v61  ;;  %v12024_v24 = vrot.slane %v11586_v61, 4 }
 0xa39   :  { %14676 = vmatmul.mubr.msk.bf16.vlgmr.msra.gmra.mrb[104].mxu1 %vm10229_vm5, %v12024_v24 }
 0xa3a   :  { %12367 = vmatpush1.bf16.msra.mxu1 %v14934_v42 }
 0xa3b   :  { %12368 = vmatprep.subr.bf16.mxu1 %v14939_v41  ;;  %v14973_v41 = vld [vmem:[%s19597_s3 + $0xd0] ss:$8 sps:$4 sm:$0xff]  }
 0xa3e   :  { %12369 = vmatpush1.bf16.msra.mxu1 %v14937_v53  ;;  %v14976_v53 = vld [vmem:[%s19597_s3 + $0xe0] ss:$8 sps:$4 sm:$0xff]  }
 0xa3f   :  { %12370 = vmatprep.subr.bf16.mxu1 %v14942_v21 }
 0xa42   :  { %12371 = vmatpush1.bf16.msra.mxu1 %v14940_v37 }
 0xa90   :  { %v19133_v4 = vpop.f32.mrb[48].mxu0 }
 0xa91   :  { %v14623_v63 = vpop.f32.mrb[49].mxu0 }
 0xa92   :  { %v11630_v51 = vpop.f32.mrb[50].mxu0  ;;  %v11678_v47 = vpop.f32.mrb[88].mxu1 }
 0xa93   :  { %v14899_v49 = vpack.i.bf16 %v11678_v47, %v18906_v38  ;;  %v14624_v55 = vpop.f32.mrb[51].mxu0  ;;  %v14629_v58 = vpop.f32.mrb[89].mxu1  ;;  %v14945_v38 = vld [vmem:[%s19597_s3 + $0x34] ss:$8 sps:$4 sm:$0xff]  }
 0xa94   :  { %v11681_v29 = vpop.f32.mrb[90].mxu1  ;;  %12372 = vmatprep.subr.bf16.mxu1 %v14945_v38  ;;  %v14979_v38 = vld [vmem:[%s19597_s3 + $0xf0] ss:$8 sps:$4 sm:$0xff]  }
 0xa95   :  { %14900 = vrot.lane.b32.xlu1 %v14899_v49, %s15090_s26  ;;  %v14630_v52 = vpop.f32.mrb[91].mxu1  ;;  %12373 = vmatpush1.bf16.msra.mxu1 %v14943_v1  ;;  %v14978_v49 = vld [vmem:[%s19597_s3 + $0xe4] ss:$8 sps:$4 sm:$0xff]  }
 0xa96   :  { %12374 = vmatprep.subr.bf16.mxu1 %v14948_v25  ;;  %v14981_v52 = vld [vmem:[%s19597_s3 + $0xf4] ss:$8 sps:$4 sm:$0xff]  }
 0xa99   :  { %12375 = vmatpush1.bf16.msra.mxu1 %v14946_v23 }
 0xa9a   :  { %12376 = vmatprep.subr.bf16.mxu1 %v14951_v45 }
 0xa9d   :  { %12377 = vmatpush1.bf16.msra.mxu1 %v14949_v50 }
 0xa9e   :  { %12378 = vmatprep.subr.bf16.mxu1 %v14954_v12 }
 0xaa1   :  { %12379 = vmatpush1.bf16.msra.mxu1 %v14952_v59 }
 0xaa2   :  { %12380 = vmatprep.subr.bf16.mxu1 %v14957_v44 }
 0xaa5   :  { %12381 = vmatpush1.bf16.msra.mxu1 %v14955_v54 }
 0xaa6   :  { %12382 = vmatprep.subr.bf16.mxu1 %v14960_v0 }
 0xaa9   :  { %12383 = vmatpush1.bf16.msra.mxu1 %v14958_v39 }
 0xaaa   :  { %12384 = vmatprep.subr.bf16.mxu1 %v14963_v2 }
 0xaad   :  { %12385 = vmatpush1.bf16.msra.mxu1 %v14961_v11 }
 0xaae   :  { %12386 = vmatprep.subr.bf16.mxu1 %v14966_v10 }
 0xab1   :  { %12387 = vmatpush1.bf16.msra.mxu1 %v14964_v56 }
 0xab2   :  { %12388 = vmatprep.subr.bf16.mxu1 %v14969_v3 }
 0xab5   :  { %12389 = vmatpush1.bf16.msra.mxu1 %v14967_v30 }
 0xab6   :  { %12390 = vmatprep.subr.bf16.mxu1 %v14972_v5 }
 0xab9   :  { %12391 = vmatpush1.bf16.msra.mxu1 %v14970_v18 }
 0xac3   :  { %v11726_v28 = vpop.f32.mrb[52].mxu0 }
 0xac4   :  { %v14904_v40 = vpack.i.bf16 %v11726_v28, %v18929_v34  ;;  %v14635_v48 = vpop.f32.mrb[53].mxu0  ;;  %v14975_v34 = vld [vmem:[%s19597_s3 + $0xd4] ss:$8 sps:$4 sm:$0xff]  }
 0xac5   :  { %v11729_v14 = vpop.f32.mrb[54].mxu0  ;;  %v11776_v43 = vpop.f32.mrb[92].mxu1  ;;  %12392 = vmatprep.subr.bf16.mxu1 %v14975_v34 }
 0xac6   :  { %v14924_v16 = vpack.i.bf16 %v11776_v43, %v18931_v22  ;;  %v14636_v61 = vpop.f32.mrb[55].mxu0  ;;  %14905 = vrot.lane.b32.xlu1 %v14904_v40, %s15089_s25  ;;  %v14641_v24 = vpop.f32.mrb[93].mxu1  ;;  %12393 = vmatpush1.bf16.msra.mxu1 %v14973_v41 }
 0xac7   :  { %v11779_v42 = vpop.f32.mrb[94].mxu1  ;;  %12394 = vmatprep.subr.bf16.mxu1 %v14978_v49 }
 0xac8   :  { %v14642_v62 = vpop.f32.mrb[95].mxu1 }
 0xaca   :  { %14925 = vrot.lane.b32.xlu1 %v14924_v16, %s15088_s1  ;;  %12395 = vmatpush1.bf16.msra.mxu1 %v14976_v53 }
 0xacb   :  { %v19219_v22 = vpop.f32.mrb[56].mxu0  ;;  %12396 = vmatprep.subr.bf16.mxu1 %v14981_v52 }
 0xacc   :  { %v14647_v63 = vpop.f32.mrb[57].mxu0 }
 0xacd   :  { %v11825_v51 = vpop.f32.mrb[58].mxu0  ;;  %v11873_v47 = vpop.f32.mrb[96].mxu1 }
 0xace   :  { %v14909_v55 = vpack.i.bf16 %v11873_v47, %v18935_v46  ;;  %v14648_v58 = vpop.f32.mrb[59].mxu0  ;;  %v14653_v21 = vpop.f32.mrb[97].mxu1  ;;  %12397 = vmatpush1.bf16.msra.mxu1 %v14979_v38  ;;  %v14984_v46 = vld [vmem:[%s19597_s3 + $0x104] ss:$8 sps:$4 sm:$0xff]  }
 0xacf   :  { %v11876_v29 = vpop.f32.mrb[98].mxu1  ;;  %12409 = vmatprep.subr.bf16.mxu1 %v14984_v46 }
 0xad0   :  { %14910 = vrot.lane.b32.xlu0 %v14909_v55, %s15090_s26  ;;  %v14654_v37 = vpop.f32.mrb[99].mxu1 }
 0xad5   :  { %v11921_v1 = vpop.f32.mrb[60].mxu0 }
 0xad6   :  { %v14914_v25 = vpack.i.bf16 %v11921_v1, %v18937_v6  ;;  %v14659_v23 = vpop.f32.mrb[61].mxu0 }
 0xad7   :  { %v11924_v45 = vpop.f32.mrb[62].mxu0  ;;  %v11971_v50 = vpop.f32.mrb[100].mxu1  ;;  %v14982_v23 = vld [vmem:[%s19597_s3 + $0x100] ss:$8 sps:$4 sm:$0xff]  }
 0xad8   :  { %v14919_v12 = vpack.i.bf16 %v11971_v50, %v18939_v20  ;;  %v14660_v59 = vpop.f32.mrb[63].mxu0  ;;  %14915 = vrot.lane.b32.xlu0 %v14914_v25, %s15089_s25  ;;  %v14665_v44 = vpop.f32.mrb[101].mxu1  ;;  %v15093_v45 = vmov 0   ;;  %v14990_v50 = vld [vmem:[%s19597_s3 + $0x124] ss:$8 sps:$4 sm:$0xff]  }
 0xad9   :  { %v11974_v54 = vpop.f32.mrb[102].mxu1  ;;  %v14993_v59 = vld [vmem:[%s19597_s3 + $0x134] ss:$8 sps:$4 sm:$0xff]   ;;  %v14991_v44 = vld [vmem:[%s19597_s3 + $0x130] ss:$8 sps:$4 sm:$0xff]  }
 0xada   :  { %v14666_v0 = vpop.f32.mrb[103].mxu1 }
 0xadc   :  { %14920 = vrot.lane.b32.xlu0 %v14919_v12, %s15088_s1  ;;  %v14988_v12 = vld [vmem:[%s19597_s3 + $0x120] ss:$8 sps:$4 sm:$0xff]  }
 0xb07   :  { %v14901_v28 = vpop.permute.xlu1 %14900 }
 0xb08   :  { %v14903_v48 = vunpack.i.h.bf16 %v14901_v28  ;;  %v14902_v14 = vunpack.i.l.bf16 %v14901_v28 }
 0xb0a   :  { %v19242_v39 = vpop.f32.mrb[64].mxu0  ;;  %v12102_v16 = vsel %vm9761_vm2, %v19133_v4, %v14903_v48 }
 0xb0b   :  { %v14671_v2 = vpop.f32.mrb[65].mxu0 }
 0xb0c   :  { %v12020_v11 = vpop.f32.mrb[66].mxu0  ;;  %v12068_v10 = vpop.f32.mrb[104].mxu1 }
 0xb0d   :  { %v14929_v6 = vpack.i.bf16 %v12068_v10, %v18943_v57  ;;  %v14672_v56 = vpop.f32.mrb[67].mxu0  ;;  %v14677_v30 = vpop.f32.mrb[105].mxu1  ;;  %v10861_v57 = vsel %vm9761_vm2, %v18900_v60, %v14902_v14 }
 0xb0e   :  { %v12071_v3 = vpop.f32.mrb[106].mxu1  ;;  %v14077_v56 = vld [vmem:[%s19600_s6 + $0x1] ss:$8 sm:$0x3] }
 0xb0f   :  { %14930 = vrot.lane.b32.xlu0 %v14929_v6, %s15090_s26  ;;  %v14678_v20 = vpop.f32.mrb[107].mxu1  ;;  %v12156_v30 = vrot.slane %v14077_v56, %v17988_v35  ;;  %v12160_v3 = vrot.slane %v14077_v56, %v18117_v17 }
 0xb38   :  { %v14906_v40 = vpop.permute.xlu1 %14905 }
 0xb39   :  { %v14908_v43 = vunpack.i.h.bf16 %v14906_v40  ;;  %v14907_v18 = vunpack.i.l.bf16 %v14906_v40 }
 0xb3b   :  { %v10862_v34 = vsel %vm9636_vm0, %v10861_v57, %v14907_v18  ;;  %v12103_v42 = vsel %vm9636_vm0, %v12102_v16, %v14908_v43 }
 0xb3c   :  { %v14926_v5 = vpop.permute.xlu1 %14925 }
 0xb3d   :  { %v14928_v61 = vunpack.i.h.bf16 %v14926_v5  ;;  %v14927_v24 = vunpack.i.l.bf16 %v14926_v5 }
 0xb3f   :  { %v12104_v62 = vsel %vm10863_vm15, %v12103_v42, %v14928_v61  ;;  %v10864_v41 = vsel %vm10863_vm15, %v10862_v34, %v14927_v24 }
 0xb40   :  { %v12109_v63 = vpack.c.bf16 %v12104_v62, %v10864_v41 }
 0xb42   :  { %v14911_v51 = vpop.permute.xlu0 %14910 }
 0xb43   :  { %v14913_v53 = vunpack.i.h.bf16 %v14911_v51  ;;  %v14912_v49 = vunpack.i.l.bf16 %v14911_v51 }
 0xb45   :  { %v12105_v60 = vsel %vm9761_vm2, %v19219_v22, %v14913_v53  ;;  %v10865_v21 = vsel %vm9761_vm2, %v18933_v36, %v14912_v49  ;;  %v14987_v22 = vld [vmem:[%s19597_s3 + $0x114] ss:$8 sps:$4 sm:$0xff]   ;;  %v14985_v36 = vld [vmem:[%s19597_s3 + $0x110] ss:$8 sps:$4 sm:$0xff]  }
 0xb4a   :  { %v14916_v47 = vpop.permute.xlu0 %14915 }
 0xb4b   :  { %v14918_v55 = vunpack.i.h.bf16 %v14916_v47  ;;  %v14917_v4 = vunpack.i.l.bf16 %v14916_v47 }
 0xb4d   :  { %v10866_v37 = vsel %vm9636_vm0, %v10865_v21, %v14917_v4  ;;  %v12106_v38 = vsel %vm9636_vm0, %v12105_v60, %v14918_v55 }
 0xb4e   :  { %v14921_v58 = vpop.permute.xlu0 %14920 }
 0xb4f   :  { %v14923_v29 = vunpack.i.h.bf16 %v14921_v58  ;;  %v14922_v52 = vunpack.i.l.bf16 %v14921_v58 }
 0xb51   :  { %v10867_v1 = vsel %vm10863_vm15, %v10866_v37, %v14922_v52  ;;  %v12107_v46 = vsel %vm10863_vm15, %v12106_v38, %v14923_v29  ;;  %v14078_v37 = vld [vmem:[%s19600_s6 + $0x2] ss:$8 sm:$0x3]  ;;  %v14079_v38 = vld [vmem:[%s19600_s6 + $0x3] ss:$8 sm:$0x3] }
 0xb52   :  { %v12110_v25 = vpack.c.bf16 %v12107_v46, %v10867_v1 }
 0xb54   :  { %12398 = vmatprep.mubr.bf16.mxu1 %v12110_v25  ;;  %v12496_v25 = vrot.slane %v14078_v37, %v17988_v35 }
 0xb55   :  { %12399 = vmatmul.mubr.bf16.vlgmr.msra.gmra.mrb[108].mxu1 %v12109_v63 }
 0xb56   :  { %12410 = vmatpush1.bf16.msra.mxu1 %v14982_v23  ;;  %12441 = vmatprep.mubr.bf16.mxu1 %v15093_v45  ;;  %v12500_v23 = vrot.slane %v14078_v37, %v18117_v17 }
 0xb57   :  { %12411 = vmatprep.subr.bf16.mxu1 %v14987_v22 }
 0xb5a   :  { %12412 = vmatpush1.bf16.msra.mxu1 %v14985_v36  ;;  %v12511_v36 = vrot.slane %v14079_v38, %v17988_v35 }
 0xb5b   :  { %12413 = vmatprep.subr.bf16.mxu1 %v14990_v50  ;;  %v12515_v50 = vrot.slane %v14079_v38, %v18117_v17 }
 0xb5e   :  { %12414 = vmatpush1.bf16.msra.mxu1 %v14988_v12 }
 0xb5f   :  { %12415 = vmatprep.subr.bf16.mxu1 %v14993_v59 }
 0xb62   :  { %12416 = vmatpush1.bf16.msra.mxu1 %v14991_v44 }
 0xb81   :  { %v14931_v54 = vpop.permute.xlu0 %14930 }
 0xb82   :  { %v14933_v0 = vunpack.i.h.bf16 %v14931_v54  ;;  %v14932_v2 = vunpack.i.l.bf16 %v14931_v54 }
 0xb84   :  { %v12108_v11 = vsel %vm9761_vm2, %v19242_v39, %v14933_v0  ;;  %v10868_v10 = vsel %vm9761_vm2, %v18941_v33, %v14932_v2 }
 0xb85   :  { %v12111_v6 = vpack.c.bf16 %v12108_v11, %v10868_v10 }
 0xb87   :  { %14296 = vmatmul.mubr.msk.bf16.vlgmr.msra.gmra.mrb[108].mxu1 %vm9636_vm0, %v12111_v6 }
 0xc5a   :  { %v12443_v20 = vpop.f32.mrb[108].mxu1 }
 0xc5b   :  { %v14679_v28 = vadd.f32 %v12443_v20, %v12156_v30  ;;  %v12445_v40 = vpop.f32.mrb[109].mxu1 }
 0xc5c   :  { %v14680_v48 = vadd.f32 %v12445_v40, %v12160_v3  ;;  %v12447_v14 = vpop.f32.mrb[110].mxu1 }
 0xc5d   :  { %v12452_v39 = vadd.f32 %v14679_v28, %v17940_v8  ;;  %v14681_v43 = vadd.f32 %v12447_v14, %v12156_v30  ;;  %v12449_v33 = vpop.f32.mrb[111].mxu1 }
 0xc5e   :  { %v12453_v18 = vadd.f32 %v14680_v48, %v17847_v13  ;;  %v14682_v5 = vadd.f32 %v12449_v33, %v12160_v3 }
 0xc5f   :  { %v12454_v16 = vadd.f32 %v14681_v43, %v17942_v9  ;;  %v12464_v62 = vmul.f32 %v12452_v39, %v12452_v39 }
 0xc60   :  { %v12455_v57 = vadd.f32 %v14682_v5, %v17849_v15  ;;  %v12456_v61 = vadd.f32 %v12453_v18, %v12452_v39  ;;  %v12465_v41 = vmul.f32 %v12453_v18, %v12453_v18 }
 0xc61   :  { %v12466_v24 = vmul.f32 %v12454_v16, %v12454_v16 }
 0xc62   :  { %12457 = vadd.xlane.f32.xlu1 %v12456_v61  ;;  %v12459_v34 = vadd.f32 %v12455_v57, %v12454_v16  ;;  %v12467_v42 = vmul.f32 %v12455_v57, %v12455_v57  ;;  %v12468_v8 = vadd.f32 %v12465_v41, %v12464_v62 }
 0xc64   :  { %12460 = vadd.xlane.f32.xlu0 %v12459_v34  ;;  %v12471_v63 = vadd.f32 %v12467_v42, %v12466_v24 }
 0xc66   :  { %12472 = vadd.xlane.f32.xlu1 %v12471_v63 }
 0xc68   :  { %12469 = vadd.xlane.f32.xlu0 %v12468_v8 }
 0xcef   :  { %v12458_v51 = vpop.xlane.xlu1 %12457 }
 0xcf0   :  { %v12462_v13 = vmul.f32 0.004, %v12458_v51 }
 0xcf1   :  { %v12461_v47 = vpop.xlane.xlu0 %12460 }
 0xcf2   :  { %v12463_v53 = vmul.f32 0.004, %v12461_v47  ;;  %v12476_v60 = vmul.f32 %v12462_v13, %v12462_v13  ;;  %v12480_v12 = vsub.f32 %v12452_v39, %v12462_v13  ;;  %v12481_v59 = vsub.f32 %v12453_v18, %v12462_v13 }
 0xcf3   :  { %v12473_v49 = vpop.xlane.xlu1 %12472 }
 0xcf4   :  { %v12477_v9 = vmul.f32 %v12463_v53, %v12463_v53  ;;  %v12475_v55 = vmul.f32 0.004, %v12473_v49  ;;  %v12482_v1 = vsub.f32 %v12454_v16, %v12463_v53  ;;  %v12483_v46 = vsub.f32 %v12455_v57, %v12463_v53 }
 0xcf5   :  { %v12470_v15 = vpop.xlane.xlu0 %12469 }
 0xcf6   :  { %v12479_v4 = vsub.f32 %v12475_v55, %v12477_v9  ;;  %v12474_v58 = vmul.f32 0.004, %v12470_v15 }
 0xcf8   :  { %v12485_v21 = vadd.f32 1e-05, %v12479_v4  ;;  %v12478_v29 = vsub.f32 %v12474_v58, %v12476_v60 }
 0xcfa   :  { %15074 = vrsqrt.f32 %v12485_v21  ;;  %v12484_v52 = vadd.f32 1e-05, %v12478_v29 }
 0xcfc   :  { %15076 = vrsqrt.f32 %v12484_v52 }
 0xd04   :  { %v15075_v22 = vpop.eup %15074 }
 0xd05   :  { %v12490_v44 = vmul.f32 %v15075_v22, %v12482_v1  ;;  %v12491_v54 = vmul.f32 %v15075_v22, %v12483_v46 }
 0xd06   :  { %v15077_v0 = vpop.eup %15076 }
 0xd07   :  { %v12505_v2 = vmul.f32 %v12496_v25, %v12490_v44  ;;  %v12506_v11 = vmul.f32 %v12500_v23, %v12491_v54  ;;  %v12488_v10 = vmul.f32 %v15077_v0, %v12480_v12  ;;  %v12489_v6 = vmul.f32 %v15077_v0, %v12481_v59 }
 0xd09   :  { %v19308_v56 = vadd.f32 %v12511_v36, %v12505_v2  ;;  %v19310_v30 = vadd.f32 %v12515_v50, %v12506_v11  ;;  %v12503_v3 = vmul.f32 %v12496_v25, %v12488_v10  ;;  %v12504_v20 = vmul.f32 %v12500_v23, %v12489_v6 }
 0xd0b   :  { %v19312_v28 = vadd.f32 %v12511_v36, %v12503_v3  ;;  %v19314_v40 = vadd.f32 %v12515_v50, %v12504_v20 }
 0xd0c   :  { %15084 = dma.done.wait [#allocation4], 32768 }
 0xd0d   :  { %15085 = vsyncadd [#allocation4], 4294934528  ;;  %v19318_v48 = vpack.c.bf16 %v19310_v30, %v19314_v40  ;;  %v12529_v14 = vld [vmem:[#allocation2 + $0x8] sm:$0xff]  ;;  %v12528_v39 = vld [vmem:[#allocation2] sm:$0xff] }
 0xd0e   :  { %v12545_v43 = vld [vmem:[#allocation2 + $0x88] sm:$0xff]  ;;  %12848 = vmatprep.subr.bf16.mxu1 %v12529_v14  ;;  %v12544_v33 = vld [vmem:[#allocation2 + $0x80] sm:$0xff] }
 0xd0f   :  { %12880 = vmatprep.mubr.bf16.mxu1 %v19318_v48  ;;  %12966 = vmatprep.mubr.bf16.mxu0 %v19318_v48  ;;  %v12561_v18 = vld [vmem:[#allocation2 + $0x108] sm:$0xff]  ;;  %v12560_v5 = vld [vmem:[#allocation2 + $0x100] sm:$0xff] }
 0xd10   :  { %12849 = vmatpush1.bf16.msra.mxu1 %v12528_v39  ;;  %v12577_v16 = vld [vmem:[#allocation2 + $0x188] sm:$0xff]  ;;  %v12576_v57 = vld [vmem:[#allocation2 + $0x180] sm:$0xff] }
 0xd11   :  { %12850 = vmatprep.subr.bf16.mxu1 %v12545_v43  ;;  %v12593_v61 = vld [vmem:[#allocation2 + $0x208] sm:$0xff]  ;;  %v12592_v24 = vld [vmem:[#allocation2 + $0x200] sm:$0xff] }
 0xd12   :  { %v12609_v34 = vld [vmem:[#allocation2 + $0x288] sm:$0xff]  ;;  %v12608_v42 = vld [vmem:[#allocation2 + $0x280] sm:$0xff] }
 0xd13   :  { %v12625_v62 = vld [vmem:[#allocation2 + $0x308] sm:$0xff]  ;;  %v12532_v63 = vld [vmem:[#allocation2 + $0x20] sm:$0xff] }
 0xd14   :  { %12851 = vmatpush1.bf16.msra.mxu1 %v12544_v33  ;;  %v12533_v41 = vld [vmem:[#allocation2 + $0x28] sm:$0xff]  ;;  %v12624_v51 = vld [vmem:[#allocation2 + $0x300] sm:$0xff]  ;;  %v12531_v33 = vld [vmem:[#allocation2 + $0x18] sm:$0xff] }
 0xd15   :  { %12852 = vmatprep.subr.bf16.mxu1 %v12561_v18  ;;  %12934 = vmatprep.subr.bf16.mxu0 %v12533_v41  ;;  %v12549_v8 = vld [vmem:[#allocation2 + $0xa8] sm:$0xff]  ;;  %v12548_v13 = vld [vmem:[#allocation2 + $0xa0] sm:$0xff] }
 0xd16   :  { %12935 = vmatpush1.bf16.msra.mxu0 %v12532_v63  ;;  %v12641_v47 = vld [vmem:[#allocation2 + $0x388] sm:$0xff]  ;;  %v12640_v49 = vld [vmem:[#allocation2 + $0x380] sm:$0xff] }
 0xd17   :  { %12936 = vmatprep.subr.bf16.mxu0 %v12549_v8  ;;  %v12565_v53 = vld [vmem:[#allocation2 + $0x128] sm:$0xff]  ;;  %v12564_v55 = vld [vmem:[#allocation2 + $0x120] sm:$0xff]  ;;  %v12562_v8 = vld [vmem:[#allocation2 + $0x110] sm:$0xff] }
 0xd18   :  { %12853 = vmatpush1.bf16.msra.mxu1 %v12560_v5  ;;  %v12657_v9 = vld [vmem:[#allocation2 + $0x408] sm:$0xff]  ;;  %v12656_v4 = vld [vmem:[#allocation2 + $0x400] sm:$0xff]  ;;  %v19324_v5 = vpack.c.bf16 %v19308_v56, %v19312_v28 }
 0xd19   :  { %12854 = vmatprep.subr.bf16.mxu1 %v12577_v16  ;;  %v12581_v15 = vld [vmem:[#allocation2 + $0x1a8] sm:$0xff]  ;;  %v12580_v60 = vld [vmem:[#allocation2 + $0x1a0] sm:$0xff] }
 0xd1a   :  { %12937 = vmatpush1.bf16.msra.mxu0 %v12548_v13  ;;  %v12673_v58 = vld [vmem:[#allocation2 + $0x488] sm:$0xff]  ;;  %v12672_v29 = vld [vmem:[#allocation2 + $0x480] sm:$0xff] }
 0xd1b   :  { %12938 = vmatprep.subr.bf16.mxu0 %v12565_v53  ;;  %v12597_v21 = vld [vmem:[#allocation2 + $0x228] sm:$0xff]  ;;  %v12596_v37 = vld [vmem:[#allocation2 + $0x220] sm:$0xff]  ;;  %v12578_v53 = vld [vmem:[#allocation2 + $0x190] sm:$0xff] }
 0xd1c   :  { %12855 = vmatpush1.bf16.msra.mxu1 %v12576_v57  ;;  %v12689_v52 = vld [vmem:[#allocation2 + $0x508] sm:$0xff]  ;;  %v12688_v1 = vld [vmem:[#allocation2 + $0x500] sm:$0xff]  ;;  %v12530_v57 = vld [vmem:[#allocation2 + $0x10] sm:$0xff] }
 0xd1d   :  { %12856 = vmatprep.subr.bf16.mxu1 %v12593_v61  ;;  %v12613_v38 = vld [vmem:[#allocation2 + $0x2a8] sm:$0xff]  ;;  %v12612_v25 = vld [vmem:[#allocation2 + $0x2a0] sm:$0xff]  ;;  %v12547_v61 = vld [vmem:[#allocation2 + $0x98] sm:$0xff] }
 0xd1e   :  { %12939 = vmatpush1.bf16.msra.mxu0 %v12564_v55  ;;  %v12705_v46 = vld [vmem:[#allocation2 + $0x588] sm:$0xff]  ;;  %v12704_v22 = vld [vmem:[#allocation2 + $0x580] sm:$0xff] }
 0xd1f   :  { %12940 = vmatprep.subr.bf16.mxu0 %v12581_v15  ;;  %v12629_v23 = vld [vmem:[#allocation2 + $0x328] sm:$0xff]  ;;  %v12628_v50 = vld [vmem:[#allocation2 + $0x320] sm:$0xff]  ;;  %v12594_v15 = vld [vmem:[#allocation2 + $0x210] sm:$0xff] }
 0xd20   :  { %12857 = vmatpush1.bf16.msra.mxu1 %v12592_v24  ;;  %v12721_v36 = vld [vmem:[#allocation2 + $0x608] sm:$0xff]  ;;  %v12720_v59 = vld [vmem:[#allocation2 + $0x600] sm:$0xff] }
 0xd21   :  { %12858 = vmatprep.subr.bf16.mxu1 %v12609_v34  ;;  %v12645_v12 = vld [vmem:[#allocation2 + $0x3a8] sm:$0xff]  ;;  %v12644_v54 = vld [vmem:[#allocation2 + $0x3a0] sm:$0xff] }
 0xd22   :  { %12941 = vmatpush1.bf16.msra.mxu0 %v12580_v60  ;;  %v12737_v44 = vld [vmem:[#allocation2 + $0x688] sm:$0xff]  ;;  %v12736_v2 = vld [vmem:[#allocation2 + $0x680] sm:$0xff] }
 0xd23   :  { %12942 = vmatprep.subr.bf16.mxu0 %v12597_v21  ;;  %v12661_v0 = vld [vmem:[#allocation2 + $0x428] sm:$0xff]  ;;  %v12660_v10 = vld [vmem:[#allocation2 + $0x420] sm:$0xff]  ;;  %v12610_v21 = vld [vmem:[#allocation2 + $0x290] sm:$0xff] }
 0xd24   :  { %12859 = vmatpush1.bf16.msra.mxu1 %v12608_v42  ;;  %v12753_v11 = vld [vmem:[#allocation2 + $0x708] sm:$0xff]  ;;  %v12752_v3 = vld [vmem:[#allocation2 + $0x700] sm:$0xff]  ;;  %v12546_v42 = vld [vmem:[#allocation2 + $0x90] sm:$0xff] }
 0xd25   :  { %12860 = vmatprep.subr.bf16.mxu1 %v12625_v62  ;;  %v12677_v6 = vld [vmem:[#allocation2 + $0x4a8] sm:$0xff]  ;;  %v12676_v14 = vld [vmem:[#allocation2 + $0x4a0] sm:$0xff]  ;;  %v12563_v62 = vld [vmem:[#allocation2 + $0x118] sm:$0xff] }
 0xd26   :  { %12943 = vmatpush1.bf16.msra.mxu0 %v12596_v37  ;;  %v12769_v20 = vld [vmem:[#allocation2 + $0x788] sm:$0xff]  ;;  %v12768_v43 = vld [vmem:[#allocation2 + $0x780] sm:$0xff] }
 0xd27   :  { %12944 = vmatprep.subr.bf16.mxu0 %v12613_v38  ;;  %v12693_v39 = vld [vmem:[#allocation2 + $0x528] sm:$0xff]  ;;  %v12692_v18 = vld [vmem:[#allocation2 + $0x520] sm:$0xff]  ;;  %v12626_v38 = vld [vmem:[#allocation2 + $0x310] sm:$0xff] }
 0xd28   :  { %12861 = vmatpush1.bf16.msra.mxu1 %v12624_v51  ;;  %v12709_v16 = vld [vmem:[#allocation2 + $0x5a8] sm:$0xff]  ;;  %v12708_v24 = vld [vmem:[#allocation2 + $0x5a0] sm:$0xff]  ;;  %v12579_v51 = vld [vmem:[#allocation2 + $0x198] sm:$0xff] }
 0xd29   :  { %12862 = vmatprep.subr.bf16.mxu1 %v12641_v47  ;;  %v12725_v34 = vld [vmem:[#allocation2 + $0x628] sm:$0xff]  ;;  %v12724_v41 = vld [vmem:[#allocation2 + $0x620] sm:$0xff] }
 0xd2a   :  { %12945 = vmatpush1.bf16.msra.mxu0 %v12612_v25  ;;  %v12741_v63 = vld [vmem:[#allocation2 + $0x6a8] sm:$0xff]  ;;  %v12740_v47 = vld [vmem:[#allocation2 + $0x6a0] sm:$0xff] }
 0xd2b   :  { %12946 = vmatprep.subr.bf16.mxu0 %v12629_v23  ;;  %v12757_v13 = vld [vmem:[#allocation2 + $0x728] sm:$0xff]  ;;  %v12642_v23 = vld [vmem:[#allocation2 + $0x390] sm:$0xff] }
 0xd2c   :  { %12863 = vmatpush1.bf16.msra.mxu1 %v12640_v49  ;;  %v12595_v49 = vld [vmem:[#allocation2 + $0x218] sm:$0xff]  ;;  %v12773_v55 = vld [vmem:[#allocation2 + $0x7a8] sm:$0xff] }
 0xd2d   :  { %12864 = vmatprep.subr.bf16.mxu1 %v12657_v9  ;;  %v12756_v9 = vld [vmem:[#allocation2 + $0x720] sm:$0xff]  ;;  %v12537_v60 = vld [vmem:[#allocation2 + $0x48] sm:$0xff] }
 0xd2e   :  { %12947 = vmatpush1.bf16.msra.mxu0 %v12628_v50  ;;  %v12553_v37 = vld [vmem:[#allocation2 + $0xc8] sm:$0xff] }
 0xd2f   :  { %12948 = vmatprep.subr.bf16.mxu0 %v12645_v12  ;;  %v12569_v25 = vld [vmem:[#allocation2 + $0x148] sm:$0xff]  ;;  %v12658_v12 = vld [vmem:[#allocation2 + $0x410] sm:$0xff] }
 0xd30   :  { %12865 = vmatpush1.bf16.msra.mxu1 %v12656_v4  ;;  %v12611_v4 = vld [vmem:[#allocation2 + $0x298] sm:$0xff]  ;;  %v12585_v50 = vld [vmem:[#allocation2 + $0x1c8] sm:$0xff] }
 0xd31   :  { %12866 = vmatprep.subr.bf16.mxu1 %v12673_v58  ;;  %v12772_v58 = vld [vmem:[#allocation2 + $0x7a0] sm:$0xff] }
 0xd32   :  { %12949 = vmatpush1.bf16.msra.mxu0 %v12644_v54  ;;  %v12601_v54 = vld [vmem:[#allocation2 + $0x248] sm:$0xff] }
 0xd33   :  { %12950 = vmatprep.subr.bf16.mxu0 %v12661_v0  ;;  %v12674_v0 = vld [vmem:[#allocation2 + $0x490] sm:$0xff] }
 0xd34   :  { %12867 = vmatpush1.bf16.msra.mxu1 %v12672_v29  ;;  %v12627_v29 = vld [vmem:[#allocation2 + $0x318] sm:$0xff] }
 0xd35   :  { %12868 = vmatprep.subr.bf16.mxu1 %v12689_v52  ;;  %v12536_v52 = vld [vmem:[#allocation2 + $0x40] sm:$0xff] }
 0xd36   :  { %12951 = vmatpush1.bf16.msra.mxu0 %v12660_v10  ;;  %v12617_v10 = vld [vmem:[#allocation2 + $0x2c8] sm:$0xff] }
 0xd37   :  { %12952 = vmatprep.subr.bf16.mxu0 %v12677_v6  ;;  %v12690_v6 = vld [vmem:[#allocation2 + $0x510] sm:$0xff] }
 0xd38   :  { %12869 = vmatpush1.bf16.msra.mxu1 %v12688_v1  ;;  %v12643_v1 = vld [vmem:[#allocation2 + $0x398] sm:$0xff] }
 0xd39   :  { %12870 = vmatprep.subr.bf16.mxu1 %v12705_v46  ;;  %v12552_v46 = vld [vmem:[#allocation2 + $0xc0] sm:$0xff] }
 0xd3a   :  { %12953 = vmatpush1.bf16.msra.mxu0 %v12676_v14  ;;  %v12633_v14 = vld [vmem:[#allocation2 + $0x348] sm:$0xff] }
 0xd3b   :  { %12954 = vmatprep.subr.bf16.mxu0 %v12693_v39  ;;  %v12706_v39 = vld [vmem:[#allocation2 + $0x590] sm:$0xff] }
 0xd3c   :  { %12871 = vmatpush1.bf16.msra.mxu1 %v12704_v22  ;;  %v12659_v22 = vld [vmem:[#allocation2 + $0x418] sm:$0xff] }
 0xd3d   :  { %12872 = vmatprep.subr.bf16.mxu1 %v12721_v36  ;;  %v12568_v36 = vld [vmem:[#allocation2 + $0x140] sm:$0xff] }
 0xd3e   :  { %12955 = vmatpush1.bf16.msra.mxu0 %v12692_v18  ;;  %v12649_v18 = vld [vmem:[#allocation2 + $0x3c8] sm:$0xff] }
 0xd3f   :  { %12956 = vmatprep.subr.bf16.mxu0 %v12709_v16  ;;  %v12722_v16 = vld [vmem:[#allocation2 + $0x610] sm:$0xff] }
 0xd40   :  { %12873 = vmatpush1.bf16.msra.mxu1 %v12720_v59  ;;  %v12675_v59 = vld [vmem:[#allocation2 + $0x498] sm:$0xff] }
 0xd41   :  { %12874 = vmatprep.subr.bf16.mxu1 %v12737_v44  ;;  %v12584_v44 = vld [vmem:[#allocation2 + $0x1c0] sm:$0xff] }
 0xd42   :  { %12957 = vmatpush1.bf16.msra.mxu0 %v12708_v24  ;;  %v12665_v24 = vld [vmem:[#allocation2 + $0x448] sm:$0xff] }
 0xd43   :  { %12958 = vmatprep.subr.bf16.mxu0 %v12725_v34  ;;  %v12738_v34 = vld [vmem:[#allocation2 + $0x690] sm:$0xff] }
 0xd44   :  { %12875 = vmatpush1.bf16.msra.mxu1 %v12736_v2  ;;  %v12691_v2 = vld [vmem:[#allocation2 + $0x518] sm:$0xff] }
 0xd45   :  { %12876 = vmatprep.subr.bf16.mxu1 %v12753_v11  ;;  %v12600_v11 = vld [vmem:[#allocation2 + $0x240] sm:$0xff] }
 0xd46   :  { %12959 = vmatpush1.bf16.msra.mxu0 %v12724_v41  ;;  %v12681_v41 = vld [vmem:[#allocation2 + $0x4c8] sm:$0xff] }
 0xd47   :  { %12960 = vmatprep.subr.bf16.mxu0 %v12741_v63  ;;  %v12754_v63 = vld [vmem:[#allocation2 + $0x710] sm:$0xff] }
 0xd48   :  { %12877 = vmatpush1.bf16.msra.mxu1 %v12752_v3  ;;  %v12707_v3 = vld [vmem:[#allocation2 + $0x598] sm:$0xff] }
 0xd49   :  { %12878 = vmatprep.subr.bf16.mxu1 %v12769_v20  ;;  %v12616_v20 = vld [vmem:[#allocation2 + $0x2c0] sm:$0xff] }
 0xd4a   :  { %12961 = vmatpush1.bf16.msra.mxu0 %v12740_v47  ;;  %v12697_v47 = vld [vmem:[#allocation2 + $0x548] sm:$0xff] }
 0xd4b   :  { %12962 = vmatprep.subr.bf16.mxu0 %v12757_v13  ;;  %v12770_v13 = vld [vmem:[#allocation2 + $0x790] sm:$0xff] }
 0xd4c   :  { %12879 = vmatpush1.bf16.msra.mxu1 %v12768_v43  ;;  %v12723_v43 = vld [vmem:[#allocation2 + $0x618] sm:$0xff] }
 0xd4d   :  { %12891 = vmatprep.subr.bf16.mxu1 %v12531_v33  ;;  %v12632_v33 = vld [vmem:[#allocation2 + $0x340] sm:$0xff] }
 0xd4e   :  { %12963 = vmatpush1.bf16.msra.mxu0 %v12756_v9  ;;  %v12713_v9 = vld [vmem:[#allocation2 + $0x5c8] sm:$0xff] }
 0xd4f   :  { %12881 = vmatmul.mubr.bf16.vlgmr.msra.gmra.mrb[112].mxu1 %v19324_v5  ;;  %12964 = vmatprep.subr.bf16.mxu0 %v12773_v55  ;;  %v12534_v55 = vld [vmem:[#allocation2 + $0x30] sm:$0xff] }
 0xd50   :  { %12892 = vmatpush1.bf16.msra.mxu1 %v12530_v57  ;;  %12923 = vmatprep.mubr.bf16.mxu1 %v19318_v48  ;;  %v12739_v57 = vld [vmem:[#allocation2 + $0x698] sm:$0xff] }
 0xd51   :  { %12893 = vmatprep.subr.bf16.mxu1 %v12547_v61  ;;  %v12648_v61 = vld [vmem:[#allocation2 + $0x3c0] sm:$0xff] }
 0xd52   :  { %12965 = vmatpush1.bf16.msra.mxu0 %v12772_v58  ;;  %v12729_v58 = vld [vmem:[#allocation2 + $0x648] sm:$0xff] }
 0xd53   :  { %13020 = vmatprep.subr.bf16.mxu0 %v12537_v60  ;;  %v12550_v60 = vld [vmem:[#allocation2 + $0xb0] sm:$0xff] }
 0xd54   :  { %12894 = vmatpush1.bf16.msra.mxu1 %v12546_v42  ;;  %v12755_v42 = vld [vmem:[#allocation2 + $0x718] sm:$0xff] }
 0xd55   :  { %12895 = vmatprep.subr.bf16.mxu1 %v12563_v62  ;;  %12967 = vmatmul.mubr.bf16.vlgmr.msra.gmra.mrb[68].mxu0 %v19324_v5  ;;  %v12664_v62 = vld [vmem:[#allocation2 + $0x440] sm:$0xff] }
 0xd56   :  { %13021 = vmatpush1.bf16.msra.mxu0 %v12536_v52  ;;  %13052 = vmatprep.mubr.bf16.mxu0 %v19318_v48  ;;  %v12745_v52 = vld [vmem:[#allocation2 + $0x6c8] sm:$0xff] }
 0xd57   :  { %13022 = vmatprep.subr.bf16.mxu0 %v12553_v37  ;;  %v12566_v37 = vld [vmem:[#allocation2 + $0x130] sm:$0xff] }
 0xd58   :  { %12896 = vmatpush1.bf16.msra.mxu1 %v12562_v8  ;;  %v12771_v8 = vld [vmem:[#allocation2 + $0x798] sm:$0xff] }
 0xd59   :  { %12897 = vmatprep.subr.bf16.mxu1 %v12579_v51  ;;  %v12680_v51 = vld [vmem:[#allocation2 + $0x4c0] sm:$0xff] }
 0xd5a   :  { %13023 = vmatpush1.bf16.msra.mxu0 %v12552_v46  ;;  %v12761_v46 = vld [vmem:[#allocation2 + $0x748] sm:$0xff] }
 0xd5b   :  { %13024 = vmatprep.subr.bf16.mxu0 %v12569_v25  ;;  %v12582_v25 = vld [vmem:[#allocation2 + $0x1b0] sm:$0xff] }
 0xd5c   :  { %12898 = vmatpush1.bf16.msra.mxu1 %v12578_v53  ;;  %v12535_v53 = vld [vmem:[#allocation2 + $0x38] sm:$0xff] }
 0xd5d   :  { %12899 = vmatprep.subr.bf16.mxu1 %v12595_v49  ;;  %v12696_v49 = vld [vmem:[#allocation2 + $0x540] sm:$0xff] }
 0xd5e   :  { %13025 = vmatpush1.bf16.msra.mxu0 %v12568_v36  ;;  %v12777_v36 = vld [vmem:[#allocation2 + $0x7c8] sm:$0xff] }
 0xd5f   :  { %13026 = vmatprep.subr.bf16.mxu0 %v12585_v50  ;;  %v12598_v50 = vld [vmem:[#allocation2 + $0x230] sm:$0xff] }
 0xd60   :  { %12900 = vmatpush1.bf16.msra.mxu1 %v12594_v15  ;;  %v12551_v15 = vld [vmem:[#allocation2 + $0xb8] sm:$0xff] }
 0xd61   :  { %12901 = vmatprep.subr.bf16.mxu1 %v12611_v4  ;;  %v12712_v4 = vld [vmem:[#allocation2 + $0x5c0] sm:$0xff] }
 0xd62   :  { %13027 = vmatpush1.bf16.msra.mxu0 %v12584_v44  ;;  %v12541_v44 = vld [vmem:[#allocation2 + $0x68] sm:$0xff] }
 0xd63   :  { %13028 = vmatprep.subr.bf16.mxu0 %v12601_v54  ;;  %v12614_v54 = vld [vmem:[#allocation2 + $0x2b0] sm:$0xff] }
 0xd64   :  { %12902 = vmatpush1.bf16.msra.mxu1 %v12610_v21  ;;  %v12567_v21 = vld [vmem:[#allocation2 + $0x138] sm:$0xff] }
 0xd65   :  { %12903 = vmatprep.subr.bf16.mxu1 %v12627_v29  ;;  %v12728_v29 = vld [vmem:[#allocation2 + $0x640] sm:$0xff] }
 0xd66   :  { %13029 = vmatpush1.bf16.msra.mxu0 %v12600_v11  ;;  %v12557_v11 = vld [vmem:[#allocation2 + $0xe8] sm:$0xff] }
 0xd67   :  { %13030 = vmatprep.subr.bf16.mxu0 %v12617_v10  ;;  %v12630_v10 = vld [vmem:[#allocation2 + $0x330] sm:$0xff] }
 0xd68   :  { %12904 = vmatpush1.bf16.msra.mxu1 %v12626_v38  ;;  %v12583_v38 = vld [vmem:[#allocation2 + $0x1b8] sm:$0xff] }
 0xd69   :  { %12905 = vmatprep.subr.bf16.mxu1 %v12643_v1  ;;  %v12744_v1 = vld [vmem:[#allocation2 + $0x6c0] sm:$0xff] }
 0xd6a   :  { %13031 = vmatpush1.bf16.msra.mxu0 %v12616_v20  ;;  %v12573_v20 = vld [vmem:[#allocation2 + $0x168] sm:$0xff] }
 0xd6b   :  { %13032 = vmatprep.subr.bf16.mxu0 %v12633_v14  ;;  %v12646_v14 = vld [vmem:[#allocation2 + $0x3b0] sm:$0xff] }
 0xd6c   :  { %12906 = vmatpush1.bf16.msra.mxu1 %v12642_v23  ;;  %v12599_v23 = vld [vmem:[#allocation2 + $0x238] sm:$0xff] }
 0xd6d   :  { %12907 = vmatprep.subr.bf16.mxu1 %v12659_v22  ;;  %v12760_v22 = vld [vmem:[#allocation2 + $0x740] sm:$0xff] }
 0xd6e   :  { %13033 = vmatpush1.bf16.msra.mxu0 %v12632_v33  ;;  %v12589_v33 = vld [vmem:[#allocation2 + $0x1e8] sm:$0xff] }
 0xd6f   :  { %13034 = vmatprep.subr.bf16.mxu0 %v12649_v18  ;;  %v12662_v18 = vld [vmem:[#allocation2 + $0x430] sm:$0xff] }
 0xd70   :  { %12908 = vmatpush1.bf16.msra.mxu1 %v12658_v12  ;;  %v12615_v12 = vld [vmem:[#allocation2 + $0x2b8] sm:$0xff] }
 0xd71   :  { %12909 = vmatprep.subr.bf16.mxu1 %v12675_v59  ;;  %v12776_v59 = vld [vmem:[#allocation2 + $0x7c0] sm:$0xff] }
 0xd72   :  { %13035 = vmatpush1.bf16.msra.mxu0 %v12648_v61  ;;  %v12605_v61 = vld [vmem:[#allocation2 + $0x268] sm:$0xff] }
 0xd73   :  { %13036 = vmatprep.subr.bf16.mxu0 %v12665_v24  ;;  %v12678_v24 = vld [vmem:[#allocation2 + $0x4b0] sm:$0xff] }
 0xd74   :  { %12910 = vmatpush1.bf16.msra.mxu1 %v12674_v0  ;;  %v12631_v0 = vld [vmem:[#allocation2 + $0x338] sm:$0xff] }
 0xd75   :  { %12911 = vmatprep.subr.bf16.mxu1 %v12691_v2  ;;  %v12540_v2 = vld [vmem:[#allocation2 + $0x60] sm:$0xff] }
 0xd76   :  { %13037 = vmatpush1.bf16.msra.mxu0 %v12664_v62  ;;  %v12621_v62 = vld [vmem:[#allocation2 + $0x2e8] sm:$0xff] }
 0xd77   :  { %13038 = vmatprep.subr.bf16.mxu0 %v12681_v41  ;;  %v12694_v41 = vld [vmem:[#allocation2 + $0x530] sm:$0xff] }
 0xd78   :  { %12912 = vmatpush1.bf16.msra.mxu1 %v12690_v6  ;;  %v12647_v6 = vld [vmem:[#allocation2 + $0x3b8] sm:$0xff] }
 0xd79   :  { %12913 = vmatprep.subr.bf16.mxu1 %v12707_v3  ;;  %v12556_v3 = vld [vmem:[#allocation2 + $0xe0] sm:$0xff] }
 0xd7a   :  { %13039 = vmatpush1.bf16.msra.mxu0 %v12680_v51  ;;  %v12637_v51 = vld [vmem:[#allocation2 + $0x368] sm:$0xff] }
 0xd7b   :  { %13040 = vmatprep.subr.bf16.mxu0 %v12697_v47  ;;  %v12710_v47 = vld [vmem:[#allocation2 + $0x5b0] sm:$0xff] }
 0xd7c   :  { %12914 = vmatpush1.bf16.msra.mxu1 %v12706_v39  ;;  %v12663_v39 = vld [vmem:[#allocation2 + $0x438] sm:$0xff] }
 0xd7d   :  { %12915 = vmatprep.subr.bf16.mxu1 %v12723_v43  ;;  %v12572_v43 = vld [vmem:[#allocation2 + $0x160] sm:$0xff] }
 0xd7e   :  { %13041 = vmatpush1.bf16.msra.mxu0 %v12696_v49  ;;  %v12653_v49 = vld [vmem:[#allocation2 + $0x3e8] sm:$0xff] }
 0xd7f   :  { %13042 = vmatprep.subr.bf16.mxu0 %v12713_v9  ;;  %v12726_v9 = vld [vmem:[#allocation2 + $0x630] sm:$0xff] }
 0xd80   :  { %12916 = vmatpush1.bf16.msra.mxu1 %v12722_v16  ;;  %v12679_v16 = vld [vmem:[#allocation2 + $0x4b8] sm:$0xff] }
 0xd81   :  { %12917 = vmatprep.subr.bf16.mxu1 %v12739_v57  ;;  %v12588_v57 = vld [vmem:[#allocation2 + $0x1e0] sm:$0xff] }
 0xd82   :  { %13043 = vmatpush1.bf16.msra.mxu0 %v12712_v4  ;;  %v12669_v4 = vld [vmem:[#allocation2 + $0x468] sm:$0xff] }
 0xd83   :  { %13044 = vmatprep.subr.bf16.mxu0 %v12729_v58  ;;  %v12742_v58 = vld [vmem:[#allocation2 + $0x6b0] sm:$0xff] }
 0xd84   :  { %12918 = vmatpush1.bf16.msra.mxu1 %v12738_v34  ;;  %v12695_v34 = vld [vmem:[#allocation2 + $0x538] sm:$0xff] }
 0xd85   :  { %12919 = vmatprep.subr.bf16.mxu1 %v12755_v42  ;;  %v12604_v42 = vld [vmem:[#allocation2 + $0x260] sm:$0xff] }
 0xd86   :  { %13045 = vmatpush1.bf16.msra.mxu0 %v12728_v29  ;;  %v12685_v29 = vld [vmem:[#allocation2 + $0x4e8] sm:$0xff] }
 0xd87   :  { %13046 = vmatprep.subr.bf16.mxu0 %v12745_v52  ;;  %v12758_v52 = vld [vmem:[#allocation2 + $0x730] sm:$0xff] }
 0xd88   :  { %12920 = vmatpush1.bf16.msra.mxu1 %v12754_v63  ;;  %v12711_v63 = vld [vmem:[#allocation2 + $0x5b8] sm:$0xff] }
 0xd89   :  { %12921 = vmatprep.subr.bf16.mxu1 %v12771_v8  ;;  %v12620_v8 = vld [vmem:[#allocation2 + $0x2e0] sm:$0xff] }
 0xd8a   :  { %13047 = vmatpush1.bf16.msra.mxu0 %v12744_v1  ;;  %v12701_v1 = vld [vmem:[#allocation2 + $0x568] sm:$0xff] }
 0xd8b   :  { %13048 = vmatprep.subr.bf16.mxu0 %v12761_v46  ;;  %v12774_v46 = vld [vmem:[#allocation2 + $0x7b0] sm:$0xff] }
 0xd8c   :  { %12922 = vmatpush1.bf16.msra.mxu1 %v12770_v13  ;;  %v12727_v13 = vld [vmem:[#allocation2 + $0x638] sm:$0xff] }
 0xd8d   :  { %12977 = vmatprep.subr.bf16.mxu1 %v12535_v53  ;;  %v12636_v53 = vld [vmem:[#allocation2 + $0x360] sm:$0xff] }
 0xd8e   :  { %13049 = vmatpush1.bf16.msra.mxu0 %v12760_v22  ;;  %v12717_v22 = vld [vmem:[#allocation2 + $0x5e8] sm:$0xff] }
 0xd8f   :  { %12924 = vmatmul.mubr.bf16.vlgmr.msra.gmra.mrb[116].mxu1 %v19324_v5  ;;  %13050 = vmatprep.subr.bf16.mxu0 %v12777_v36  ;;  %v12538_v36 = vld [vmem:[#allocation2 + $0x50] sm:$0xff] }
 0xd90   :  { %12978 = vmatpush1.bf16.msra.mxu1 %v12534_v55  ;;  %13009 = vmatprep.mubr.bf16.mxu1 %v19318_v48  ;;  %v12743_v55 = vld [vmem:[#allocation2 + $0x6b8] sm:$0xff] }
 0xd91   :  { %12979 = vmatprep.subr.bf16.mxu1 %v12551_v15  ;;  %v12652_v15 = vld [vmem:[#allocation2 + $0x3e0] sm:$0xff] }
 0xd92   :  { %13051 = vmatpush1.bf16.msra.mxu0 %v12776_v59  ;;  %v12733_v59 = vld [vmem:[#allocation2 + $0x668] sm:$0xff] }
 0xd93   :  { %13106 = vmatprep.subr.bf16.mxu0 %v12541_v44  ;;  %v12554_v44 = vld [vmem:[#allocation2 + $0xd0] sm:$0xff] }
 0xd94   :  { %12980 = vmatpush1.bf16.msra.mxu1 %v12550_v60  ;;  %v12759_v60 = vld [vmem:[#allocation2 + $0x738] sm:$0xff] }
 0xd95   :  { %12981 = vmatprep.subr.bf16.mxu1 %v12567_v21  ;;  %13053 = vmatmul.mubr.bf16.vlgmr.msra.gmra.mrb[72].mxu0 %v19324_v5  ;;  %v12668_v21 = vld [vmem:[#allocation2 + $0x460] sm:$0xff] }
 0xd96   :  { %13107 = vmatpush1.bf16.msra.mxu0 %v12540_v2  ;;  %13138 = vmatprep.mubr.bf16.mxu0 %v19318_v48  ;;  %v12749_v2 = vld [vmem:[#allocation2 + $0x6e8] sm:$0xff] }
 0xd97   :  { %13108 = vmatprep.subr.bf16.mxu0 %v12557_v11  ;;  %v12570_v11 = vld [vmem:[#allocation2 + $0x150] sm:$0xff] }
 0xd98   :  { %12982 = vmatpush1.bf16.msra.mxu1 %v12566_v37  ;;  %v12775_v37 = vld [vmem:[#allocation2 + $0x7b8] sm:$0xff] }
 0xd99   :  { %12983 = vmatprep.subr.bf16.mxu1 %v12583_v38  ;;  %v12684_v38 = vld [vmem:[#allocation2 + $0x4e0] sm:$0xff] }
 0xd9a   :  { %13109 = vmatpush1.bf16.msra.mxu0 %v12556_v3  ;;  %v12765_v3 = vld [vmem:[#allocation2 + $0x768] sm:$0xff] }
 0xd9b   :  { %13110 = vmatprep.subr.bf16.mxu0 %v12573_v20  ;;  %v12586_v20 = vld [vmem:[#allocation2 + $0x1d0] sm:$0xff] }
 0xd9c   :  { %12984 = vmatpush1.bf16.msra.mxu1 %v12582_v25  ;;  %v12539_v25 = vld [vmem:[#allocation2 + $0x58] sm:$0xff] }
 0xd9d   :  { %12985 = vmatprep.subr.bf16.mxu1 %v12599_v23  ;;  %v12700_v23 = vld [vmem:[#allocation2 + $0x560] sm:$0xff] }
 0xd9e   :  { %13111 = vmatpush1.bf16.msra.mxu0 %v12572_v43  ;;  %v12781_v43 = vld [vmem:[#allocation2 + $0x7e8] sm:$0xff] }
 0xd9f   :  { %13112 = vmatprep.subr.bf16.mxu0 %v12589_v33  ;;  %v12602_v33 = vld [vmem:[#allocation2 + $0x250] sm:$0xff] }
 0xda0   :  { %12986 = vmatpush1.bf16.msra.mxu1 %v12598_v50  ;;  %v12555_v50 = vld [vmem:[#allocation2 + $0xd8] sm:$0xff] }
 0xda1   :  { %12987 = vmatprep.subr.bf16.mxu1 %v12615_v12  ;;  %v12716_v12 = vld [vmem:[#allocation2 + $0x5e0] sm:$0xff] }
 0xda2   :  { %13113 = vmatpush1.bf16.msra.mxu0 %v12588_v57  ;;  %v12618_v57 = vld [vmem:[#allocation2 + $0x2d0] sm:$0xff] }
 0xda3   :  { %13114 = vmatprep.subr.bf16.mxu0 %v12605_v61  ;;  %v12635_v61 = vld [vmem:[#allocation2 + $0x358] sm:$0xff] }
 0xda4   :  { %12988 = vmatpush1.bf16.msra.mxu1 %v12614_v54  ;;  %v12571_v54 = vld [vmem:[#allocation2 + $0x158] sm:$0xff] }
 0xda5   :  { %12989 = vmatprep.subr.bf16.mxu1 %v12631_v0  ;;  %v12732_v0 = vld [vmem:[#allocation2 + $0x660] sm:$0xff] }
 0xda6   :  { %13115 = vmatpush1.bf16.msra.mxu0 %v12604_v42  ;;  %v12650_v42 = vld [vmem:[#allocation2 + $0x3d0] sm:$0xff] }
 0xda7   :  { %13116 = vmatprep.subr.bf16.mxu0 %v12621_v62  ;;  %v12667_v62 = vld [vmem:[#allocation2 + $0x458] sm:$0xff] }
 0xda8   :  { %12990 = vmatpush1.bf16.msra.mxu1 %v12630_v10  ;;  %v12587_v10 = vld [vmem:[#allocation2 + $0x1d8] sm:$0xff] }
 0xda9   :  { %12991 = vmatprep.subr.bf16.mxu1 %v12647_v6  ;;  %v12748_v6 = vld [vmem:[#allocation2 + $0x6e0] sm:$0xff] }
 0xdaa   :  { %13117 = vmatpush1.bf16.msra.mxu0 %v12620_v8  ;;  %v12682_v8 = vld [vmem:[#allocation2 + $0x4d0] sm:$0xff] }
 0xdab   :  { %13118 = vmatprep.subr.bf16.mxu0 %v12637_v51  ;;  %v12699_v51 = vld [vmem:[#allocation2 + $0x558] sm:$0xff] }
 0xdac   :  { %12992 = vmatpush1.bf16.msra.mxu1 %v12646_v14  ;;  %v12603_v14 = vld [vmem:[#allocation2 + $0x258] sm:$0xff] }
 0xdad   :  { %12993 = vmatprep.subr.bf16.mxu1 %v12663_v39  ;;  %v12764_v39 = vld [vmem:[#allocation2 + $0x760] sm:$0xff] }
 0xdae   :  { %13119 = vmatpush1.bf16.msra.mxu0 %v12636_v53  ;;  %v12714_v53 = vld [vmem:[#allocation2 + $0x5d0] sm:$0xff] }
 0xdaf   :  { %13120 = vmatprep.subr.bf16.mxu0 %v12653_v49  ;;  %v12731_v49 = vld [vmem:[#allocation2 + $0x658] sm:$0xff] }
 0xdb0   :  { %12994 = vmatpush1.bf16.msra.mxu1 %v12662_v18  ;;  %v12619_v18 = vld [vmem:[#allocation2 + $0x2d8] sm:$0xff] }
 0xdb1   :  { %12995 = vmatprep.subr.bf16.mxu1 %v12679_v16  ;;  %v12780_v16 = vld [vmem:[#allocation2 + $0x7e0] sm:$0xff] }
 0xdb2   :  { %13121 = vmatpush1.bf16.msra.mxu0 %v12652_v15  ;;  %v12746_v15 = vld [vmem:[#allocation2 + $0x6d0] sm:$0xff] }
 0xdb3   :  { %13122 = vmatprep.subr.bf16.mxu0 %v12669_v4  ;;  %v12763_v4 = vld [vmem:[#allocation2 + $0x758] sm:$0xff] }
 0xdb4   :  { %12996 = vmatpush1.bf16.msra.mxu1 %v12678_v24  ;;  %v12634_v24 = vld [vmem:[#allocation2 + $0x350] sm:$0xff] }
 0xdb5   :  { %12997 = vmatprep.subr.bf16.mxu1 %v12695_v34  ;;  %v12651_v34 = vld [vmem:[#allocation2 + $0x3d8] sm:$0xff] }
 0xdb6   :  { %13123 = vmatpush1.bf16.msra.mxu0 %v12668_v21  ;;  %v12778_v21 = vld [vmem:[#allocation2 + $0x7d0] sm:$0xff] }
 0xdb7   :  { %13124 = vmatprep.subr.bf16.mxu0 %v12685_v29  ;;  %v12543_v29 = vld [vmem:[#allocation2 + $0x78] sm:$0xff] }
 0xdb8   :  { %12998 = vmatpush1.bf16.msra.mxu1 %v12694_v41  ;;  %v12666_v41 = vld [vmem:[#allocation2 + $0x450] sm:$0xff] }
 0xdb9   :  { %12999 = vmatprep.subr.bf16.mxu1 %v12711_v63  ;;  %v12683_v63 = vld [vmem:[#allocation2 + $0x4d8] sm:$0xff] }
 0xdba   :  { %13125 = vmatpush1.bf16.msra.mxu0 %v12684_v38  ;;  %v12558_v38 = vld [vmem:[#allocation2 + $0xf0] sm:$0xff] }
 0xdbb   :  { %13126 = vmatprep.subr.bf16.mxu0 %v12701_v1  ;;  %v12575_v1 = vld [vmem:[#allocation2 + $0x178] sm:$0xff] }
 0xdbc   :  { %13000 = vmatpush1.bf16.msra.mxu1 %v12710_v47  ;;  %v12698_v47 = vld [vmem:[#allocation2 + $0x550] sm:$0xff] }
 0xdbd   :  { %13001 = vmatprep.subr.bf16.mxu1 %v12727_v13  ;;  %v12715_v13 = vld [vmem:[#allocation2 + $0x5d8] sm:$0xff] }
 0xdbe   :  { %13127 = vmatpush1.bf16.msra.mxu0 %v12700_v23  ;;  %v12590_v23 = vld [vmem:[#allocation2 + $0x1f0] sm:$0xff] }
 0xdbf   :  { %13128 = vmatprep.subr.bf16.mxu0 %v12717_v22  ;;  %v12607_v22 = vld [vmem:[#allocation2 + $0x278] sm:$0xff] }
 0xdc0   :  { %13002 = vmatpush1.bf16.msra.mxu1 %v12726_v9  ;;  %v12730_v9 = vld [vmem:[#allocation2 + $0x650] sm:$0xff] }
 0xdc1   :  { %13003 = vmatprep.subr.bf16.mxu1 %v12743_v55  ;;  %v12747_v55 = vld [vmem:[#allocation2 + $0x6d8] sm:$0xff] }
 0xdc2   :  { %13129 = vmatpush1.bf16.msra.mxu0 %v12716_v12  ;;  %v19641_v12 = vrot.slane %v17980_v31, %v17988_v35 }
 0xdc3   :  { %13130 = vmatprep.subr.bf16.mxu0 %v12733_v59  ;;  %v19642_v59 = vrot.slane %v17980_v31, %v18117_v17 }
 0xdc4   :  { %13004 = vmatpush1.bf16.msra.mxu1 %v12742_v58  ;;  %v12762_v58 = vld [vmem:[#allocation2 + $0x750] sm:$0xff] }
 0xdc5   :  { %13005 = vmatprep.subr.bf16.mxu1 %v12759_v60  ;;  %v12779_v60 = vld [vmem:[#allocation2 + $0x7d8] sm:$0xff] }
 0xdc6   :  { %13131 = vmatpush1.bf16.msra.mxu0 %v12732_v0 }
 0xdc7   :  { %13132 = vmatprep.subr.bf16.mxu0 %v12749_v2  ;;  %v12639_v2 = vld [vmem:[#allocation2 + $0x378] sm:$0xff] }
 0xdc8   :  { %13006 = vmatpush1.bf16.msra.mxu1 %v12758_v52  ;;  %v12542_v52 = vld [vmem:[#allocation2 + $0x70] sm:$0xff] }
 0xdc9   :  { %13007 = vmatprep.subr.bf16.mxu1 %v12775_v37  ;;  %v12559_v37 = vld [vmem:[#allocation2 + $0xf8] sm:$0xff] }
 0xdca   :  { %13133 = vmatpush1.bf16.msra.mxu0 %v12748_v6 }
 0xdcb   :  { %13134 = vmatprep.subr.bf16.mxu0 %v12765_v3 }
 0xdcc   :  { %13008 = vmatpush1.bf16.msra.mxu1 %v12774_v46  ;;  %v12574_v46 = vld [vmem:[#allocation2 + $0x170] sm:$0xff] }
 0xdcd   :  { %13063 = vmatprep.subr.bf16.mxu1 %v12539_v25  ;;  %v12591_v25 = vld [vmem:[#allocation2 + $0x1f8] sm:$0xff] }
 0xdce   :  { %13135 = vmatpush1.bf16.msra.mxu0 %v12764_v39 }
 0xdcf   :  { %13010 = vmatmul.mubr.bf16.vlgmr.msra.gmra.mrb[120].mxu1 %v19324_v5  ;;  %13136 = vmatprep.subr.bf16.mxu0 %v12781_v43  ;;  %v12638_v43 = vld [vmem:[#allocation2 + $0x370] sm:$0xff] }
 0xdd0   :  { %13064 = vmatpush1.bf16.msra.mxu1 %v12538_v36  ;;  %13095 = vmatprep.mubr.bf16.mxu1 %v19318_v48  ;;  %v12606_v36 = vld [vmem:[#allocation2 + $0x270] sm:$0xff] }
 0xdd1   :  { %13065 = vmatprep.subr.bf16.mxu1 %v12555_v50  ;;  %v12623_v50 = vld [vmem:[#allocation2 + $0x2f8] sm:$0xff] }
 0xdd2   :  { %13137 = vmatpush1.bf16.msra.mxu0 %v12780_v16  ;;  %v12655_v16 = vld [vmem:[#allocation2 + $0x3f8] sm:$0xff] }
 0xdd4   :  { %13066 = vmatpush1.bf16.msra.mxu1 %v12554_v44  ;;  %v12791_v44 = vrot.slane %v19642_v59, %v17988_v35  ;;  %v12782_v59 = vld [vmem:[#allocation2 + $0x7f0] sm:$0xff] }
 0xdd5   :  { %13067 = vmatprep.subr.bf16.mxu1 %v12571_v54  ;;  %13139 = vmatmul.mubr.bf16.vlgmr.msra.gmra.mrb[76].mxu0 %v19324_v5  ;;  %v12622_v54 = vld [vmem:[#allocation2 + $0x2f0] sm:$0xff] }
 0xdd8   :  { %13068 = vmatpush1.bf16.msra.mxu1 %v12570_v11 }
 0xdd9   :  { %13069 = vmatprep.subr.bf16.mxu1 %v12587_v10 }
 0xddc   :  { %13070 = vmatpush1.bf16.msra.mxu1 %v12586_v20 }
 0xddd   :  { %13071 = vmatprep.subr.bf16.mxu1 %v12603_v14 }
 0xde0   :  { %13072 = vmatpush1.bf16.msra.mxu1 %v12602_v33 }
 0xde1   :  { %13073 = vmatprep.subr.bf16.mxu1 %v12619_v18 }
 0xde4   :  { %13074 = vmatpush1.bf16.msra.mxu1 %v12618_v57 }
 0xde5   :  { %13075 = vmatprep.subr.bf16.mxu1 %v12635_v61 }
 0xde8   :  { %13076 = vmatpush1.bf16.msra.mxu1 %v12634_v24  ;;  %v12654_v24 = vld [vmem:[#allocation2 + $0x3f0] sm:$0xff] }
 0xde9   :  { %13077 = vmatprep.subr.bf16.mxu1 %v12651_v34  ;;  %v12671_v34 = vld [vmem:[#allocation2 + $0x478] sm:$0xff] }
 0xdec   :  { %13078 = vmatpush1.bf16.msra.mxu1 %v12650_v42  ;;  %v12670_v42 = vld [vmem:[#allocation2 + $0x470] sm:$0xff] }
 0xded   :  { %13079 = vmatprep.subr.bf16.mxu1 %v12667_v62  ;;  %v12687_v62 = vld [vmem:[#allocation2 + $0x4f8] sm:$0xff] }
 0xdf0   :  { %13080 = vmatpush1.bf16.msra.mxu1 %v12666_v41  ;;  %v12686_v41 = vld [vmem:[#allocation2 + $0x4f0] sm:$0xff] }
 0xdf1   :  { %13081 = vmatprep.subr.bf16.mxu1 %v12683_v63  ;;  %v12703_v63 = vld [vmem:[#allocation2 + $0x578] sm:$0xff] }
 0xdf4   :  { %13082 = vmatpush1.bf16.msra.mxu1 %v12682_v8  ;;  %v19643_v8 = vrot.slane %v17980_v31, %v18194_v19 }
 0xdf5   :  { %13083 = vmatprep.subr.bf16.mxu1 %v12699_v51 }
 0xdf6   :  { %v12803_v51 = vrot.slane %v19643_v8, %v17988_v35  ;;  %v19647_v8 = vrot.slane %v17982_v32, %v17988_v35 }
 0xdf8   :  { %13084 = vmatpush1.bf16.msra.mxu1 %v12698_v47  ;;  %v12702_v47 = vld [vmem:[#allocation2 + $0x570] sm:$0xff] }
 0xdf9   :  { %13085 = vmatprep.subr.bf16.mxu1 %v12715_v13  ;;  %v19644_v13 = vrot.slane %v17980_v31, %v18205_v26 }
 0xdfc   :  { %13086 = vmatpush1.bf16.msra.mxu1 %v12714_v53  ;;  %v12807_v53 = vrot.slane %v19644_v13, %v17988_v35 }
 0xdfd   :  { %13087 = vmatprep.subr.bf16.mxu1 %v12731_v49  ;;  %v12719_v49 = vld [vmem:[#allocation2 + $0x5f8] sm:$0xff] }
 0xe00   :  { %13088 = vmatpush1.bf16.msra.mxu1 %v12730_v9 }
 0xe01   :  { %13089 = vmatprep.subr.bf16.mxu1 %v12747_v55 }
 0xe04   :  { %13090 = vmatpush1.bf16.msra.mxu1 %v12746_v15 }
 0xe05   :  { %13091 = vmatprep.subr.bf16.mxu1 %v12763_v4  ;;  %v12718_v4 = vld [vmem:[#allocation2 + $0x5f0] sm:$0xff] }
 0xe08   :  { %13092 = vmatpush1.bf16.msra.mxu1 %v12762_v58 }
 0xe09   :  { %13093 = vmatprep.subr.bf16.mxu1 %v12779_v60 }
 0xe0c   :  { %13094 = vmatpush1.bf16.msra.mxu1 %v12778_v21  ;;  %v12735_v21 = vld [vmem:[#allocation2 + $0x678] sm:$0xff] }
 0xe0d   :  { %13149 = vmatprep.subr.bf16.mxu1 %v12543_v29 }
 0xe0f   :  { %13096 = vmatmul.mubr.bf16.vlgmr.msra.gmra.mrb[124].mxu1 %v19324_v5 }
 0xe10   :  { %13150 = vmatpush1.bf16.msra.mxu1 %v12542_v52  ;;  %13181 = vmatprep.mubr.bf16.mxu1 %v19318_v48  ;;  %v12787_v48 = vrot.slane %v19641_v12, %v17988_v35  ;;  %v12766_v12 = vld [vmem:[#allocation2 + $0x770] sm:$0xff] }
 0xe11   :  { %13151 = vmatprep.subr.bf16.mxu1 %v12559_v37 }
 0xe14   :  { %13152 = vmatpush1.bf16.msra.mxu1 %v12558_v38 }
 0xe15   :  { %13153 = vmatprep.subr.bf16.mxu1 %v12575_v1 }
 0xe18   :  { %13154 = vmatpush1.bf16.msra.mxu1 %v12574_v46 }
 0xe19   :  { %13155 = vmatprep.subr.bf16.mxu1 %v12591_v25  ;;  %v12734_v25 = vld [vmem:[#allocation2 + $0x670] sm:$0xff] }
 0xe1c   :  { %13156 = vmatpush1.bf16.msra.mxu1 %v12590_v23 }
 0xe1d   :  { %13157 = vmatprep.subr.bf16.mxu1 %v12607_v22  ;;  %v12751_v22 = vld [vmem:[#allocation2 + $0x6f8] sm:$0xff] }
 0xe20   :  { %13158 = vmatpush1.bf16.msra.mxu1 %v12606_v36  ;;  %v12750_v36 = vld [vmem:[#allocation2 + $0x6f0] sm:$0xff] }
 0xe21   :  { %13159 = vmatprep.subr.bf16.mxu1 %v12623_v50  ;;  %v12767_v50 = vld [vmem:[#allocation2 + $0x778] sm:$0xff] }
 0xe22   :  { %v12882_v0 = vpop.f32.mrb[112].mxu1 }
 0xe23   :  { %v19347_v11 = vadd.f32 %v12882_v0, %v12787_v48  ;;  %v12884_v10 = vpop.f32.mrb[113].mxu1  ;;  %v19646_v0 = vrot.slane %v17980_v31, %v18181_v7 }
 0xe24   :  { %v19349_v6 = vadd.f32 %v12884_v10, %v12791_v44  ;;  %v12886_v3 = vpop.f32.mrb[114].mxu1  ;;  %13160 = vmatpush1.bf16.msra.mxu1 %v12622_v54 }
 0xe25   :  { %v13192_v20 = vmax.f32 %v19347_v11, 0.0  ;;  %v19352_v14 = vadd.f32 %v12886_v3, %v12787_v48  ;;  %v12888_v39 = vpop.f32.mrb[115].mxu1  ;;  %13161 = vmatprep.subr.bf16.mxu1 %v12639_v2  ;;  %v12783_v48 = vld [vmem:[#allocation2 + $0x7f8] sm:$0xff]  ;;  %v12799_v2 = vrot.slane %v19646_v0, %v17988_v35 }
 0xe26   :  { %v13193_v33 = vmax.f32 %v19349_v6, 0.0  ;;  %v19355_v18 = vadd.f32 %v12888_v39, %v12791_v44  ;;  %v19645_v44 = vrot.slane %v17980_v31, %v18130_v27 }
 0xe27   :  { %v13208_v57 = vmax.f32 %v19352_v14, 0.0 }
 0xe28   :  { %v13209_v61 = vmax.f32 %v19355_v18, 0.0  ;;  %13162 = vmatpush1.bf16.msra.mxu1 %v12638_v43  ;;  %v12968_v9 = vpop.f32.mrb[68].mxu0  ;;  %v12795_v54 = vrot.slane %v19645_v44, %v17988_v35  ;;  %v19651_v44 = vld [vmem:[#allocation15_spill] sm:$0xff] }
 0xe29   :  { %13163 = vmatprep.subr.bf16.mxu1 %v12655_v16  ;;  %v19367_v55 = vadd.f32 %v12968_v9, %v12803_v51  ;;  %v12970_v15 = vpop.f32.mrb[69].mxu0 }
 0xe2a   :  { %v19369_v58 = vadd.f32 %v12970_v15, %v12807_v53  ;;  %v12972_v60 = vpop.f32.mrb[70].mxu0 }
 0xe2b   :  { %v13196_v29 = vmax.f32 %v19367_v55, 0.0  ;;  %v19372_v52 = vadd.f32 %v12972_v60, %v12803_v51  ;;  %v12974_v37 = vpop.f32.mrb[71].mxu0  ;;  %v12819_v51 = vrot.slane %v19647_v8, %v17988_v35 }
 0xe2c   :  { %13164 = vmatpush1.bf16.msra.mxu1 %v12654_v24  ;;  %v13197_v38 = vmax.f32 %v19369_v58, 0.0  ;;  %v19375_v1 = vadd.f32 %v12974_v37, %v12807_v53 }
 0xe2d   :  { %13165 = vmatprep.subr.bf16.mxu1 %v12671_v34  ;;  %v13212_v46 = vmax.f32 %v19372_v52, 0.0 }
 0xe2e   :  { %v13213_v23 = vmax.f32 %v19375_v1, 0.0 }
 0xe30   :  { %13166 = vmatpush1.bf16.msra.mxu1 %v12670_v42 }
 0xe31   :  { %13167 = vmatprep.subr.bf16.mxu1 %v12687_v62 }
 0xe34   :  { %13168 = vmatpush1.bf16.msra.mxu1 %v12686_v41 }
 0xe35   :  { %13169 = vmatprep.subr.bf16.mxu1 %v12703_v63 }
 0xe38   :  { %13170 = vmatpush1.bf16.msra.mxu1 %v12702_v47  ;;  %v19648_v47 = vrot.slane %v17982_v32, %v18117_v17 }
 0xe39   :  { %13171 = vmatprep.subr.bf16.mxu1 %v12719_v49 }
 0xe3a   :  { %v12823_v13 = vrot.slane %v19648_v47, %v17988_v35 }
 0xe3c   :  { %13172 = vmatpush1.bf16.msra.mxu1 %v12718_v4 }
 0xe3d   :  { %13173 = vmatprep.subr.bf16.mxu1 %v12735_v21 }
 0xe40   :  { %13174 = vmatpush1.bf16.msra.mxu1 %v12734_v25 }
 0xe41   :  { %13175 = vmatprep.subr.bf16.mxu1 %v12751_v22 }
 0xe44   :  { %13176 = vmatpush1.bf16.msra.mxu1 %v12750_v36 }
 0xe45   :  { %13177 = vmatprep.subr.bf16.mxu1 %v12767_v50 }
 0xe48   :  { %13178 = vmatpush1.bf16.msra.mxu1 %v12766_v12  ;;  %v19649_v12 = vld [vmem:[#allocation14_spill] sm:$0xff] }
 0xe49   :  { %13179 = vmatprep.subr.bf16.mxu1 %v12783_v48  ;;  %v19650_v48 = vrot.slane %v17980_v31, %v19649_v12 }
 0xe4c   :  { %13180 = vmatpush1.bf16.msra.mxu1 %v12782_v59  ;;  %v12811_v59 = vrot.slane %v19650_v48, %v17988_v35  ;;  %v19654_v48 = vrot.slane %v17982_v32, %v18205_v26 }
 0xe4f   :  { %13182 = vmatmul.mubr.bf16.vlgmr.msra.gmra.mrb[128].mxu1 %v19324_v5 }
 0xe62   :  { %v12925_v10 = vpop.f32.mrb[116].mxu1 }
 0xe63   :  { %v19388_v3 = vadd.f32 %v12925_v10, %v12795_v54  ;;  %v12927_v39 = vpop.f32.mrb[117].mxu1 }
 0xe64   :  { %v19390_v43 = vadd.f32 %v12927_v39, %v12799_v2  ;;  %v12929_v16 = vpop.f32.mrb[118].mxu1 }
 0xe65   :  { %v13194_v24 = vmax.f32 %v19388_v3, 0.0  ;;  %v19393_v5 = vadd.f32 %v12929_v16, %v12795_v54  ;;  %v12931_v34 = vpop.f32.mrb[119].mxu1  ;;  %v19652_v54 = vrot.slane %v17980_v31, %v19651_v44 }
 0xe66   :  { %v13195_v42 = vmax.f32 %v19390_v43, 0.0  ;;  %v19396_v62 = vadd.f32 %v12931_v34, %v12799_v2 }
 0xe67   :  { %v13210_v41 = vmax.f32 %v19393_v5, 0.0  ;;  %v12815_v0 = vrot.slane %v19652_v54, %v17988_v35 }
 0xe68   :  { %v13211_v63 = vmax.f32 %v19396_v62, 0.0  ;;  %v13054_v53 = vpop.f32.mrb[72].mxu0 }
 0xe69   :  { %v19408_v49 = vadd.f32 %v13054_v53, %v12819_v51  ;;  %v13056_v9 = vpop.f32.mrb[73].mxu0 }
 0xe6a   :  { %v19410_v15 = vadd.f32 %v13056_v9, %v12823_v13  ;;  %v13058_v4 = vpop.f32.mrb[74].mxu0 }
 0xe6b   :  { %v19413_v21 = vadd.f32 %v13058_v4, %v12819_v51  ;;  %v13060_v37 = vpop.f32.mrb[75].mxu0  ;;  %v19653_v4 = vrot.slane %v17982_v32, %v18194_v19 }
 0xe6c   :  { %v19416_v22 = vadd.f32 %v13060_v37, %v12823_v13 }
 0xe6d   :  { %v12835_v37 = vrot.slane %v19653_v4, %v17988_v35 }
 0xea2   :  { %v13011_v2 = vpop.f32.mrb[120].mxu1 }
 0xea3   :  { %v19428_v10 = vadd.f32 %v13011_v2, %v12811_v59  ;;  %v13013_v39 = vpop.f32.mrb[121].mxu1 }
 0xea4   :  { %v19430_v16 = vadd.f32 %v13013_v39, %v12815_v0  ;;  %v13015_v34 = vpop.f32.mrb[122].mxu1 }
 0xea5   :  { %v19433_v51 = vadd.f32 %v13015_v34, %v12811_v59  ;;  %v13017_v47 = vpop.f32.mrb[123].mxu1  ;;  %v12839_v59 = vrot.slane %v19654_v48, %v17988_v35  ;;  %v19655_v48 = vrot.slane %v17982_v32, %v18130_v27 }
 0xea6   :  { %v13199_v13 = vmax.f32 %v19430_v16, 0.0  ;;  %v19436_v53 = vadd.f32 %v13017_v47, %v12815_v0 }
 0xea8   :  { %v13140_v54 = vpop.f32.mrb[76].mxu0 }
 0xea9   :  { %v19448_v2 = vadd.f32 %v13140_v54, %v12835_v37  ;;  %v13142_v39 = vpop.f32.mrb[77].mxu0  ;;  %v12827_v54 = vrot.slane %v19655_v48, %v17988_v35 }
 0xeaa   :  { %v19450_v0 = vadd.f32 %v13142_v39, %v12839_v59  ;;  %v13144_v34 = vpop.f32.mrb[78].mxu0  ;;  %v19656_v39 = vrot.slane %v17982_v32, %v18181_v7 }
 0xeab   :  { %v19453_v36 = vadd.f32 %v13144_v34, %v12835_v37  ;;  %v13146_v60 = vpop.f32.mrb[79].mxu0 }
 0xeac   :  { %v19456_v4 = vadd.f32 %v13146_v60, %v12839_v59  ;;  %v12831_v37 = vrot.slane %v19656_v39, %v17988_v35  ;;  %v19657_v39 = vrot.slane %v17982_v32, %v19649_v12 }
 0xee2   :  { %v13097_v34 = vpop.f32.mrb[124].mxu1 }
 0xee3   :  { %v19468_v47 = vadd.f32 %v13097_v34, %v12827_v54  ;;  %v13099_v19 = vpop.f32.mrb[125].mxu1  ;;  %v19658_v34 = vrot.slane %v17982_v32, %v19651_v44 }
 0xee4   :  { %v19470_v60 = vadd.f32 %v13099_v19, %v12831_v37  ;;  %v13101_v59 = vpop.f32.mrb[126].mxu1  ;;  %v12843_v19 = vrot.slane %v19657_v39, %v17988_v35 }
 0xee5   :  { %v19473_v26 = vadd.f32 %v13101_v59, %v12827_v54  ;;  %v13103_v25 = vpop.f32.mrb[127].mxu1  ;;  %v12847_v54 = vrot.slane %v19658_v34, %v17988_v35 }
 0xee6   :  { %v19476_v48 = vadd.f32 %v13103_v25, %v12831_v37 }
 0xf22   :  { %v13183_v59 = vpop.f32.mrb[128].mxu1 }
 0xf23   :  { %v19488_v50 = vadd.f32 %v13183_v59, %v12843_v19  ;;  %v13185_v27 = vpop.f32.mrb[129].mxu1 }
 0xf24   :  { %v19490_v25 = vadd.f32 %v13185_v27, %v12847_v54  ;;  %v13187_v37 = vpop.f32.mrb[130].mxu1 }
 0xf25   :  { %v13206_v9 = vmax.f32 %v19488_v50, 0.0  ;;  %v19493_v7 = vadd.f32 %v13187_v37, %v12843_v19  ;;  %v13189_v8 = vpop.f32.mrb[131].mxu1 }
 0xf26   :  { %v13207_v12 = vmax.f32 %v19490_v25, 0.0  ;;  %v19496_v39 = vadd.f32 %v13189_v8, %v12847_v54 }
 0xf27   :  { %v13222_v31 = vmax.f32 %v19493_v7, 0.0 }
 0xf28   :  { %v13223_v32 = vmax.f32 %v19496_v39, 0.0 }
 0xf29   :  { %15086 = dma.done.wait [#allocation4 + $0x1], 32768 }
 0xf2a   :  { %15087 = vsyncadd [#allocation4 + $0x1], 4294934528  ;;  %v13229_v44 = vpack.c.bf16 %v13209_v61, %v13193_v33  ;;  %15078 = vset.pattern.permute.xlu0 %v15093_v45  ;;  %15079 = vset.pattern.permute.xlu1 %v15093_v45  ;;  %v13245_v27 = vld [vmem:[#allocation3 + $0x8] sm:$0xff]  ;;  %v13244_v19 = vld [vmem:[#allocation3] sm:$0xff] }
 0xf2b   :  { %v13247_v8 = vld [vmem:[#allocation3 + $0x18] sm:$0xff]  ;;  %13511 = vmatprep.subr.bf16.mxu0 %v13245_v27  ;;  %v13246_v34 = vld [vmem:[#allocation3 + $0x10] sm:$0xff]  ;;  %v13249_v54 = vld [vmem:[#allocation3 + $0x28] sm:$0xff] }
 0xf2c   :  { %13543 = vmatprep.mubr.bf16.mxu0 %v13229_v44  ;;  %13512 = vmatpush1.bf16.msra.mxu0 %v13244_v19  ;;  %v13248_v59 = vld [vmem:[#allocation3 + $0x20] sm:$0xff]  ;;  %v13251_v6 = vld [vmem:[#allocation3 + $0x38] sm:$0xff]  ;;  %v13250_v33 = vld [vmem:[#allocation3 + $0x30] sm:$0xff] }
 0xf2d   :  { %13513 = vmatprep.subr.bf16.mxu0 %v13247_v8  ;;  %v13253_v18 = vld [vmem:[#allocation3 + $0x48] sm:$0xff]  ;;  %v13252_v45 = vld [vmem:[#allocation3 + $0x40] sm:$0xff]  ;;  %v13255_v61 = vld [vmem:[#allocation3 + $0x58] sm:$0xff] }
 0xf2e   :  { %v13254_v37 = vld [vmem:[#allocation3 + $0x50] sm:$0xff]  ;;  %v13257_v44 = vld [vmem:[#allocation3 + $0x68] sm:$0xff]  ;;  %v13256_v27 = vld [vmem:[#allocation3 + $0x60] sm:$0xff] }
 0xf2f   :  { %v13259_v19 = vld [vmem:[#allocation3 + $0x78] sm:$0xff]  ;;  %v13258_v8 = vld [vmem:[#allocation3 + $0x70] sm:$0xff]  ;;  %v13280_v11 = vld [vmem:[#allocation3 + $0x120] sm:$0xff] }
 0xf30   :  { %13514 = vmatpush1.bf16.msra.mxu0 %v13246_v34  ;;  %v13261_v34 = vld [vmem:[#allocation3 + $0x88] sm:$0xff]  ;;  %v13283_v14 = vld [vmem:[#allocation3 + $0x138] sm:$0xff]  ;;  %v13284_v43 = vld [vmem:[#allocation3 + $0x140] sm:$0xff] }
 0xf31   :  { %13515 = vmatprep.subr.bf16.mxu0 %v13249_v54  ;;  %v13260_v54 = vld [vmem:[#allocation3 + $0x80] sm:$0xff]  ;;  %v13286_v62 = vld [vmem:[#allocation3 + $0x150] sm:$0xff]  ;;  %v13315_v5 = vld [vmem:[#allocation3 + $0x238] sm:$0xff] }
 0xf32   :  { %v13312_v3 = vld [vmem:[#allocation3 + $0x220] sm:$0xff]  ;;  %v13317_v58 = vld [vmem:[#allocation3 + $0x248] sm:$0xff]  ;;  %v13319_v1 = vld [vmem:[#allocation3 + $0x258] sm:$0xff] }
 0xf33   :  { %v13344_v55 = vld [vmem:[#allocation3 + $0x320] sm:$0xff]  ;;  %v13347_v52 = vld [vmem:[#allocation3 + $0x338] sm:$0xff]  ;;  %v13477_v25 = vld [vmem:[#allocation3 + $0x748] sm:$0xff] }
 0xf34   :  { %13516 = vmatpush1.bf16.msra.mxu0 %v13248_v59  ;;  %v13263_v59 = vld [vmem:[#allocation3 + $0x98] sm:$0xff]  ;;  %v13348_v16 = vld [vmem:[#allocation3 + $0x340] sm:$0xff] }
 0xf35   :  { %13517 = vmatprep.subr.bf16.mxu0 %v13251_v6  ;;  %v13262_v6 = vld [vmem:[#allocation3 + $0x90] sm:$0xff]  ;;  %v13479_v39 = vld [vmem:[#allocation3 + $0x758] sm:$0xff] }
 0xf38   :  { %13518 = vmatpush1.bf16.msra.mxu0 %v13250_v33  ;;  %v13265_v33 = vld [vmem:[#allocation3 + $0xa8] sm:$0xff] }
 0xf39   :  { %13519 = vmatprep.subr.bf16.mxu0 %v13253_v18  ;;  %v13264_v18 = vld [vmem:[#allocation3 + $0xa0] sm:$0xff] }
 0xf3c   :  { %13520 = vmatpush1.bf16.msra.mxu0 %v13252_v45  ;;  %v13267_v45 = vld [vmem:[#allocation3 + $0xb8] sm:$0xff] }
 0xf3d   :  { %13521 = vmatprep.subr.bf16.mxu0 %v13255_v61  ;;  %v13266_v61 = vld [vmem:[#allocation3 + $0xb0] sm:$0xff] }
 0xf40   :  { %13522 = vmatpush1.bf16.msra.mxu0 %v13254_v37  ;;  %v13269_v37 = vld [vmem:[#allocation3 + $0xc8] sm:$0xff] }
 0xf41   :  { %13523 = vmatprep.subr.bf16.mxu0 %v13257_v44  ;;  %v13268_v44 = vld [vmem:[#allocation3 + $0xc0] sm:$0xff] }
 0xf44   :  { %13524 = vmatpush1.bf16.msra.mxu0 %v13256_v27  ;;  %v13271_v27 = vld [vmem:[#allocation3 + $0xd8] sm:$0xff] }
 0xf45   :  { %13525 = vmatprep.subr.bf16.mxu0 %v13259_v19  ;;  %v13270_v19 = vld [vmem:[#allocation3 + $0xd0] sm:$0xff] }
 0xf48   :  { %13526 = vmatpush1.bf16.msra.mxu0 %v13258_v8  ;;  %v13273_v8 = vld [vmem:[#allocation3 + $0xe8] sm:$0xff] }
 0xf49   :  { %13527 = vmatprep.subr.bf16.mxu0 %v13261_v34  ;;  %v13272_v34 = vld [vmem:[#allocation3 + $0xe0] sm:$0xff] }
 0xf4c   :  { %13528 = vmatpush1.bf16.msra.mxu0 %v13260_v54  ;;  %v13275_v54 = vld [vmem:[#allocation3 + $0xf8] sm:$0xff] }
 0xf4d   :  { %13529 = vmatprep.subr.bf16.mxu0 %v13263_v59  ;;  %v13274_v59 = vld [vmem:[#allocation3 + $0xf0] sm:$0xff] }
 0xf50   :  { %13530 = vmatpush1.bf16.msra.mxu0 %v13262_v6  ;;  %v13277_v6 = vld [vmem:[#allocation3 + $0x108] sm:$0xff] }
 0xf51   :  { %13531 = vmatprep.subr.bf16.mxu0 %v13265_v33  ;;  %v13228_v33 = vpack.c.bf16 %v13208_v57, %v13192_v20  ;;  %v13282_v20 = vld [vmem:[#allocation3 + $0x130] sm:$0xff]  ;;  %v13285_v57 = vld [vmem:[#allocation3 + $0x148] sm:$0xff] }
 0xf54   :  { %13532 = vmatpush1.bf16.msra.mxu0 %v13264_v18  ;;  %v13231_v18 = vpack.c.bf16 %v13211_v63, %v13195_v42  ;;  %v13287_v42 = vld [vmem:[#allocation3 + $0x158] sm:$0xff]  ;;  %v13289_v63 = vld [vmem:[#allocation3 + $0x168] sm:$0xff] }
 0xf55   :  { %13533 = vmatprep.subr.bf16.mxu0 %v13267_v45  ;;  %v13276_v45 = vld [vmem:[#allocation3 + $0x100] sm:$0xff] }
 0xf58   :  { %13534 = vmatpush1.bf16.msra.mxu0 %v13266_v61  ;;  %v13279_v61 = vld [vmem:[#allocation3 + $0x118] sm:$0xff] }
 0xf59   :  { %13535 = vmatprep.subr.bf16.mxu0 %v13269_v37  ;;  %v13278_v37 = vld [vmem:[#allocation3 + $0x110] sm:$0xff] }
 0xf5c   :  { %13536 = vmatpush1.bf16.msra.mxu0 %v13268_v44  ;;  %v13281_v44 = vld [vmem:[#allocation3 + $0x128] sm:$0xff] }
 0xf5d   :  { %13537 = vmatprep.subr.bf16.mxu0 %v13271_v27  ;;  %v13288_v27 = vld [vmem:[#allocation3 + $0x160] sm:$0xff] }
 0xf60   :  { %13538 = vmatpush1.bf16.msra.mxu0 %v13270_v19  ;;  %v13291_v19 = vld [vmem:[#allocation3 + $0x178] sm:$0xff] }
 0xf61   :  { %13539 = vmatprep.subr.bf16.mxu0 %v13273_v8  ;;  %v13290_v8 = vld [vmem:[#allocation3 + $0x170] sm:$0xff] }
 0xf64   :  { %13540 = vmatpush1.bf16.msra.mxu0 %v13272_v34  ;;  %v13293_v34 = vld [vmem:[#allocation3 + $0x188] sm:$0xff] }
 0xf65   :  { %13541 = vmatprep.subr.bf16.mxu0 %v13275_v54  ;;  %v13292_v54 = vld [vmem:[#allocation3 + $0x180] sm:$0xff] }
 0xf68   :  { %13542 = vmatpush1.bf16.msra.mxu0 %v13274_v59  ;;  %v13295_v59 = vld [vmem:[#allocation3 + $0x198] sm:$0xff] }
 0xf69   :  { %13554 = vmatprep.subr.bf16.mxu0 %v13277_v6  ;;  %v13294_v6 = vld [vmem:[#allocation3 + $0x190] sm:$0xff] }
 0xf6b   :  { %13544 = vmatmul.mubr.bf16.vlgmr.msra.gmra.mrb[80].mxu0 %v13228_v33  ;;  %v13297_v33 = vld [vmem:[#allocation3 + $0x1a8] sm:$0xff] }
 0xf6c   :  { %13555 = vmatpush1.bf16.msra.mxu0 %v13276_v45  ;;  %13586 = vmatprep.mubr.bf16.mxu0 %v13231_v18  ;;  %v13296_v18 = vld [vmem:[#allocation3 + $0x1a0] sm:$0xff]  ;;  %v13299_v45 = vld [vmem:[#allocation3 + $0x1b8] sm:$0xff] }
 0xf6d   :  { %13556 = vmatprep.subr.bf16.mxu0 %v13279_v61  ;;  %v13298_v61 = vld [vmem:[#allocation3 + $0x1b0] sm:$0xff] }
 0xf70   :  { %13557 = vmatpush1.bf16.msra.mxu0 %v13278_v37  ;;  %v13301_v37 = vld [vmem:[#allocation3 + $0x1c8] sm:$0xff] }
 0xf71   :  { %13558 = vmatprep.subr.bf16.mxu0 %v13281_v44  ;;  %v13300_v44 = vld [vmem:[#allocation3 + $0x1c0] sm:$0xff] }
 0xf74   :  { %13559 = vmatpush1.bf16.msra.mxu0 %v13280_v11  ;;  %v13303_v11 = vld [vmem:[#allocation3 + $0x1d8] sm:$0xff] }
 0xf75   :  { %13560 = vmatprep.subr.bf16.mxu0 %v13283_v14  ;;  %v13302_v14 = vld [vmem:[#allocation3 + $0x1d0] sm:$0xff] }
 0xf78   :  { %13561 = vmatpush1.bf16.msra.mxu0 %v13282_v20  ;;  %v13305_v20 = vld [vmem:[#allocation3 + $0x1e8] sm:$0xff] }
 0xf79   :  { %13562 = vmatprep.subr.bf16.mxu0 %v13285_v57  ;;  %v13304_v57 = vld [vmem:[#allocation3 + $0x1e0] sm:$0xff] }
 0xf7c   :  { %13563 = vmatpush1.bf16.msra.mxu0 %v13284_v43  ;;  %v13307_v43 = vld [vmem:[#allocation3 + $0x1f8] sm:$0xff] }
 0xf7d   :  { %13564 = vmatprep.subr.bf16.mxu0 %v13287_v42  ;;  %v13306_v42 = vld [vmem:[#allocation3 + $0x1f0] sm:$0xff] }
 0xf80   :  { %13565 = vmatpush1.bf16.msra.mxu0 %v13286_v62  ;;  %v13309_v62 = vld [vmem:[#allocation3 + $0x208] sm:$0xff] }
 0xf81   :  { %13566 = vmatprep.subr.bf16.mxu0 %v13289_v63  ;;  %v13230_v63 = vpack.c.bf16 %v13210_v41, %v13194_v24  ;;  %v13314_v24 = vld [vmem:[#allocation3 + $0x230] sm:$0xff]  ;;  %v13321_v41 = vld [vmem:[#allocation3 + $0x268] sm:$0xff] }
 0xf84   :  { %13567 = vmatpush1.bf16.msra.mxu0 %v13288_v27  ;;  %v13233_v27 = vpack.c.bf16 %v13213_v23, %v13197_v38  ;;  %v13316_v38 = vld [vmem:[#allocation3 + $0x240] sm:$0xff]  ;;  %v13318_v23 = vld [vmem:[#allocation3 + $0x250] sm:$0xff] }
 0xf85   :  { %13568 = vmatprep.subr.bf16.mxu0 %v13291_v19  ;;  %v13308_v19 = vld [vmem:[#allocation3 + $0x200] sm:$0xff] }
 0xf88   :  { %13569 = vmatpush1.bf16.msra.mxu0 %v13290_v8  ;;  %v13311_v8 = vld [vmem:[#allocation3 + $0x218] sm:$0xff] }
 0xf89   :  { %13570 = vmatprep.subr.bf16.mxu0 %v13293_v34  ;;  %v13310_v34 = vld [vmem:[#allocation3 + $0x210] sm:$0xff] }
 0xf8c   :  { %13571 = vmatpush1.bf16.msra.mxu0 %v13292_v54  ;;  %v13313_v54 = vld [vmem:[#allocation3 + $0x228] sm:$0xff] }
 0xf8d   :  { %13572 = vmatprep.subr.bf16.mxu0 %v13295_v59  ;;  %v13320_v59 = vld [vmem:[#allocation3 + $0x260] sm:$0xff] }
 0xf90   :  { %13573 = vmatpush1.bf16.msra.mxu0 %v13294_v6  ;;  %v13323_v6 = vld [vmem:[#allocation3 + $0x278] sm:$0xff] }
 0xf91   :  { %13574 = vmatprep.subr.bf16.mxu0 %v13297_v33  ;;  %v13322_v33 = vld [vmem:[#allocation3 + $0x270] sm:$0xff] }
 0xf94   :  { %13575 = vmatpush1.bf16.msra.mxu0 %v13296_v18  ;;  %v13325_v18 = vld [vmem:[#allocation3 + $0x288] sm:$0xff] }
 0xf95   :  { %13576 = vmatprep.subr.bf16.mxu0 %v13299_v45  ;;  %v13324_v45 = vld [vmem:[#allocation3 + $0x280] sm:$0xff] }
 0xf98   :  { %13577 = vmatpush1.bf16.msra.mxu0 %v13298_v61  ;;  %v13327_v61 = vld [vmem:[#allocation3 + $0x298] sm:$0xff] }
 0xf99   :  { %13578 = vmatprep.subr.bf16.mxu0 %v13301_v37  ;;  %v13326_v37 = vld [vmem:[#allocation3 + $0x290] sm:$0xff] }
 0xf9c   :  { %13579 = vmatpush1.bf16.msra.mxu0 %v13300_v44  ;;  %v13329_v44 = vld [vmem:[#allocation3 + $0x2a8] sm:$0xff] }
 0xf9d   :  { %13580 = vmatprep.subr.bf16.mxu0 %v13303_v11  ;;  %v13328_v11 = vld [vmem:[#allocation3 + $0x2a0] sm:$0xff] }
 0xfa0   :  { %13581 = vmatpush1.bf16.msra.mxu0 %v13302_v14  ;;  %v13331_v14 = vld [vmem:[#allocation3 + $0x2b8] sm:$0xff] }
 0xfa1   :  { %13582 = vmatprep.subr.bf16.mxu0 %v13305_v20  ;;  %v13330_v20 = vld [vmem:[#allocation3 + $0x2b0] sm:$0xff] }
 0xfa4   :  { %13583 = vmatpush1.bf16.msra.mxu0 %v13304_v57  ;;  %v13333_v57 = vld [vmem:[#allocation3 + $0x2c8] sm:$0xff] }
 0xfa5   :  { %13584 = vmatprep.subr.bf16.mxu0 %v13307_v43  ;;  %v13332_v43 = vld [vmem:[#allocation3 + $0x2c0] sm:$0xff] }
 0xfa8   :  { %13585 = vmatpush1.bf16.msra.mxu0 %v13306_v42  ;;  %v13335_v42 = vld [vmem:[#allocation3 + $0x2d8] sm:$0xff] }
 0xfa9   :  { %13597 = vmatprep.subr.bf16.mxu0 %v13309_v62  ;;  %v13334_v62 = vld [vmem:[#allocation3 + $0x2d0] sm:$0xff] }
 0xfab   :  { %13587 = vmatmul.mubr.bf16.vlgmr.msra.gmra.mrb[80].mxu0 %v13230_v63  ;;  %v13337_v63 = vld [vmem:[#allocation3 + $0x2e8] sm:$0xff] }
 0xfac   :  { %13598 = vmatpush1.bf16.msra.mxu0 %v13308_v19  ;;  %13629 = vmatprep.mubr.bf16.mxu0 %v13233_v27  ;;  %v13336_v27 = vld [vmem:[#allocation3 + $0x2e0] sm:$0xff]  ;;  %v13339_v19 = vld [vmem:[#allocation3 + $0x2f8] sm:$0xff] }
 0xfad   :  { %13599 = vmatprep.subr.bf16.mxu0 %v13311_v8  ;;  %v13338_v8 = vld [vmem:[#allocation3 + $0x2f0] sm:$0xff] }
 0xfb0   :  { %13600 = vmatpush1.bf16.msra.mxu0 %v13310_v34  ;;  %v13341_v34 = vld [vmem:[#allocation3 + $0x308] sm:$0xff] }
 0xfb1   :  { %13601 = vmatprep.subr.bf16.mxu0 %v13313_v54  ;;  %v13232_v54 = vpack.c.bf16 %v13212_v46, %v13196_v29  ;;  %v13346_v29 = vld [vmem:[#allocation3 + $0x330] sm:$0xff]  ;;  %v13349_v46 = vld [vmem:[#allocation3 + $0x348] sm:$0xff] }
 0xfb4   :  { %13602 = vmatpush1.bf16.msra.mxu0 %v13312_v3  ;;  %v19659_v3 = vmax.f32 %v19436_v53, 0.0  ;;  %v13350_v53 = vld [vmem:[#allocation3 + $0x350] sm:$0xff] }
 0xfb5   :  { %13603 = vmatprep.subr.bf16.mxu0 %v13315_v5 }
 0xfb6   :  { %v13235_v5 = vpack.c.bf16 %v19659_v3, %v13199_v13  ;;  %v13351_v13 = vld [vmem:[#allocation3 + $0x358] sm:$0xff] }
 0xfb8   :  { %13604 = vmatpush1.bf16.msra.mxu0 %v13314_v24  ;;  %v13340_v24 = vld [vmem:[#allocation3 + $0x300] sm:$0xff] }
 0xfb9   :  { %13605 = vmatprep.subr.bf16.mxu0 %v13317_v58  ;;  %v13343_v58 = vld [vmem:[#allocation3 + $0x318] sm:$0xff] }
 0xfbc   :  { %13606 = vmatpush1.bf16.msra.mxu0 %v13316_v38  ;;  %v13342_v38 = vld [vmem:[#allocation3 + $0x310] sm:$0xff] }
 0xfbd   :  { %13607 = vmatprep.subr.bf16.mxu0 %v13319_v1  ;;  %v13345_v1 = vld [vmem:[#allocation3 + $0x328] sm:$0xff] }
 0xfc0   :  { %13608 = vmatpush1.bf16.msra.mxu0 %v13318_v23  ;;  %v13353_v23 = vld [vmem:[#allocation3 + $0x368] sm:$0xff] }
 0xfc1   :  { %13609 = vmatprep.subr.bf16.mxu0 %v13321_v41  ;;  %v13352_v41 = vld [vmem:[#allocation3 + $0x360] sm:$0xff] }
 0xfc4   :  { %13610 = vmatpush1.bf16.msra.mxu0 %v13320_v59  ;;  %v13355_v59 = vld [vmem:[#allocation3 + $0x378] sm:$0xff] }
 0xfc5   :  { %13611 = vmatprep.subr.bf16.mxu0 %v13323_v6  ;;  %v13354_v6 = vld [vmem:[#allocation3 + $0x370] sm:$0xff] }
 0xfc8   :  { %13612 = vmatpush1.bf16.msra.mxu0 %v13322_v33  ;;  %v13357_v33 = vld [vmem:[#allocation3 + $0x388] sm:$0xff] }
 0xfc9   :  { %13613 = vmatprep.subr.bf16.mxu0 %v13325_v18  ;;  %v13356_v18 = vld [vmem:[#allocation3 + $0x380] sm:$0xff] }
 0xfcc   :  { %13614 = vmatpush1.bf16.msra.mxu0 %v13324_v45  ;;  %v13359_v45 = vld [vmem:[#allocation3 + $0x398] sm:$0xff] }
 0xfcd   :  { %13615 = vmatprep.subr.bf16.mxu0 %v13327_v61  ;;  %v13358_v61 = vld [vmem:[#allocation3 + $0x390] sm:$0xff] }
 0xfd0   :  { %13616 = vmatpush1.bf16.msra.mxu0 %v13326_v37  ;;  %v13361_v37 = vld [vmem:[#allocation3 + $0x3a8] sm:$0xff] }
 0xfd1   :  { %13617 = vmatprep.subr.bf16.mxu0 %v13329_v44  ;;  %v13360_v44 = vld [vmem:[#allocation3 + $0x3a0] sm:$0xff] }
 0xfd4   :  { %13618 = vmatpush1.bf16.msra.mxu0 %v13328_v11  ;;  %v13363_v11 = vld [vmem:[#allocation3 + $0x3b8] sm:$0xff] }
 0xfd5   :  { %13619 = vmatprep.subr.bf16.mxu0 %v13331_v14  ;;  %v13362_v14 = vld [vmem:[#allocation3 + $0x3b0] sm:$0xff] }
 0xfd8   :  { %13620 = vmatpush1.bf16.msra.mxu0 %v13330_v20  ;;  %v13365_v20 = vld [vmem:[#allocation3 + $0x3c8] sm:$0xff] }
 0xfd9   :  { %13621 = vmatprep.subr.bf16.mxu0 %v13333_v57  ;;  %v13364_v57 = vld [vmem:[#allocation3 + $0x3c0] sm:$0xff] }
 0xfdc   :  { %13622 = vmatpush1.bf16.msra.mxu0 %v13332_v43  ;;  %v13367_v43 = vld [vmem:[#allocation3 + $0x3d8] sm:$0xff] }
 0xfdd   :  { %13623 = vmatprep.subr.bf16.mxu0 %v13335_v42  ;;  %v13366_v42 = vld [vmem:[#allocation3 + $0x3d0] sm:$0xff] }
 0xfe0   :  { %13624 = vmatpush1.bf16.msra.mxu0 %v13334_v62  ;;  %v13369_v62 = vld [vmem:[#allocation3 + $0x3e8] sm:$0xff] }
 0xfe1   :  { %13625 = vmatprep.subr.bf16.mxu0 %v13337_v63  ;;  %v13368_v63 = vld [vmem:[#allocation3 + $0x3e0] sm:$0xff] }
 0xfe4   :  { %13626 = vmatpush1.bf16.msra.mxu0 %v13336_v27  ;;  %v13371_v27 = vld [vmem:[#allocation3 + $0x3f8] sm:$0xff] }
 0xfe5   :  { %13627 = vmatprep.subr.bf16.mxu0 %v13339_v19  ;;  %v13370_v19 = vld [vmem:[#allocation3 + $0x3f0] sm:$0xff] }
 0xfe8   :  { %13628 = vmatpush1.bf16.msra.mxu0 %v13338_v8  ;;  %v13373_v8 = vld [vmem:[#allocation3 + $0x408] sm:$0xff] }
 0xfe9   :  { %13640 = vmatprep.subr.bf16.mxu0 %v13341_v34  ;;  %v19660_v34 = vmax.f32 %v19428_v10, 0.0  ;;  %v13376_v10 = vld [vmem:[#allocation3 + $0x420] sm:$0xff] }
 0xfeb   :  { %13630 = vmatmul.mubr.bf16.vlgmr.msra.gmra.mrb[80].mxu0 %v13232_v54  ;;  %v19661_v54 = vmax.f32 %v19433_v51, 0.0  ;;  %v13379_v51 = vld [vmem:[#allocation3 + $0x438] sm:$0xff] }
 0xfec   :  { %13641 = vmatpush1.bf16.msra.mxu0 %v13340_v24  ;;  %13672 = vmatprep.mubr.bf16.mxu0 %v13235_v5  ;;  %v19662_v5 = vmax.f32 %v19410_v15, 0.0  ;;  %v19663_v24 = vmax.f32 %v19416_v22, 0.0  ;;  %v13381_v15 = vld [vmem:[#allocation3 + $0x448] sm:$0xff]  ;;  %v13380_v22 = vld [vmem:[#allocation3 + $0x440] sm:$0xff] }
 0xfed   :  { %13642 = vmatprep.subr.bf16.mxu0 %v13343_v58  ;;  %v13234_v3 = vpack.c.bf16 %v19661_v54, %v19660_v34  ;;  %v19666_v54 = vmax.f32 %v19470_v60, 0.0  ;;  %v13413_v60 = vld [vmem:[#allocation3 + $0x548] sm:$0xff] }
 0xfee   :  { %v13237_v58 = vpack.c.bf16 %v19663_v24, %v19662_v5  ;;  %v13404_v24 = vld [vmem:[#allocation3 + $0x500] sm:$0xff] }
 0xff0   :  { %13643 = vmatpush1.bf16.msra.mxu0 %v13342_v38  ;;  %v13372_v38 = vld [vmem:[#allocation3 + $0x400] sm:$0xff] }
 0xff1   :  { %13644 = vmatprep.subr.bf16.mxu0 %v13345_v1  ;;  %v13375_v1 = vld [vmem:[#allocation3 + $0x418] sm:$0xff] }
 0xff4   :  { %13645 = vmatpush1.bf16.msra.mxu0 %v13344_v55  ;;  %v13374_v55 = vld [vmem:[#allocation3 + $0x410] sm:$0xff] }
 0xff5   :  { %13646 = vmatprep.subr.bf16.mxu0 %v13347_v52  ;;  %v13377_v52 = vld [vmem:[#allocation3 + $0x428] sm:$0xff] }
 0xff8   :  { %13647 = vmatpush1.bf16.msra.mxu0 %v13346_v29  ;;  %v13378_v29 = vld [vmem:[#allocation3 + $0x430] sm:$0xff] }
 0xff9   :  { %13648 = vmatprep.subr.bf16.mxu0 %v13349_v46  ;;  %v13383_v46 = vld [vmem:[#allocation3 + $0x458] sm:$0xff] }
 0xffc   :  { %13649 = vmatpush1.bf16.msra.mxu0 %v13348_v16  ;;  %v13382_v16 = vld [vmem:[#allocation3 + $0x450] sm:$0xff] }
 0xffd   :  { %13650 = vmatprep.subr.bf16.mxu0 %v13351_v13  ;;  %v13385_v13 = vld [vmem:[#allocation3 + $0x468] sm:$0xff] }
0x1000   :  { %13651 = vmatpush1.bf16.msra.mxu0 %v13350_v53  ;;  %v13384_v53 = vld [vmem:[#allocation3 + $0x460] sm:$0xff] }
0x1001   :  { %13652 = vmatprep.subr.bf16.mxu0 %v13353_v23  ;;  %v13387_v23 = vld [vmem:[#allocation3 + $0x478] sm:$0xff] }
0x1004   :  { %13653 = vmatpush1.bf16.msra.mxu0 %v13352_v41  ;;  %v13386_v41 = vld [vmem:[#allocation3 + $0x470] sm:$0xff] }
0x1005   :  { %13654 = vmatprep.subr.bf16.mxu0 %v13355_v59  ;;  %v13389_v59 = vld [vmem:[#allocation3 + $0x488] sm:$0xff] }
0x1008   :  { %13655 = vmatpush1.bf16.msra.mxu0 %v13354_v6  ;;  %v13388_v6 = vld [vmem:[#allocation3 + $0x480] sm:$0xff] }
0x1009   :  { %13656 = vmatprep.subr.bf16.mxu0 %v13357_v33  ;;  %v13391_v33 = vld [vmem:[#allocation3 + $0x498] sm:$0xff] }
0x100c   :  { %13657 = vmatpush1.bf16.msra.mxu0 %v13356_v18  ;;  %v13390_v18 = vld [vmem:[#allocation3 + $0x490] sm:$0xff] }
0x100d   :  { %13658 = vmatprep.subr.bf16.mxu0 %v13359_v45  ;;  %v13393_v45 = vld [vmem:[#allocation3 + $0x4a8] sm:$0xff] }
0x1010   :  { %13659 = vmatpush1.bf16.msra.mxu0 %v13358_v61  ;;  %v13392_v61 = vld [vmem:[#allocation3 + $0x4a0] sm:$0xff] }
0x1011   :  { %13660 = vmatprep.subr.bf16.mxu0 %v13361_v37  ;;  %v13395_v37 = vld [vmem:[#allocation3 + $0x4b8] sm:$0xff] }
0x1014   :  { %13661 = vmatpush1.bf16.msra.mxu0 %v13360_v44  ;;  %v13394_v44 = vld [vmem:[#allocation3 + $0x4b0] sm:$0xff] }
0x1015   :  { %13662 = vmatprep.subr.bf16.mxu0 %v13363_v11  ;;  %v13397_v11 = vld [vmem:[#allocation3 + $0x4c8] sm:$0xff] }
0x1018   :  { %13663 = vmatpush1.bf16.msra.mxu0 %v13362_v14  ;;  %v13396_v14 = vld [vmem:[#allocation3 + $0x4c0] sm:$0xff] }
0x1019   :  { %13664 = vmatprep.subr.bf16.mxu0 %v13365_v20  ;;  %v13399_v20 = vld [vmem:[#allocation3 + $0x4d8] sm:$0xff] }
0x101c   :  { %13665 = vmatpush1.bf16.msra.mxu0 %v13364_v57  ;;  %v13398_v57 = vld [vmem:[#allocation3 + $0x4d0] sm:$0xff] }
0x101d   :  { %13666 = vmatprep.subr.bf16.mxu0 %v13367_v43  ;;  %v13401_v43 = vld [vmem:[#allocation3 + $0x4e8] sm:$0xff] }
0x1020   :  { %13667 = vmatpush1.bf16.msra.mxu0 %v13366_v42  ;;  %v13400_v42 = vld [vmem:[#allocation3 + $0x4e0] sm:$0xff] }
0x1021   :  { %13668 = vmatprep.subr.bf16.mxu0 %v13369_v62  ;;  %v13403_v62 = vld [vmem:[#allocation3 + $0x4f8] sm:$0xff] }
0x1024   :  { %13669 = vmatpush1.bf16.msra.mxu0 %v13368_v63  ;;  %v13402_v63 = vld [vmem:[#allocation3 + $0x4f0] sm:$0xff] }
0x1025   :  { %13670 = vmatprep.subr.bf16.mxu0 %v13371_v27  ;;  %v13405_v27 = vld [vmem:[#allocation3 + $0x508] sm:$0xff] }
0x1028   :  { %13671 = vmatpush1.bf16.msra.mxu0 %v13370_v19  ;;  %v19664_v19 = vmax.f32 %v19408_v49, 0.0  ;;  %v13408_v49 = vld [vmem:[#allocation3 + $0x520] sm:$0xff] }
0x1029   :  { %13683 = vmatprep.subr.bf16.mxu0 %v13373_v8  ;;  %v19665_v8 = vmax.f32 %v19413_v21, 0.0  ;;  %v13411_v21 = vld [vmem:[#allocation3 + $0x538] sm:$0xff] }
0x102b   :  { %13673 = vmatmul.mubr.bf16.vlgmr.msra.gmra.mrb[80].mxu0 %v13234_v3  ;;  %v13236_v34 = vpack.c.bf16 %v19665_v8, %v19664_v19  ;;  %v19667_v3 = vmax.f32 %v19476_v48, 0.0  ;;  %v13412_v48 = vld [vmem:[#allocation3 + $0x540] sm:$0xff]  ;;  %v13439_v8 = vld [vmem:[#allocation3 + $0x618] sm:$0xff] }
0x102c   :  { %13684 = vmatpush1.bf16.msra.mxu0 %v13372_v38  ;;  %13715 = vmatprep.mubr.bf16.mxu0 %v13237_v58  ;;  %v13407_v58 = vld [vmem:[#allocation3 + $0x518] sm:$0xff]  ;;  %v13406_v38 = vld [vmem:[#allocation3 + $0x510] sm:$0xff]  ;;  %v13436_v19 = vld [vmem:[#allocation3 + $0x600] sm:$0xff] }
0x102d   :  { %13685 = vmatprep.subr.bf16.mxu0 %v13375_v1  ;;  %v13239_v5 = vpack.c.bf16 %v19667_v3, %v19666_v54  ;;  %v13409_v1 = vld [vmem:[#allocation3 + $0x528] sm:$0xff]  ;;  %v13442_v3 = vld [vmem:[#allocation3 + $0x630] sm:$0xff] }
0x102e   :  { %v13441_v54 = vld [vmem:[#allocation3 + $0x628] sm:$0xff] }
0x1030   :  { %13686 = vmatpush1.bf16.msra.mxu0 %v13374_v55  ;;  %v13410_v55 = vld [vmem:[#allocation3 + $0x530] sm:$0xff] }
0x1031   :  { %13687 = vmatprep.subr.bf16.mxu0 %v13377_v52  ;;  %v13415_v52 = vld [vmem:[#allocation3 + $0x558] sm:$0xff] }
0x1034   :  { %13688 = vmatpush1.bf16.msra.mxu0 %v13376_v10  ;;  %v13414_v10 = vld [vmem:[#allocation3 + $0x550] sm:$0xff] }
0x1035   :  { %13689 = vmatprep.subr.bf16.mxu0 %v13379_v51  ;;  %v13417_v51 = vld [vmem:[#allocation3 + $0x568] sm:$0xff] }
0x1038   :  { %13690 = vmatpush1.bf16.msra.mxu0 %v13378_v29  ;;  %v13416_v29 = vld [vmem:[#allocation3 + $0x560] sm:$0xff] }
0x1039   :  { %13691 = vmatprep.subr.bf16.mxu0 %v13381_v15  ;;  %v13419_v15 = vld [vmem:[#allocation3 + $0x578] sm:$0xff] }
0x103c   :  { %13692 = vmatpush1.bf16.msra.mxu0 %v13380_v22  ;;  %v13418_v22 = vld [vmem:[#allocation3 + $0x570] sm:$0xff] }
0x103d   :  { %13693 = vmatprep.subr.bf16.mxu0 %v13383_v46  ;;  %v13421_v46 = vld [vmem:[#allocation3 + $0x588] sm:$0xff] }
0x1040   :  { %13694 = vmatpush1.bf16.msra.mxu0 %v13382_v16  ;;  %v13420_v16 = vld [vmem:[#allocation3 + $0x580] sm:$0xff] }
0x1041   :  { %13695 = vmatprep.subr.bf16.mxu0 %v13385_v13  ;;  %v13423_v13 = vld [vmem:[#allocation3 + $0x598] sm:$0xff] }
0x1044   :  { %13696 = vmatpush1.bf16.msra.mxu0 %v13384_v53  ;;  %v13422_v53 = vld [vmem:[#allocation3 + $0x590] sm:$0xff] }
0x1045   :  { %13697 = vmatprep.subr.bf16.mxu0 %v13387_v23  ;;  %v13425_v23 = vld [vmem:[#allocation3 + $0x5a8] sm:$0xff] }
0x1048   :  { %13698 = vmatpush1.bf16.msra.mxu0 %v13386_v41  ;;  %v13424_v41 = vld [vmem:[#allocation3 + $0x5a0] sm:$0xff] }
0x1049   :  { %13699 = vmatprep.subr.bf16.mxu0 %v13389_v59  ;;  %v13427_v59 = vld [vmem:[#allocation3 + $0x5b8] sm:$0xff] }
0x104c   :  { %13700 = vmatpush1.bf16.msra.mxu0 %v13388_v6  ;;  %v13426_v6 = vld [vmem:[#allocation3 + $0x5b0] sm:$0xff] }
0x104d   :  { %13701 = vmatprep.subr.bf16.mxu0 %v13391_v33  ;;  %v13429_v33 = vld [vmem:[#allocation3 + $0x5c8] sm:$0xff] }
0x1050   :  { %13702 = vmatpush1.bf16.msra.mxu0 %v13390_v18  ;;  %v13428_v18 = vld [vmem:[#allocation3 + $0x5c0] sm:$0xff] }
0x1051   :  { %13703 = vmatprep.subr.bf16.mxu0 %v13393_v45  ;;  %v13431_v45 = vld [vmem:[#allocation3 + $0x5d8] sm:$0xff] }
0x1054   :  { %13704 = vmatpush1.bf16.msra.mxu0 %v13392_v61  ;;  %v13430_v61 = vld [vmem:[#allocation3 + $0x5d0] sm:$0xff] }
0x1055   :  { %13705 = vmatprep.subr.bf16.mxu0 %v13395_v37  ;;  %v13433_v37 = vld [vmem:[#allocation3 + $0x5e8] sm:$0xff] }
0x1058   :  { %13706 = vmatpush1.bf16.msra.mxu0 %v13394_v44  ;;  %v13432_v44 = vld [vmem:[#allocation3 + $0x5e0] sm:$0xff] }
0x1059   :  { %13707 = vmatprep.subr.bf16.mxu0 %v13397_v11  ;;  %v13435_v11 = vld [vmem:[#allocation3 + $0x5f8] sm:$0xff] }
0x105c   :  { %13708 = vmatpush1.bf16.msra.mxu0 %v13396_v14  ;;  %v13434_v14 = vld [vmem:[#allocation3 + $0x5f0] sm:$0xff] }
0x105d   :  { %13709 = vmatprep.subr.bf16.mxu0 %v13399_v20  ;;  %v13437_v20 = vld [vmem:[#allocation3 + $0x608] sm:$0xff] }
0x1060   :  { %13710 = vmatpush1.bf16.msra.mxu0 %v13398_v57  ;;  %v19668_v57 = vmax.f32 %v19468_v47, 0.0  ;;  %v13440_v47 = vld [vmem:[#allocation3 + $0x620] sm:$0xff] }
0x1061   :  { %13711 = vmatprep.subr.bf16.mxu0 %v13401_v43  ;;  %v19669_v43 = vmax.f32 %v19473_v26, 0.0  ;;  %v13443_v26 = vld [vmem:[#allocation3 + $0x638] sm:$0xff] }
0x1064   :  { %13712 = vmatpush1.bf16.msra.mxu0 %v13400_v42  ;;  %v13238_v42 = vpack.c.bf16 %v19669_v43, %v19668_v57  ;;  %v13480_v57 = vld [vmem:[#allocation3 + $0x760] sm:$0xff]  ;;  %v13483_v43 = vld [vmem:[#allocation3 + $0x778] sm:$0xff] }
0x1065   :  { %13713 = vmatprep.subr.bf16.mxu0 %v13403_v62  ;;  %v19670_v62 = vmax.f32 %v19450_v0, 0.0  ;;  %v13445_v0 = vld [vmem:[#allocation3 + $0x648] sm:$0xff] }
0x1068   :  { %13714 = vmatpush1.bf16.msra.mxu0 %v13402_v63  ;;  %v19671_v63 = vmax.f32 %v19456_v4, 0.0  ;;  %v13444_v4 = vld [vmem:[#allocation3 + $0x640] sm:$0xff] }
0x1069   :  { %13726 = vmatprep.subr.bf16.mxu0 %v13405_v27 }
0x106a   :  { %v13241_v27 = vpack.c.bf16 %v19671_v63, %v19670_v62  ;;  %v13485_v62 = vld [vmem:[#allocation3 + $0x788] sm:$0xff]  ;;  %v13484_v63 = vld [vmem:[#allocation3 + $0x780] sm:$0xff] }
0x106b   :  { %13716 = vmatmul.mubr.bf16.vlgmr.msra.gmra.mrb[80].mxu0 %v13236_v34  ;;  %v13438_v34 = vld [vmem:[#allocation3 + $0x610] sm:$0xff] }
0x106c   :  { %13727 = vmatpush1.bf16.msra.mxu0 %v13404_v24  ;;  %13758 = vmatprep.mubr.bf16.mxu0 %v13239_v5  ;;  %v13447_v5 = vld [vmem:[#allocation3 + $0x658] sm:$0xff]  ;;  %v13446_v24 = vld [vmem:[#allocation3 + $0x650] sm:$0xff] }
0x106d   :  { %13728 = vmatprep.subr.bf16.mxu0 %v13407_v58  ;;  %v13449_v58 = vld [vmem:[#allocation3 + $0x668] sm:$0xff] }
0x1070   :  { %13729 = vmatpush1.bf16.msra.mxu0 %v13406_v38  ;;  %v13448_v38 = vld [vmem:[#allocation3 + $0x660] sm:$0xff] }
0x1071   :  { %13730 = vmatprep.subr.bf16.mxu0 %v13409_v1  ;;  %v13451_v1 = vld [vmem:[#allocation3 + $0x678] sm:$0xff] }
0x1074   :  { %13731 = vmatpush1.bf16.msra.mxu0 %v13408_v49  ;;  %v13450_v49 = vld [vmem:[#allocation3 + $0x670] sm:$0xff] }
0x1075   :  { %13732 = vmatprep.subr.bf16.mxu0 %v13411_v21  ;;  %v13453_v21 = vld [vmem:[#allocation3 + $0x688] sm:$0xff] }
0x1078   :  { %13733 = vmatpush1.bf16.msra.mxu0 %v13410_v55  ;;  %v13452_v55 = vld [vmem:[#allocation3 + $0x680] sm:$0xff] }
0x1079   :  { %13734 = vmatprep.subr.bf16.mxu0 %v13413_v60  ;;  %v13455_v60 = vld [vmem:[#allocation3 + $0x698] sm:$0xff] }
0x107c   :  { %13735 = vmatpush1.bf16.msra.mxu0 %v13412_v48  ;;  %v13454_v48 = vld [vmem:[#allocation3 + $0x690] sm:$0xff] }
0x107d   :  { %13736 = vmatprep.subr.bf16.mxu0 %v13415_v52  ;;  %v13457_v52 = vld [vmem:[#allocation3 + $0x6a8] sm:$0xff] }
0x1080   :  { %13737 = vmatpush1.bf16.msra.mxu0 %v13414_v10  ;;  %v13456_v10 = vld [vmem:[#allocation3 + $0x6a0] sm:$0xff] }
0x1081   :  { %13738 = vmatprep.subr.bf16.mxu0 %v13417_v51  ;;  %v13459_v51 = vld [vmem:[#allocation3 + $0x6b8] sm:$0xff] }
0x1084   :  { %13739 = vmatpush1.bf16.msra.mxu0 %v13416_v29  ;;  %v13458_v29 = vld [vmem:[#allocation3 + $0x6b0] sm:$0xff] }
0x1085   :  { %13740 = vmatprep.subr.bf16.mxu0 %v13419_v15  ;;  %v13461_v15 = vld [vmem:[#allocation3 + $0x6c8] sm:$0xff] }
0x1088   :  { %13741 = vmatpush1.bf16.msra.mxu0 %v13418_v22  ;;  %v13460_v22 = vld [vmem:[#allocation3 + $0x6c0] sm:$0xff] }
0x1089   :  { %13742 = vmatprep.subr.bf16.mxu0 %v13421_v46  ;;  %v13463_v46 = vld [vmem:[#allocation3 + $0x6d8] sm:$0xff] }
0x108c   :  { %13743 = vmatpush1.bf16.msra.mxu0 %v13420_v16  ;;  %v13462_v16 = vld [vmem:[#allocation3 + $0x6d0] sm:$0xff] }
0x108d   :  { %13744 = vmatprep.subr.bf16.mxu0 %v13423_v13  ;;  %v13465_v13 = vld [vmem:[#allocation3 + $0x6e8] sm:$0xff] }
0x1090   :  { %13745 = vmatpush1.bf16.msra.mxu0 %v13422_v53  ;;  %v13464_v53 = vld [vmem:[#allocation3 + $0x6e0] sm:$0xff] }
0x1091   :  { %13746 = vmatprep.subr.bf16.mxu0 %v13425_v23  ;;  %v13467_v23 = vld [vmem:[#allocation3 + $0x6f8] sm:$0xff] }
0x1094   :  { %13747 = vmatpush1.bf16.msra.mxu0 %v13424_v41  ;;  %v13466_v41 = vld [vmem:[#allocation3 + $0x6f0] sm:$0xff] }
0x1095   :  { %13748 = vmatprep.subr.bf16.mxu0 %v13427_v59  ;;  %v13469_v59 = vld [vmem:[#allocation3 + $0x708] sm:$0xff] }
0x1098   :  { %13749 = vmatpush1.bf16.msra.mxu0 %v13426_v6  ;;  %v19672_v6 = vmax.f32 %v19448_v2, 0.0  ;;  %v13472_v2 = vld [vmem:[#allocation3 + $0x720] sm:$0xff] }
0x1099   :  { %13750 = vmatprep.subr.bf16.mxu0 %v13429_v33  ;;  %v19673_v33 = vmax.f32 %v19453_v36, 0.0  ;;  %v13475_v36 = vld [vmem:[#allocation3 + $0x738] sm:$0xff] }
0x109c   :  { %13751 = vmatpush1.bf16.msra.mxu0 %v13428_v18  ;;  %v13240_v18 = vpack.c.bf16 %v19673_v33, %v19672_v6 }
0x109d   :  { %13752 = vmatprep.subr.bf16.mxu0 %v13431_v45  ;;  %v13243_v45 = vpack.c.bf16 %v13223_v32, %v13207_v12  ;;  %v13476_v12 = vld [vmem:[#allocation3 + $0x740] sm:$0xff]  ;;  %v13478_v32 = vld [vmem:[#allocation3 + $0x750] sm:$0xff] }
0x10a0   :  { %13753 = vmatpush1.bf16.msra.mxu0 %v13430_v61  ;;  %v13468_v61 = vld [vmem:[#allocation3 + $0x700] sm:$0xff] }
0x10a1   :  { %13754 = vmatprep.subr.bf16.mxu0 %v13433_v37  ;;  %v13471_v37 = vld [vmem:[#allocation3 + $0x718] sm:$0xff] }
0x10a4   :  { %13755 = vmatpush1.bf16.msra.mxu0 %v13432_v44  ;;  %v13470_v44 = vld [vmem:[#allocation3 + $0x710] sm:$0xff] }
0x10a5   :  { %13756 = vmatprep.subr.bf16.mxu0 %v13435_v11  ;;  %v13473_v11 = vld [vmem:[#allocation3 + $0x728] sm:$0xff] }
0x10a8   :  { %13757 = vmatpush1.bf16.msra.mxu0 %v13434_v14  ;;  %v13474_v14 = vld [vmem:[#allocation3 + $0x730] sm:$0xff] }
0x10a9   :  { %13769 = vmatprep.subr.bf16.mxu0 %v13437_v20  ;;  %v13481_v20 = vld [vmem:[#allocation3 + $0x768] sm:$0xff] }
0x10ab   :  { %13759 = vmatmul.mubr.bf16.vlgmr.msra.gmra.mrb[80].mxu0 %v13238_v42  ;;  %v13482_v42 = vld [vmem:[#allocation3 + $0x770] sm:$0xff] }
0x10ac   :  { %13770 = vmatpush1.bf16.msra.mxu0 %v13436_v19  ;;  %13801 = vmatprep.mubr.bf16.mxu0 %v13241_v27  ;;  %v13487_v27 = vld [vmem:[#allocation3 + $0x798] sm:$0xff]  ;;  %v13486_v19 = vld [vmem:[#allocation3 + $0x790] sm:$0xff] }
0x10ad   :  { %13771 = vmatprep.subr.bf16.mxu0 %v13439_v8  ;;  %v13489_v8 = vld [vmem:[#allocation3 + $0x7a8] sm:$0xff] }
0x10b0   :  { %13772 = vmatpush1.bf16.msra.mxu0 %v13438_v34  ;;  %v13488_v34 = vld [vmem:[#allocation3 + $0x7a0] sm:$0xff] }
0x10b1   :  { %13773 = vmatprep.subr.bf16.mxu0 %v13441_v54  ;;  %v13491_v54 = vld [vmem:[#allocation3 + $0x7b8] sm:$0xff] }
0x10b4   :  { %13774 = vmatpush1.bf16.msra.mxu0 %v13440_v47  ;;  %v13490_v47 = vld [vmem:[#allocation3 + $0x7b0] sm:$0xff] }
0x10b5   :  { %13775 = vmatprep.subr.bf16.mxu0 %v13443_v26  ;;  %v13493_v26 = vld [vmem:[#allocation3 + $0x7c8] sm:$0xff] }
0x10b8   :  { %13776 = vmatpush1.bf16.msra.mxu0 %v13442_v3  ;;  %v13492_v3 = vld [vmem:[#allocation3 + $0x7c0] sm:$0xff] }
0x10b9   :  { %13777 = vmatprep.subr.bf16.mxu0 %v13445_v0  ;;  %v13495_v0 = vld [vmem:[#allocation3 + $0x7d8] sm:$0xff] }
0x10bc   :  { %13778 = vmatpush1.bf16.msra.mxu0 %v13444_v4  ;;  %v13494_v4 = vld [vmem:[#allocation3 + $0x7d0] sm:$0xff] }
0x10bd   :  { %13779 = vmatprep.subr.bf16.mxu0 %v13447_v5  ;;  %v13497_v5 = vld [vmem:[#allocation3 + $0x7e8] sm:$0xff] }
0x10c0   :  { %13780 = vmatpush1.bf16.msra.mxu0 %v13446_v24  ;;  %v13496_v24 = vld [vmem:[#allocation3 + $0x7e0] sm:$0xff] }
0x10c1   :  { %13781 = vmatprep.subr.bf16.mxu0 %v13449_v58  ;;  %v13499_v58 = vld [vmem:[#allocation3 + $0x7f8] sm:$0xff] }
0x10c4   :  { %13782 = vmatpush1.bf16.msra.mxu0 %v13448_v38  ;;  %v13498_v38 = vld [vmem:[#allocation3 + $0x7f0] sm:$0xff] }
0x10c5   :  { %13783 = vmatprep.subr.bf16.mxu0 %v13451_v1  ;;  %v13242_v1 = vpack.c.bf16 %v13222_v31, %v13206_v9 }
0x10c8   :  { %13784 = vmatpush1.bf16.msra.mxu0 %v13450_v49  ;;  %v19674_v49 = vld [vmem:[#allocation9_spill] sm:$0xff] }
0x10c9   :  { %13785 = vmatprep.subr.bf16.mxu0 %v13453_v21  ;;  %v13504_v21 = vrot.slane %v19674_v49, %v17988_v35 }
0x10cc   :  { %13786 = vmatpush1.bf16.msra.mxu0 %v13452_v55  ;;  %v13508_v55 = vrot.slane %v19674_v49, %v18117_v17 }
0x10cd   :  { %13787 = vmatprep.subr.bf16.mxu0 %v13455_v60 }
0x10d0   :  { %13788 = vmatpush1.bf16.msra.mxu0 %v13454_v48 }
0x10d1   :  { %13789 = vmatprep.subr.bf16.mxu0 %v13457_v52 }
0x10d4   :  { %13790 = vmatpush1.bf16.msra.mxu0 %v13456_v10 }
0x10d5   :  { %13791 = vmatprep.subr.bf16.mxu0 %v13459_v51 }
0x10d8   :  { %13792 = vmatpush1.bf16.msra.mxu0 %v13458_v29 }
0x10d9   :  { %13793 = vmatprep.subr.bf16.mxu0 %v13461_v15 }
0x10dc   :  { %13794 = vmatpush1.bf16.msra.mxu0 %v13460_v22 }
0x10dd   :  { %13795 = vmatprep.subr.bf16.mxu0 %v13463_v46 }
0x10e0   :  { %13796 = vmatpush1.bf16.msra.mxu0 %v13462_v16 }
0x10e1   :  { %13797 = vmatprep.subr.bf16.mxu0 %v13465_v13 }
0x10e4   :  { %13798 = vmatpush1.bf16.msra.mxu0 %v13464_v53 }
0x10e5   :  { %13799 = vmatprep.subr.bf16.mxu0 %v13467_v23 }
0x10e8   :  { %13800 = vmatpush1.bf16.msra.mxu0 %v13466_v41 }
0x10e9   :  { %13812 = vmatprep.subr.bf16.mxu0 %v13469_v59 }
0x10eb   :  { %13802 = vmatmul.mubr.bf16.vlgmr.msra.gmra.mrb[80].mxu0 %v13240_v18 }
0x10ec   :  { %13813 = vmatpush1.bf16.msra.mxu0 %v13468_v61  ;;  %13844 = vmatprep.mubr.bf16.mxu0 %v13243_v45 }
0x10ed   :  { %13814 = vmatprep.subr.bf16.mxu0 %v13471_v37 }
0x10f0   :  { %13815 = vmatpush1.bf16.msra.mxu0 %v13470_v44 }
0x10f1   :  { %13816 = vmatprep.subr.bf16.mxu0 %v13473_v11 }
0x10f4   :  { %13817 = vmatpush1.bf16.msra.mxu0 %v13472_v2 }
0x10f5   :  { %13818 = vmatprep.subr.bf16.mxu0 %v13475_v36 }
0x10f8   :  { %13819 = vmatpush1.bf16.msra.mxu0 %v13474_v14 }
0x10f9   :  { %13820 = vmatprep.subr.bf16.mxu0 %v13477_v25 }
0x10fc   :  { %13821 = vmatpush1.bf16.msra.mxu0 %v13476_v12 }
0x10fd   :  { %13822 = vmatprep.subr.bf16.mxu0 %v13479_v39  ;;  %v19675_v39 = vld [vmem:[#allocation10_spill] sm:$0xff] }
0x1100   :  { %13823 = vmatpush1.bf16.msra.mxu0 %v13478_v32  ;;  %v13899_v32 = vrot.slane %v19675_v39, %v17988_v35 }
0x1101   :  { %13824 = vmatprep.subr.bf16.mxu0 %v13481_v20  ;;  %v13903_v20 = vrot.slane %v19675_v39, %v18117_v17 }
0x1104   :  { %13825 = vmatpush1.bf16.msra.mxu0 %v13480_v57 }
0x1105   :  { %13826 = vmatprep.subr.bf16.mxu0 %v13483_v43 }
0x1108   :  { %13827 = vmatpush1.bf16.msra.mxu0 %v13482_v42 }
0x1109   :  { %13828 = vmatprep.subr.bf16.mxu0 %v13485_v62  ;;  %v19676_v62 = vld [vmem:[#allocation11_spill] sm:$0xff] }
0x110c   :  { %13829 = vmatpush1.bf16.msra.mxu0 %v13484_v63  ;;  %v13914_v63 = vrot.slane %v19676_v62, %v17988_v35 }
0x110d   :  { %13830 = vmatprep.subr.bf16.mxu0 %v13487_v27  ;;  %v13918_v27 = vrot.slane %v19676_v62, %v18117_v17 }
0x1110   :  { %13831 = vmatpush1.bf16.msra.mxu0 %v13486_v19 }
0x1111   :  { %13832 = vmatprep.subr.bf16.mxu0 %v13489_v8 }
0x1114   :  { %13833 = vmatpush1.bf16.msra.mxu0 %v13488_v34  ;;  %v19677_v34 = vld [vmem:[#allocation12_spill] sm:$0xff] }
0x1115   :  { %13834 = vmatprep.subr.bf16.mxu0 %v13491_v54  ;;  %v13929_v54 = vrot.slane %v19677_v34, %v17988_v35 }
0x1118   :  { %13835 = vmatpush1.bf16.msra.mxu0 %v13490_v47  ;;  %v13933_v47 = vrot.slane %v19677_v34, %v18117_v17 }
0x1119   :  { %13836 = vmatprep.subr.bf16.mxu0 %v13493_v26 }
0x111c   :  { %13837 = vmatpush1.bf16.msra.mxu0 %v13492_v3 }
0x111d   :  { %13838 = vmatprep.subr.bf16.mxu0 %v13495_v0 }
0x1120   :  { %13839 = vmatpush1.bf16.msra.mxu0 %v13494_v4 }
0x1121   :  { %13840 = vmatprep.subr.bf16.mxu0 %v13497_v5 }
0x1124   :  { %13841 = vmatpush1.bf16.msra.mxu0 %v13496_v24 }
0x1125   :  { %13842 = vmatprep.subr.bf16.mxu0 %v13499_v58 }
0x1128   :  { %13843 = vmatpush1.bf16.msra.mxu0 %v13498_v38 }
0x112b   :  { %13845 = vmatmul.mubr.bf16.vlgmr.msra.gmra.mrb[80].mxu0 %v13242_v1 }
0x11fe   :  { %v13846_v60 = vpop.f32.mrb[80].mxu0 }
0x11ff   :  { %v14683_v48 = vadd.f32 %v13846_v60, %v13504_v21  ;;  %v13848_v52 = vpop.f32.mrb[81].mxu0 }
0x1200   :  { %v14684_v10 = vadd.f32 %v13848_v52, %v13508_v55  ;;  %v13850_v51 = vpop.f32.mrb[82].mxu0 }
0x1201   :  { %v13855_v29 = vadd.f32 %v14683_v48, %v19312_v28  ;;  %v14685_v15 = vadd.f32 %v13850_v51, %v13504_v21  ;;  %v13852_v50 = vpop.f32.mrb[83].mxu0  ;;  %v19678_v51 = vld [vmem:[#allocation13_spill] sm:$0xff] }
0x1202   :  { %v13856_v7 = vadd.f32 %v14684_v10, %v19314_v40  ;;  %v14686_v9 = vadd.f32 %v13852_v50, %v13508_v55 }
0x1203   :  { %v13857_v31 = vadd.f32 %v14685_v15, %v19308_v56  ;;  %v13867_v22 = vmul.f32 %v13855_v29, %v13855_v29 }
0x1204   :  { %v13858_v46 = vadd.f32 %v14686_v9, %v19310_v30  ;;  %v13859_v16 = vadd.f32 %v13856_v7, %v13855_v29  ;;  %v13868_v13 = vmul.f32 %v13856_v7, %v13856_v7 }
0x1205   :  { %v13869_v23 = vmul.f32 %v13857_v31, %v13857_v31 }
0x1206   :  { %13860 = vadd.xlane.f32.xlu0 %v13859_v16  ;;  %v13871_v53 = vadd.f32 %v13868_v13, %v13867_v22  ;;  %v13870_v41 = vmul.f32 %v13858_v46, %v13858_v46  ;;  %v13862_v59 = vadd.f32 %v13858_v46, %v13857_v31 }
0x1208   :  { %13872 = vadd.xlane.f32.xlu1 %v13871_v53  ;;  %v13874_v28 = vadd.f32 %v13870_v41, %v13869_v23 }
0x120a   :  { %13863 = vadd.xlane.f32.xlu0 %v13862_v59 }
0x120c   :  { %13875 = vadd.xlane.f32.xlu1 %v13874_v28 }
0x1293   :  { %v13861_v6 = vpop.xlane.xlu0 %13860 }
0x1294   :  { %v13865_v33 = vmul.f32 0.004, %v13861_v6 }
0x1295   :  { %v13873_v40 = vpop.xlane.xlu1 %13872 }
0x1296   :  { %v13877_v18 = vmul.f32 0.004, %v13873_v40  ;;  %v13879_v45 = vmul.f32 %v13865_v33, %v13865_v33  ;;  %v13883_v25 = vsub.f32 %v13855_v29, %v13865_v33  ;;  %v13884_v12 = vsub.f32 %v13856_v7, %v13865_v33 }
0x1297   :  { %v13864_v56 = vpop.xlane.xlu0 %13863 }
0x1298   :  { %v13881_v61 = vsub.f32 %v13877_v18, %v13879_v45  ;;  %v13866_v37 = vmul.f32 0.004, %v13864_v56 }
0x1299   :  { %v13876_v30 = vpop.xlane.xlu1 %13875 }
0x129a   :  { %v13887_v44 = vadd.f32 1e-05, %v13881_v61  ;;  %v13878_v11 = vmul.f32 0.004, %v13876_v30  ;;  %v13880_v2 = vmul.f32 %v13866_v37, %v13866_v37  ;;  %v13885_v26 = vsub.f32 %v13857_v31, %v13866_v37 }
0x129b   :  { %v13886_v3 = vsub.f32 %v13858_v46, %v13866_v37 }
0x129c   :  { %15080 = vrsqrt.f32 %v13887_v44  ;;  %v13882_v36 = vsub.f32 %v13878_v11, %v13880_v2 }
0x129e   :  { %v13888_v14 = vadd.f32 1e-05, %v13882_v36 }
0x12a0   :  { %15082 = vrsqrt.f32 %v13888_v14 }
0x12a6   :  { %v15081_v57 = vpop.eup %15080 }
0x12a7   :  { %v13891_v43 = vmul.f32 %v15081_v57, %v13883_v25  ;;  %v13892_v42 = vmul.f32 %v15081_v57, %v13884_v12 }
0x12a9   :  { %v13906_v19 = vmul.f32 %v13899_v32, %v13891_v43  ;;  %v13907_v8 = vmul.f32 %v13903_v20, %v13892_v42 }
0x12aa   :  { %v15083_v0 = vpop.eup %15082 }
0x12ab   :  { %v13921_v4 = vadd.f32 %v13914_v63, %v13906_v19  ;;  %v13922_v5 = vadd.f32 %v13918_v27, %v13907_v8  ;;  %v13893_v24 = vmul.f32 %v15083_v0, %v13885_v26  ;;  %v13894_v58 = vmul.f32 %v15083_v0, %v13886_v3 }
0x12ad   :  { %v13936_v38 = vmul.f32 %v13929_v54, %v13921_v4  ;;  %v13937_v1 = vmul.f32 %v13933_v47, %v13922_v5  ;;  %v13908_v49 = vmul.f32 %v13899_v32, %v13893_v24  ;;  %v13909_v21 = vmul.f32 %v13903_v20, %v13894_v58 }
0x12af   :  { %v13940_v55 = vadd.f32 %v13937_v1, %v13936_v38  ;;  %v13923_v60 = vadd.f32 %v13914_v63, %v13908_v49  ;;  %v13924_v48 = vadd.f32 %v13918_v27, %v13909_v21 }
0x12b1   :  { %13941 = vadd.xlane.f32.xlu0 %v13940_v55  ;;  %v13938_v52 = vmul.f32 %v13929_v54, %v13923_v60  ;;  %v13939_v35 = vmul.f32 %v13933_v47, %v13924_v48 }
0x12b3   :  { %v13943_v10 = vadd.f32 %v13939_v35, %v13938_v52 }
0x12b5   :  { %13944 = vadd.xlane.f32.xlu1 %v13943_v10 }
0x133e   :  { %v13942_v17 = vpop.xlane.xlu0 %13941 }
0x133f   :  { %v13946_v29 = vadd.f32 %v13942_v17, %v19678_v51 }
0x1341   :  { %13950 = vperm.xlu0 %15078, %v13946_v29  }
0x1342   :  { %v13945_v15 = vpop.xlane.xlu1 %13944 }
0x1343   :  { %v13947_v50 = vadd.f32 %v13945_v15, %v19678_v51 }
0x1345   :  { %13955 = vperm.xlu1 %15079, %v13947_v50  }
0x13c0   :  { %v13951_v7 = vpop.permute.xlu0 %13950 }
0x13c1   :  { %13958 = vst [vmem:[%s19601_s7] sm:$0xff] %v13951_v7 }
0x13c4   :  { %v13956_v9 = vpop.permute.xlu1 %13955 }
0x13c5   :  { %13959 = vst [vmem:[%s19601_s7 + $0x8] sm:$0xff] %v13956_v9 }
0x13c6   :  { %13964 = vsyncmov [#allocation4] }
0x13c9   :  { %s13965_s28 = vpop.sfrf %13964 }
0x13ca   :  { %p14297_p0 = scmp.ne.s32.totalorder %s13965_s28, 0 }
0x13cc   :  { %13969 = shalt.err (%p14297_p0)  }
0x13cd   :  { %13971 = vsyncmov [#allocation4 + $0x1] }
0x13d0   :  { %s13972_s29 = vpop.sfrf %13971 }
0x13d1   :  { %p14298_p1 = scmp.ne.s32.totalorder %s13972_s29, 0 }
0x13d3   :  { %13976 = shalt.err (%p14298_p1)  }

</bundles_post_ra>
